<compile_context>
chip_gen: v7x
topology: tpu7x:2x2x1
jax: 0.10.0
libtpu: 0.0.40
codegen_flags: <defaults>
</compile_context>

<pallas_src>
import math
import jax
import jax.numpy as jnp
from jax import lax
from jax.experimental import pallas as pl
from jax.experimental.pallas import tpu as pltpu

EMBED = 768
HEADS = 16
HEAD_DIM = EMBED // HEADS   # 48
FC_IN = 2 * EMBED           # 1536
FC_OUT = 41
MAX_TA_TILE = 256           # Ta row-tile size once sequences get long


# ----------------------------------------------------------------------------
# Fused Pallas kernel: dense QKV proj + 16-head SDPA + (out_proj folded) fc1
# ----------------------------------------------------------------------------
def _fused_kernel(hq_ref, ling_ref,
                  wq_ref, wk_ref, wv_ref,
                  bq_ref, bk_ref, bv_ref,
                  w_attn_ref, w_hq_ref, b_ref,
                  o_ref):
    f32 = jnp.float32
    bf16 = jnp.bfloat16
    scale = 1.0 / math.sqrt(HEAD_DIM)

    hq = hq_ref[...]                    # (bTa, 768) f32
    hq_bf = hq.astype(bf16)             # single cast, reused by the projection
    hk_bf = ling_ref[0].astype(bf16)    # (Tl, 768)
    hv_bf = ling_ref[1].astype(bf16)    # (Tl, 768)

    # Dense, lane-dense (N=768) QKV projections on the native bf16 MXU path.
    # Weights stay bf16 (no per-head f32 upcast temporaries); accumulate in f32.
    q = jnp.dot(hq_bf, wq_ref[...], preferred_element_type=f32) + bq_ref[...]
    k = jnp.dot(hk_bf, wk_ref[...], preferred_element_type=f32) + bk_ref[...]
    v = jnp.dot(hv_bf, wv_ref[...], preferred_element_type=f32) + bv_ref[...]
    q = q * scale

    # fc1 contribution of the Hq half of the concat + combined (folded) bias.
    acc = jnp.dot(hq, w_hq_ref[...], preferred_element_type=f32) + b_ref[...]

    # Per-head attention: only the tiny score / PV matmuls use 48-lane slices
    # (relayout cost O(T*768) vs O(T*768*768) projection work).
    dn_nt = (((1,), (1,)), ((), ()))    # q @ k^T without materializing k^T
    for h in range(HEADS):
        lo = h * HEAD_DIM
        q_h = q[:, lo:lo + HEAD_DIM]                                   # (bTa, 48)
        k_h = k[:, lo:lo + HEAD_DIM]                                   # (Tl, 48)
        v_h = v[:, lo:lo + HEAD_DIM]                                   # (Tl, 48)

        s = lax.dot_general(q_h, k_h, dn_nt, preferred_element_type=f32)  # (bTa, Tl)
        s = s - jnp.max(s, axis=-1, keepdims=True)
        p = jnp.exp(s)
        p = p * pl.reciprocal(jnp.sum(p, axis=-1, keepdims=True), approx=True)
        o_h = jnp.dot(p, v_h, preferred_element_type=f32)              # (bTa, 48)

        # out_proj folded into fc1: accumulate this head's slice directly.
        acc = acc + jnp.dot(o_h, w_attn_ref[h], preferred_element_type=f32)

    o_ref[...] = acc                                                   # (bTa, 41)


# ----------------------------------------------------------------------------
# Host-side parameter preparation (done once, on weights only)
# ----------------------------------------------------------------------------
def prepare_params(p):
    fc_top = p["fc1_w"][:EMBED]                       # acts on attn_output
    fc_bot = p["fc1_w"][EMBED:]                       # acts on Hq
    w_attn = (p["wo"] @ fc_top).reshape(HEADS, HEAD_DIM, FC_OUT)   # (H, 48, 41)
    b_comb = (p["bo"] @ fc_top + p["fc1_b"]).reshape(1, FC_OUT)    # (1, 41)

    return {
        # Dense QKV weights streamed as bf16 -> native bf16 MXU path in-kernel.
        "wq": p["wq"].astype(jnp.bfloat16),
        "wk": p["wk"].astype(jnp.bfloat16),
        "wv": p["wv"].astype(jnp.bfloat16),
        # Biases as dense 2-D rows (no per-head (1,48) VMEM tile padding).
        "bq": p["bq"].reshape(1, EMBED).astype(jnp.float32),
        "bk": p["bk"].reshape(1, EMBED).astype(jnp.float32),
        "bv": p["bv"].reshape(1, EMBED).astype(jnp.float32),
        # Folded fc1 tail kept in f32 (tiny; keeps tail math exact vs reference).
        "w_attn": w_attn.astype(jnp.float32),
        "w_hq": fc_bot.astype(jnp.float32),
        "b": b_comb.astype(jnp.float32),
    }


# ----------------------------------------------------------------------------
# Forward pass: single pallas_call with a "parallel" Ta-tile grid
# ----------------------------------------------------------------------------
@jax.jit
def acoustic_linguistic_forward(acoustic, linguistic, prep):
    # acoustic: (1, 1, 768, Ta);  linguistic: (2, Tl, 768)
    Ta = acoustic.shape[-1]
    Tl = linguistic.shape[1]
    # TODO(synk): fold this transpose into the kernel (trans_a dot_general on the
    # (768,Ta) slab) once validated on the target Mosaic version; kept host-side
    # for lowering safety at small / unaligned Ta.
    hq = acoustic[0, 0].T                              # (Ta, 768)

    block_ta = Ta if Ta <= MAX_TA_TILE else MAX_TA_TILE
    grid = (pl.cdiv(Ta, block_ta),)

    resident2 = lambda i: (0, 0)        # weights/biases: constant block index
    resident3 = lambda i: (0, 0, 0)     # -> DMA'd once, stay resident in VMEM

    return pl.pallas_call(
        _fused_kernel,
        out_shape=jax.ShapeDtypeStruct((Ta, FC_OUT), jnp.float32),
        grid=grid,
        in_specs=[
            pl.BlockSpec((block_ta, EMBED), lambda i: (i, 0)),     # Hq row tile
            pl.BlockSpec((2, Tl, EMBED), resident3),               # Hk / Hv
            pl.BlockSpec((EMBED, EMBED), resident2),               # wq (bf16)
            pl.BlockSpec((EMBED, EMBED), resident2),               # wk (bf16)
            pl.BlockSpec((EMBED, EMBED), resident2),               # wv (bf16)
            pl.BlockSpec((1, EMBED), resident2),                   # bq
            pl.BlockSpec((1, EMBED), resident2),                   # bk
            pl.BlockSpec((1, EMBED), resident2),                   # bv
            pl.BlockSpec((HEADS, HEAD_DIM, FC_OUT), resident3),    # wo @ fc1_top
            pl.BlockSpec((EMBED, FC_OUT), resident2),              # fc1 bottom (Hq half)
            pl.BlockSpec((1, FC_OUT), resident2),                  # folded bias
        ],
        out_specs=pl.BlockSpec((block_ta, FC_OUT), lambda i: (i, 0)),
        compiler_params=pltpu.CompilerParams(
            dimension_semantics=("parallel",)),   # megacore-shardable on v7x
    )(hq, linguistic,
      prep["wq"], prep["wk"], prep["wv"],
      prep["bq"], prep["bk"], prep["bv"],
      prep["w_attn"], prep["w_hq"], prep["b"])


# ----------------------------------------------------------------------------
# Deterministic synthetic parameter init
# ----------------------------------------------------------------------------
def init_params(key):
    ks = jax.random.split(key, 10)
    s = 0.02

    def w(k, shape):
        return (s * jax.random.normal(k, shape)).astype(jnp.float32)

    return {
        # in_proj (torch in_proj_weight is (3*768, 768); stored here as W^T slices)
        "wq": w(ks[0], (EMBED, EMBED)), "bq": w(ks[1], (EMBED,)),
        "wk": w(ks[2], (EMBED, EMBED)), "bk": w(ks[3], (EMBED,)),
        "wv": w(ks[4], (EMBED, EMBED)), "bv": w(ks[5], (EMBED,)),
        # out_proj: Linear(768, 768)
        "wo": w(ks[6], (EMBED, EMBED)), "bo": w(ks[7], (EMBED,)),
        # fc1: Linear(1536, 41)
        "fc1_w": w(ks[8], (FC_IN, FC_OUT)), "fc1_b": w(ks[9], (FC_OUT,)),
    }


# Pure-JAX reference (un-folded math; mirrors the kernel's bf16 quantization of
# the QKV weights AND of the activations feeding the QKV projections).
def _reference(acoustic, linguistic, p):
    f32 = jnp.float32
    bf = lambda x: x.astype(jnp.bfloat16)
    hq = acoustic[0, 0].T
    hk, hv = linguistic[0], linguistic[1]
    q = jnp.dot(bf(hq), bf(p["wq"]), preferred_element_type=f32) + p["bq"]
    k = jnp.dot(bf(hk), bf(p["wk"]), preferred_element_type=f32) + p["bk"]
    v = jnp.dot(bf(hv), bf(p["wv"]), preferred_element_type=f32) + p["bv"]
    Tq, Tk = hq.shape[0], hk.shape[0]
    qh = q.reshape(Tq, HEADS, HEAD_DIM).transpose(1, 0, 2) / math.sqrt(HEAD_DIM)
    kh = k.reshape(Tk, HEADS, HEAD_DIM).transpose(1, 0, 2)
    vh = v.reshape(Tk, HEADS, HEAD_DIM).transpose(1, 0, 2)
    s = jnp.einsum("hqd,hkd->hqk", qh, kh)
    pw = jax.nn.softmax(s, axis=-1)
    oh = jnp.einsum("hqk,hkd->hqd", pw, vh)
    o = oh.transpose(1, 0, 2).reshape(Tq, EMBED) @ p["wo"] + p["bo"]
    before = jnp.concatenate([o, hq], axis=1)
    return before @ p["fc1_w"] + p["fc1_b"]


if __name__ == "__main__":
    key = jax.random.PRNGKey(0)
    k_p, k_a, k_l = jax.random.split(key, 3)

    Ta, Tl = 8, 16
    acoustic = jax.random.normal(k_a, (1, 1, EMBED, Ta), dtype=jnp.float32)
    linguistic = jax.random.normal(k_l, (2, Tl, EMBED), dtype=jnp.float32)

    params = init_params(k_p)
    prep = prepare_params(params)

    out = acoustic_linguistic_forward(acoustic, linguistic, prep)
    out = jax.block_until_ready(out)

    assert out.shape == (Ta, FC_OUT), out.shape
    ref = _reference(acoustic, linguistic, params)
    max_err = float(jnp.max(jnp.abs(out - ref)))
    assert jnp.allclose(out, ref, atol=2e-3, rtol=2e-3), max_err

    print("KERNEL_OK")
</pallas_src>

<mosaic_0001>
module attributes {stable_mosaic.version = 11 : i64} {
  func.func @_fused_kernel(%arg0: i32, %arg1: memref<8x768xf32, #tpu.memory_space<vmem>>, %arg2: memref<2x16x768xf32, #tpu.memory_space<vmem>>, %arg3: memref<768x768xbf16, #tpu.memory_space<vmem>>, %arg4: memref<768x768xbf16, #tpu.memory_space<vmem>>, %arg5: memref<768x768xbf16, #tpu.memory_space<vmem>>, %arg6: memref<1x768xf32, #tpu.memory_space<vmem>>, %arg7: memref<1x768xf32, #tpu.memory_space<vmem>>, %arg8: memref<1x768xf32, #tpu.memory_space<vmem>>, %arg9: memref<16x48x41xf32, #tpu.memory_space<vmem>>, %arg10: memref<768x41xf32, #tpu.memory_space<vmem>>, %arg11: memref<1x41xf32, #tpu.memory_space<vmem>>, %arg12: memref<8x41xf32, #tpu.memory_space<vmem>>) attributes {dimension_semantics = [#tpu.dimension_semantics<parallel>], iteration_bounds = array<i64: 1>, scalar_prefetch = 0 : i64, scratch_operands = 0 : i64, tpu.core_type = #tpu.core_type<tc>, window_params = [{transform_indices = @transform_0, window_bounds = array<i64: 8, 768>}, {pipeline_mode = #tpu.pipeline_mode<synchronous>, transform_indices = @transform_1, window_bounds = array<i64: 2, 16, 768>}, {pipeline_mode = #tpu.pipeline_mode<synchronous>, transform_indices = @transform_2, window_bounds = array<i64: 768, 768>}, {pipeline_mode = #tpu.pipeline_mode<synchronous>, transform_indices = @transform_3, window_bounds = array<i64: 768, 768>}, {pipeline_mode = #tpu.pipeline_mode<synchronous>, transform_indices = @transform_4, window_bounds = array<i64: 768, 768>}, {pipeline_mode = #tpu.pipeline_mode<synchronous>, transform_indices = @transform_5, window_bounds = array<i64: 1, 768>}, {pipeline_mode = #tpu.pipeline_mode<synchronous>, transform_indices = @transform_6, window_bounds = array<i64: 1, 768>}, {pipeline_mode = #tpu.pipeline_mode<synchronous>, transform_indices = @transform_7, window_bounds = array<i64: 1, 768>}, {pipeline_mode = #tpu.pipeline_mode<synchronous>, transform_indices = @transform_8, window_bounds = array<i64: 16, 48, 41>}, {pipeline_mode = #tpu.pipeline_mode<synchronous>, transform_indices = @transform_9, window_bounds = array<i64: 768, 41>}, {pipeline_mode = #tpu.pipeline_mode<synchronous>, transform_indices = @transform_10, window_bounds = array<i64: 1, 41>}, {transform_indices = @transform_11, window_bounds = array<i64: 8, 41>}]} {
    %c0 = arith.constant 0 : index
    %c0_0 = arith.constant 0 : index
    %0 = vector.load %arg1[%c0, %c0_0] : memref<8x768xf32, #tpu.memory_space<vmem>>, vector<8x768xf32>
    %1 = arith.truncf %0 : vector<8x768xf32> to vector<8x768xbf16>
    %c0_1 = arith.constant 0 : index
    %c0_2 = arith.constant 0 : index
    %c0_3 = arith.constant 0 : index
    %2 = vector.load %arg2[%c0_1, %c0_2, %c0_3] : memref<2x16x768xf32, #tpu.memory_space<vmem>>, vector<1x16x768xf32>
    %3 = vector.shape_cast %2 : vector<1x16x768xf32> to vector<16x768xf32>
    %4 = arith.truncf %3 : vector<16x768xf32> to vector<16x768xbf16>
    %c1 = arith.constant 1 : index
    %c0_4 = arith.constant 0 : index
    %c0_5 = arith.constant 0 : index
    %5 = vector.load %arg2[%c1, %c0_4, %c0_5] : memref<2x16x768xf32, #tpu.memory_space<vmem>>, vector<1x16x768xf32>
    %6 = vector.shape_cast %5 : vector<1x16x768xf32> to vector<16x768xf32>
    %7 = arith.truncf %6 : vector<16x768xf32> to vector<16x768xbf16>
    %c0_6 = arith.constant 0 : index
    %c0_7 = arith.constant 0 : index
    %8 = vector.load %arg3[%c0_6, %c0_7] : memref<768x768xbf16, #tpu.memory_space<vmem>>, vector<768x768xbf16>
    %cst = arith.constant dense<0.000000e+00> : vector<8x768xf32>
    %9 = tpu.matmul %1, %8, %cst {dimension_numbers = #tpu.dot_dimension_numbers<[1], [0], [0], [1], [0, 0, 1, 1], [], []>} : vector<8x768xbf16>, vector<768x768xbf16>, vector<8x768xf32> -> vector<8x768xf32>
    %c0_8 = arith.constant 0 : index
    %c0_9 = arith.constant 0 : index
    %10 = vector.load %arg6[%c0_8, %c0_9] : memref<1x768xf32, #tpu.memory_space<vmem>>, vector<1x768xf32>
    %11 = vector.broadcast %10 : vector<1x768xf32> to vector<8x768xf32>
    %12 = arith.addf %9, %11 : vector<8x768xf32>
    %c0_10 = arith.constant 0 : index
    %c0_11 = arith.constant 0 : index
    %13 = vector.load %arg4[%c0_10, %c0_11] : memref<768x768xbf16, #tpu.memory_space<vmem>>, vector<768x768xbf16>
    %cst_12 = arith.constant dense<0.000000e+00> : vector<16x768xf32>
    %14 = tpu.matmul %4, %13, %cst_12 {dimension_numbers = #tpu.dot_dimension_numbers<[1], [0], [0], [1], [0, 0, 1, 1], [], []>} : vector<16x768xbf16>, vector<768x768xbf16>, vector<16x768xf32> -> vector<16x768xf32>
    %c0_13 = arith.constant 0 : index
    %c0_14 = arith.constant 0 : index
    %15 = vector.load %arg7[%c0_13, %c0_14] : memref<1x768xf32, #tpu.memory_space<vmem>>, vector<1x768xf32>
    %16 = vector.broadcast %15 : vector<1x768xf32> to vector<16x768xf32>
    %17 = arith.addf %14, %16 : vector<16x768xf32>
    %c0_15 = arith.constant 0 : index
    %c0_16 = arith.constant 0 : index
    %18 = vector.load %arg5[%c0_15, %c0_16] : memref<768x768xbf16, #tpu.memory_space<vmem>>, vector<768x768xbf16>
    %cst_17 = arith.constant dense<0.000000e+00> : vector<16x768xf32>
    %19 = tpu.matmul %7, %18, %cst_17 {dimension_numbers = #tpu.dot_dimension_numbers<[1], [0], [0], [1], [0, 0, 1, 1], [], []>} : vector<16x768xbf16>, vector<768x768xbf16>, vector<16x768xf32> -> vector<16x768xf32>
    %c0_18 = arith.constant 0 : index
    %c0_19 = arith.constant 0 : index
    %20 = vector.load %arg8[%c0_18, %c0_19] : memref<1x768xf32, #tpu.memory_space<vmem>>, vector<1x768xf32>
    %21 = vector.broadcast %20 : vector<1x768xf32> to vector<16x768xf32>
    %22 = arith.addf %19, %21 : vector<16x768xf32>
    %cst_20 = arith.constant 0.144337565 : f32
    %23 = vector.broadcast %cst_20 : f32 to vector<8x768xf32>
    %24 = arith.mulf %12, %23 : vector<8x768xf32>
    %c0_21 = arith.constant 0 : index
    %c0_22 = arith.constant 0 : index
    %25 = vector.load %arg10[%c0_21, %c0_22] : memref<768x41xf32, #tpu.memory_space<vmem>>, vector<768x41xf32>
    %cst_23 = arith.constant dense<0.000000e+00> : vector<8x41xf32>
    %26 = tpu.matmul %0, %25, %cst_23 {dimension_numbers = #tpu.dot_dimension_numbers<[1], [0], [0], [1], [0, 0, 1, 1], [], []>} : vector<8x768xf32>, vector<768x41xf32>, vector<8x41xf32> -> vector<8x41xf32>
    %c0_24 = arith.constant 0 : index
    %c0_25 = arith.constant 0 : index
    %27 = vector.load %arg11[%c0_24, %c0_25] : memref<1x41xf32, #tpu.memory_space<vmem>>, vector<1x41xf32>
    %28 = vector.broadcast %27 : vector<1x41xf32> to vector<8x41xf32>
    %29 = arith.addf %26, %28 : vector<8x41xf32>
    %30 = vector.extract_strided_slice %24 {offsets = [0, 0], sizes = [8, 48], strides = [1, 1]} : vector<8x768xf32> to vector<8x48xf32>
    %31 = vector.extract_strided_slice %17 {offsets = [0, 0], sizes = [16, 48], strides = [1, 1]} : vector<16x768xf32> to vector<16x48xf32>
    %32 = vector.extract_strided_slice %22 {offsets = [0, 0], sizes = [16, 48], strides = [1, 1]} : vector<16x768xf32> to vector<16x48xf32>
    %cst_26 = arith.constant dense<0.000000e+00> : vector<8x16xf32>
    %33 = tpu.matmul %30, %31, %cst_26 {dimension_numbers = #tpu.dot_dimension_numbers<[1], [1], [0], [0], [0, 0, 1, 0], [], []>} : vector<8x48xf32>, vector<16x48xf32>, vector<8x16xf32> -> vector<8x16xf32>
    %cst_27 = arith.constant dense<0xFF800000> : vector<8xf32>
    %34 = vector.multi_reduction <maximumf>, %33, %cst_27 [1] : vector<8x16xf32> to vector<8xf32>
    %35 = vector.shape_cast %34 : vector<8xf32> to vector<8x1xf32>
    %36 = vector.broadcast %35 : vector<8x1xf32> to vector<8x16xf32>
    %37 = arith.subf %33, %36 : vector<8x16xf32>
    %38 = math.exp %37 : vector<8x16xf32>
    %cst_28 = arith.constant dense<0.000000e+00> : vector<8xf32>
    %39 = vector.multi_reduction <add>, %38, %cst_28 [1] : vector<8x16xf32> to vector<8xf32>
    %40 = vector.shape_cast %39 : vector<8xf32> to vector<8x1xf32>
    %41 = tpu.reciprocal %40 {approx = true} : vector<8x1xf32> -> vector<8x1xf32>
    %42 = vector.broadcast %41 : vector<8x1xf32> to vector<8x16xf32>
    %43 = arith.mulf %38, %42 : vector<8x16xf32>
    %cst_29 = arith.constant dense<0.000000e+00> : vector<8x48xf32>
    %44 = tpu.matmul %43, %32, %cst_29 {dimension_numbers = #tpu.dot_dimension_numbers<[1], [0], [0], [1], [0, 0, 1, 1], [], []>} : vector<8x16xf32>, vector<16x48xf32>, vector<8x48xf32> -> vector<8x48xf32>
    %c0_30 = arith.constant 0 : index
    %c0_31 = arith.constant 0 : index
    %c0_32 = arith.constant 0 : index
    %45 = vector.load %arg9[%c0_30, %c0_31, %c0_32] : memref<16x48x41xf32, #tpu.memory_space<vmem>>, vector<1x48x41xf32>
    %46 = vector.shape_cast %45 : vector<1x48x41xf32> to vector<48x41xf32>
    %cst_33 = arith.constant dense<0.000000e+00> : vector<8x41xf32>
    %47 = tpu.matmul %44, %46, %cst_33 {dimension_numbers = #tpu.dot_dimension_numbers<[1], [0], [0], [1], [0, 0, 1, 1], [], []>} : vector<8x48xf32>, vector<48x41xf32>, vector<8x41xf32> -> vector<8x41xf32>
    %48 = arith.addf %29, %47 : vector<8x41xf32>
    %49 = vector.extract_strided_slice %24 {offsets = [0, 48], sizes = [8, 48], strides = [1, 1]} : vector<8x768xf32> to vector<8x48xf32>
    %50 = vector.extract_strided_slice %17 {offsets = [0, 48], sizes = [16, 48], strides = [1, 1]} : vector<16x768xf32> to vector<16x48xf32>
    %51 = vector.extract_strided_slice %22 {offsets = [0, 48], sizes = [16, 48], strides = [1, 1]} : vector<16x768xf32> to vector<16x48xf32>
    %cst_34 = arith.constant dense<0.000000e+00> : vector<8x16xf32>
    %52 = tpu.matmul %49, %50, %cst_34 {dimension_numbers = #tpu.dot_dimension_numbers<[1], [1], [0], [0], [0, 0, 1, 0], [], []>} : vector<8x48xf32>, vector<16x48xf32>, vector<8x16xf32> -> vector<8x16xf32>
    %cst_35 = arith.constant dense<0xFF800000> : vector<8xf32>
    %53 = vector.multi_reduction <maximumf>, %52, %cst_35 [1] : vector<8x16xf32> to vector<8xf32>
    %54 = vector.shape_cast %53 : vector<8xf32> to vector<8x1xf32>
    %55 = vector.broadcast %54 : vector<8x1xf32> to vector<8x16xf32>
    %56 = arith.subf %52, %55 : vector<8x16xf32>
    %57 = math.exp %56 : vector<8x16xf32>
    %cst_36 = arith.constant dense<0.000000e+00> : vector<8xf32>
    %58 = vector.multi_reduction <add>, %57, %cst_36 [1] : vector<8x16xf32> to vector<8xf32>
    %59 = vector.shape_cast %58 : vector<8xf32> to vector<8x1xf32>
    %60 = tpu.reciprocal %59 {approx = true} : vector<8x1xf32> -> vector<8x1xf32>
    %61 = vector.broadcast %60 : vector<8x1xf32> to vector<8x16xf32>
    %62 = arith.mulf %57, %61 : vector<8x16xf32>
    %cst_37 = arith.constant dense<0.000000e+00> : vector<8x48xf32>
    %63 = tpu.matmul %62, %51, %cst_37 {dimension_numbers = #tpu.dot_dimension_numbers<[1], [0], [0], [1], [0, 0, 1, 1], [], []>} : vector<8x16xf32>, vector<16x48xf32>, vector<8x48xf32> -> vector<8x48xf32>
    %c1_38 = arith.constant 1 : index
    %c0_39 = arith.constant 0 : index
    %c0_40 = arith.constant 0 : index
    %64 = vector.load %arg9[%c1_38, %c0_39, %c0_40] : memref<16x48x41xf32, #tpu.memory_space<vmem>>, vector<1x48x41xf32>
    %65 = vector.shape_cast %64 : vector<1x48x41xf32> to vector<48x41xf32>
    %cst_41 = arith.constant dense<0.000000e+00> : vector<8x41xf32>
    %66 = tpu.matmul %63, %65, %cst_41 {dimension_numbers = #tpu.dot_dimension_numbers<[1], [0], [0], [1], [0, 0, 1, 1], [], []>} : vector<8x48xf32>, vector<48x41xf32>, vector<8x41xf32> -> vector<8x41xf32>
    %67 = arith.addf %48, %66 : vector<8x41xf32>
    %68 = vector.extract_strided_slice %24 {offsets = [0, 96], sizes = [8, 48], strides = [1, 1]} : vector<8x768xf32> to vector<8x48xf32>
    %69 = vector.extract_strided_slice %17 {offsets = [0, 96], sizes = [16, 48], strides = [1, 1]} : vector<16x768xf32> to vector<16x48xf32>
    %70 = vector.extract_strided_slice %22 {offsets = [0, 96], sizes = [16, 48], strides = [1, 1]} : vector<16x768xf32> to vector<16x48xf32>
    %cst_42 = arith.constant dense<0.000000e+00> : vector<8x16xf32>
    %71 = tpu.matmul %68, %69, %cst_42 {dimension_numbers = #tpu.dot_dimension_numbers<[1], [1], [0], [0], [0, 0, 1, 0], [], []>} : vector<8x48xf32>, vector<16x48xf32>, vector<8x16xf32> -> vector<8x16xf32>
    %cst_43 = arith.constant dense<0xFF800000> : vector<8xf32>
    %72 = vector.multi_reduction <maximumf>, %71, %cst_43 [1] : vector<8x16xf32> to vector<8xf32>
    %73 = vector.shape_cast %72 : vector<8xf32> to vector<8x1xf32>
    %74 = vector.broadcast %73 : vector<8x1xf32> to vector<8x16xf32>
    %75 = arith.subf %71, %74 : vector<8x16xf32>
    %76 = math.exp %75 : vector<8x16xf32>
    %cst_44 = arith.constant dense<0.000000e+00> : vector<8xf32>
    %77 = vector.multi_reduction <add>, %76, %cst_44 [1] : vector<8x16xf32> to vector<8xf32>
    %78 = vector.shape_cast %77 : vector<8xf32> to vector<8x1xf32>
    %79 = tpu.reciprocal %78 {approx = true} : vector<8x1xf32> -> vector<8x1xf32>
    %80 = vector.broadcast %79 : vector<8x1xf32> to vector<8x16xf32>
    %81 = arith.mulf %76, %80 : vector<8x16xf32>
    %cst_45 = arith.constant dense<0.000000e+00> : vector<8x48xf32>
    %82 = tpu.matmul %81, %70, %cst_45 {dimension_numbers = #tpu.dot_dimension_numbers<[1], [0], [0], [1], [0, 0, 1, 1], [], []>} : vector<8x16xf32>, vector<16x48xf32>, vector<8x48xf32> -> vector<8x48xf32>
    %c2 = arith.constant 2 : index
    %c0_46 = arith.constant 0 : index
    %c0_47 = arith.constant 0 : index
    %83 = vector.load %arg9[%c2, %c0_46, %c0_47] : memref<16x48x41xf32, #tpu.memory_space<vmem>>, vector<1x48x41xf32>
    %84 = vector.shape_cast %83 : vector<1x48x41xf32> to vector<48x41xf32>
    %cst_48 = arith.constant dense<0.000000e+00> : vector<8x41xf32>
    %85 = tpu.matmul %82, %84, %cst_48 {dimension_numbers = #tpu.dot_dimension_numbers<[1], [0], [0], [1], [0, 0, 1, 1], [], []>} : vector<8x48xf32>, vector<48x41xf32>, vector<8x41xf32> -> vector<8x41xf32>
    %86 = arith.addf %67, %85 : vector<8x41xf32>
    %87 = vector.extract_strided_slice %24 {offsets = [0, 144], sizes = [8, 48], strides = [1, 1]} : vector<8x768xf32> to vector<8x48xf32>
    %88 = vector.extract_strided_slice %17 {offsets = [0, 144], sizes = [16, 48], strides = [1, 1]} : vector<16x768xf32> to vector<16x48xf32>
    %89 = vector.extract_strided_slice %22 {offsets = [0, 144], sizes = [16, 48], strides = [1, 1]} : vector<16x768xf32> to vector<16x48xf32>
    %cst_49 = arith.constant dense<0.000000e+00> : vector<8x16xf32>
    %90 = tpu.matmul %87, %88, %cst_49 {dimension_numbers = #tpu.dot_dimension_numbers<[1], [1], [0], [0], [0, 0, 1, 0], [], []>} : vector<8x48xf32>, vector<16x48xf32>, vector<8x16xf32> -> vector<8x16xf32>
    %cst_50 = arith.constant dense<0xFF800000> : vector<8xf32>
    %91 = vector.multi_reduction <maximumf>, %90, %cst_50 [1] : vector<8x16xf32> to vector<8xf32>
    %92 = vector.shape_cast %91 : vector<8xf32> to vector<8x1xf32>
    %93 = vector.broadcast %92 : vector<8x1xf32> to vector<8x16xf32>
    %94 = arith.subf %90, %93 : vector<8x16xf32>
    %95 = math.exp %94 : vector<8x16xf32>
    %cst_51 = arith.constant dense<0.000000e+00> : vector<8xf32>
    %96 = vector.multi_reduction <add>, %95, %cst_51 [1] : vector<8x16xf32> to vector<8xf32>
    %97 = vector.shape_cast %96 : vector<8xf32> to vector<8x1xf32>
    %98 = tpu.reciprocal %97 {approx = true} : vector<8x1xf32> -> vector<8x1xf32>
    %99 = vector.broadcast %98 : vector<8x1xf32> to vector<8x16xf32>
    %100 = arith.mulf %95, %99 : vector<8x16xf32>
    %cst_52 = arith.constant dense<0.000000e+00> : vector<8x48xf32>
    %101 = tpu.matmul %100, %89, %cst_52 {dimension_numbers = #tpu.dot_dimension_numbers<[1], [0], [0], [1], [0, 0, 1, 1], [], []>} : vector<8x16xf32>, vector<16x48xf32>, vector<8x48xf32> -> vector<8x48xf32>
    %c3 = arith.constant 3 : index
    %c0_53 = arith.constant 0 : index
    %c0_54 = arith.constant 0 : index
    %102 = vector.load %arg9[%c3, %c0_53, %c0_54] : memref<16x48x41xf32, #tpu.memory_space<vmem>>, vector<1x48x41xf32>
    %103 = vector.shape_cast %102 : vector<1x48x41xf32> to vector<48x41xf32>
    %cst_55 = arith.constant dense<0.000000e+00> : vector<8x41xf32>
    %104 = tpu.matmul %101, %103, %cst_55 {dimension_numbers = #tpu.dot_dimension_numbers<[1], [0], [0], [1], [0, 0, 1, 1], [], []>} : vector<8x48xf32>, vector<48x41xf32>, vector<8x41xf32> -> vector<8x41xf32>
    %105 = arith.addf %86, %104 : vector<8x41xf32>
    %106 = vector.extract_strided_slice %24 {offsets = [0, 192], sizes = [8, 48], strides = [1, 1]} : vector<8x768xf32> to vector<8x48xf32>
    %107 = vector.extract_strided_slice %17 {offsets = [0, 192], sizes = [16, 48], strides = [1, 1]} : vector<16x768xf32> to vector<16x48xf32>
    %108 = vector.extract_strided_slice %22 {offsets = [0, 192], sizes = [16, 48], strides = [1, 1]} : vector<16x768xf32> to vector<16x48xf32>
    %cst_56 = arith.constant dense<0.000000e+00> : vector<8x16xf32>
    %109 = tpu.matmul %106, %107, %cst_56 {dimension_numbers = #tpu.dot_dimension_numbers<[1], [1], [0], [0], [0, 0, 1, 0], [], []>} : vector<8x48xf32>, vector<16x48xf32>, vector<8x16xf32> -> vector<8x16xf32>
    %cst_57 = arith.constant dense<0xFF800000> : vector<8xf32>
    %110 = vector.multi_reduction <maximumf>, %109, %cst_57 [1] : vector<8x16xf32> to vector<8xf32>
    %111 = vector.shape_cast %110 : vector<8xf32> to vector<8x1xf32>
    %112 = vector.broadcast %111 : vector<8x1xf32> to vector<8x16xf32>
    %113 = arith.subf %109, %112 : vector<8x16xf32>
    %114 = math.exp %113 : vector<8x16xf32>
    %cst_58 = arith.constant dense<0.000000e+00> : vector<8xf32>
    %115 = vector.multi_reduction <add>, %114, %cst_58 [1] : vector<8x16xf32> to vector<8xf32>
    %116 = vector.shape_cast %115 : vector<8xf32> to vector<8x1xf32>
    %117 = tpu.reciprocal %116 {approx = true} : vector<8x1xf32> -> vector<8x1xf32>
    %118 = vector.broadcast %117 : vector<8x1xf32> to vector<8x16xf32>
    %119 = arith.mulf %114, %118 : vector<8x16xf32>
    %cst_59 = arith.constant dense<0.000000e+00> : vector<8x48xf32>
    %120 = tpu.matmul %119, %108, %cst_59 {dimension_numbers = #tpu.dot_dimension_numbers<[1], [0], [0], [1], [0, 0, 1, 1], [], []>} : vector<8x16xf32>, vector<16x48xf32>, vector<8x48xf32> -> vector<8x48xf32>
    %c4 = arith.constant 4 : index
    %c0_60 = arith.constant 0 : index
    %c0_61 = arith.constant 0 : index
    %121 = vector.load %arg9[%c4, %c0_60, %c0_61] : memref<16x48x41xf32, #tpu.memory_space<vmem>>, vector<1x48x41xf32>
    %122 = vector.shape_cast %121 : vector<1x48x41xf32> to vector<48x41xf32>
    %cst_62 = arith.constant dense<0.000000e+00> : vector<8x41xf32>
    %123 = tpu.matmul %120, %122, %cst_62 {dimension_numbers = #tpu.dot_dimension_numbers<[1], [0], [0], [1], [0, 0, 1, 1], [], []>} : vector<8x48xf32>, vector<48x41xf32>, vector<8x41xf32> -> vector<8x41xf32>
    %124 = arith.addf %105, %123 : vector<8x41xf32>
    %125 = vector.extract_strided_slice %24 {offsets = [0, 240], sizes = [8, 48], strides = [1, 1]} : vector<8x768xf32> to vector<8x48xf32>
    %126 = vector.extract_strided_slice %17 {offsets = [0, 240], sizes = [16, 48], strides = [1, 1]} : vector<16x768xf32> to vector<16x48xf32>
    %127 = vector.extract_strided_slice %22 {offsets = [0, 240], sizes = [16, 48], strides = [1, 1]} : vector<16x768xf32> to vector<16x48xf32>
    %cst_63 = arith.constant dense<0.000000e+00> : vector<8x16xf32>
    %128 = tpu.matmul %125, %126, %cst_63 {dimension_numbers = #tpu.dot_dimension_numbers<[1], [1], [0], [0], [0, 0, 1, 0], [], []>} : vector<8x48xf32>, vector<16x48xf32>, vector<8x16xf32> -> vector<8x16xf32>
    %cst_64 = arith.constant dense<0xFF800000> : vector<8xf32>
    %129 = vector.multi_reduction <maximumf>, %128, %cst_64 [1] : vector<8x16xf32> to vector<8xf32>
    %130 = vector.shape_cast %129 : vector<8xf32> to vector<8x1xf32>
    %131 = vector.broadcast %130 : vector<8x1xf32> to vector<8x16xf32>
    %132 = arith.subf %128, %131 : vector<8x16xf32>
    %133 = math.exp %132 : vector<8x16xf32>
    %cst_65 = arith.constant dense<0.000000e+00> : vector<8xf32>
    %134 = vector.multi_reduction <add>, %133, %cst_65 [1] : vector<8x16xf32> to vector<8xf32>
    %135 = vector.shape_cast %134 : vector<8xf32> to vector<8x1xf32>
    %136 = tpu.reciprocal %135 {approx = true} : vector<8x1xf32> -> vector<8x1xf32>
    %137 = vector.broadcast %136 : vector<8x1xf32> to vector<8x16xf32>
    %138 = arith.mulf %133, %137 : vector<8x16xf32>
    %cst_66 = arith.constant dense<0.000000e+00> : vector<8x48xf32>
    %139 = tpu.matmul %138, %127, %cst_66 {dimension_numbers = #tpu.dot_dimension_numbers<[1], [0], [0], [1], [0, 0, 1, 1], [], []>} : vector<8x16xf32>, vector<16x48xf32>, vector<8x48xf32> -> vector<8x48xf32>
    %c5 = arith.constant 5 : index
    %c0_67 = arith.constant 0 : index
    %c0_68 = arith.constant 0 : index
    %140 = vector.load %arg9[%c5, %c0_67, %c0_68] : memref<16x48x41xf32, #tpu.memory_space<vmem>>, vector<1x48x41xf32>
    %141 = vector.shape_cast %140 : vector<1x48x41xf32> to vector<48x41xf32>
    %cst_69 = arith.constant dense<0.000000e+00> : vector<8x41xf32>
    %142 = tpu.matmul %139, %141, %cst_69 {dimension_numbers = #tpu.dot_dimension_numbers<[1], [0], [0], [1], [0, 0, 1, 1], [], []>} : vector<8x48xf32>, vector<48x41xf32>, vector<8x41xf32> -> vector<8x41xf32>
    %143 = arith.addf %124, %142 : vector<8x41xf32>
    %144 = vector.extract_strided_slice %24 {offsets = [0, 288], sizes = [8, 48], strides = [1, 1]} : vector<8x768xf32> to vector<8x48xf32>
    %145 = vector.extract_strided_slice %17 {offsets = [0, 288], sizes = [16, 48], strides = [1, 1]} : vector<16x768xf32> to vector<16x48xf32>
    %146 = vector.extract_strided_slice %22 {offsets = [0, 288], sizes = [16, 48], strides = [1, 1]} : vector<16x768xf32> to vector<16x48xf32>
    %cst_70 = arith.constant dense<0.000000e+00> : vector<8x16xf32>
    %147 = tpu.matmul %144, %145, %cst_70 {dimension_numbers = #tpu.dot_dimension_numbers<[1], [1], [0], [0], [0, 0, 1, 0], [], []>} : vector<8x48xf32>, vector<16x48xf32>, vector<8x16xf32> -> vector<8x16xf32>
    %cst_71 = arith.constant dense<0xFF800000> : vector<8xf32>
    %148 = vector.multi_reduction <maximumf>, %147, %cst_71 [1] : vector<8x16xf32> to vector<8xf32>
    %149 = vector.shape_cast %148 : vector<8xf32> to vector<8x1xf32>
    %150 = vector.broadcast %149 : vector<8x1xf32> to vector<8x16xf32>
    %151 = arith.subf %147, %150 : vector<8x16xf32>
    %152 = math.exp %151 : vector<8x16xf32>
    %cst_72 = arith.constant dense<0.000000e+00> : vector<8xf32>
    %153 = vector.multi_reduction <add>, %152, %cst_72 [1] : vector<8x16xf32> to vector<8xf32>
    %154 = vector.shape_cast %153 : vector<8xf32> to vector<8x1xf32>
    %155 = tpu.reciprocal %154 {approx = true} : vector<8x1xf32> -> vector<8x1xf32>
    %156 = vector.broadcast %155 : vector<8x1xf32> to vector<8x16xf32>
    %157 = arith.mulf %152, %156 : vector<8x16xf32>
    %cst_73 = arith.constant dense<0.000000e+00> : vector<8x48xf32>
    %158 = tpu.matmul %157, %146, %cst_73 {dimension_numbers = #tpu.dot_dimension_numbers<[1], [0], [0], [1], [0, 0, 1, 1], [], []>} : vector<8x16xf32>, vector<16x48xf32>, vector<8x48xf32> -> vector<8x48xf32>
    %c6 = arith.constant 6 : index
    %c0_74 = arith.constant 0 : index
    %c0_75 = arith.constant 0 : index
    %159 = vector.load %arg9[%c6, %c0_74, %c0_75] : memref<16x48x41xf32, #tpu.memory_space<vmem>>, vector<1x48x41xf32>
    %160 = vector.shape_cast %159 : vector<1x48x41xf32> to vector<48x41xf32>
    %cst_76 = arith.constant dense<0.000000e+00> : vector<8x41xf32>
    %161 = tpu.matmul %158, %160, %cst_76 {dimension_numbers = #tpu.dot_dimension_numbers<[1], [0], [0], [1], [0, 0, 1, 1], [], []>} : vector<8x48xf32>, vector<48x41xf32>, vector<8x41xf32> -> vector<8x41xf32>
    %162 = arith.addf %143, %161 : vector<8x41xf32>
    %163 = vector.extract_strided_slice %24 {offsets = [0, 336], sizes = [8, 48], strides = [1, 1]} : vector<8x768xf32> to vector<8x48xf32>
    %164 = vector.extract_strided_slice %17 {offsets = [0, 336], sizes = [16, 48], strides = [1, 1]} : vector<16x768xf32> to vector<16x48xf32>
    %165 = vector.extract_strided_slice %22 {offsets = [0, 336], sizes = [16, 48], strides = [1, 1]} : vector<16x768xf32> to vector<16x48xf32>
    %cst_77 = arith.constant dense<0.000000e+00> : vector<8x16xf32>
    %166 = tpu.matmul %163, %164, %cst_77 {dimension_numbers = #tpu.dot_dimension_numbers<[1], [1], [0], [0], [0, 0, 1, 0], [], []>} : vector<8x48xf32>, vector<16x48xf32>, vector<8x16xf32> -> vector<8x16xf32>
    %cst_78 = arith.constant dense<0xFF800000> : vector<8xf32>
    %167 = vector.multi_reduction <maximumf>, %166, %cst_78 [1] : vector<8x16xf32> to vector<8xf32>
    %168 = vector.shape_cast %167 : vector<8xf32> to vector<8x1xf32>
    %169 = vector.broadcast %168 : vector<8x1xf32> to vector<8x16xf32>
    %170 = arith.subf %166, %169 : vector<8x16xf32>
    %171 = math.exp %170 : vector<8x16xf32>
    %cst_79 = arith.constant dense<0.000000e+00> : vector<8xf32>
    %172 = vector.multi_reduction <add>, %171, %cst_79 [1] : vector<8x16xf32> to vector<8xf32>
    %173 = vector.shape_cast %172 : vector<8xf32> to vector<8x1xf32>
    %174 = tpu.reciprocal %173 {approx = true} : vector<8x1xf32> -> vector<8x1xf32>
    %175 = vector.broadcast %174 : vector<8x1xf32> to vector<8x16xf32>
    %176 = arith.mulf %171, %175 : vector<8x16xf32>
    %cst_80 = arith.constant dense<0.000000e+00> : vector<8x48xf32>
    %177 = tpu.matmul %176, %165, %cst_80 {dimension_numbers = #tpu.dot_dimension_numbers<[1], [0], [0], [1], [0, 0, 1, 1], [], []>} : vector<8x16xf32>, vector<16x48xf32>, vector<8x48xf32> -> vector<8x48xf32>
    %c7 = arith.constant 7 : index
    %c0_81 = arith.constant 0 : index
    %c0_82 = arith.constant 0 : index
    %178 = vector.load %arg9[%c7, %c0_81, %c0_82] : memref<16x48x41xf32, #tpu.memory_space<vmem>>, vector<1x48x41xf32>
    %179 = vector.shape_cast %178 : vector<1x48x41xf32> to vector<48x41xf32>
    %cst_83 = arith.constant dense<0.000000e+00> : vector<8x41xf32>
    %180 = tpu.matmul %177, %179, %cst_83 {dimension_numbers = #tpu.dot_dimension_numbers<[1], [0], [0], [1], [0, 0, 1, 1], [], []>} : vector<8x48xf32>, vector<48x41xf32>, vector<8x41xf32> -> vector<8x41xf32>
    %181 = arith.addf %162, %180 : vector<8x41xf32>
    %182 = vector.extract_strided_slice %24 {offsets = [0, 384], sizes = [8, 48], strides = [1, 1]} : vector<8x768xf32> to vector<8x48xf32>
    %183 = vector.extract_strided_slice %17 {offsets = [0, 384], sizes = [16, 48], strides = [1, 1]} : vector<16x768xf32> to vector<16x48xf32>
    %184 = vector.extract_strided_slice %22 {offsets = [0, 384], sizes = [16, 48], strides = [1, 1]} : vector<16x768xf32> to vector<16x48xf32>
    %cst_84 = arith.constant dense<0.000000e+00> : vector<8x16xf32>
    %185 = tpu.matmul %182, %183, %cst_84 {dimension_numbers = #tpu.dot_dimension_numbers<[1], [1], [0], [0], [0, 0, 1, 0], [], []>} : vector<8x48xf32>, vector<16x48xf32>, vector<8x16xf32> -> vector<8x16xf32>
    %cst_85 = arith.constant dense<0xFF800000> : vector<8xf32>
    %186 = vector.multi_reduction <maximumf>, %185, %cst_85 [1] : vector<8x16xf32> to vector<8xf32>
    %187 = vector.shape_cast %186 : vector<8xf32> to vector<8x1xf32>
    %188 = vector.broadcast %187 : vector<8x1xf32> to vector<8x16xf32>
    %189 = arith.subf %185, %188 : vector<8x16xf32>
    %190 = math.exp %189 : vector<8x16xf32>
    %cst_86 = arith.constant dense<0.000000e+00> : vector<8xf32>
    %191 = vector.multi_reduction <add>, %190, %cst_86 [1] : vector<8x16xf32> to vector<8xf32>
    %192 = vector.shape_cast %191 : vector<8xf32> to vector<8x1xf32>
    %193 = tpu.reciprocal %192 {approx = true} : vector<8x1xf32> -> vector<8x1xf32>
    %194 = vector.broadcast %193 : vector<8x1xf32> to vector<8x16xf32>
    %195 = arith.mulf %190, %194 : vector<8x16xf32>
    %cst_87 = arith.constant dense<0.000000e+00> : vector<8x48xf32>
    %196 = tpu.matmul %195, %184, %cst_87 {dimension_numbers = #tpu.dot_dimension_numbers<[1], [0], [0], [1], [0, 0, 1, 1], [], []>} : vector<8x16xf32>, vector<16x48xf32>, vector<8x48xf32> -> vector<8x48xf32>
    %c8 = arith.constant 8 : index
    %c0_88 = arith.constant 0 : index
    %c0_89 = arith.constant 0 : index
    %197 = vector.load %arg9[%c8, %c0_88, %c0_89] : memref<16x48x41xf32, #tpu.memory_space<vmem>>, vector<1x48x41xf32>
    %198 = vector.shape_cast %197 : vector<1x48x41xf32> to vector<48x41xf32>
    %cst_90 = arith.constant dense<0.000000e+00> : vector<8x41xf32>
    %199 = tpu.matmul %196, %198, %cst_90 {dimension_numbers = #tpu.dot_dimension_numbers<[1], [0], [0], [1], [0, 0, 1, 1], [], []>} : vector<8x48xf32>, vector<48x41xf32>, vector<8x41xf32> -> vector<8x41xf32>
    %200 = arith.addf %181, %199 : vector<8x41xf32>
    %201 = vector.extract_strided_slice %24 {offsets = [0, 432], sizes = [8, 48], strides = [1, 1]} : vector<8x768xf32> to vector<8x48xf32>
    %202 = vector.extract_strided_slice %17 {offsets = [0, 432], sizes = [16, 48], strides = [1, 1]} : vector<16x768xf32> to vector<16x48xf32>
    %203 = vector.extract_strided_slice %22 {offsets = [0, 432], sizes = [16, 48], strides = [1, 1]} : vector<16x768xf32> to vector<16x48xf32>
    %cst_91 = arith.constant dense<0.000000e+00> : vector<8x16xf32>
    %204 = tpu.matmul %201, %202, %cst_91 {dimension_numbers = #tpu.dot_dimension_numbers<[1], [1], [0], [0], [0, 0, 1, 0], [], []>} : vector<8x48xf32>, vector<16x48xf32>, vector<8x16xf32> -> vector<8x16xf32>
    %cst_92 = arith.constant dense<0xFF800000> : vector<8xf32>
    %205 = vector.multi_reduction <maximumf>, %204, %cst_92 [1] : vector<8x16xf32> to vector<8xf32>
    %206 = vector.shape_cast %205 : vector<8xf32> to vector<8x1xf32>
    %207 = vector.broadcast %206 : vector<8x1xf32> to vector<8x16xf32>
    %208 = arith.subf %204, %207 : vector<8x16xf32>
    %209 = math.exp %208 : vector<8x16xf32>
    %cst_93 = arith.constant dense<0.000000e+00> : vector<8xf32>
    %210 = vector.multi_reduction <add>, %209, %cst_93 [1] : vector<8x16xf32> to vector<8xf32>
    %211 = vector.shape_cast %210 : vector<8xf32> to vector<8x1xf32>
    %212 = tpu.reciprocal %211 {approx = true} : vector<8x1xf32> -> vector<8x1xf32>
    %213 = vector.broadcast %212 : vector<8x1xf32> to vector<8x16xf32>
    %214 = arith.mulf %209, %213 : vector<8x16xf32>
    %cst_94 = arith.constant dense<0.000000e+00> : vector<8x48xf32>
    %215 = tpu.matmul %214, %203, %cst_94 {dimension_numbers = #tpu.dot_dimension_numbers<[1], [0], [0], [1], [0, 0, 1, 1], [], []>} : vector<8x16xf32>, vector<16x48xf32>, vector<8x48xf32> -> vector<8x48xf32>
    %c9 = arith.constant 9 : index
    %c0_95 = arith.constant 0 : index
    %c0_96 = arith.constant 0 : index
    %216 = vector.load %arg9[%c9, %c0_95, %c0_96] : memref<16x48x41xf32, #tpu.memory_space<vmem>>, vector<1x48x41xf32>
    %217 = vector.shape_cast %216 : vector<1x48x41xf32> to vector<48x41xf32>
    %cst_97 = arith.constant dense<0.000000e+00> : vector<8x41xf32>
    %218 = tpu.matmul %215, %217, %cst_97 {dimension_numbers = #tpu.dot_dimension_numbers<[1], [0], [0], [1], [0, 0, 1, 1], [], []>} : vector<8x48xf32>, vector<48x41xf32>, vector<8x41xf32> -> vector<8x41xf32>
    %219 = arith.addf %200, %218 : vector<8x41xf32>
    %220 = vector.extract_strided_slice %24 {offsets = [0, 480], sizes = [8, 48], strides = [1, 1]} : vector<8x768xf32> to vector<8x48xf32>
    %221 = vector.extract_strided_slice %17 {offsets = [0, 480], sizes = [16, 48], strides = [1, 1]} : vector<16x768xf32> to vector<16x48xf32>
    %222 = vector.extract_strided_slice %22 {offsets = [0, 480], sizes = [16, 48], strides = [1, 1]} : vector<16x768xf32> to vector<16x48xf32>
    %cst_98 = arith.constant dense<0.000000e+00> : vector<8x16xf32>
    %223 = tpu.matmul %220, %221, %cst_98 {dimension_numbers = #tpu.dot_dimension_numbers<[1], [1], [0], [0], [0, 0, 1, 0], [], []>} : vector<8x48xf32>, vector<16x48xf32>, vector<8x16xf32> -> vector<8x16xf32>
    %cst_99 = arith.constant dense<0xFF800000> : vector<8xf32>
    %224 = vector.multi_reduction <maximumf>, %223, %cst_99 [1] : vector<8x16xf32> to vector<8xf32>
    %225 = vector.shape_cast %224 : vector<8xf32> to vector<8x1xf32>
    %226 = vector.broadcast %225 : vector<8x1xf32> to vector<8x16xf32>
    %227 = arith.subf %223, %226 : vector<8x16xf32>
    %228 = math.exp %227 : vector<8x16xf32>
    %cst_100 = arith.constant dense<0.000000e+00> : vector<8xf32>
    %229 = vector.multi_reduction <add>, %228, %cst_100 [1] : vector<8x16xf32> to vector<8xf32>
    %230 = vector.shape_cast %229 : vector<8xf32> to vector<8x1xf32>
    %231 = tpu.reciprocal %230 {approx = true} : vector<8x1xf32> -> vector<8x1xf32>
    %232 = vector.broadcast %231 : vector<8x1xf32> to vector<8x16xf32>
    %233 = arith.mulf %228, %232 : vector<8x16xf32>
    %cst_101 = arith.constant dense<0.000000e+00> : vector<8x48xf32>
    %234 = tpu.matmul %233, %222, %cst_101 {dimension_numbers = #tpu.dot_dimension_numbers<[1], [0], [0], [1], [0, 0, 1, 1], [], []>} : vector<8x16xf32>, vector<16x48xf32>, vector<8x48xf32> -> vector<8x48xf32>
    %c10 = arith.constant 10 : index
    %c0_102 = arith.constant 0 : index
    %c0_103 = arith.constant 0 : index
    %235 = vector.load %arg9[%c10, %c0_102, %c0_103] : memref<16x48x41xf32, #tpu.memory_space<vmem>>, vector<1x48x41xf32>
    %236 = vector.shape_cast %235 : vector<1x48x41xf32> to vector<48x41xf32>
    %cst_104 = arith.constant dense<0.000000e+00> : vector<8x41xf32>
    %237 = tpu.matmul %234, %236, %cst_104 {dimension_numbers = #tpu.dot_dimension_numbers<[1], [0], [0], [1], [0, 0, 1, 1], [], []>} : vector<8x48xf32>, vector<48x41xf32>, vector<8x41xf32> -> vector<8x41xf32>
    %238 = arith.addf %219, %237 : vector<8x41xf32>
    %239 = vector.extract_strided_slice %24 {offsets = [0, 528], sizes = [8, 48], strides = [1, 1]} : vector<8x768xf32> to vector<8x48xf32>
    %240 = vector.extract_strided_slice %17 {offsets = [0, 528], sizes = [16, 48], strides = [1, 1]} : vector<16x768xf32> to vector<16x48xf32>
    %241 = vector.extract_strided_slice %22 {offsets = [0, 528], sizes = [16, 48], strides = [1, 1]} : vector<16x768xf32> to vector<16x48xf32>
    %cst_105 = arith.constant dense<0.000000e+00> : vector<8x16xf32>
    %242 = tpu.matmul %239, %240, %cst_105 {dimension_numbers = #tpu.dot_dimension_numbers<[1], [1], [0], [0], [0, 0, 1, 0], [], []>} : vector<8x48xf32>, vector<16x48xf32>, vector<8x16xf32> -> vector<8x16xf32>
    %cst_106 = arith.constant dense<0xFF800000> : vector<8xf32>
    %243 = vector.multi_reduction <maximumf>, %242, %cst_106 [1] : vector<8x16xf32> to vector<8xf32>
    %244 = vector.shape_cast %243 : vector<8xf32> to vector<8x1xf32>
    %245 = vector.broadcast %244 : vector<8x1xf32> to vector<8x16xf32>
    %246 = arith.subf %242, %245 : vector<8x16xf32>
    %247 = math.exp %246 : vector<8x16xf32>
    %cst_107 = arith.constant dense<0.000000e+00> : vector<8xf32>
    %248 = vector.multi_reduction <add>, %247, %cst_107 [1] : vector<8x16xf32> to vector<8xf32>
    %249 = vector.shape_cast %248 : vector<8xf32> to vector<8x1xf32>
    %250 = tpu.reciprocal %249 {approx = true} : vector<8x1xf32> -> vector<8x1xf32>
    %251 = vector.broadcast %250 : vector<8x1xf32> to vector<8x16xf32>
    %252 = arith.mulf %247, %251 : vector<8x16xf32>
    %cst_108 = arith.constant dense<0.000000e+00> : vector<8x48xf32>
    %253 = tpu.matmul %252, %241, %cst_108 {dimension_numbers = #tpu.dot_dimension_numbers<[1], [0], [0], [1], [0, 0, 1, 1], [], []>} : vector<8x16xf32>, vector<16x48xf32>, vector<8x48xf32> -> vector<8x48xf32>
    %c11 = arith.constant 11 : index
    %c0_109 = arith.constant 0 : index
    %c0_110 = arith.constant 0 : index
    %254 = vector.load %arg9[%c11, %c0_109, %c0_110] : memref<16x48x41xf32, #tpu.memory_space<vmem>>, vector<1x48x41xf32>
    %255 = vector.shape_cast %254 : vector<1x48x41xf32> to vector<48x41xf32>
    %cst_111 = arith.constant dense<0.000000e+00> : vector<8x41xf32>
    %256 = tpu.matmul %253, %255, %cst_111 {dimension_numbers = #tpu.dot_dimension_numbers<[1], [0], [0], [1], [0, 0, 1, 1], [], []>} : vector<8x48xf32>, vector<48x41xf32>, vector<8x41xf32> -> vector<8x41xf32>
    %257 = arith.addf %238, %256 : vector<8x41xf32>
    %258 = vector.extract_strided_slice %24 {offsets = [0, 576], sizes = [8, 48], strides = [1, 1]} : vector<8x768xf32> to vector<8x48xf32>
    %259 = vector.extract_strided_slice %17 {offsets = [0, 576], sizes = [16, 48], strides = [1, 1]} : vector<16x768xf32> to vector<16x48xf32>
    %260 = vector.extract_strided_slice %22 {offsets = [0, 576], sizes = [16, 48], strides = [1, 1]} : vector<16x768xf32> to vector<16x48xf32>
    %cst_112 = arith.constant dense<0.000000e+00> : vector<8x16xf32>
    %261 = tpu.matmul %258, %259, %cst_112 {dimension_numbers = #tpu.dot_dimension_numbers<[1], [1], [0], [0], [0, 0, 1, 0], [], []>} : vector<8x48xf32>, vector<16x48xf32>, vector<8x16xf32> -> vector<8x16xf32>
    %cst_113 = arith.constant dense<0xFF800000> : vector<8xf32>
    %262 = vector.multi_reduction <maximumf>, %261, %cst_113 [1] : vector<8x16xf32> to vector<8xf32>
    %263 = vector.shape_cast %262 : vector<8xf32> to vector<8x1xf32>
    %264 = vector.broadcast %263 : vector<8x1xf32> to vector<8x16xf32>
    %265 = arith.subf %261, %264 : vector<8x16xf32>
    %266 = math.exp %265 : vector<8x16xf32>
    %cst_114 = arith.constant dense<0.000000e+00> : vector<8xf32>
    %267 = vector.multi_reduction <add>, %266, %cst_114 [1] : vector<8x16xf32> to vector<8xf32>
    %268 = vector.shape_cast %267 : vector<8xf32> to vector<8x1xf32>
    %269 = tpu.reciprocal %268 {approx = true} : vector<8x1xf32> -> vector<8x1xf32>
    %270 = vector.broadcast %269 : vector<8x1xf32> to vector<8x16xf32>
    %271 = arith.mulf %266, %270 : vector<8x16xf32>
    %cst_115 = arith.constant dense<0.000000e+00> : vector<8x48xf32>
    %272 = tpu.matmul %271, %260, %cst_115 {dimension_numbers = #tpu.dot_dimension_numbers<[1], [0], [0], [1], [0, 0, 1, 1], [], []>} : vector<8x16xf32>, vector<16x48xf32>, vector<8x48xf32> -> vector<8x48xf32>
    %c12 = arith.constant 12 : index
    %c0_116 = arith.constant 0 : index
    %c0_117 = arith.constant 0 : index
    %273 = vector.load %arg9[%c12, %c0_116, %c0_117] : memref<16x48x41xf32, #tpu.memory_space<vmem>>, vector<1x48x41xf32>
    %274 = vector.shape_cast %273 : vector<1x48x41xf32> to vector<48x41xf32>
    %cst_118 = arith.constant dense<0.000000e+00> : vector<8x41xf32>
    %275 = tpu.matmul %272, %274, %cst_118 {dimension_numbers = #tpu.dot_dimension_numbers<[1], [0], [0], [1], [0, 0, 1, 1], [], []>} : vector<8x48xf32>, vector<48x41xf32>, vector<8x41xf32> -> vector<8x41xf32>
    %276 = arith.addf %257, %275 : vector<8x41xf32>
    %277 = vector.extract_strided_slice %24 {offsets = [0, 624], sizes = [8, 48], strides = [1, 1]} : vector<8x768xf32> to vector<8x48xf32>
    %278 = vector.extract_strided_slice %17 {offsets = [0, 624], sizes = [16, 48], strides = [1, 1]} : vector<16x768xf32> to vector<16x48xf32>
    %279 = vector.extract_strided_slice %22 {offsets = [0, 624], sizes = [16, 48], strides = [1, 1]} : vector<16x768xf32> to vector<16x48xf32>
    %cst_119 = arith.constant dense<0.000000e+00> : vector<8x16xf32>
    %280 = tpu.matmul %277, %278, %cst_119 {dimension_numbers = #tpu.dot_dimension_numbers<[1], [1], [0], [0], [0, 0, 1, 0], [], []>} : vector<8x48xf32>, vector<16x48xf32>, vector<8x16xf32> -> vector<8x16xf32>
    %cst_120 = arith.constant dense<0xFF800000> : vector<8xf32>
    %281 = vector.multi_reduction <maximumf>, %280, %cst_120 [1] : vector<8x16xf32> to vector<8xf32>
    %282 = vector.shape_cast %281 : vector<8xf32> to vector<8x1xf32>
    %283 = vector.broadcast %282 : vector<8x1xf32> to vector<8x16xf32>
    %284 = arith.subf %280, %283 : vector<8x16xf32>
    %285 = math.exp %284 : vector<8x16xf32>
    %cst_121 = arith.constant dense<0.000000e+00> : vector<8xf32>
    %286 = vector.multi_reduction <add>, %285, %cst_121 [1] : vector<8x16xf32> to vector<8xf32>
    %287 = vector.shape_cast %286 : vector<8xf32> to vector<8x1xf32>
    %288 = tpu.reciprocal %287 {approx = true} : vector<8x1xf32> -> vector<8x1xf32>
    %289 = vector.broadcast %288 : vector<8x1xf32> to vector<8x16xf32>
    %290 = arith.mulf %285, %289 : vector<8x16xf32>
    %cst_122 = arith.constant dense<0.000000e+00> : vector<8x48xf32>
    %291 = tpu.matmul %290, %279, %cst_122 {dimension_numbers = #tpu.dot_dimension_numbers<[1], [0], [0], [1], [0, 0, 1, 1], [], []>} : vector<8x16xf32>, vector<16x48xf32>, vector<8x48xf32> -> vector<8x48xf32>
    %c13 = arith.constant 13 : index
    %c0_123 = arith.constant 0 : index
    %c0_124 = arith.constant 0 : index
    %292 = vector.load %arg9[%c13, %c0_123, %c0_124] : memref<16x48x41xf32, #tpu.memory_space<vmem>>, vector<1x48x41xf32>
    %293 = vector.shape_cast %292 : vector<1x48x41xf32> to vector<48x41xf32>
    %cst_125 = arith.constant dense<0.000000e+00> : vector<8x41xf32>
    %294 = tpu.matmul %291, %293, %cst_125 {dimension_numbers = #tpu.dot_dimension_numbers<[1], [0], [0], [1], [0, 0, 1, 1], [], []>} : vector<8x48xf32>, vector<48x41xf32>, vector<8x41xf32> -> vector<8x41xf32>
    %295 = arith.addf %276, %294 : vector<8x41xf32>
    %296 = vector.extract_strided_slice %24 {offsets = [0, 672], sizes = [8, 48], strides = [1, 1]} : vector<8x768xf32> to vector<8x48xf32>
    %297 = vector.extract_strided_slice %17 {offsets = [0, 672], sizes = [16, 48], strides = [1, 1]} : vector<16x768xf32> to vector<16x48xf32>
    %298 = vector.extract_strided_slice %22 {offsets = [0, 672], sizes = [16, 48], strides = [1, 1]} : vector<16x768xf32> to vector<16x48xf32>
    %cst_126 = arith.constant dense<0.000000e+00> : vector<8x16xf32>
    %299 = tpu.matmul %296, %297, %cst_126 {dimension_numbers = #tpu.dot_dimension_numbers<[1], [1], [0], [0], [0, 0, 1, 0], [], []>} : vector<8x48xf32>, vector<16x48xf32>, vector<8x16xf32> -> vector<8x16xf32>
    %cst_127 = arith.constant dense<0xFF800000> : vector<8xf32>
    %300 = vector.multi_reduction <maximumf>, %299, %cst_127 [1] : vector<8x16xf32> to vector<8xf32>
    %301 = vector.shape_cast %300 : vector<8xf32> to vector<8x1xf32>
    %302 = vector.broadcast %301 : vector<8x1xf32> to vector<8x16xf32>
    %303 = arith.subf %299, %302 : vector<8x16xf32>
    %304 = math.exp %303 : vector<8x16xf32>
    %cst_128 = arith.constant dense<0.000000e+00> : vector<8xf32>
    %305 = vector.multi_reduction <add>, %304, %cst_128 [1] : vector<8x16xf32> to vector<8xf32>
    %306 = vector.shape_cast %305 : vector<8xf32> to vector<8x1xf32>
    %307 = tpu.reciprocal %306 {approx = true} : vector<8x1xf32> -> vector<8x1xf32>
    %308 = vector.broadcast %307 : vector<8x1xf32> to vector<8x16xf32>
    %309 = arith.mulf %304, %308 : vector<8x16xf32>
    %cst_129 = arith.constant dense<0.000000e+00> : vector<8x48xf32>
    %310 = tpu.matmul %309, %298, %cst_129 {dimension_numbers = #tpu.dot_dimension_numbers<[1], [0], [0], [1], [0, 0, 1, 1], [], []>} : vector<8x16xf32>, vector<16x48xf32>, vector<8x48xf32> -> vector<8x48xf32>
    %c14 = arith.constant 14 : index
    %c0_130 = arith.constant 0 : index
    %c0_131 = arith.constant 0 : index
    %311 = vector.load %arg9[%c14, %c0_130, %c0_131] : memref<16x48x41xf32, #tpu.memory_space<vmem>>, vector<1x48x41xf32>
    %312 = vector.shape_cast %311 : vector<1x48x41xf32> to vector<48x41xf32>
    %cst_132 = arith.constant dense<0.000000e+00> : vector<8x41xf32>
    %313 = tpu.matmul %310, %312, %cst_132 {dimension_numbers = #tpu.dot_dimension_numbers<[1], [0], [0], [1], [0, 0, 1, 1], [], []>} : vector<8x48xf32>, vector<48x41xf32>, vector<8x41xf32> -> vector<8x41xf32>
    %314 = arith.addf %295, %313 : vector<8x41xf32>
    %315 = vector.extract_strided_slice %24 {offsets = [0, 720], sizes = [8, 48], strides = [1, 1]} : vector<8x768xf32> to vector<8x48xf32>
    %316 = vector.extract_strided_slice %17 {offsets = [0, 720], sizes = [16, 48], strides = [1, 1]} : vector<16x768xf32> to vector<16x48xf32>
    %317 = vector.extract_strided_slice %22 {offsets = [0, 720], sizes = [16, 48], strides = [1, 1]} : vector<16x768xf32> to vector<16x48xf32>
    %cst_133 = arith.constant dense<0.000000e+00> : vector<8x16xf32>
    %318 = tpu.matmul %315, %316, %cst_133 {dimension_numbers = #tpu.dot_dimension_numbers<[1], [1], [0], [0], [0, 0, 1, 0], [], []>} : vector<8x48xf32>, vector<16x48xf32>, vector<8x16xf32> -> vector<8x16xf32>
    %cst_134 = arith.constant dense<0xFF800000> : vector<8xf32>
    %319 = vector.multi_reduction <maximumf>, %318, %cst_134 [1] : vector<8x16xf32> to vector<8xf32>
    %320 = vector.shape_cast %319 : vector<8xf32> to vector<8x1xf32>
    %321 = vector.broadcast %320 : vector<8x1xf32> to vector<8x16xf32>
    %322 = arith.subf %318, %321 : vector<8x16xf32>
    %323 = math.exp %322 : vector<8x16xf32>
    %cst_135 = arith.constant dense<0.000000e+00> : vector<8xf32>
    %324 = vector.multi_reduction <add>, %323, %cst_135 [1] : vector<8x16xf32> to vector<8xf32>
    %325 = vector.shape_cast %324 : vector<8xf32> to vector<8x1xf32>
    %326 = tpu.reciprocal %325 {approx = true} : vector<8x1xf32> -> vector<8x1xf32>
    %327 = vector.broadcast %326 : vector<8x1xf32> to vector<8x16xf32>
    %328 = arith.mulf %323, %327 : vector<8x16xf32>
    %cst_136 = arith.constant dense<0.000000e+00> : vector<8x48xf32>
    %329 = tpu.matmul %328, %317, %cst_136 {dimension_numbers = #tpu.dot_dimension_numbers<[1], [0], [0], [1], [0, 0, 1, 1], [], []>} : vector<8x16xf32>, vector<16x48xf32>, vector<8x48xf32> -> vector<8x48xf32>
    %c15 = arith.constant 15 : index
    %c0_137 = arith.constant 0 : index
    %c0_138 = arith.constant 0 : index
    %330 = vector.load %arg9[%c15, %c0_137, %c0_138] : memref<16x48x41xf32, #tpu.memory_space<vmem>>, vector<1x48x41xf32>
    %331 = vector.shape_cast %330 : vector<1x48x41xf32> to vector<48x41xf32>
    %cst_139 = arith.constant dense<0.000000e+00> : vector<8x41xf32>
    %332 = tpu.matmul %329, %331, %cst_139 {dimension_numbers = #tpu.dot_dimension_numbers<[1], [0], [0], [1], [0, 0, 1, 1], [], []>} : vector<8x48xf32>, vector<48x41xf32>, vector<8x41xf32> -> vector<8x41xf32>
    %333 = arith.addf %314, %332 : vector<8x41xf32>
    %c0_140 = arith.constant 0 : index
    %c0_141 = arith.constant 0 : index
    %334 = vector.load %arg12[%c0_140, %c0_141] : memref<8x41xf32, #tpu.memory_space<vmem>>, vector<8x41xf32>
    tpu.vector_store %arg12[%c0_140, %c0_141], %333 {strides = array<i32>} : memref<8x41xf32, #tpu.memory_space<vmem>>, vector<8x41xf32>,
    return
  }
  func.func @transform_0(%arg0: i32) -> (i32, i32) {
    %c0_i32 = arith.constant 0 : i32
    %c0_i32_0 = arith.constant 0 : i32
    return %arg0, %c0_i32 : i32, i32
  }
  func.func @transform_1(%arg0: i32) -> (i32, i32, i32) {
    %c0_i32 = arith.constant 0 : i32
    %c0_i32_0 = arith.constant 0 : i32
    %c0_i32_1 = arith.constant 0 : i32
    %c0_i32_2 = arith.constant 0 : i32
    return %c0_i32, %c0_i32_0, %c0_i32_1 : i32, i32, i32
  }
  func.func @transform_2(%arg0: i32) -> (i32, i32) {
    %c0_i32 = arith.constant 0 : i32
    %c0_i32_0 = arith.constant 0 : i32
    %c0_i32_1 = arith.constant 0 : i32
    return %c0_i32, %c0_i32_0 : i32, i32
  }
  func.func @transform_3(%arg0: i32) -> (i32, i32) {
    %c0_i32 = arith.constant 0 : i32
    %c0_i32_0 = arith.constant 0 : i32
    %c0_i32_1 = arith.constant 0 : i32
    return %c0_i32, %c0_i32_0 : i32, i32
  }
  func.func @transform_4(%arg0: i32) -> (i32, i32) {
    %c0_i32 = arith.constant 0 : i32
    %c0_i32_0 = arith.constant 0 : i32
    %c0_i32_1 = arith.constant 0 : i32
    return %c0_i32, %c0_i32_0 : i32, i32
  }
  func.func @transform_5(%arg0: i32) -> (i32, i32) {
    %c0_i32 = arith.constant 0 : i32
    %c0_i32_0 = arith.constant 0 : i32
    %c0_i32_1 = arith.constant 0 : i32
    return %c0_i32, %c0_i32_0 : i32, i32
  }
  func.func @transform_6(%arg0: i32) -> (i32, i32) {
    %c0_i32 = arith.constant 0 : i32
    %c0_i32_0 = arith.constant 0 : i32
    %c0_i32_1 = arith.constant 0 : i32
    return %c0_i32, %c0_i32_0 : i32, i32
  }
  func.func @transform_7(%arg0: i32) -> (i32, i32) {
    %c0_i32 = arith.constant 0 : i32
    %c0_i32_0 = arith.constant 0 : i32
    %c0_i32_1 = arith.constant 0 : i32
    return %c0_i32, %c0_i32_0 : i32, i32
  }
  func.func @transform_8(%arg0: i32) -> (i32, i32, i32) {
    %c0_i32 = arith.constant 0 : i32
    %c0_i32_0 = arith.constant 0 : i32
    %c0_i32_1 = arith.constant 0 : i32
    %c0_i32_2 = arith.constant 0 : i32
    return %c0_i32, %c0_i32_0, %c0_i32_1 : i32, i32, i32
  }
  func.func @transform_9(%arg0: i32) -> (i32, i32) {
    %c0_i32 = arith.constant 0 : i32
    %c0_i32_0 = arith.constant 0 : i32
    %c0_i32_1 = arith.constant 0 : i32
    return %c0_i32, %c0_i32_0 : i32, i32
  }
  func.func @transform_10(%arg0: i32) -> (i32, i32) {
    %c0_i32 = arith.constant 0 : i32
    %c0_i32_0 = arith.constant 0 : i32
    %c0_i32_1 = arith.constant 0 : i32
    return %c0_i32, %c0_i32_0 : i32, i32
  }
  func.func @transform_11(%arg0: i32) -> (i32, i32) {
    %c0_i32 = arith.constant 0 : i32
    %c0_i32_0 = arith.constant 0 : i32
    return %arg0, %c0_i32 : i32, i32
  }
}

</mosaic_0001>

<bundles_post_ra>
// kernel: acoustic_linguistic_forward.1
= control target key start
LH: loop header
LB: loop body
LE: loop exit
PB: predicated region body
PF: predicated region fallthrough
CT: control target
= control target key end

     0   :  { %16 = vsyncpa [#allocation3], 0  ;;  %s17444_s0 = inlined_call_operand.hbm [shape: f32[8,768], index: 0, kind: input, shape index: {}]   ;;  %s17445_s1 = inlined_call_operand.vmem [shape: f32[2,16,768], index: 1, kind: input, shape index: {}]   ;;  %s17446_s2 = inlined_call_operand.vmem [shape: bf16[768,768], index: 2, kind: input, shape index: {}]   ;;  %s17447_s3 = inlined_call_operand.hbm [shape: bf16[768,768], index: 3, kind: input, shape index: {}]   ;;  %s17448_s4 = inlined_call_operand.hbm [shape: bf16[768,768], index: 4, kind: input, shape index: {}]   ;;  %s17449_s5 = inlined_call_operand.vmem [shape: f32[1,768], index: 5, kind: input, shape index: {}]   ;;  %s17450_s6 = inlined_call_operand.vmem [shape: f32[1,768], index: 6, kind: input, shape index: {}]   ;;  %s17451_s7 = inlined_call_operand.vmem [shape: f32[1,768], index: 7, kind: input, shape index: {}]   ;;  %s17452_s8 = inlined_call_operand.vmem [shape: f32[16,48,41], index: 8, kind: input, shape index: {}]   ;;  %s17453_s9 = inlined_call_operand.vmem [shape: f32[768,41], index: 9, kind: input, shape index: {}]   ;;  %s17454_s10 = inlined_call_operand.vmem [shape: f32[1,41], index: 10, kind: input, shape index: {}]   ;;  %s17455_s11 = inlined_call_operand.hbm [shape: f32[8,41], index: 11, kind: output, shape index: {}]  }
   0x1   :  { %17 = vsyncpa [#allocation6], 0 }
   0x2   :  { %18 = vsyncpa [#allocation4], 0  ;;  %s14971_s17 = smov [#allocation5]   ;;  %s14877_s21 = scalar_lea.hbm %s17447_s3, 36864 }
   0x3   :  { %s38_s18 = sshll.u32 %s14971_s17, 4  ;;  %p14878_p0 = scmp.ne.s32.totalorder %s17447_s3, %s14877_s21  ;;  %s39_s18 = int_to_ptr.vmem [resolvable:$true] %s38_s18 }
   0x4   :  { %p14881_p1 = scmp.lt.u32.totalorder %s14877_s21, %s17447_s3 }
   0x6   :  { %p14883_p2 = pnand %p14881_p1, %p14878_p0 }
   0x8   :  { %14886 = shalt.err (!%p14883_p2)
}
   0x9   :  { %s14887_s26 = scalar_lea.vmem %s39_s18, 36864  ;;  %p14892_p4 = scmp.lt.s32.totalorder %s39_s18, %s39_s18 }
   0xa   :  { %p14888_p3 = scmp.ne.s32.totalorder %s39_s18, %s14887_s26  ;;  %p14893_p5 = scmp.lt.s32.totalorder %s14887_s26, %s14887_s26 }
   0xc   :  { %p14894_p6 = por %p14893_p5, %p14892_p4 }
   0xe   :  { %p14895_p7 = pnand %p14894_p6, %p14888_p3 }
  0x10   :  { %14898 = shalt.err (!%p14895_p7)
}
  0x11   :  { %s14972_s27 = smov 384   ;;  %s14973_s28 = smov 24  }
  0x12   :  { %44 = dma.hbm_to_vmem [thread:$0]  %s17447_s3, 36864, %s39_s18, [#allocation6], %s14972_s27, %s14972_s27, %s14973_s28  }
  0x13   :  { %s14974_s12 = smov [#allocation2]   ;;  %s14975_s14 = smov [#allocation7]  }
  0x14   :  { %s25_s13 = sshll.u32 %s14974_s12, 4  ;;  %s50_s15 = sshll.u32 %s14975_s14, 4  ;;  %s26_s13 = int_to_ptr.vmem [resolvable:$true] %s25_s13  ;;  %s51_s15 = int_to_ptr.vmem [resolvable:$true] %s50_s15 }
  0x15   :  { %s14899_s19 = scalar_lea.hbm %s17444_s0, 768 }
  0x16   :  { %p14900_p8 = scmp.ne.s32.totalorder %s17444_s0, %s14899_s19  ;;  %p14903_p9 = scmp.lt.u32.totalorder %s14899_s19, %s17444_s0 }
  0x18   :  { %p14905_p10 = pnand %p14903_p9, %p14900_p8 }
  0x1a   :  { %14908 = shalt.err (!%p14905_p10)
}
  0x1b   :  { %s14909_s3 = scalar_lea.vmem %s26_s13, 768  ;;  %p14914_p12 = scmp.lt.s32.totalorder %s26_s13, %s26_s13 }
  0x1c   :  { %p14910_p11 = scmp.ne.s32.totalorder %s26_s13, %s14909_s3  ;;  %p14915_p13 = scmp.lt.s32.totalorder %s14909_s3, %s14909_s3 }
  0x1e   :  { %p14916_p0 = por %p14915_p13, %p14914_p12 }
  0x20   :  { %p14917_p1 = pnand %p14916_p0, %p14910_p11 }
  0x22   :  { %14920 = shalt.err (!%p14917_p1)
}
  0x23   :  { %28 = dma.hbm_to_vmem [thread:$0]  %s17444_s0, 768, %s26_s13, [#allocation3]  }
  0x24   :  { %s14921_s29 = scalar_lea.hbm %s17448_s4, 36864 }
  0x25   :  { %p14922_p2 = scmp.ne.s32.totalorder %s17448_s4, %s14921_s29  ;;  %p14925_p3 = scmp.lt.u32.totalorder %s14921_s29, %s17448_s4 }
  0x27   :  { %p14927_p4 = pnand %p14925_p3, %p14922_p2 }
  0x29   :  { %14930 = shalt.err (!%p14927_p4)
}
  0x2a   :  { %s14931_s17 = scalar_lea.vmem %s51_s15, 36864  ;;  %p14936_p6 = scmp.lt.s32.totalorder %s51_s15, %s51_s15 }
  0x2b   :  { %p14932_p5 = scmp.ne.s32.totalorder %s51_s15, %s14931_s17  ;;  %p14937_p7 = scmp.lt.s32.totalorder %s14931_s17, %s14931_s17 }
  0x2d   :  { %p14938_p8 = por %p14937_p7, %p14936_p6 }
  0x2f   :  { %p14939_p9 = pnand %p14938_p8, %p14932_p5 }
  0x31   :  { %14942 = shalt.err (!%p14939_p9)
}
  0x32   :  { %56 = dma.hbm_to_vmem [thread:$0]  %s17448_s4, 36864, %s51_s15, [#allocation6], %s14972_s27, %s14972_s27, %s14973_s28  }
  0x33   :  { %14965 = dma.done.wait [#allocation3], 768  }
  0x34   :  { %14966 = vsyncadd [#allocation3], 4294966528 }
  0x35   :  { %14967 = dma.done.wait [#allocation6], 73728  }
  0x36   :  { %14968 = vsyncadd [#allocation6], 4294893568  ;;  %v13508_v0 = vld [vmem:[%s17446_s2 + $0x4] ss:$24 sps:$4 sm:$0xff]   ;;  %v13512_v2 = vld [vmem:[%s17446_s2] ss:$24 sps:$4 sm:$0xff]  }
  0x37   :  { %v13510_v1 = vld [vmem:[%s17446_s2 + $0xc] ss:$24 sps:$4 sm:$0xff]   ;;  %1887 = vmatprep.subr.bf16.mxu0 %v13508_v0  ;;  %v13513_v3 = vld [vmem:[%s17446_s2 + $0x8] ss:$24 sps:$4 sm:$0xff]   ;;  %v13516_v5 = vld [vmem:[%s17446_s2 + $0x3c] ss:$24 sps:$4 sm:$0xff]  }
  0x38   :  { %2010 = vmatprep.subr.bf16.mxu1 %v13510_v1  ;;  %v13514_v4 = vld [vmem:[%s17446_s2 + $0x34] ss:$24 sps:$4 sm:$0xff]   ;;  %1888 = vmatpush1.bf16.msra.mxu0 %v13512_v2  ;;  %v13518_v6 = vld [vmem:[%s17446_s2 + $0x30] ss:$24 sps:$4 sm:$0xff]   ;;  %v13520_v8 = vld [vmem:[%s17446_s2 + $0x64] ss:$24 sps:$4 sm:$0xff]  }
  0x39   :  { %2011 = vmatpush1.bf16.msra.mxu1 %v13513_v3  ;;  %1889 = vmatprep.subr.bf16.mxu0 %v13514_v4  ;;  %v13519_v7 = vld [vmem:[%s17446_s2 + $0x38] ss:$24 sps:$4 sm:$0xff]   ;;  %v13522_v9 = vld [vmem:[%s17446_s2 + $0x6c] ss:$24 sps:$4 sm:$0xff]   ;;  %v13525_v11 = vld [vmem:[%s17446_s2 + $0x68] ss:$24 sps:$4 sm:$0xff]  }
  0x3a   :  { %2012 = vmatprep.subr.bf16.mxu1 %v13516_v5  ;;  %v13524_v10 = vld [vmem:[%s17446_s2 + $0x60] ss:$24 sps:$4 sm:$0xff]   ;;  %v13526_v12 = vld [vmem:[%s17446_s2 + $0x94] ss:$24 sps:$4 sm:$0xff]   ;;  %v13530_v14 = vld [vmem:[%s17446_s2 + $0x90] ss:$24 sps:$4 sm:$0xff]  }
  0x3b   :  { %v13528_v13 = vld [vmem:[%s17446_s2 + $0x9c] ss:$24 sps:$4 sm:$0xff]   ;;  %v13531_v15 = vld [vmem:[%s17446_s2 + $0x98] ss:$24 sps:$4 sm:$0xff]   ;;  %v13534_v17 = vld [vmem:[%s17446_s2 + $0xcc] ss:$24 sps:$4 sm:$0xff]  }
  0x3c   :  { %1890 = vmatpush1.bf16.msra.mxu0 %v13518_v6  ;;  %v13532_v16 = vld [vmem:[%s17446_s2 + $0xc4] ss:$24 sps:$4 sm:$0xff]   ;;  %v13536_v18 = vld [vmem:[%s17446_s2 + $0xc0] ss:$24 sps:$4 sm:$0xff]   ;;  %v13538_v20 = vld [vmem:[%s17446_s2 + $0xf4] ss:$24 sps:$4 sm:$0xff]  }
  0x3d   :  { %2013 = vmatpush1.bf16.msra.mxu1 %v13519_v7  ;;  %1891 = vmatprep.subr.bf16.mxu0 %v13520_v8  ;;  %v13537_v19 = vld [vmem:[%s17446_s2 + $0xc8] ss:$24 sps:$4 sm:$0xff]   ;;  %v13540_v21 = vld [vmem:[%s17446_s2 + $0xfc] ss:$24 sps:$4 sm:$0xff]   ;;  %v13543_v23 = vld [vmem:[%s17446_s2 + $0xf8] ss:$24 sps:$4 sm:$0xff]  }
  0x3e   :  { %2014 = vmatprep.subr.bf16.mxu1 %v13522_v9  ;;  %v13542_v22 = vld [vmem:[%s17446_s2 + $0xf0] ss:$24 sps:$4 sm:$0xff]   ;;  %v13544_v24 = vld [vmem:[%s17446_s2 + $0x124] ss:$24 sps:$4 sm:$0xff]   ;;  %v13548_v26 = vld [vmem:[%s17446_s2 + $0x120] ss:$24 sps:$4 sm:$0xff]  }
  0x3f   :  { %v13546_v25 = vld [vmem:[%s17446_s2 + $0x12c] ss:$24 sps:$4 sm:$0xff]   ;;  %v13549_v27 = vld [vmem:[%s17446_s2 + $0x128] ss:$24 sps:$4 sm:$0xff]   ;;  %v13552_v29 = vld [vmem:[%s17446_s2 + $0x15c] ss:$24 sps:$4 sm:$0xff]  }
  0x40   :  { %1892 = vmatpush1.bf16.msra.mxu0 %v13524_v10  ;;  %v13550_v28 = vld [vmem:[%s17446_s2 + $0x154] ss:$24 sps:$4 sm:$0xff]   ;;  %v13554_v30 = vld [vmem:[%s17446_s2 + $0x150] ss:$24 sps:$4 sm:$0xff]   ;;  %v13556_v32 = vld [vmem:[%s17446_s2 + $0x184] ss:$24 sps:$4 sm:$0xff]  }
  0x41   :  { %2015 = vmatpush1.bf16.msra.mxu1 %v13525_v11  ;;  %1893 = vmatprep.subr.bf16.mxu0 %v13526_v12  ;;  %v13555_v31 = vld [vmem:[%s17446_s2 + $0x158] ss:$24 sps:$4 sm:$0xff]   ;;  %v13558_v33 = vld [vmem:[%s17446_s2 + $0x18c] ss:$24 sps:$4 sm:$0xff]   ;;  %v13561_v35 = vld [vmem:[%s17446_s2 + $0x188] ss:$24 sps:$4 sm:$0xff]  }
  0x42   :  { %2016 = vmatprep.subr.bf16.mxu1 %v13528_v13  ;;  %v13560_v34 = vld [vmem:[%s17446_s2 + $0x180] ss:$24 sps:$4 sm:$0xff]   ;;  %v13562_v36 = vld [vmem:[%s17446_s2 + $0x1b4] ss:$24 sps:$4 sm:$0xff]   ;;  %v13566_v38 = vld [vmem:[%s17446_s2 + $0x1b0] ss:$24 sps:$4 sm:$0xff]  }
  0x43   :  { %v13564_v37 = vld [vmem:[%s17446_s2 + $0x1bc] ss:$24 sps:$4 sm:$0xff]   ;;  %v13567_v39 = vld [vmem:[%s17446_s2 + $0x1b8] ss:$24 sps:$4 sm:$0xff]   ;;  %v13570_v41 = vld [vmem:[%s17446_s2 + $0x1ec] ss:$24 sps:$4 sm:$0xff]  }
  0x44   :  { %1894 = vmatpush1.bf16.msra.mxu0 %v13530_v14  ;;  %v13568_v40 = vld [vmem:[%s17446_s2 + $0x1e4] ss:$24 sps:$4 sm:$0xff]   ;;  %v13572_v42 = vld [vmem:[%s17446_s2 + $0x1e0] ss:$24 sps:$4 sm:$0xff]   ;;  %v13574_v44 = vld [vmem:[%s17446_s2 + $0x214] ss:$24 sps:$4 sm:$0xff]  }
  0x45   :  { %2017 = vmatpush1.bf16.msra.mxu1 %v13531_v15  ;;  %1895 = vmatprep.subr.bf16.mxu0 %v13532_v16  ;;  %v13573_v43 = vld [vmem:[%s17446_s2 + $0x1e8] ss:$24 sps:$4 sm:$0xff]   ;;  %v13576_v45 = vld [vmem:[%s17446_s2 + $0x21c] ss:$24 sps:$4 sm:$0xff]   ;;  %v13579_v49 = vld [vmem:[%s17446_s2 + $0x218] ss:$24 sps:$4 sm:$0xff]  }
  0x46   :  { %2018 = vmatprep.subr.bf16.mxu1 %v13534_v17  ;;  %v79_v46 = vld [vmem:[#allocation2 + $0x8] sm:$0xff]  ;;  %v13580_v50 = vld [vmem:[%s17446_s2 + $0x244] ss:$24 sps:$4 sm:$0xff]   ;;  %v13584_v52 = vld [vmem:[%s17446_s2 + $0x240] ss:$24 sps:$4 sm:$0xff]   ;;  %s14976_s26 = smov 64  }
  0x47   :  { %v13578_v47 = vld [vmem:[%s17446_s2 + $0x210] ss:$24 sps:$4 sm:$0xff]   ;;  %v15230_v48 = vpack.c.bf16 %v79_v46, %v79_v46  ;;  %v13582_v51 = vld [vmem:[%s17446_s2 + $0x24c] ss:$24 sps:$4 sm:$0xff]   ;;  %v13588_v55 = vld [vmem:[%s17446_s2 + $0x27c] ss:$24 sps:$4 sm:$0xff]  }
  0x48   :  { %1896 = vmatpush1.bf16.msra.mxu0 %v13536_v18  ;;  %v13585_v53 = vld [vmem:[%s17446_s2 + $0x248] ss:$24 sps:$4 sm:$0xff]   ;;  %v13586_v54 = vld [vmem:[%s17446_s2 + $0x274] ss:$24 sps:$4 sm:$0xff]   ;;  %v13591_v57 = vld [vmem:[%s17446_s2 + $0x278] ss:$24 sps:$4 sm:$0xff]  }
  0x49   :  { %2019 = vmatpush1.bf16.msra.mxu1 %v13537_v19  ;;  %1897 = vmatprep.subr.bf16.mxu0 %v13538_v20  ;;  %v13590_v56 = vld [vmem:[%s17446_s2 + $0x270] ss:$24 sps:$4 sm:$0xff]   ;;  %v13592_v58 = vld [vmem:[%s17446_s2 + $0x2a4] ss:$24 sps:$4 sm:$0xff]   ;;  %v13596_v60 = vld [vmem:[%s17446_s2 + $0x2a0] ss:$24 sps:$4 sm:$0xff]  }
  0x4a   :  { %2020 = vmatprep.subr.bf16.mxu1 %v13540_v21  ;;  %1919 = vmatprep.mubr.bf16.mxu0 %v15230_v48  ;;  %v13594_v59 = vld [vmem:[%s17446_s2 + $0x2ac] ss:$24 sps:$4 sm:$0xff]   ;;  %v13597_v61 = vld [vmem:[%s17446_s2 + $0x2a8] ss:$24 sps:$4 sm:$0xff]   ;;  %v13600_v63 = vld [vmem:[%s17446_s2 + $0x2dc] ss:$24 sps:$4 sm:$0xff]  }
  0x4b   :  { %2042 = vmatprep.mubr.bf16.mxu1 %v15230_v48  ;;  %v13598_v62 = vld [vmem:[%s17446_s2 + $0x2d4] ss:$24 sps:$4 sm:$0xff]   ;;  %v13602_v0 = vld [vmem:[%s17446_s2 + $0x2d0] ss:$24 sps:$4 sm:$0xff]   ;;  %v78_v2 = vld [vmem:[#allocation2] sm:$0xff]  ;;  %vm6869_vm0 = vcmask 392192  }
  0x4c   :  { %1898 = vmatpush1.bf16.msra.mxu0 %v13542_v22  ;;  %v13603_v1 = vld [vmem:[%s17446_s2 + $0x2d8] ss:$24 sps:$4 sm:$0xff]   ;;  %v13606_v3 = vld [vmem:[%s17446_s2 + $0x304] ss:$24 sps:$4 sm:$0xff]   ;;  %v15291_v5 = vpack.c.bf16 %v78_v2, %v78_v2  ;;  %v13607_v7 = vld [vmem:[%s17446_s2 + $0x308] ss:$24 sps:$4 sm:$0xff]  }
  0x4d   :  { %2021 = vmatpush1.bf16.msra.mxu1 %v13543_v23  ;;  %1899 = vmatprep.subr.bf16.mxu0 %v13544_v24  ;;  %v13609_v4 = vld [vmem:[%s17446_s2 + $0x30c] ss:$24 sps:$4 sm:$0xff]   ;;  %v13604_v6 = vld [vmem:[%s17446_s2 + $0x300] ss:$24 sps:$4 sm:$0xff]   ;;  %v13615_v9 = vld [vmem:[%s17446_s2 + $0x33c] ss:$24 sps:$4 sm:$0xff]  }
  0x4e   :  { %2022 = vmatprep.subr.bf16.mxu1 %v13546_v25  ;;  %v13612_v8 = vld [vmem:[%s17446_s2 + $0x334] ss:$24 sps:$4 sm:$0xff]   ;;  %v13610_v10 = vld [vmem:[%s17446_s2 + $0x330] ss:$24 sps:$4 sm:$0xff]   ;;  %v13618_v12 = vld [vmem:[%s17446_s2 + $0x364] ss:$24 sps:$4 sm:$0xff]  }
  0x4f   :  { %v13613_v11 = vld [vmem:[%s17446_s2 + $0x338] ss:$24 sps:$4 sm:$0xff]   ;;  %v13621_v13 = vld [vmem:[%s17446_s2 + $0x36c] ss:$24 sps:$4 sm:$0xff]   ;;  %v13619_v15 = vld [vmem:[%s17446_s2 + $0x368] ss:$24 sps:$4 sm:$0xff]  }
  0x50   :  { %1900 = vmatpush1.bf16.msra.mxu0 %v13548_v26  ;;  %v13616_v14 = vld [vmem:[%s17446_s2 + $0x360] ss:$24 sps:$4 sm:$0xff]   ;;  %v13624_v16 = vld [vmem:[%s17446_s2 + $0x394] ss:$24 sps:$4 sm:$0xff]   ;;  %v13622_v18 = vld [vmem:[%s17446_s2 + $0x390] ss:$24 sps:$4 sm:$0xff]  }
  0x51   :  { %2023 = vmatpush1.bf16.msra.mxu1 %v13549_v27  ;;  %1901 = vmatprep.subr.bf16.mxu0 %v13550_v28  ;;  %v13627_v17 = vld [vmem:[%s17446_s2 + $0x39c] ss:$24 sps:$4 sm:$0xff]   ;;  %v13625_v19 = vld [vmem:[%s17446_s2 + $0x398] ss:$24 sps:$4 sm:$0xff]   ;;  %v13633_v21 = vld [vmem:[%s17446_s2 + $0x3cc] ss:$24 sps:$4 sm:$0xff]  }
  0x52   :  { %2024 = vmatprep.subr.bf16.mxu1 %v13552_v29  ;;  %v13630_v20 = vld [vmem:[%s17446_s2 + $0x3c4] ss:$24 sps:$4 sm:$0xff]   ;;  %v13628_v22 = vld [vmem:[%s17446_s2 + $0x3c0] ss:$24 sps:$4 sm:$0xff]   ;;  %v13636_v24 = vld [vmem:[%s17446_s2 + $0x3f4] ss:$24 sps:$4 sm:$0xff]  }
  0x53   :  { %v13631_v23 = vld [vmem:[%s17446_s2 + $0x3c8] ss:$24 sps:$4 sm:$0xff]   ;;  %v13639_v25 = vld [vmem:[%s17446_s2 + $0x3fc] ss:$24 sps:$4 sm:$0xff]   ;;  %v13637_v27 = vld [vmem:[%s17446_s2 + $0x3f8] ss:$24 sps:$4 sm:$0xff]  }
  0x54   :  { %1902 = vmatpush1.bf16.msra.mxu0 %v13554_v30  ;;  %v13634_v26 = vld [vmem:[%s17446_s2 + $0x3f0] ss:$24 sps:$4 sm:$0xff]   ;;  %v13642_v28 = vld [vmem:[%s17446_s2 + $0x424] ss:$24 sps:$4 sm:$0xff]   ;;  %vm14978_vm1 = vmmov 0   ;;  %vm16510_vm2 = vmpackc.low %vm6869_vm0, %vm6869_vm0  ;;  %vm6949_vm3 = vcmask 130048  }
  0x55   :  { %2025 = vmatpush1.bf16.msra.mxu1 %v13555_v31  ;;  %1903 = vmatprep.subr.bf16.mxu0 %v13556_v32  ;;  %v13645_v29 = vld [vmem:[%s17446_s2 + $0x42c] ss:$24 sps:$4 sm:$0xff]   ;;  %v81_v30 = vld [vmem:[#allocation2 + $0x18] sm:$0xff]  ;;  %v13691_v2 = vld [vmem:[%s17446_s2 + $0x5a8] ss:$24 sps:$4 sm:$0xff]   ;;  %s14982_s22 = smov 48  }
  0x56   :  { %2026 = vmatprep.subr.bf16.mxu1 %v13558_v33  ;;  %v13640_v31 = vld [vmem:[%s17446_s2 + $0x420] ss:$24 sps:$4 sm:$0xff]   ;;  %v15370_v32 = vpack.c.bf16 %v81_v30, %v81_v30  ;;  %v13666_v46 = vld [vmem:[%s17446_s2 + $0x4e4] ss:$24 sps:$4 sm:$0xff]   ;;  %s14983_s23 = smov 80   ;;  %s14984_s3 = smov 32  }
  0x57   :  { %v13643_v33 = vld [vmem:[%s17446_s2 + $0x428] ss:$24 sps:$4 sm:$0xff]   ;;  %vm7374_vm4 = vcmask 261120   ;;  %s14986_s21 = smov [#allocation8]   ;;  %vm10985_vm5 = vcmask 334848  }
  0x58   :  { %1904 = vmatpush1.bf16.msra.mxu0 %v13560_v34  ;;  %v13648_v34 = vld [vmem:[%s17446_s2 + $0x454] ss:$24 sps:$4 sm:$0xff]   ;;  %v13724_v30 = vld [vmem:[%s17446_s2 + $0x6c0] ss:$24 sps:$4 sm:$0xff]  }
  0x59   :  { %2027 = vmatpush1.bf16.msra.mxu1 %v13561_v35  ;;  %1905 = vmatprep.subr.bf16.mxu0 %v13562_v36  ;;  %v13651_v35 = vld [vmem:[%s17446_s2 + $0x45c] ss:$24 sps:$4 sm:$0xff]   ;;  %v13646_v36 = vld [vmem:[%s17446_s2 + $0x450] ss:$24 sps:$4 sm:$0xff]  }
  0x5a   :  { %2028 = vmatprep.subr.bf16.mxu1 %v13564_v37  ;;  %v13649_v37 = vld [vmem:[%s17446_s2 + $0x458] ss:$24 sps:$4 sm:$0xff]  }
  0x5c   :  { %1906 = vmatpush1.bf16.msra.mxu0 %v13566_v38  ;;  %v13654_v38 = vld [vmem:[%s17446_s2 + $0x484] ss:$24 sps:$4 sm:$0xff]  }
  0x5d   :  { %2029 = vmatpush1.bf16.msra.mxu1 %v13567_v39  ;;  %1907 = vmatprep.subr.bf16.mxu0 %v13568_v40  ;;  %v13657_v39 = vld [vmem:[%s17446_s2 + $0x48c] ss:$24 sps:$4 sm:$0xff]   ;;  %v13652_v40 = vld [vmem:[%s17446_s2 + $0x480] ss:$24 sps:$4 sm:$0xff]  }
  0x5e   :  { %2030 = vmatprep.subr.bf16.mxu1 %v13570_v41  ;;  %v13655_v41 = vld [vmem:[%s17446_s2 + $0x488] ss:$24 sps:$4 sm:$0xff]  }
  0x60   :  { %1908 = vmatpush1.bf16.msra.mxu0 %v13572_v42  ;;  %v13660_v42 = vld [vmem:[%s17446_s2 + $0x4b4] ss:$24 sps:$4 sm:$0xff]  }
  0x61   :  { %2031 = vmatpush1.bf16.msra.mxu1 %v13573_v43  ;;  %1909 = vmatprep.subr.bf16.mxu0 %v13574_v44  ;;  %v13663_v43 = vld [vmem:[%s17446_s2 + $0x4bc] ss:$24 sps:$4 sm:$0xff]   ;;  %v13658_v44 = vld [vmem:[%s17446_s2 + $0x4b0] ss:$24 sps:$4 sm:$0xff]  }
  0x62   :  { %2032 = vmatprep.subr.bf16.mxu1 %v13576_v45  ;;  %v13661_v45 = vld [vmem:[%s17446_s2 + $0x4b8] ss:$24 sps:$4 sm:$0xff]  }
  0x64   :  { %1910 = vmatpush1.bf16.msra.mxu0 %v13578_v47  ;;  %v13669_v47 = vld [vmem:[%s17446_s2 + $0x4ec] ss:$24 sps:$4 sm:$0xff]  }
  0x65   :  { %2033 = vmatpush1.bf16.msra.mxu1 %v13579_v49  ;;  %1911 = vmatprep.subr.bf16.mxu0 %v13580_v50  ;;  %v13664_v49 = vld [vmem:[%s17446_s2 + $0x4e0] ss:$24 sps:$4 sm:$0xff]  }
  0x66   :  { %2034 = vmatprep.subr.bf16.mxu1 %v13582_v51  ;;  %v13667_v50 = vld [vmem:[%s17446_s2 + $0x4e8] ss:$24 sps:$4 sm:$0xff]   ;;  %v13672_v51 = vld [vmem:[%s17446_s2 + $0x514] ss:$24 sps:$4 sm:$0xff]  }
  0x68   :  { %1912 = vmatpush1.bf16.msra.mxu0 %v13584_v52  ;;  %v13675_v52 = vld [vmem:[%s17446_s2 + $0x51c] ss:$24 sps:$4 sm:$0xff]  }
  0x69   :  { %2035 = vmatpush1.bf16.msra.mxu1 %v13585_v53  ;;  %1913 = vmatprep.subr.bf16.mxu0 %v13586_v54  ;;  %v13670_v53 = vld [vmem:[%s17446_s2 + $0x510] ss:$24 sps:$4 sm:$0xff]  }
  0x6a   :  { %2036 = vmatprep.subr.bf16.mxu1 %v13588_v55  ;;  %v13673_v54 = vld [vmem:[%s17446_s2 + $0x518] ss:$24 sps:$4 sm:$0xff]   ;;  %v13678_v55 = vld [vmem:[%s17446_s2 + $0x544] ss:$24 sps:$4 sm:$0xff]  }
  0x6c   :  { %1914 = vmatpush1.bf16.msra.mxu0 %v13590_v56  ;;  %v13681_v56 = vld [vmem:[%s17446_s2 + $0x54c] ss:$24 sps:$4 sm:$0xff]  }
  0x6d   :  { %2037 = vmatpush1.bf16.msra.mxu1 %v13591_v57  ;;  %1915 = vmatprep.subr.bf16.mxu0 %v13592_v58  ;;  %v13676_v57 = vld [vmem:[%s17446_s2 + $0x540] ss:$24 sps:$4 sm:$0xff]  }
  0x6e   :  { %2038 = vmatprep.subr.bf16.mxu1 %v13594_v59  ;;  %v13679_v58 = vld [vmem:[%s17446_s2 + $0x548] ss:$24 sps:$4 sm:$0xff]   ;;  %v13684_v59 = vld [vmem:[%s17446_s2 + $0x574] ss:$24 sps:$4 sm:$0xff]  }
  0x70   :  { %1916 = vmatpush1.bf16.msra.mxu0 %v13596_v60  ;;  %v13687_v60 = vld [vmem:[%s17446_s2 + $0x57c] ss:$24 sps:$4 sm:$0xff]  }
  0x71   :  { %2039 = vmatpush1.bf16.msra.mxu1 %v13597_v61  ;;  %1917 = vmatprep.subr.bf16.mxu0 %v13598_v62  ;;  %v13682_v61 = vld [vmem:[%s17446_s2 + $0x570] ss:$24 sps:$4 sm:$0xff]  }
  0x72   :  { %2040 = vmatprep.subr.bf16.mxu1 %v13600_v63  ;;  %v13685_v62 = vld [vmem:[%s17446_s2 + $0x578] ss:$24 sps:$4 sm:$0xff]   ;;  %v13690_v63 = vld [vmem:[%s17446_s2 + $0x5a4] ss:$24 sps:$4 sm:$0xff]  }
  0x74   :  { %1918 = vmatpush1.bf16.msra.mxu0 %v13602_v0  ;;  %v13693_v0 = vld [vmem:[%s17446_s2 + $0x5ac] ss:$24 sps:$4 sm:$0xff]  }
  0x75   :  { %2041 = vmatpush1.bf16.msra.mxu1 %v13603_v1  ;;  %1928 = vmatprep.subr.bf16.mxu0 %v13606_v3  ;;  %v13688_v1 = vld [vmem:[%s17446_s2 + $0x5a0] ss:$24 sps:$4 sm:$0xff]   ;;  %v13696_v3 = vld [vmem:[%s17446_s2 + $0x5d4] ss:$24 sps:$4 sm:$0xff]  }
  0x76   :  { %2051 = vmatprep.subr.bf16.mxu1 %v13609_v4  ;;  %v13699_v4 = vld [vmem:[%s17446_s2 + $0x5dc] ss:$24 sps:$4 sm:$0xff]  }
  0x77   :  { %1920 = vmatmul.mubr.bf16.vlgmr.msra.gmra.mrb[0].mxu0 %v15291_v5 }
  0x78   :  { %2043 = vmatmul.mubr.bf16.vlgmr.msra.gmra.mrb[0].mxu1 %v15291_v5  ;;  %1929 = vmatpush1.bf16.msra.mxu0 %v13604_v6  ;;  %v13694_v6 = vld [vmem:[%s17446_s2 + $0x5d0] ss:$24 sps:$4 sm:$0xff]  }
  0x79   :  { %2052 = vmatpush1.bf16.msra.mxu1 %v13607_v7  ;;  %1930 = vmatprep.subr.bf16.mxu0 %v13612_v8  ;;  %v13697_v7 = vld [vmem:[%s17446_s2 + $0x5d8] ss:$24 sps:$4 sm:$0xff]   ;;  %v13702_v8 = vld [vmem:[%s17446_s2 + $0x604] ss:$24 sps:$4 sm:$0xff]  }
  0x7a   :  { %2053 = vmatprep.subr.bf16.mxu1 %v13615_v9  ;;  %1960 = vmatprep.mubr.bf16.mxu0 %v15370_v32  ;;  %v80_v9 = vld [vmem:[#allocation2 + $0x10] sm:$0xff] }
  0x7b   :  { %2083 = vmatprep.mubr.bf16.mxu1 %v15370_v32 }
  0x7c   :  { %1931 = vmatpush1.bf16.msra.mxu0 %v13610_v10  ;;  %v13705_v10 = vld [vmem:[%s17446_s2 + $0x60c] ss:$24 sps:$4 sm:$0xff]  }
  0x7d   :  { %2054 = vmatpush1.bf16.msra.mxu1 %v13613_v11  ;;  %1932 = vmatprep.subr.bf16.mxu0 %v13618_v12  ;;  %v13700_v11 = vld [vmem:[%s17446_s2 + $0x600] ss:$24 sps:$4 sm:$0xff]   ;;  %v15494_v12 = vpack.c.bf16 %v80_v9, %v80_v9 }
  0x7e   :  { %2055 = vmatprep.subr.bf16.mxu1 %v13621_v13  ;;  %v13703_v13 = vld [vmem:[%s17446_s2 + $0x608] ss:$24 sps:$4 sm:$0xff]  }
  0x7f   :  { %v13784_v9 = vld [vmem:[%s17446_s2 + $0x8a0] ss:$24 sps:$4 sm:$0xff]  }
  0x80   :  { %1933 = vmatpush1.bf16.msra.mxu0 %v13616_v14  ;;  %v13708_v14 = vld [vmem:[%s17446_s2 + $0x634] ss:$24 sps:$4 sm:$0xff]  }
  0x81   :  { %2056 = vmatpush1.bf16.msra.mxu1 %v13619_v15  ;;  %1934 = vmatprep.subr.bf16.mxu0 %v13624_v16  ;;  %v13711_v15 = vld [vmem:[%s17446_s2 + $0x63c] ss:$24 sps:$4 sm:$0xff]   ;;  %v83_v16 = vld [vmem:[#allocation2 + $0x28] sm:$0xff] }
  0x82   :  { %2057 = vmatprep.subr.bf16.mxu1 %v13627_v17  ;;  %v15505_v17 = vpack.c.bf16 %v83_v16, %v83_v16  ;;  %v82_v16 = vld [vmem:[#allocation2 + $0x20] sm:$0xff] }
  0x84   :  { %1935 = vmatpush1.bf16.msra.mxu0 %v13622_v18  ;;  %v13706_v18 = vld [vmem:[%s17446_s2 + $0x630] ss:$24 sps:$4 sm:$0xff]  }
  0x85   :  { %2058 = vmatpush1.bf16.msra.mxu1 %v13625_v19  ;;  %1936 = vmatprep.subr.bf16.mxu0 %v13630_v20  ;;  %v13709_v19 = vld [vmem:[%s17446_s2 + $0x638] ss:$24 sps:$4 sm:$0xff]   ;;  %v13714_v20 = vld [vmem:[%s17446_s2 + $0x664] ss:$24 sps:$4 sm:$0xff]  }
  0x86   :  { %2059 = vmatprep.subr.bf16.mxu1 %v13633_v21  ;;  %v13717_v21 = vld [vmem:[%s17446_s2 + $0x66c] ss:$24 sps:$4 sm:$0xff]  }
  0x88   :  { %1937 = vmatpush1.bf16.msra.mxu0 %v13628_v22  ;;  %v13712_v22 = vld [vmem:[%s17446_s2 + $0x660] ss:$24 sps:$4 sm:$0xff]  }
  0x89   :  { %2060 = vmatpush1.bf16.msra.mxu1 %v13631_v23  ;;  %1938 = vmatprep.subr.bf16.mxu0 %v13636_v24  ;;  %v13715_v23 = vld [vmem:[%s17446_s2 + $0x668] ss:$24 sps:$4 sm:$0xff]   ;;  %v13720_v24 = vld [vmem:[%s17446_s2 + $0x694] ss:$24 sps:$4 sm:$0xff]  }
  0x8a   :  { %2061 = vmatprep.subr.bf16.mxu1 %v13639_v25  ;;  %v13723_v25 = vld [vmem:[%s17446_s2 + $0x69c] ss:$24 sps:$4 sm:$0xff]  }
  0x8c   :  { %1939 = vmatpush1.bf16.msra.mxu0 %v13634_v26  ;;  %v13718_v26 = vld [vmem:[%s17446_s2 + $0x690] ss:$24 sps:$4 sm:$0xff]  }
  0x8d   :  { %2062 = vmatpush1.bf16.msra.mxu1 %v13637_v27  ;;  %1940 = vmatprep.subr.bf16.mxu0 %v13642_v28  ;;  %v13721_v27 = vld [vmem:[%s17446_s2 + $0x698] ss:$24 sps:$4 sm:$0xff]   ;;  %v13726_v28 = vld [vmem:[%s17446_s2 + $0x6c4] ss:$24 sps:$4 sm:$0xff]  }
  0x8e   :  { %2063 = vmatprep.subr.bf16.mxu1 %v13645_v29  ;;  %v13729_v29 = vld [vmem:[%s17446_s2 + $0x6cc] ss:$24 sps:$4 sm:$0xff]  }
  0x90   :  { %1941 = vmatpush1.bf16.msra.mxu0 %v13640_v31  ;;  %v13727_v31 = vld [vmem:[%s17446_s2 + $0x6c8] ss:$24 sps:$4 sm:$0xff]  }
  0x91   :  { %2064 = vmatpush1.bf16.msra.mxu1 %v13643_v33  ;;  %1942 = vmatprep.subr.bf16.mxu0 %v13648_v34  ;;  %v13732_v33 = vld [vmem:[%s17446_s2 + $0x6f4] ss:$24 sps:$4 sm:$0xff]  }
  0x92   :  { %2065 = vmatprep.subr.bf16.mxu1 %v13651_v35  ;;  %v13735_v34 = vld [vmem:[%s17446_s2 + $0x6fc] ss:$24 sps:$4 sm:$0xff]   ;;  %v13730_v35 = vld [vmem:[%s17446_s2 + $0x6f0] ss:$24 sps:$4 sm:$0xff]  }
  0x94   :  { %1943 = vmatpush1.bf16.msra.mxu0 %v13646_v36  ;;  %v13733_v36 = vld [vmem:[%s17446_s2 + $0x6f8] ss:$24 sps:$4 sm:$0xff]  }
  0x95   :  { %2066 = vmatpush1.bf16.msra.mxu1 %v13649_v37  ;;  %1944 = vmatprep.subr.bf16.mxu0 %v13654_v38  ;;  %v13738_v37 = vld [vmem:[%s17446_s2 + $0x724] ss:$24 sps:$4 sm:$0xff]  }
  0x96   :  { %2067 = vmatprep.subr.bf16.mxu1 %v13657_v39  ;;  %v13741_v38 = vld [vmem:[%s17446_s2 + $0x72c] ss:$24 sps:$4 sm:$0xff]   ;;  %v13736_v39 = vld [vmem:[%s17446_s2 + $0x720] ss:$24 sps:$4 sm:$0xff]  }
  0x98   :  { %1945 = vmatpush1.bf16.msra.mxu0 %v13652_v40  ;;  %v13739_v40 = vld [vmem:[%s17446_s2 + $0x728] ss:$24 sps:$4 sm:$0xff]  }
  0x99   :  { %2068 = vmatpush1.bf16.msra.mxu1 %v13655_v41  ;;  %1946 = vmatprep.subr.bf16.mxu0 %v13660_v42  ;;  %v13744_v41 = vld [vmem:[%s17446_s2 + $0x754] ss:$24 sps:$4 sm:$0xff]  }
  0x9a   :  { %2069 = vmatprep.subr.bf16.mxu1 %v13663_v43  ;;  %v13747_v42 = vld [vmem:[%s17446_s2 + $0x75c] ss:$24 sps:$4 sm:$0xff]   ;;  %v13742_v43 = vld [vmem:[%s17446_s2 + $0x750] ss:$24 sps:$4 sm:$0xff]  }
  0x9c   :  { %1947 = vmatpush1.bf16.msra.mxu0 %v13658_v44  ;;  %v13745_v44 = vld [vmem:[%s17446_s2 + $0x758] ss:$24 sps:$4 sm:$0xff]  }
  0x9d   :  { %2070 = vmatpush1.bf16.msra.mxu1 %v13661_v45  ;;  %1948 = vmatprep.subr.bf16.mxu0 %v13666_v46  ;;  %v13750_v45 = vld [vmem:[%s17446_s2 + $0x784] ss:$24 sps:$4 sm:$0xff]  }
  0x9e   :  { %2071 = vmatprep.subr.bf16.mxu1 %v13669_v47  ;;  %v13753_v46 = vld [vmem:[%s17446_s2 + $0x78c] ss:$24 sps:$4 sm:$0xff]   ;;  %v13748_v47 = vld [vmem:[%s17446_s2 + $0x780] ss:$24 sps:$4 sm:$0xff]  }
  0xa0   :  { %1949 = vmatpush1.bf16.msra.mxu0 %v13664_v49  ;;  %v13751_v49 = vld [vmem:[%s17446_s2 + $0x788] ss:$24 sps:$4 sm:$0xff]  }
  0xa1   :  { %2072 = vmatpush1.bf16.msra.mxu1 %v13667_v50  ;;  %1950 = vmatprep.subr.bf16.mxu0 %v13672_v51  ;;  %v13756_v50 = vld [vmem:[%s17446_s2 + $0x7b4] ss:$24 sps:$4 sm:$0xff]  }
  0xa2   :  { %2073 = vmatprep.subr.bf16.mxu1 %v13675_v52  ;;  %v13759_v51 = vld [vmem:[%s17446_s2 + $0x7bc] ss:$24 sps:$4 sm:$0xff]   ;;  %v13754_v52 = vld [vmem:[%s17446_s2 + $0x7b0] ss:$24 sps:$4 sm:$0xff]  }
  0xa4   :  { %1951 = vmatpush1.bf16.msra.mxu0 %v13670_v53  ;;  %v13757_v53 = vld [vmem:[%s17446_s2 + $0x7b8] ss:$24 sps:$4 sm:$0xff]  }
  0xa5   :  { %2074 = vmatpush1.bf16.msra.mxu1 %v13673_v54  ;;  %1952 = vmatprep.subr.bf16.mxu0 %v13678_v55  ;;  %v13762_v54 = vld [vmem:[%s17446_s2 + $0x7e4] ss:$24 sps:$4 sm:$0xff]  }
  0xa6   :  { %2075 = vmatprep.subr.bf16.mxu1 %v13681_v56  ;;  %v13765_v55 = vld [vmem:[%s17446_s2 + $0x7ec] ss:$24 sps:$4 sm:$0xff]   ;;  %v13760_v56 = vld [vmem:[%s17446_s2 + $0x7e0] ss:$24 sps:$4 sm:$0xff]  }
  0xa8   :  { %1953 = vmatpush1.bf16.msra.mxu0 %v13676_v57  ;;  %v13763_v57 = vld [vmem:[%s17446_s2 + $0x7e8] ss:$24 sps:$4 sm:$0xff]  }
  0xa9   :  { %2076 = vmatpush1.bf16.msra.mxu1 %v13679_v58  ;;  %1954 = vmatprep.subr.bf16.mxu0 %v13684_v59  ;;  %v13768_v58 = vld [vmem:[%s17446_s2 + $0x814] ss:$24 sps:$4 sm:$0xff]  }
  0xaa   :  { %2077 = vmatprep.subr.bf16.mxu1 %v13687_v60  ;;  %v13771_v59 = vld [vmem:[%s17446_s2 + $0x81c] ss:$24 sps:$4 sm:$0xff]   ;;  %v13766_v60 = vld [vmem:[%s17446_s2 + $0x810] ss:$24 sps:$4 sm:$0xff]  }
  0xac   :  { %1955 = vmatpush1.bf16.msra.mxu0 %v13682_v61  ;;  %v13769_v61 = vld [vmem:[%s17446_s2 + $0x818] ss:$24 sps:$4 sm:$0xff]  }
  0xad   :  { %2078 = vmatpush1.bf16.msra.mxu1 %v13685_v62  ;;  %1956 = vmatprep.subr.bf16.mxu0 %v13690_v63  ;;  %v13774_v62 = vld [vmem:[%s17446_s2 + $0x844] ss:$24 sps:$4 sm:$0xff]  }
  0xae   :  { %2079 = vmatprep.subr.bf16.mxu1 %v13693_v0  ;;  %v13777_v63 = vld [vmem:[%s17446_s2 + $0x84c] ss:$24 sps:$4 sm:$0xff]   ;;  %v13772_v0 = vld [vmem:[%s17446_s2 + $0x840] ss:$24 sps:$4 sm:$0xff]  }
  0xb0   :  { %1957 = vmatpush1.bf16.msra.mxu0 %v13688_v1  ;;  %v13775_v1 = vld [vmem:[%s17446_s2 + $0x848] ss:$24 sps:$4 sm:$0xff]  }
  0xb1   :  { %2080 = vmatpush1.bf16.msra.mxu1 %v13691_v2  ;;  %1958 = vmatprep.subr.bf16.mxu0 %v13696_v3  ;;  %v13780_v2 = vld [vmem:[%s17446_s2 + $0x874] ss:$24 sps:$4 sm:$0xff]  }
  0xb2   :  { %2081 = vmatprep.subr.bf16.mxu1 %v13699_v4  ;;  %v13783_v3 = vld [vmem:[%s17446_s2 + $0x87c] ss:$24 sps:$4 sm:$0xff]   ;;  %v13778_v4 = vld [vmem:[%s17446_s2 + $0x870] ss:$24 sps:$4 sm:$0xff]  }
  0xb4   :  { %1959 = vmatpush1.bf16.msra.mxu0 %v13694_v6  ;;  %v13781_v6 = vld [vmem:[%s17446_s2 + $0x878] ss:$24 sps:$4 sm:$0xff]  }
  0xb5   :  { %2082 = vmatpush1.bf16.msra.mxu1 %v13697_v7  ;;  %1969 = vmatprep.subr.bf16.mxu0 %v13702_v8  ;;  %v13786_v7 = vld [vmem:[%s17446_s2 + $0x8a4] ss:$24 sps:$4 sm:$0xff]  }
  0xb6   :  { %2092 = vmatprep.subr.bf16.mxu1 %v13705_v10  ;;  %v13789_v8 = vld [vmem:[%s17446_s2 + $0x8ac] ss:$24 sps:$4 sm:$0xff]   ;;  %v13787_v10 = vld [vmem:[%s17446_s2 + $0x8a8] ss:$24 sps:$4 sm:$0xff]  }
  0xb7   :  { %1961 = vmatmul.mubr.bf16.vlgmr.msra.gmra.mrb[0].mxu0 %v15494_v12 }
  0xb8   :  { %2084 = vmatmul.mubr.bf16.vlgmr.msra.gmra.mrb[0].mxu1 %v15494_v12  ;;  %1970 = vmatpush1.bf16.msra.mxu0 %v13700_v11  ;;  %v13792_v11 = vld [vmem:[%s17446_s2 + $0x8d4] ss:$24 sps:$4 sm:$0xff]  }
  0xb9   :  { %2093 = vmatpush1.bf16.msra.mxu1 %v13703_v13  ;;  %1971 = vmatprep.subr.bf16.mxu0 %v13708_v14  ;;  %v13795_v13 = vld [vmem:[%s17446_s2 + $0x8dc] ss:$24 sps:$4 sm:$0xff]   ;;  %v13790_v14 = vld [vmem:[%s17446_s2 + $0x8d0] ss:$24 sps:$4 sm:$0xff]  }
  0xba   :  { %2094 = vmatprep.subr.bf16.mxu1 %v13711_v15  ;;  %2001 = vmatprep.mubr.bf16.mxu0 %v15505_v17  ;;  %v13793_v15 = vld [vmem:[%s17446_s2 + $0x8d8] ss:$24 sps:$4 sm:$0xff]  }
  0xbb   :  { %2124 = vmatprep.mubr.bf16.mxu1 %v15505_v17 }
  0xbc   :  { %1972 = vmatpush1.bf16.msra.mxu0 %v13706_v18  ;;  %v13798_v18 = vld [vmem:[%s17446_s2 + $0x14] ss:$24 sps:$4 sm:$0xff]  }
  0xbd   :  { %2095 = vmatpush1.bf16.msra.mxu1 %v13709_v19  ;;  %1973 = vmatprep.subr.bf16.mxu0 %v13714_v20  ;;  %v13801_v19 = vld [vmem:[#allocation5 + $0x4] ss:$24 sps:$4 sm:$0xff]  }
  0xbe   :  { %2096 = vmatprep.subr.bf16.mxu1 %v13717_v21  ;;  %v91_v20 = vld [vmem:[%s17445_s1 + $0x8] sm:$0xff]  ;;  %v15691_v21 = vpack.c.bf16 %v82_v16, %v82_v16  ;;  %v13877_v16 = vld [vmem:[#allocation5 + $0x270] ss:$24 sps:$4 sm:$0xff]  }
  0xc0   :  { %1974 = vmatpush1.bf16.msra.mxu0 %v13712_v22  ;;  %v97_v22 = vld [vmem:[%s17445_s1 + $0x38] sm:$0xff] }
  0xc1   :  { %2097 = vmatpush1.bf16.msra.mxu1 %v13715_v23  ;;  %1975 = vmatprep.subr.bf16.mxu0 %v13720_v24  ;;  %v13796_v23 = vld [vmem:[%s17446_s2 + $0x10] ss:$24 sps:$4 sm:$0xff]  }
  0xc2   :  { %2098 = vmatprep.subr.bf16.mxu1 %v13723_v25  ;;  %v13799_v24 = vld [vmem:[#allocation5] ss:$24 sps:$4 sm:$0xff]   ;;  %v13804_v25 = vld [vmem:[%s17446_s2 + $0x44] ss:$24 sps:$4 sm:$0xff]  }
  0xc4   :  { %1976 = vmatpush1.bf16.msra.mxu0 %v13718_v26  ;;  %v13807_v26 = vld [vmem:[#allocation5 + $0x34] ss:$24 sps:$4 sm:$0xff]  }
  0xc5   :  { %2099 = vmatpush1.bf16.msra.mxu1 %v13721_v27  ;;  %1977 = vmatprep.subr.bf16.mxu0 %v13726_v28  ;;  %v15702_v27 = vpack.c.bf16 %v97_v22, %v91_v20  ;;  %v13802_v28 = vld [vmem:[%s17446_s2 + $0x40] ss:$24 sps:$4 sm:$0xff]   ;;  %v13880_v20 = vld [vmem:[%s17446_s2 + $0x2b0] ss:$24 sps:$4 sm:$0xff]  }
  0xc6   :  { %2100 = vmatprep.subr.bf16.mxu1 %v13729_v29  ;;  %v13805_v29 = vld [vmem:[#allocation5 + $0x30] ss:$24 sps:$4 sm:$0xff]   ;;  %v13883_v22 = vld [vmem:[#allocation5 + $0x2a0] ss:$24 sps:$4 sm:$0xff]  }
  0xc8   :  { %1978 = vmatpush1.bf16.msra.mxu0 %v13724_v30  ;;  %v13810_v30 = vld [vmem:[%s17446_s2 + $0x74] ss:$24 sps:$4 sm:$0xff]  }
  0xc9   :  { %2101 = vmatpush1.bf16.msra.mxu1 %v13727_v31  ;;  %1979 = vmatprep.subr.bf16.mxu0 %v13732_v33  ;;  %v13813_v31 = vld [vmem:[#allocation5 + $0x64] ss:$24 sps:$4 sm:$0xff]   ;;  %v13808_v33 = vld [vmem:[%s17446_s2 + $0x70] ss:$24 sps:$4 sm:$0xff]  }
  0xca   :  { %2102 = vmatprep.subr.bf16.mxu1 %v13735_v34  ;;  %v13811_v34 = vld [vmem:[#allocation5 + $0x60] ss:$24 sps:$4 sm:$0xff]  }
  0xcc   :  { %1980 = vmatpush1.bf16.msra.mxu0 %v13730_v35  ;;  %v13816_v35 = vld [vmem:[%s17446_s2 + $0xa4] ss:$24 sps:$4 sm:$0xff]  }
  0xcd   :  { %2103 = vmatpush1.bf16.msra.mxu1 %v13733_v36  ;;  %1981 = vmatprep.subr.bf16.mxu0 %v13738_v37  ;;  %v13819_v36 = vld [vmem:[#allocation5 + $0x94] ss:$24 sps:$4 sm:$0xff]   ;;  %v13817_v37 = vld [vmem:[#allocation5 + $0x90] ss:$24 sps:$4 sm:$0xff]  }
  0xce   :  { %2104 = vmatprep.subr.bf16.mxu1 %v13741_v38  ;;  %v13822_v38 = vld [vmem:[%s17446_s2 + $0xd4] ss:$24 sps:$4 sm:$0xff]  }
  0xd0   :  { %1982 = vmatpush1.bf16.msra.mxu0 %v13736_v39  ;;  %v13825_v39 = vld [vmem:[#allocation5 + $0xc4] ss:$24 sps:$4 sm:$0xff]  }
  0xd1   :  { %2105 = vmatpush1.bf16.msra.mxu1 %v13739_v40  ;;  %1983 = vmatprep.subr.bf16.mxu0 %v13744_v41  ;;  %v13820_v40 = vld [vmem:[%s17446_s2 + $0xd0] ss:$24 sps:$4 sm:$0xff]  }
  0xd2   :  { %2106 = vmatprep.subr.bf16.mxu1 %v13747_v42  ;;  %v13823_v41 = vld [vmem:[#allocation5 + $0xc0] ss:$24 sps:$4 sm:$0xff]   ;;  %v13828_v42 = vld [vmem:[%s17446_s2 + $0x104] ss:$24 sps:$4 sm:$0xff]  }
  0xd4   :  { %1984 = vmatpush1.bf16.msra.mxu0 %v13742_v43  ;;  %v13831_v43 = vld [vmem:[#allocation5 + $0xf4] ss:$24 sps:$4 sm:$0xff]  }
  0xd5   :  { %2107 = vmatpush1.bf16.msra.mxu1 %v13745_v44  ;;  %1985 = vmatprep.subr.bf16.mxu0 %v13750_v45  ;;  %v13826_v44 = vld [vmem:[%s17446_s2 + $0x100] ss:$24 sps:$4 sm:$0xff]  }
  0xd6   :  { %2108 = vmatprep.subr.bf16.mxu1 %v13753_v46  ;;  %v13829_v45 = vld [vmem:[#allocation5 + $0xf0] ss:$24 sps:$4 sm:$0xff]   ;;  %v13834_v46 = vld [vmem:[%s17446_s2 + $0x134] ss:$24 sps:$4 sm:$0xff]  }
  0xd8   :  { %1986 = vmatpush1.bf16.msra.mxu0 %v13748_v47  ;;  %v13837_v47 = vld [vmem:[#allocation5 + $0x124] ss:$24 sps:$4 sm:$0xff]  }
  0xd9   :  { %2109 = vmatpush1.bf16.msra.mxu1 %v13751_v49  ;;  %1987 = vmatprep.subr.bf16.mxu0 %v13756_v50  ;;  %v13832_v49 = vld [vmem:[%s17446_s2 + $0x130] ss:$24 sps:$4 sm:$0xff]  }
  0xda   :  { %2110 = vmatprep.subr.bf16.mxu1 %v13759_v51  ;;  %v13835_v50 = vld [vmem:[#allocation5 + $0x120] ss:$24 sps:$4 sm:$0xff]   ;;  %v13840_v51 = vld [vmem:[%s17446_s2 + $0x164] ss:$24 sps:$4 sm:$0xff]  }
  0xdc   :  { %1988 = vmatpush1.bf16.msra.mxu0 %v13754_v52  ;;  %v13843_v52 = vld [vmem:[#allocation5 + $0x154] ss:$24 sps:$4 sm:$0xff]  }
  0xdd   :  { %2111 = vmatpush1.bf16.msra.mxu1 %v13757_v53  ;;  %1989 = vmatprep.subr.bf16.mxu0 %v13762_v54  ;;  %v13838_v53 = vld [vmem:[%s17446_s2 + $0x160] ss:$24 sps:$4 sm:$0xff]  }
  0xde   :  { %2112 = vmatprep.subr.bf16.mxu1 %v13765_v55  ;;  %v13841_v54 = vld [vmem:[#allocation5 + $0x150] ss:$24 sps:$4 sm:$0xff]   ;;  %v13846_v55 = vld [vmem:[%s17446_s2 + $0x194] ss:$24 sps:$4 sm:$0xff]  }
  0xe0   :  { %1990 = vmatpush1.bf16.msra.mxu0 %v13760_v56  ;;  %v13849_v56 = vld [vmem:[#allocation5 + $0x184] ss:$24 sps:$4 sm:$0xff]  }
  0xe1   :  { %2113 = vmatpush1.bf16.msra.mxu1 %v13763_v57  ;;  %1991 = vmatprep.subr.bf16.mxu0 %v13768_v58  ;;  %v13844_v57 = vld [vmem:[%s17446_s2 + $0x190] ss:$24 sps:$4 sm:$0xff]  }
  0xe2   :  { %2114 = vmatprep.subr.bf16.mxu1 %v13771_v59  ;;  %v13847_v58 = vld [vmem:[#allocation5 + $0x180] ss:$24 sps:$4 sm:$0xff]   ;;  %v13852_v59 = vld [vmem:[%s17446_s2 + $0x1c4] ss:$24 sps:$4 sm:$0xff]  }
  0xe4   :  { %1992 = vmatpush1.bf16.msra.mxu0 %v13766_v60  ;;  %v13855_v60 = vld [vmem:[#allocation5 + $0x1b4] ss:$24 sps:$4 sm:$0xff]  }
  0xe5   :  { %2115 = vmatpush1.bf16.msra.mxu1 %v13769_v61  ;;  %1993 = vmatprep.subr.bf16.mxu0 %v13774_v62  ;;  %v13850_v61 = vld [vmem:[%s17446_s2 + $0x1c0] ss:$24 sps:$4 sm:$0xff]  }
  0xe6   :  { %2116 = vmatprep.subr.bf16.mxu1 %v13777_v63  ;;  %v13853_v62 = vld [vmem:[#allocation5 + $0x1b0] ss:$24 sps:$4 sm:$0xff]   ;;  %v13858_v63 = vld [vmem:[%s17446_s2 + $0x1f4] ss:$24 sps:$4 sm:$0xff]  }
  0xe8   :  { %1994 = vmatpush1.bf16.msra.mxu0 %v13772_v0  ;;  %v13861_v0 = vld [vmem:[#allocation5 + $0x1e4] ss:$24 sps:$4 sm:$0xff]  }
  0xe9   :  { %2117 = vmatpush1.bf16.msra.mxu1 %v13775_v1  ;;  %1995 = vmatprep.subr.bf16.mxu0 %v13780_v2  ;;  %v13856_v1 = vld [vmem:[%s17446_s2 + $0x1f0] ss:$24 sps:$4 sm:$0xff]  }
  0xea   :  { %2118 = vmatprep.subr.bf16.mxu1 %v13783_v3  ;;  %v13859_v2 = vld [vmem:[#allocation5 + $0x1e0] ss:$24 sps:$4 sm:$0xff]   ;;  %v13864_v3 = vld [vmem:[%s17446_s2 + $0x224] ss:$24 sps:$4 sm:$0xff]  }
  0xec   :  { %1996 = vmatpush1.bf16.msra.mxu0 %v13778_v4  ;;  %v13867_v4 = vld [vmem:[#allocation5 + $0x214] ss:$24 sps:$4 sm:$0xff]  }
  0xed   :  { %2119 = vmatpush1.bf16.msra.mxu1 %v13781_v6  ;;  %1997 = vmatprep.subr.bf16.mxu0 %v13786_v7  ;;  %v13862_v6 = vld [vmem:[%s17446_s2 + $0x220] ss:$24 sps:$4 sm:$0xff]  }
  0xee   :  { %2120 = vmatprep.subr.bf16.mxu1 %v13789_v8  ;;  %v13865_v7 = vld [vmem:[#allocation5 + $0x210] ss:$24 sps:$4 sm:$0xff]   ;;  %v13870_v8 = vld [vmem:[%s17446_s2 + $0x254] ss:$24 sps:$4 sm:$0xff]  }
  0xf0   :  { %1998 = vmatpush1.bf16.msra.mxu0 %v13784_v9  ;;  %v13873_v9 = vld [vmem:[#allocation5 + $0x244] ss:$24 sps:$4 sm:$0xff]  }
  0xf1   :  { %2121 = vmatpush1.bf16.msra.mxu1 %v13787_v10  ;;  %1999 = vmatprep.subr.bf16.mxu0 %v13792_v11  ;;  %v13868_v10 = vld [vmem:[%s17446_s2 + $0x250] ss:$24 sps:$4 sm:$0xff]  }
  0xf2   :  { %2122 = vmatprep.subr.bf16.mxu1 %v13795_v13  ;;  %v13871_v11 = vld [vmem:[#allocation5 + $0x240] ss:$24 sps:$4 sm:$0xff]   ;;  %v13876_v13 = vld [vmem:[%s17446_s2 + $0x284] ss:$24 sps:$4 sm:$0xff]  }
  0xf4   :  { %2000 = vmatpush1.bf16.msra.mxu0 %v13790_v14  ;;  %v13879_v14 = vld [vmem:[#allocation5 + $0x274] ss:$24 sps:$4 sm:$0xff]  }
  0xf5   :  { %2123 = vmatpush1.bf16.msra.mxu1 %v13793_v15  ;;  %2133 = vmatprep.subr.bf16.mxu0 %v13798_v18  ;;  %v13874_v15 = vld [vmem:[%s17446_s2 + $0x280] ss:$24 sps:$4 sm:$0xff]   ;;  %v13882_v18 = vld [vmem:[%s17446_s2 + $0x2b4] ss:$24 sps:$4 sm:$0xff]  }
  0xf6   :  { %4016 = vmatprep.subr.bf16.mxu1 %v13801_v19  ;;  %v13885_v19 = vld [vmem:[#allocation5 + $0x2a4] ss:$24 sps:$4 sm:$0xff]  }
  0xf7   :  { %2002 = vmatmul.mubr.bf16.vlgmr.msra.gmra.mrb[0].mxu0 %v15691_v21 }
  0xf8   :  { %2125 = vmatmul.mubr.bf16.vlgmr.msra.gmra.mrb[0].mxu1 %v15691_v21  ;;  %2134 = vmatpush1.bf16.msra.mxu0 %v13796_v23  ;;  %v13888_v23 = vld [vmem:[%s17446_s2 + $0x2e4] ss:$24 sps:$4 sm:$0xff]  }
  0xf9   :  { %4017 = vmatpush1.bf16.msra.mxu1 %v13799_v24  ;;  %2135 = vmatprep.subr.bf16.mxu0 %v13804_v25  ;;  %v13891_v24 = vld [vmem:[#allocation5 + $0x2d4] ss:$24 sps:$4 sm:$0xff]   ;;  %v13886_v25 = vld [vmem:[%s17446_s2 + $0x2e0] ss:$24 sps:$4 sm:$0xff]  }
  0xfa   :  { %4018 = vmatprep.subr.bf16.mxu1 %v13807_v26  ;;  %2165 = vmatprep.mubr.bf16.mxu0 %v15230_v48  ;;  %v13814_v48 = vld [vmem:[%s17446_s2 + $0xa0] ss:$24 sps:$4 sm:$0xff]  }
  0xfb   :  { %4048 = vmatprep.mubr.bf16.mxu1 %v15702_v27  ;;  %v13889_v26 = vld [vmem:[#allocation5 + $0x2d0] ss:$24 sps:$4 sm:$0xff]  }
  0xfc   :  { %2136 = vmatpush1.bf16.msra.mxu0 %v13802_v28  ;;  %v90_v28 = vld [vmem:[%s17445_s1] sm:$0xff] }
  0xfd   :  { %4019 = vmatpush1.bf16.msra.mxu1 %v13805_v29  ;;  %2137 = vmatprep.subr.bf16.mxu0 %v13810_v30  ;;  %v96_v29 = vld [vmem:[%s17445_s1 + $0x30] sm:$0xff] }
  0xfe   :  { %4020 = vmatprep.subr.bf16.mxu1 %v13813_v31  ;;  %v13894_v30 = vld [vmem:[%s17446_s2 + $0x314] ss:$24 sps:$4 sm:$0xff]  }
  0xff   :  { %v13897_v31 = vld [vmem:[#allocation5 + $0x304] ss:$24 sps:$4 sm:$0xff]  }
 0x100   :  { %2138 = vmatpush1.bf16.msra.mxu0 %v13808_v33  ;;  %v93_v33 = vld [vmem:[%s17445_s1 + $0x18] sm:$0xff] }
 0x101   :  { %4021 = vmatpush1.bf16.msra.mxu1 %v13811_v34  ;;  %2139 = vmatprep.subr.bf16.mxu0 %v13816_v35  ;;  %v15807_v34 = vpack.c.bf16 %v96_v29, %v90_v28  ;;  %v99_v35 = vld [vmem:[%s17445_s1 + $0x48] sm:$0xff]  ;;  %v13970_v28 = vld [vmem:[%s17446_s2 + $0x580] ss:$24 sps:$4 sm:$0xff]  }
 0x102   :  { %4022 = vmatprep.subr.bf16.mxu1 %v13819_v36  ;;  %v13892_v36 = vld [vmem:[%s17446_s2 + $0x310] ss:$24 sps:$4 sm:$0xff]   ;;  %v13973_v29 = vld [vmem:[#allocation5 + $0x570] ss:$24 sps:$4 sm:$0xff]  }
 0x104   :  { %2140 = vmatpush1.bf16.msra.mxu0 %v13814_v48  ;;  %v13895_v48 = vld [vmem:[#allocation5 + $0x300] ss:$24 sps:$4 sm:$0xff]  }
 0x105   :  { %4023 = vmatpush1.bf16.msra.mxu1 %v13817_v37  ;;  %2141 = vmatprep.subr.bf16.mxu0 %v13822_v38  ;;  %v13900_v37 = vld [vmem:[%s17446_s2 + $0x344] ss:$24 sps:$4 sm:$0xff]  }
 0x106   :  { %4024 = vmatprep.subr.bf16.mxu1 %v13825_v39  ;;  %v13903_v38 = vld [vmem:[#allocation5 + $0x334] ss:$24 sps:$4 sm:$0xff]   ;;  %v15818_v39 = vpack.c.bf16 %v99_v35, %v93_v33  ;;  %v13976_v33 = vld [vmem:[%s17446_s2 + $0x5b0] ss:$24 sps:$4 sm:$0xff]  }
 0x107   :  { %v13979_v35 = vld [vmem:[#allocation5 + $0x5a0] ss:$24 sps:$4 sm:$0xff]  }
 0x108   :  { %2142 = vmatpush1.bf16.msra.mxu0 %v13820_v40  ;;  %v13898_v40 = vld [vmem:[%s17446_s2 + $0x340] ss:$24 sps:$4 sm:$0xff]  }
 0x109   :  { %4025 = vmatpush1.bf16.msra.mxu1 %v13823_v41  ;;  %2143 = vmatprep.subr.bf16.mxu0 %v13828_v42  ;;  %v13901_v41 = vld [vmem:[#allocation5 + $0x330] ss:$24 sps:$4 sm:$0xff]   ;;  %v13906_v42 = vld [vmem:[%s17446_s2 + $0x374] ss:$24 sps:$4 sm:$0xff]  }
 0x10a   :  { %4026 = vmatprep.subr.bf16.mxu1 %v13831_v43  ;;  %v13909_v43 = vld [vmem:[#allocation5 + $0x364] ss:$24 sps:$4 sm:$0xff]  }
 0x10c   :  { %2144 = vmatpush1.bf16.msra.mxu0 %v13826_v44  ;;  %v13907_v44 = vld [vmem:[#allocation5 + $0x360] ss:$24 sps:$4 sm:$0xff]  }
 0x10d   :  { %4027 = vmatpush1.bf16.msra.mxu1 %v13829_v45  ;;  %2145 = vmatprep.subr.bf16.mxu0 %v13834_v46  ;;  %v13912_v45 = vld [vmem:[%s17446_s2 + $0x3a4] ss:$24 sps:$4 sm:$0xff]  }
 0x10e   :  { %4028 = vmatprep.subr.bf16.mxu1 %v13837_v47  ;;  %v13915_v46 = vld [vmem:[#allocation5 + $0x394] ss:$24 sps:$4 sm:$0xff]   ;;  %v13913_v47 = vld [vmem:[#allocation5 + $0x390] ss:$24 sps:$4 sm:$0xff]  }
 0x110   :  { %2146 = vmatpush1.bf16.msra.mxu0 %v13832_v49  ;;  %v13918_v49 = vld [vmem:[%s17446_s2 + $0x3d4] ss:$24 sps:$4 sm:$0xff]  }
 0x111   :  { %4029 = vmatpush1.bf16.msra.mxu1 %v13835_v50  ;;  %2147 = vmatprep.subr.bf16.mxu0 %v13840_v51  ;;  %v13921_v50 = vld [vmem:[#allocation5 + $0x3c4] ss:$24 sps:$4 sm:$0xff]   ;;  %v13916_v51 = vld [vmem:[%s17446_s2 + $0x3d0] ss:$24 sps:$4 sm:$0xff]  }
 0x112   :  { %4030 = vmatprep.subr.bf16.mxu1 %v13843_v52  ;;  %v13919_v52 = vld [vmem:[#allocation5 + $0x3c0] ss:$24 sps:$4 sm:$0xff]  }
 0x114   :  { %2148 = vmatpush1.bf16.msra.mxu0 %v13838_v53  ;;  %v13924_v53 = vld [vmem:[%s17446_s2 + $0x404] ss:$24 sps:$4 sm:$0xff]  }
 0x115   :  { %4031 = vmatpush1.bf16.msra.mxu1 %v13841_v54  ;;  %2149 = vmatprep.subr.bf16.mxu0 %v13846_v55  ;;  %v13927_v54 = vld [vmem:[#allocation5 + $0x3f4] ss:$24 sps:$4 sm:$0xff]   ;;  %v13922_v55 = vld [vmem:[%s17446_s2 + $0x400] ss:$24 sps:$4 sm:$0xff]  }
 0x116   :  { %4032 = vmatprep.subr.bf16.mxu1 %v13849_v56  ;;  %v13925_v56 = vld [vmem:[#allocation5 + $0x3f0] ss:$24 sps:$4 sm:$0xff]  }
 0x118   :  { %2150 = vmatpush1.bf16.msra.mxu0 %v13844_v57  ;;  %v13930_v57 = vld [vmem:[%s17446_s2 + $0x434] ss:$24 sps:$4 sm:$0xff]  }
 0x119   :  { %4033 = vmatpush1.bf16.msra.mxu1 %v13847_v58  ;;  %2151 = vmatprep.subr.bf16.mxu0 %v13852_v59  ;;  %v13933_v58 = vld [vmem:[#allocation5 + $0x424] ss:$24 sps:$4 sm:$0xff]   ;;  %v13928_v59 = vld [vmem:[%s17446_s2 + $0x430] ss:$24 sps:$4 sm:$0xff]  }
 0x11a   :  { %4034 = vmatprep.subr.bf16.mxu1 %v13855_v60  ;;  %v13931_v60 = vld [vmem:[#allocation5 + $0x420] ss:$24 sps:$4 sm:$0xff]  }
 0x11c   :  { %2152 = vmatpush1.bf16.msra.mxu0 %v13850_v61  ;;  %v13936_v61 = vld [vmem:[%s17446_s2 + $0x464] ss:$24 sps:$4 sm:$0xff]  }
 0x11d   :  { %4035 = vmatpush1.bf16.msra.mxu1 %v13853_v62  ;;  %2153 = vmatprep.subr.bf16.mxu0 %v13858_v63  ;;  %v13939_v62 = vld [vmem:[#allocation5 + $0x454] ss:$24 sps:$4 sm:$0xff]   ;;  %v13934_v63 = vld [vmem:[%s17446_s2 + $0x460] ss:$24 sps:$4 sm:$0xff]  }
 0x11e   :  { %4036 = vmatprep.subr.bf16.mxu1 %v13861_v0  ;;  %v13937_v0 = vld [vmem:[#allocation5 + $0x450] ss:$24 sps:$4 sm:$0xff]  }
 0x120   :  { %2154 = vmatpush1.bf16.msra.mxu0 %v13856_v1  ;;  %v13942_v1 = vld [vmem:[%s17446_s2 + $0x494] ss:$24 sps:$4 sm:$0xff]  }
 0x121   :  { %4037 = vmatpush1.bf16.msra.mxu1 %v13859_v2  ;;  %2155 = vmatprep.subr.bf16.mxu0 %v13864_v3  ;;  %v13945_v2 = vld [vmem:[#allocation5 + $0x484] ss:$24 sps:$4 sm:$0xff]   ;;  %v13940_v3 = vld [vmem:[%s17446_s2 + $0x490] ss:$24 sps:$4 sm:$0xff]  }
 0x122   :  { %4038 = vmatprep.subr.bf16.mxu1 %v13867_v4  ;;  %v13943_v4 = vld [vmem:[#allocation5 + $0x480] ss:$24 sps:$4 sm:$0xff]  }
 0x124   :  { %2156 = vmatpush1.bf16.msra.mxu0 %v13862_v6  ;;  %v13948_v6 = vld [vmem:[%s17446_s2 + $0x4c4] ss:$24 sps:$4 sm:$0xff]  }
 0x125   :  { %4039 = vmatpush1.bf16.msra.mxu1 %v13865_v7  ;;  %2157 = vmatprep.subr.bf16.mxu0 %v13870_v8  ;;  %v13951_v7 = vld [vmem:[#allocation5 + $0x4b4] ss:$24 sps:$4 sm:$0xff]   ;;  %v13946_v8 = vld [vmem:[%s17446_s2 + $0x4c0] ss:$24 sps:$4 sm:$0xff]  }
 0x126   :  { %4040 = vmatprep.subr.bf16.mxu1 %v13873_v9  ;;  %v13949_v9 = vld [vmem:[#allocation5 + $0x4b0] ss:$24 sps:$4 sm:$0xff]  }
 0x128   :  { %2158 = vmatpush1.bf16.msra.mxu0 %v13868_v10  ;;  %v13954_v10 = vld [vmem:[%s17446_s2 + $0x4f4] ss:$24 sps:$4 sm:$0xff]  }
 0x129   :  { %4041 = vmatpush1.bf16.msra.mxu1 %v13871_v11  ;;  %2159 = vmatprep.subr.bf16.mxu0 %v13876_v13  ;;  %v13957_v11 = vld [vmem:[#allocation5 + $0x4e4] ss:$24 sps:$4 sm:$0xff]   ;;  %v13952_v13 = vld [vmem:[%s17446_s2 + $0x4f0] ss:$24 sps:$4 sm:$0xff]  }
 0x12a   :  { %4042 = vmatprep.subr.bf16.mxu1 %v13879_v14  ;;  %v13955_v14 = vld [vmem:[#allocation5 + $0x4e0] ss:$24 sps:$4 sm:$0xff]  }
 0x12c   :  { %2160 = vmatpush1.bf16.msra.mxu0 %v13874_v15  ;;  %v13960_v15 = vld [vmem:[%s17446_s2 + $0x524] ss:$24 sps:$4 sm:$0xff]  }
 0x12d   :  { %4043 = vmatpush1.bf16.msra.mxu1 %v13877_v16  ;;  %2161 = vmatprep.subr.bf16.mxu0 %v13882_v18  ;;  %v13963_v16 = vld [vmem:[#allocation5 + $0x514] ss:$24 sps:$4 sm:$0xff]   ;;  %v13958_v18 = vld [vmem:[%s17446_s2 + $0x520] ss:$24 sps:$4 sm:$0xff]  }
 0x12e   :  { %4044 = vmatprep.subr.bf16.mxu1 %v13885_v19  ;;  %v13961_v19 = vld [vmem:[#allocation5 + $0x510] ss:$24 sps:$4 sm:$0xff]  }
 0x130   :  { %2162 = vmatpush1.bf16.msra.mxu0 %v13880_v20  ;;  %v13966_v20 = vld [vmem:[%s17446_s2 + $0x554] ss:$24 sps:$4 sm:$0xff]  }
 0x131   :  { %4045 = vmatpush1.bf16.msra.mxu1 %v13883_v22  ;;  %2163 = vmatprep.subr.bf16.mxu0 %v13888_v23  ;;  %v13969_v22 = vld [vmem:[#allocation5 + $0x544] ss:$24 sps:$4 sm:$0xff]   ;;  %v13964_v23 = vld [vmem:[%s17446_s2 + $0x550] ss:$24 sps:$4 sm:$0xff]  }
 0x132   :  { %4046 = vmatprep.subr.bf16.mxu1 %v13891_v24  ;;  %v13967_v24 = vld [vmem:[#allocation5 + $0x540] ss:$24 sps:$4 sm:$0xff]  }
 0x134   :  { %2164 = vmatpush1.bf16.msra.mxu0 %v13886_v25  ;;  %v13972_v25 = vld [vmem:[%s17446_s2 + $0x584] ss:$24 sps:$4 sm:$0xff]  }
 0x135   :  { %4047 = vmatpush1.bf16.msra.mxu1 %v13889_v26  ;;  %2174 = vmatprep.subr.bf16.mxu0 %v13894_v30  ;;  %v13975_v26 = vld [vmem:[#allocation5 + $0x574] ss:$24 sps:$4 sm:$0xff]   ;;  %v13978_v30 = vld [vmem:[%s17446_s2 + $0x5b4] ss:$24 sps:$4 sm:$0xff]  }
 0x136   :  { %4059 = vmatprep.subr.bf16.mxu1 %v13897_v31  ;;  %v13981_v31 = vld [vmem:[#allocation5 + $0x5a4] ss:$24 sps:$4 sm:$0xff]  }
 0x137   :  { %2166 = vmatmul.mubr.bf16.vlgmr.msra.gmra.mrb[4].mxu0 %v15291_v5  ;;  %v13904_v5 = vld [vmem:[%s17446_s2 + $0x370] ss:$24 sps:$4 sm:$0xff]  }
 0x138   :  { %4049 = vmatmul.mubr.bf16.vlgmr.msra.gmra.mrb[4].mxu1 %v15807_v34  ;;  %2175 = vmatpush1.bf16.msra.mxu0 %v13892_v36  ;;  %v13984_v36 = vld [vmem:[%s17446_s2 + $0x5e4] ss:$24 sps:$4 sm:$0xff]  }
 0x139   :  { %4060 = vmatpush1.bf16.msra.mxu1 %v13895_v48  ;;  %2176 = vmatprep.subr.bf16.mxu0 %v13900_v37  ;;  %v13987_v48 = vld [vmem:[#allocation5 + $0x5d4] ss:$24 sps:$4 sm:$0xff]   ;;  %v13982_v37 = vld [vmem:[%s17446_s2 + $0x5e0] ss:$24 sps:$4 sm:$0xff]  }
 0x13a   :  { %4061 = vmatprep.subr.bf16.mxu1 %v13903_v38  ;;  %2206 = vmatprep.mubr.bf16.mxu0 %v15370_v32  ;;  %v13910_v32 = vld [vmem:[%s17446_s2 + $0x3a0] ss:$24 sps:$4 sm:$0xff]  }
 0x13b   :  { %4091 = vmatprep.mubr.bf16.mxu1 %v15818_v39  ;;  %v13985_v38 = vld [vmem:[#allocation5 + $0x5d0] ss:$24 sps:$4 sm:$0xff]  }
 0x13c   :  { %2177 = vmatpush1.bf16.msra.mxu0 %v13898_v40  ;;  %v13990_v40 = vld [vmem:[%s17446_s2 + $0x614] ss:$24 sps:$4 sm:$0xff]  }
 0x13d   :  { %4062 = vmatpush1.bf16.msra.mxu1 %v13901_v41  ;;  %2178 = vmatprep.subr.bf16.mxu0 %v13906_v42  ;;  %v13993_v41 = vld [vmem:[#allocation5 + $0x604] ss:$24 sps:$4 sm:$0xff]  }
 0x13e   :  { %4063 = vmatprep.subr.bf16.mxu1 %v13909_v43  ;;  %v92_v42 = vld [vmem:[%s17445_s1 + $0x10] sm:$0xff]  ;;  %v98_v43 = vld [vmem:[%s17445_s1 + $0x40] sm:$0xff] }
 0x140   :  { %2179 = vmatpush1.bf16.msra.mxu0 %v13904_v5  ;;  %v95_v5 = vld [vmem:[%s17445_s1 + $0x28] sm:$0xff] }
 0x141   :  { %4064 = vmatpush1.bf16.msra.mxu1 %v13907_v44  ;;  %2180 = vmatprep.subr.bf16.mxu0 %v13912_v45  ;;  %v101_v44 = vld [vmem:[%s17445_s1 + $0x58] sm:$0xff]  ;;  %v15926_v45 = vpack.c.bf16 %v98_v43, %v92_v42  ;;  %v14074_v42 = vld [vmem:[%s17446_s2 + $0x8b4] ss:$24 sps:$4 sm:$0xff]  }
 0x142   :  { %4065 = vmatprep.subr.bf16.mxu1 %v13915_v46  ;;  %v13988_v46 = vld [vmem:[%s17446_s2 + $0x610] ss:$24 sps:$4 sm:$0xff]   ;;  %v14077_v43 = vld [vmem:[#allocation5 + $0x8a4] ss:$24 sps:$4 sm:$0xff]  }
 0x144   :  { %2181 = vmatpush1.bf16.msra.mxu0 %v13910_v32  ;;  %v13991_v32 = vld [vmem:[#allocation5 + $0x600] ss:$24 sps:$4 sm:$0xff]  }
 0x145   :  { %4066 = vmatpush1.bf16.msra.mxu1 %v13913_v47  ;;  %2182 = vmatprep.subr.bf16.mxu0 %v13918_v49  ;;  %v13996_v47 = vld [vmem:[%s17446_s2 + $0x644] ss:$24 sps:$4 sm:$0xff]  }
 0x146   :  { %4067 = vmatprep.subr.bf16.mxu1 %v13921_v50  ;;  %v13999_v49 = vld [vmem:[#allocation5 + $0x634] ss:$24 sps:$4 sm:$0xff]   ;;  %v15934_v50 = vpack.c.bf16 %v101_v44, %v95_v5  ;;  %v14072_v5 = vld [vmem:[%s17446_s2 + $0x8b0] ss:$24 sps:$4 sm:$0xff]  }
 0x147   :  { %v14075_v44 = vld [vmem:[#allocation5 + $0x8a0] ss:$24 sps:$4 sm:$0xff]  }
 0x148   :  { %2183 = vmatpush1.bf16.msra.mxu0 %v13916_v51  ;;  %v13994_v51 = vld [vmem:[%s17446_s2 + $0x640] ss:$24 sps:$4 sm:$0xff]  }
 0x149   :  { %4068 = vmatpush1.bf16.msra.mxu1 %v13919_v52  ;;  %2184 = vmatprep.subr.bf16.mxu0 %v13924_v53  ;;  %v13997_v52 = vld [vmem:[#allocation5 + $0x630] ss:$24 sps:$4 sm:$0xff]   ;;  %v14002_v53 = vld [vmem:[%s17446_s2 + $0x674] ss:$24 sps:$4 sm:$0xff]  }
 0x14a   :  { %4069 = vmatprep.subr.bf16.mxu1 %v13927_v54  ;;  %v14005_v54 = vld [vmem:[#allocation5 + $0x664] ss:$24 sps:$4 sm:$0xff]  }
 0x14c   :  { %2185 = vmatpush1.bf16.msra.mxu0 %v13922_v55  ;;  %v14003_v55 = vld [vmem:[#allocation5 + $0x660] ss:$24 sps:$4 sm:$0xff]  }
 0x14d   :  { %4070 = vmatpush1.bf16.msra.mxu1 %v13925_v56  ;;  %2186 = vmatprep.subr.bf16.mxu0 %v13930_v57  ;;  %v14008_v56 = vld [vmem:[%s17446_s2 + $0x6a4] ss:$24 sps:$4 sm:$0xff]  }
 0x14e   :  { %4071 = vmatprep.subr.bf16.mxu1 %v13933_v58  ;;  %v14011_v57 = vld [vmem:[#allocation5 + $0x694] ss:$24 sps:$4 sm:$0xff]   ;;  %v14009_v58 = vld [vmem:[#allocation5 + $0x690] ss:$24 sps:$4 sm:$0xff]  }
 0x150   :  { %2187 = vmatpush1.bf16.msra.mxu0 %v13928_v59  ;;  %v14014_v59 = vld [vmem:[%s17446_s2 + $0x6d4] ss:$24 sps:$4 sm:$0xff]  }
 0x151   :  { %4072 = vmatpush1.bf16.msra.mxu1 %v13931_v60  ;;  %2188 = vmatprep.subr.bf16.mxu0 %v13936_v61  ;;  %v14017_v60 = vld [vmem:[#allocation5 + $0x6c4] ss:$24 sps:$4 sm:$0xff]   ;;  %v14012_v61 = vld [vmem:[%s17446_s2 + $0x6d0] ss:$24 sps:$4 sm:$0xff]  }
 0x152   :  { %4073 = vmatprep.subr.bf16.mxu1 %v13939_v62  ;;  %v14015_v62 = vld [vmem:[#allocation5 + $0x6c0] ss:$24 sps:$4 sm:$0xff]  }
 0x154   :  { %2189 = vmatpush1.bf16.msra.mxu0 %v13934_v63  ;;  %v14020_v63 = vld [vmem:[%s17446_s2 + $0x704] ss:$24 sps:$4 sm:$0xff]  }
 0x155   :  { %4074 = vmatpush1.bf16.msra.mxu1 %v13937_v0  ;;  %2190 = vmatprep.subr.bf16.mxu0 %v13942_v1  ;;  %v14023_v0 = vld [vmem:[#allocation5 + $0x6f4] ss:$24 sps:$4 sm:$0xff]   ;;  %v14018_v1 = vld [vmem:[%s17446_s2 + $0x700] ss:$24 sps:$4 sm:$0xff]  }
 0x156   :  { %4075 = vmatprep.subr.bf16.mxu1 %v13945_v2  ;;  %v14021_v2 = vld [vmem:[#allocation5 + $0x6f0] ss:$24 sps:$4 sm:$0xff]  }
 0x158   :  { %2191 = vmatpush1.bf16.msra.mxu0 %v13940_v3  ;;  %v14026_v3 = vld [vmem:[%s17446_s2 + $0x734] ss:$24 sps:$4 sm:$0xff]  }
 0x159   :  { %4076 = vmatpush1.bf16.msra.mxu1 %v13943_v4  ;;  %2192 = vmatprep.subr.bf16.mxu0 %v13948_v6  ;;  %v14029_v4 = vld [vmem:[#allocation5 + $0x724] ss:$24 sps:$4 sm:$0xff]   ;;  %v14024_v6 = vld [vmem:[%s17446_s2 + $0x730] ss:$24 sps:$4 sm:$0xff]  }
 0x15a   :  { %4077 = vmatprep.subr.bf16.mxu1 %v13951_v7  ;;  %v14027_v7 = vld [vmem:[#allocation5 + $0x720] ss:$24 sps:$4 sm:$0xff]  }
 0x15c   :  { %2193 = vmatpush1.bf16.msra.mxu0 %v13946_v8  ;;  %v14032_v8 = vld [vmem:[%s17446_s2 + $0x764] ss:$24 sps:$4 sm:$0xff]  }
 0x15d   :  { %4078 = vmatpush1.bf16.msra.mxu1 %v13949_v9  ;;  %2194 = vmatprep.subr.bf16.mxu0 %v13954_v10  ;;  %v14035_v9 = vld [vmem:[#allocation5 + $0x754] ss:$24 sps:$4 sm:$0xff]   ;;  %v14030_v10 = vld [vmem:[%s17446_s2 + $0x760] ss:$24 sps:$4 sm:$0xff]  }
 0x15e   :  { %4079 = vmatprep.subr.bf16.mxu1 %v13957_v11  ;;  %v14033_v11 = vld [vmem:[#allocation5 + $0x750] ss:$24 sps:$4 sm:$0xff]  }
 0x160   :  { %2195 = vmatpush1.bf16.msra.mxu0 %v13952_v13  ;;  %v14038_v13 = vld [vmem:[%s17446_s2 + $0x794] ss:$24 sps:$4 sm:$0xff]  }
 0x161   :  { %4080 = vmatpush1.bf16.msra.mxu1 %v13955_v14  ;;  %2196 = vmatprep.subr.bf16.mxu0 %v13960_v15  ;;  %v14041_v14 = vld [vmem:[#allocation5 + $0x784] ss:$24 sps:$4 sm:$0xff]   ;;  %v14036_v15 = vld [vmem:[%s17446_s2 + $0x790] ss:$24 sps:$4 sm:$0xff]  }
 0x162   :  { %4081 = vmatprep.subr.bf16.mxu1 %v13963_v16  ;;  %v14039_v16 = vld [vmem:[#allocation5 + $0x780] ss:$24 sps:$4 sm:$0xff]  }
 0x164   :  { %2197 = vmatpush1.bf16.msra.mxu0 %v13958_v18  ;;  %v14044_v18 = vld [vmem:[%s17446_s2 + $0x7c4] ss:$24 sps:$4 sm:$0xff]  }
 0x165   :  { %4082 = vmatpush1.bf16.msra.mxu1 %v13961_v19  ;;  %2198 = vmatprep.subr.bf16.mxu0 %v13966_v20  ;;  %v14047_v19 = vld [vmem:[#allocation5 + $0x7b4] ss:$24 sps:$4 sm:$0xff]   ;;  %v14042_v20 = vld [vmem:[%s17446_s2 + $0x7c0] ss:$24 sps:$4 sm:$0xff]  }
 0x166   :  { %4083 = vmatprep.subr.bf16.mxu1 %v13969_v22  ;;  %v14045_v22 = vld [vmem:[#allocation5 + $0x7b0] ss:$24 sps:$4 sm:$0xff]  }
 0x168   :  { %2199 = vmatpush1.bf16.msra.mxu0 %v13964_v23  ;;  %v14050_v23 = vld [vmem:[%s17446_s2 + $0x7f4] ss:$24 sps:$4 sm:$0xff]  }
 0x169   :  { %4084 = vmatpush1.bf16.msra.mxu1 %v13967_v24  ;;  %2200 = vmatprep.subr.bf16.mxu0 %v13972_v25  ;;  %v14053_v24 = vld [vmem:[#allocation5 + $0x7e4] ss:$24 sps:$4 sm:$0xff]   ;;  %v14048_v25 = vld [vmem:[%s17446_s2 + $0x7f0] ss:$24 sps:$4 sm:$0xff]  }
 0x16a   :  { %4085 = vmatprep.subr.bf16.mxu1 %v13975_v26  ;;  %v14051_v26 = vld [vmem:[#allocation5 + $0x7e0] ss:$24 sps:$4 sm:$0xff]  }
 0x16c   :  { %2201 = vmatpush1.bf16.msra.mxu0 %v13970_v28  ;;  %v14056_v28 = vld [vmem:[%s17446_s2 + $0x824] ss:$24 sps:$4 sm:$0xff]  }
 0x16d   :  { %4086 = vmatpush1.bf16.msra.mxu1 %v13973_v29  ;;  %2202 = vmatprep.subr.bf16.mxu0 %v13978_v30  ;;  %v14059_v29 = vld [vmem:[#allocation5 + $0x814] ss:$24 sps:$4 sm:$0xff]   ;;  %v14054_v30 = vld [vmem:[%s17446_s2 + $0x820] ss:$24 sps:$4 sm:$0xff]  }
 0x16e   :  { %4087 = vmatprep.subr.bf16.mxu1 %v13981_v31  ;;  %v14057_v31 = vld [vmem:[#allocation5 + $0x810] ss:$24 sps:$4 sm:$0xff]  }
 0x170   :  { %2203 = vmatpush1.bf16.msra.mxu0 %v13976_v33  ;;  %v14062_v33 = vld [vmem:[%s17446_s2 + $0x854] ss:$24 sps:$4 sm:$0xff]  }
 0x171   :  { %4088 = vmatpush1.bf16.msra.mxu1 %v13979_v35  ;;  %2204 = vmatprep.subr.bf16.mxu0 %v13984_v36  ;;  %v14065_v35 = vld [vmem:[#allocation5 + $0x844] ss:$24 sps:$4 sm:$0xff]   ;;  %v14060_v36 = vld [vmem:[%s17446_s2 + $0x850] ss:$24 sps:$4 sm:$0xff]  }
 0x172   :  { %4089 = vmatprep.subr.bf16.mxu1 %v13987_v48  ;;  %v14063_v48 = vld [vmem:[#allocation5 + $0x840] ss:$24 sps:$4 sm:$0xff]  }
 0x174   :  { %2205 = vmatpush1.bf16.msra.mxu0 %v13982_v37  ;;  %v14068_v37 = vld [vmem:[%s17446_s2 + $0x884] ss:$24 sps:$4 sm:$0xff]  }
 0x175   :  { %4090 = vmatpush1.bf16.msra.mxu1 %v13985_v38  ;;  %2215 = vmatprep.subr.bf16.mxu0 %v13990_v40  ;;  %v14071_v38 = vld [vmem:[#allocation5 + $0x874] ss:$24 sps:$4 sm:$0xff]   ;;  %v14066_v40 = vld [vmem:[%s17446_s2 + $0x880] ss:$24 sps:$4 sm:$0xff]  }
 0x176   :  { %4102 = vmatprep.subr.bf16.mxu1 %v13993_v41  ;;  %v14069_v41 = vld [vmem:[#allocation5 + $0x870] ss:$24 sps:$4 sm:$0xff]  }
 0x177   :  { %2207 = vmatmul.mubr.bf16.vlgmr.msra.gmra.mrb[4].mxu0 %v15494_v12  ;;  %v14000_v12 = vld [vmem:[%s17446_s2 + $0x670] ss:$24 sps:$4 sm:$0xff]  }
 0x178   :  { %4092 = vmatmul.mubr.bf16.vlgmr.msra.gmra.mrb[4].mxu1 %v15926_v45  ;;  %2216 = vmatpush1.bf16.msra.mxu0 %v13988_v46  ;;  %v14080_v46 = vld [vmem:[%s17446_s2 + $0x8e4] ss:$24 sps:$4 sm:$0xff]  }
 0x179   :  { %4103 = vmatpush1.bf16.msra.mxu1 %v13991_v32  ;;  %2217 = vmatprep.subr.bf16.mxu0 %v13996_v47  ;;  %v14083_v32 = vld [vmem:[#allocation5 + $0x8d4] ss:$24 sps:$4 sm:$0xff]   ;;  %v14078_v47 = vld [vmem:[%s17446_s2 + $0x8e0] ss:$24 sps:$4 sm:$0xff]  }
 0x17a   :  { %4104 = vmatprep.subr.bf16.mxu1 %v13999_v49  ;;  %2247 = vmatprep.mubr.bf16.mxu0 %v15505_v17  ;;  %v14006_v17 = vld [vmem:[%s17446_s2 + $0x6a0] ss:$24 sps:$4 sm:$0xff]   ;;  %s14985_s2 = smov 112  }
 0x17b   :  { %4134 = vmatprep.mubr.bf16.mxu1 %v15934_v50  ;;  %v14081_v49 = vld [vmem:[#allocation5 + $0x8d0] ss:$24 sps:$4 sm:$0xff]  }
 0x17c   :  { %2218 = vmatpush1.bf16.msra.mxu0 %v13994_v51  ;;  %v94_v51 = vld [vmem:[%s17445_s1 + $0x20] sm:$0xff] }
 0x17d   :  { %4105 = vmatpush1.bf16.msra.mxu1 %v13997_v52  ;;  %2219 = vmatprep.subr.bf16.mxu0 %v14002_v53  ;;  %v100_v52 = vld [vmem:[%s17445_s1 + $0x50] sm:$0xff] }
 0x17e   :  { %4106 = vmatprep.subr.bf16.mxu1 %v14005_v54  ;;  %v14086_v53 = vld [vmem:[#allocation5 + $0xc] ss:$24 sps:$4 sm:$0xff]  }
 0x17f   :  { %v14089_v54 = vld [vmem:[#allocation5 + $0x14] ss:$24 sps:$4 sm:$0xff]  }
 0x180   :  { %2220 = vmatpush1.bf16.msra.mxu0 %v14000_v12  ;;  %v16033_v12 = vpack.c.bf16 %v100_v52, %v94_v51  ;;  %v14161_v51 = vld [vmem:[#allocation5 + $0x254] ss:$24 sps:$4 sm:$0xff]   ;;  %v14156_v52 = vld [vmem:[#allocation5 + $0x248] ss:$24 sps:$4 sm:$0xff]  }
 0x181   :  { %4107 = vmatpush1.bf16.msra.mxu1 %v14003_v55  ;;  %2221 = vmatprep.subr.bf16.mxu0 %v14008_v56  ;;  %v14084_v55 = vld [vmem:[#allocation5 + $0x8] ss:$24 sps:$4 sm:$0xff]  }
 0x182   :  { %4108 = vmatprep.subr.bf16.mxu1 %v14011_v57  ;;  %v14087_v56 = vld [vmem:[#allocation5 + $0x10] ss:$24 sps:$4 sm:$0xff]   ;;  %v14092_v57 = vld [vmem:[#allocation5 + $0x3c] ss:$24 sps:$4 sm:$0xff]  }
 0x184   :  { %2222 = vmatpush1.bf16.msra.mxu0 %v14006_v17  ;;  %v14095_v17 = vld [vmem:[#allocation5 + $0x44] ss:$24 sps:$4 sm:$0xff]  }
 0x185   :  { %4109 = vmatpush1.bf16.msra.mxu1 %v14009_v58  ;;  %2223 = vmatprep.subr.bf16.mxu0 %v14014_v59  ;;  %v14090_v58 = vld [vmem:[#allocation5 + $0x38] ss:$24 sps:$4 sm:$0xff]  }
 0x186   :  { %4110 = vmatprep.subr.bf16.mxu1 %v14017_v60  ;;  %v14093_v59 = vld [vmem:[#allocation5 + $0x40] ss:$24 sps:$4 sm:$0xff]   ;;  %v14098_v60 = vld [vmem:[#allocation5 + $0x6c] ss:$24 sps:$4 sm:$0xff]  }
 0x188   :  { %2224 = vmatpush1.bf16.msra.mxu0 %v14012_v61  ;;  %v14101_v61 = vld [vmem:[#allocation5 + $0x74] ss:$24 sps:$4 sm:$0xff]  }
 0x189   :  { %4111 = vmatpush1.bf16.msra.mxu1 %v14015_v62  ;;  %2225 = vmatprep.subr.bf16.mxu0 %v14020_v63  ;;  %v14096_v62 = vld [vmem:[#allocation5 + $0x68] ss:$24 sps:$4 sm:$0xff]  }
 0x18a   :  { %4112 = vmatprep.subr.bf16.mxu1 %v14023_v0  ;;  %v14099_v63 = vld [vmem:[#allocation5 + $0x70] ss:$24 sps:$4 sm:$0xff]   ;;  %v14107_v0 = vld [vmem:[#allocation5 + $0xa4] ss:$24 sps:$4 sm:$0xff]  }
 0x18c   :  { %2226 = vmatpush1.bf16.msra.mxu0 %v14018_v1  ;;  %v14102_v1 = vld [vmem:[#allocation5 + $0x98] ss:$24 sps:$4 sm:$0xff]  }
 0x18d   :  { %4113 = vmatpush1.bf16.msra.mxu1 %v14021_v2  ;;  %2227 = vmatprep.subr.bf16.mxu0 %v14026_v3  ;;  %v14105_v2 = vld [vmem:[#allocation5 + $0xa0] ss:$24 sps:$4 sm:$0xff]   ;;  %v14110_v3 = vld [vmem:[#allocation5 + $0xcc] ss:$24 sps:$4 sm:$0xff]  }
 0x18e   :  { %4114 = vmatprep.subr.bf16.mxu1 %v14029_v4  ;;  %v14113_v4 = vld [vmem:[#allocation5 + $0xd4] ss:$24 sps:$4 sm:$0xff]  }
 0x190   :  { %2228 = vmatpush1.bf16.msra.mxu0 %v14024_v6  ;;  %v14108_v6 = vld [vmem:[#allocation5 + $0xc8] ss:$24 sps:$4 sm:$0xff]  }
 0x191   :  { %4115 = vmatpush1.bf16.msra.mxu1 %v14027_v7  ;;  %2229 = vmatprep.subr.bf16.mxu0 %v14032_v8  ;;  %v14116_v7 = vld [vmem:[#allocation5 + $0xfc] ss:$24 sps:$4 sm:$0xff]  }
 0x192   :  { %4116 = vmatprep.subr.bf16.mxu1 %v14035_v9  ;;  %v14119_v8 = vld [vmem:[#allocation5 + $0x104] ss:$24 sps:$4 sm:$0xff]   ;;  %v14114_v9 = vld [vmem:[#allocation5 + $0xf8] ss:$24 sps:$4 sm:$0xff]  }
 0x194   :  { %2230 = vmatpush1.bf16.msra.mxu0 %v14030_v10  ;;  %v14117_v10 = vld [vmem:[#allocation5 + $0x100] ss:$24 sps:$4 sm:$0xff]  }
 0x195   :  { %4117 = vmatpush1.bf16.msra.mxu1 %v14033_v11  ;;  %2231 = vmatprep.subr.bf16.mxu0 %v14038_v13  ;;  %v14122_v11 = vld [vmem:[#allocation5 + $0x12c] ss:$24 sps:$4 sm:$0xff]  }
 0x196   :  { %4118 = vmatprep.subr.bf16.mxu1 %v14041_v14  ;;  %v14125_v13 = vld [vmem:[#allocation5 + $0x134] ss:$24 sps:$4 sm:$0xff]  }
 0x198   :  { %2232 = vmatpush1.bf16.msra.mxu0 %v14036_v15 }
 0x199   :  { %4119 = vmatpush1.bf16.msra.mxu1 %v14039_v16  ;;  %2233 = vmatprep.subr.bf16.mxu0 %v14044_v18 }
 0x19a   :  { %4120 = vmatprep.subr.bf16.mxu1 %v14047_v19 }
 0x19c   :  { %2234 = vmatpush1.bf16.msra.mxu0 %v14042_v20  ;;  %v14120_v20 = vld [vmem:[#allocation5 + $0x128] ss:$24 sps:$4 sm:$0xff]  }
 0x19d   :  { %4121 = vmatpush1.bf16.msra.mxu1 %v14045_v22  ;;  %2235 = vmatprep.subr.bf16.mxu0 %v14050_v23  ;;  %v14123_v22 = vld [vmem:[#allocation5 + $0x130] ss:$24 sps:$4 sm:$0xff]  }
 0x19e   :  { %4122 = vmatprep.subr.bf16.mxu1 %v14053_v24 }
 0x1a0   :  { %2236 = vmatpush1.bf16.msra.mxu0 %v14048_v25  ;;  %v14128_v25 = vld [vmem:[#allocation5 + $0x15c] ss:$24 sps:$4 sm:$0xff]  }
 0x1a1   :  { %4123 = vmatpush1.bf16.msra.mxu1 %v14051_v26  ;;  %2237 = vmatprep.subr.bf16.mxu0 %v14056_v28  ;;  %v14131_v26 = vld [vmem:[#allocation5 + $0x164] ss:$24 sps:$4 sm:$0xff]  }
 0x1a2   :  { %4124 = vmatprep.subr.bf16.mxu1 %v14059_v29  ;;  %v14126_v29 = vld [vmem:[#allocation5 + $0x158] ss:$24 sps:$4 sm:$0xff]  }
 0x1a4   :  { %2238 = vmatpush1.bf16.msra.mxu0 %v14054_v30  ;;  %v14129_v30 = vld [vmem:[#allocation5 + $0x160] ss:$24 sps:$4 sm:$0xff]  }
 0x1a5   :  { %4125 = vmatpush1.bf16.msra.mxu1 %v14057_v31  ;;  %2239 = vmatprep.subr.bf16.mxu0 %v14062_v33  ;;  %v14134_v31 = vld [vmem:[#allocation5 + $0x18c] ss:$24 sps:$4 sm:$0xff]  }
 0x1a6   :  { %4126 = vmatprep.subr.bf16.mxu1 %v14065_v35  ;;  %v14137_v33 = vld [vmem:[#allocation5 + $0x194] ss:$24 sps:$4 sm:$0xff]   ;;  %v14132_v35 = vld [vmem:[#allocation5 + $0x188] ss:$24 sps:$4 sm:$0xff]  }
 0x1a8   :  { %2240 = vmatpush1.bf16.msra.mxu0 %v14060_v36  ;;  %v14135_v36 = vld [vmem:[#allocation5 + $0x190] ss:$24 sps:$4 sm:$0xff]  }
 0x1a9   :  { %4127 = vmatpush1.bf16.msra.mxu1 %v14063_v48  ;;  %2241 = vmatprep.subr.bf16.mxu0 %v14068_v37  ;;  %v14140_v48 = vld [vmem:[#allocation5 + $0x1bc] ss:$24 sps:$4 sm:$0xff]  }
 0x1aa   :  { %4128 = vmatprep.subr.bf16.mxu1 %v14071_v38  ;;  %v14143_v37 = vld [vmem:[#allocation5 + $0x1c4] ss:$24 sps:$4 sm:$0xff]   ;;  %v14138_v38 = vld [vmem:[#allocation5 + $0x1b8] ss:$24 sps:$4 sm:$0xff]  }
 0x1ac   :  { %2242 = vmatpush1.bf16.msra.mxu0 %v14066_v40  ;;  %v14141_v40 = vld [vmem:[#allocation5 + $0x1c0] ss:$24 sps:$4 sm:$0xff]  }
 0x1ad   :  { %4129 = vmatpush1.bf16.msra.mxu1 %v14069_v41  ;;  %2243 = vmatprep.subr.bf16.mxu0 %v14074_v42  ;;  %v14146_v41 = vld [vmem:[#allocation5 + $0x1ec] ss:$24 sps:$4 sm:$0xff]  }
 0x1ae   :  { %4130 = vmatprep.subr.bf16.mxu1 %v14077_v43  ;;  %v14149_v42 = vld [vmem:[#allocation5 + $0x1f4] ss:$24 sps:$4 sm:$0xff]   ;;  %v14144_v43 = vld [vmem:[#allocation5 + $0x1e8] ss:$24 sps:$4 sm:$0xff]  }
 0x1b0   :  { %2244 = vmatpush1.bf16.msra.mxu0 %v14072_v5  ;;  %v14147_v5 = vld [vmem:[#allocation5 + $0x1f0] ss:$24 sps:$4 sm:$0xff]  }
 0x1b1   :  { %4131 = vmatpush1.bf16.msra.mxu1 %v14075_v44  ;;  %2245 = vmatprep.subr.bf16.mxu0 %v14080_v46  ;;  %v14152_v44 = vld [vmem:[#allocation5 + $0x21c] ss:$24 sps:$4 sm:$0xff]  }
 0x1b2   :  { %4132 = vmatprep.subr.bf16.mxu1 %v14083_v32  ;;  %v14155_v46 = vld [vmem:[#allocation5 + $0x224] ss:$24 sps:$4 sm:$0xff]   ;;  %v14150_v32 = vld [vmem:[#allocation5 + $0x218] ss:$24 sps:$4 sm:$0xff]  }
 0x1b4   :  { %2246 = vmatpush1.bf16.msra.mxu0 %v14078_v47  ;;  %v14153_v47 = vld [vmem:[#allocation5 + $0x220] ss:$24 sps:$4 sm:$0xff]  }
 0x1b5   :  { %4133 = vmatpush1.bf16.msra.mxu1 %v14081_v49  ;;  %4145 = vmatprep.subr.bf16.mxu0 %v14086_v53  ;;  %v14158_v49 = vld [vmem:[#allocation5 + $0x24c] ss:$24 sps:$4 sm:$0xff]   ;;  %v14159_v53 = vld [vmem:[#allocation5 + $0x250] ss:$24 sps:$4 sm:$0xff]  }
 0x1b6   :  { %4274 = vmatprep.subr.bf16.mxu1 %v14089_v54  ;;  %v14164_v54 = vld [vmem:[#allocation5 + $0x27c] ss:$24 sps:$4 sm:$0xff]  }
 0x1b7   :  { %2248 = vmatmul.mubr.bf16.vlgmr.msra.gmra.mrb[4].mxu0 %v15691_v21  ;;  %v14104_v21 = vld [vmem:[#allocation5 + $0x9c] ss:$24 sps:$4 sm:$0xff]  }
 0x1b8   :  { %4135 = vmatmul.mubr.bf16.vlgmr.msra.gmra.mrb[4].mxu1 %v16033_v12  ;;  %4146 = vmatpush1.bf16.msra.mxu0 %v14084_v55  ;;  %v14167_v55 = vld [vmem:[#allocation5 + $0x284] ss:$24 sps:$4 sm:$0xff]  }
 0x1b9   :  { %4275 = vmatpush1.bf16.msra.mxu1 %v14087_v56  ;;  %4147 = vmatprep.subr.bf16.mxu0 %v14092_v57  ;;  %v14162_v56 = vld [vmem:[#allocation5 + $0x278] ss:$24 sps:$4 sm:$0xff]  }
 0x1ba   :  { %4276 = vmatprep.subr.bf16.mxu1 %v14095_v17  ;;  %4177 = vmatprep.mubr.bf16.mxu0 %v15702_v27  ;;  %v14165_v57 = vld [vmem:[#allocation5 + $0x280] ss:$24 sps:$4 sm:$0xff]   ;;  %v14170_v17 = vld [vmem:[#allocation5 + $0x2ac] ss:$24 sps:$4 sm:$0xff]  }
 0x1bb   :  { %4306 = vmatprep.mubr.bf16.mxu1 %v15702_v27  ;;  %v14111_v27 = vld [vmem:[#allocation5 + $0xd0] ss:$24 sps:$4 sm:$0xff]  }
 0x1bc   :  { %4148 = vmatpush1.bf16.msra.mxu0 %v14090_v58  ;;  %v14173_v58 = vld [vmem:[#allocation5 + $0x2b4] ss:$24 sps:$4 sm:$0xff]  }
 0x1bd   :  { %4277 = vmatpush1.bf16.msra.mxu1 %v14093_v59  ;;  %4149 = vmatprep.subr.bf16.mxu0 %v14098_v60  ;;  %v14168_v59 = vld [vmem:[#allocation5 + $0x2a8] ss:$24 sps:$4 sm:$0xff]  }
 0x1be   :  { %4278 = vmatprep.subr.bf16.mxu1 %v14101_v61  ;;  %v14171_v60 = vld [vmem:[#allocation5 + $0x2b0] ss:$24 sps:$4 sm:$0xff]   ;;  %v14176_v61 = vld [vmem:[#allocation5 + $0x2dc] ss:$24 sps:$4 sm:$0xff]  }
 0x1c0   :  { %4150 = vmatpush1.bf16.msra.mxu0 %v14096_v62  ;;  %v14179_v62 = vld [vmem:[#allocation5 + $0x2e4] ss:$24 sps:$4 sm:$0xff]  }
 0x1c1   :  { %4279 = vmatpush1.bf16.msra.mxu1 %v14099_v63  ;;  %4151 = vmatprep.subr.bf16.mxu0 %v14104_v21  ;;  %v14174_v63 = vld [vmem:[#allocation5 + $0x2d8] ss:$24 sps:$4 sm:$0xff]  }
 0x1c2   :  { %4280 = vmatprep.subr.bf16.mxu1 %v14107_v0  ;;  %v14177_v21 = vld [vmem:[#allocation5 + $0x2e0] ss:$24 sps:$4 sm:$0xff]   ;;  %v14182_v0 = vld [vmem:[#allocation5 + $0x30c] ss:$24 sps:$4 sm:$0xff]  }
 0x1c4   :  { %4152 = vmatpush1.bf16.msra.mxu0 %v14102_v1  ;;  %v14185_v1 = vld [vmem:[#allocation5 + $0x314] ss:$24 sps:$4 sm:$0xff]  }
 0x1c5   :  { %4281 = vmatpush1.bf16.msra.mxu1 %v14105_v2  ;;  %4153 = vmatprep.subr.bf16.mxu0 %v14110_v3  ;;  %v14180_v2 = vld [vmem:[#allocation5 + $0x308] ss:$24 sps:$4 sm:$0xff]  }
 0x1c6   :  { %4282 = vmatprep.subr.bf16.mxu1 %v14113_v4  ;;  %v14183_v3 = vld [vmem:[#allocation5 + $0x310] ss:$24 sps:$4 sm:$0xff]   ;;  %v14188_v4 = vld [vmem:[#allocation5 + $0x33c] ss:$24 sps:$4 sm:$0xff]  }
 0x1c8   :  { %4154 = vmatpush1.bf16.msra.mxu0 %v14108_v6  ;;  %v14191_v6 = vld [vmem:[#allocation5 + $0x344] ss:$24 sps:$4 sm:$0xff]  }
 0x1c9   :  { %4283 = vmatpush1.bf16.msra.mxu1 %v14111_v27  ;;  %4155 = vmatprep.subr.bf16.mxu0 %v14116_v7  ;;  %v14186_v27 = vld [vmem:[#allocation5 + $0x338] ss:$24 sps:$4 sm:$0xff]  }
 0x1ca   :  { %4284 = vmatprep.subr.bf16.mxu1 %v14119_v8  ;;  %v16039_v14 = vpop.f32.mrb[0].mxu0  ;;  %v14189_v7 = vld [vmem:[#allocation5 + $0x340] ss:$24 sps:$4 sm:$0xff]   ;;  %v14194_v8 = vld [vmem:[#allocation5 + $0x36c] ss:$24 sps:$4 sm:$0xff]  }
 0x1cb   :  { %v16041_v15 = vpop.f32.mrb[0].mxu1  ;;  %v16043_v16 = vpop.f32.mrb[1].mxu0 }
 0x1cc   :  { %v16045_v18 = vpop.f32.mrb[1].mxu1  ;;  %v2007_v19 = vpop.f32.mrb[2].mxu0  ;;  %4156 = vmatpush1.bf16.msra.mxu0 %v14114_v9  ;;  %v14197_v9 = vld [vmem:[#allocation5 + $0x374] ss:$24 sps:$4 sm:$0xff]  }
 0x1cd   :  { %4285 = vmatpush1.bf16.msra.mxu1 %v14117_v10  ;;  %v2130_v23 = vpop.f32.mrb[2].mxu1  ;;  %v2008_v24 = vpop.f32.mrb[3].mxu0  ;;  %4157 = vmatprep.subr.bf16.mxu0 %v14122_v11  ;;  %v14192_v10 = vld [vmem:[#allocation5 + $0x368] ss:$24 sps:$4 sm:$0xff]   ;;  %v14198_v19 = vld [vmem:[#allocation5 + $0x398] ss:$24 sps:$4 sm:$0xff]  }
 0x1ce   :  { %4286 = vmatprep.subr.bf16.mxu1 %v14125_v13  ;;  %v2131_v28 = vpop.f32.mrb[3].mxu1  ;;  %v14195_v11 = vld [vmem:[#allocation5 + $0x370] ss:$24 sps:$4 sm:$0xff]   ;;  %v14200_v13 = vld [vmem:[#allocation5 + $0x39c] ss:$24 sps:$4 sm:$0xff]  }
 0x1cf   :  { %v14209_v23 = vld [vmem:[#allocation5 + $0x3d4] ss:$24 sps:$4 sm:$0xff]   ;;  %v14204_v24 = vld [vmem:[#allocation5 + $0x3c8] ss:$24 sps:$4 sm:$0xff]   ;;  %v14210_v28 = vld [vmem:[#allocation5 + $0x3f8] ss:$24 sps:$4 sm:$0xff]  }
 0x1d0   :  { %4158 = vmatpush1.bf16.msra.mxu0 %v14120_v20  ;;  %v14201_v20 = vld [vmem:[#allocation5 + $0x3a0] ss:$24 sps:$4 sm:$0xff]  }
 0x1d1   :  { %4287 = vmatpush1.bf16.msra.mxu1 %v14123_v22  ;;  %4159 = vmatprep.subr.bf16.mxu0 %v14128_v25  ;;  %v14206_v22 = vld [vmem:[#allocation5 + $0x3cc] ss:$24 sps:$4 sm:$0xff]   ;;  %v14212_v25 = vld [vmem:[#allocation5 + $0x3fc] ss:$24 sps:$4 sm:$0xff]  }
 0x1d2   :  { %4288 = vmatprep.subr.bf16.mxu1 %v14131_v26  ;;  %v14215_v26 = vld [vmem:[#allocation5 + $0x404] ss:$24 sps:$4 sm:$0xff]  }
 0x1d4   :  { %4160 = vmatpush1.bf16.msra.mxu0 %v14126_v29  ;;  %v14213_v29 = vld [vmem:[#allocation5 + $0x400] ss:$24 sps:$4 sm:$0xff]  }
 0x1d5   :  { %4289 = vmatpush1.bf16.msra.mxu1 %v14129_v30  ;;  %4161 = vmatprep.subr.bf16.mxu0 %v14134_v31  ;;  %v14218_v30 = vld [vmem:[#allocation5 + $0x42c] ss:$24 sps:$4 sm:$0xff]  }
 0x1d6   :  { %4290 = vmatprep.subr.bf16.mxu1 %v14137_v33  ;;  %v14221_v31 = vld [vmem:[#allocation5 + $0x434] ss:$24 sps:$4 sm:$0xff]   ;;  %v14216_v33 = vld [vmem:[#allocation5 + $0x428] ss:$24 sps:$4 sm:$0xff]  }
 0x1d8   :  { %4162 = vmatpush1.bf16.msra.mxu0 %v14132_v35  ;;  %v14219_v35 = vld [vmem:[#allocation5 + $0x430] ss:$24 sps:$4 sm:$0xff]  }
 0x1d9   :  { %4291 = vmatpush1.bf16.msra.mxu1 %v14135_v36  ;;  %4163 = vmatprep.subr.bf16.mxu0 %v14140_v48  ;;  %v14224_v36 = vld [vmem:[#allocation5 + $0x45c] ss:$24 sps:$4 sm:$0xff]  }
 0x1da   :  { %4292 = vmatprep.subr.bf16.mxu1 %v14143_v37  ;;  %v14227_v48 = vld [vmem:[#allocation5 + $0x464] ss:$24 sps:$4 sm:$0xff]   ;;  %v14222_v37 = vld [vmem:[#allocation5 + $0x458] ss:$24 sps:$4 sm:$0xff]  }
 0x1dc   :  { %4164 = vmatpush1.bf16.msra.mxu0 %v14138_v38  ;;  %v14225_v38 = vld [vmem:[#allocation5 + $0x460] ss:$24 sps:$4 sm:$0xff]  }
 0x1dd   :  { %4293 = vmatpush1.bf16.msra.mxu1 %v14141_v40  ;;  %4165 = vmatprep.subr.bf16.mxu0 %v14146_v41  ;;  %v14230_v40 = vld [vmem:[#allocation5 + $0x48c] ss:$24 sps:$4 sm:$0xff]  }
 0x1de   :  { %4294 = vmatprep.subr.bf16.mxu1 %v14149_v42  ;;  %v14233_v41 = vld [vmem:[#allocation5 + $0x494] ss:$24 sps:$4 sm:$0xff]   ;;  %v14228_v42 = vld [vmem:[#allocation5 + $0x488] ss:$24 sps:$4 sm:$0xff]  }
 0x1e0   :  { %4166 = vmatpush1.bf16.msra.mxu0 %v14144_v43  ;;  %v14231_v43 = vld [vmem:[#allocation5 + $0x490] ss:$24 sps:$4 sm:$0xff]  }
 0x1e1   :  { %4295 = vmatpush1.bf16.msra.mxu1 %v14147_v5  ;;  %4167 = vmatprep.subr.bf16.mxu0 %v14152_v44  ;;  %v14236_v5 = vld [vmem:[#allocation5 + $0x4bc] ss:$24 sps:$4 sm:$0xff]  }
 0x1e2   :  { %4296 = vmatprep.subr.bf16.mxu1 %v14155_v46  ;;  %v14239_v44 = vld [vmem:[#allocation5 + $0x4c4] ss:$24 sps:$4 sm:$0xff]   ;;  %v14234_v46 = vld [vmem:[#allocation5 + $0x4b8] ss:$24 sps:$4 sm:$0xff]  }
 0x1e4   :  { %4168 = vmatpush1.bf16.msra.mxu0 %v14150_v32  ;;  %v14237_v32 = vld [vmem:[#allocation5 + $0x4c0] ss:$24 sps:$4 sm:$0xff]  }
 0x1e5   :  { %4297 = vmatpush1.bf16.msra.mxu1 %v14153_v47  ;;  %4169 = vmatprep.subr.bf16.mxu0 %v14158_v49  ;;  %v14242_v47 = vld [vmem:[#allocation5 + $0x4ec] ss:$24 sps:$4 sm:$0xff]  }
 0x1e6   :  { %4298 = vmatprep.subr.bf16.mxu1 %v14161_v51  ;;  %v14245_v49 = vld [vmem:[#allocation5 + $0x4f4] ss:$24 sps:$4 sm:$0xff]   ;;  %v14240_v51 = vld [vmem:[#allocation5 + $0x4e8] ss:$24 sps:$4 sm:$0xff]  }
 0x1e8   :  { %4170 = vmatpush1.bf16.msra.mxu0 %v14156_v52  ;;  %v14243_v52 = vld [vmem:[#allocation5 + $0x4f0] ss:$24 sps:$4 sm:$0xff]  }
 0x1e9   :  { %4299 = vmatpush1.bf16.msra.mxu1 %v14159_v53  ;;  %4171 = vmatprep.subr.bf16.mxu0 %v14164_v54  ;;  %v14248_v53 = vld [vmem:[#allocation5 + $0x51c] ss:$24 sps:$4 sm:$0xff]  }
 0x1ea   :  { %4300 = vmatprep.subr.bf16.mxu1 %v14167_v55  ;;  %v14251_v54 = vld [vmem:[#allocation5 + $0x524] ss:$24 sps:$4 sm:$0xff]   ;;  %v14246_v55 = vld [vmem:[#allocation5 + $0x518] ss:$24 sps:$4 sm:$0xff]  }
 0x1ec   :  { %4172 = vmatpush1.bf16.msra.mxu0 %v14162_v56  ;;  %v14249_v56 = vld [vmem:[#allocation5 + $0x520] ss:$24 sps:$4 sm:$0xff]  }
 0x1ed   :  { %4301 = vmatpush1.bf16.msra.mxu1 %v14165_v57  ;;  %4173 = vmatprep.subr.bf16.mxu0 %v14170_v17  ;;  %v14254_v57 = vld [vmem:[#allocation5 + $0x54c] ss:$24 sps:$4 sm:$0xff]  }
 0x1ee   :  { %4302 = vmatprep.subr.bf16.mxu1 %v14173_v58  ;;  %v14257_v17 = vld [vmem:[#allocation5 + $0x554] ss:$24 sps:$4 sm:$0xff]   ;;  %v14252_v58 = vld [vmem:[#allocation5 + $0x548] ss:$24 sps:$4 sm:$0xff]  }
 0x1f0   :  { %4174 = vmatpush1.bf16.msra.mxu0 %v14168_v59  ;;  %v14255_v59 = vld [vmem:[#allocation5 + $0x550] ss:$24 sps:$4 sm:$0xff]  }
 0x1f1   :  { %4303 = vmatpush1.bf16.msra.mxu1 %v14171_v60  ;;  %4175 = vmatprep.subr.bf16.mxu0 %v14176_v61  ;;  %v14260_v60 = vld [vmem:[#allocation5 + $0x57c] ss:$24 sps:$4 sm:$0xff]  }
 0x1f2   :  { %4304 = vmatprep.subr.bf16.mxu1 %v14179_v62  ;;  %v14263_v61 = vld [vmem:[#allocation5 + $0x584] ss:$24 sps:$4 sm:$0xff]   ;;  %v14258_v62 = vld [vmem:[#allocation5 + $0x578] ss:$24 sps:$4 sm:$0xff]  }
 0x1f4   :  { %4176 = vmatpush1.bf16.msra.mxu0 %v14174_v63  ;;  %v14261_v63 = vld [vmem:[#allocation5 + $0x580] ss:$24 sps:$4 sm:$0xff]  }
 0x1f5   :  { %4305 = vmatpush1.bf16.msra.mxu1 %v14177_v21  ;;  %4188 = vmatprep.subr.bf16.mxu0 %v14182_v0  ;;  %v14266_v21 = vld [vmem:[#allocation5 + $0x5ac] ss:$24 sps:$4 sm:$0xff]  }
 0x1f6   :  { %4317 = vmatprep.subr.bf16.mxu1 %v14185_v1  ;;  %v14269_v0 = vld [vmem:[#allocation5 + $0x5b4] ss:$24 sps:$4 sm:$0xff]   ;;  %v14264_v1 = vld [vmem:[#allocation5 + $0x5a8] ss:$24 sps:$4 sm:$0xff]  }
 0x1f7   :  { %4178 = vmatmul.mubr.bf16.vlgmr.msra.gmra.mrb[8].mxu0 %v15807_v34 }
 0x1f8   :  { %4307 = vmatmul.mubr.bf16.vlgmr.msra.gmra.mrb[8].mxu1 %v15807_v34  ;;  %4189 = vmatpush1.bf16.msra.mxu0 %v14180_v2  ;;  %v14203_v34 = vld [vmem:[#allocation5 + $0x3a4] ss:$24 sps:$4 sm:$0xff]   ;;  %v14267_v2 = vld [vmem:[#allocation5 + $0x5b0] ss:$24 sps:$4 sm:$0xff]  }
 0x1f9   :  { %4318 = vmatpush1.bf16.msra.mxu1 %v14183_v3  ;;  %4190 = vmatprep.subr.bf16.mxu0 %v14188_v4  ;;  %v14272_v3 = vld [vmem:[#allocation5 + $0x5dc] ss:$24 sps:$4 sm:$0xff]  }
 0x1fa   :  { %4319 = vmatprep.subr.bf16.mxu1 %v14191_v6  ;;  %4220 = vmatprep.mubr.bf16.mxu0 %v15818_v39  ;;  %v14275_v4 = vld [vmem:[#allocation5 + $0x5e4] ss:$24 sps:$4 sm:$0xff]   ;;  %v14270_v6 = vld [vmem:[#allocation5 + $0x5d8] ss:$24 sps:$4 sm:$0xff]  }
 0x1fb   :  { %4349 = vmatprep.mubr.bf16.mxu1 %v15818_v39  ;;  %v14207_v39 = vld [vmem:[#allocation5 + $0x3d0] ss:$24 sps:$4 sm:$0xff]  }
 0x1fc   :  { %4191 = vmatpush1.bf16.msra.mxu0 %v14186_v27  ;;  %v14273_v27 = vld [vmem:[#allocation5 + $0x5e0] ss:$24 sps:$4 sm:$0xff]  }
 0x1fd   :  { %4320 = vmatpush1.bf16.msra.mxu1 %v14189_v7  ;;  %4192 = vmatprep.subr.bf16.mxu0 %v14194_v8  ;;  %v14278_v7 = vld [vmem:[#allocation5 + $0x60c] ss:$24 sps:$4 sm:$0xff]  }
 0x1fe   :  { %4321 = vmatprep.subr.bf16.mxu1 %v14197_v9  ;;  %v14281_v8 = vld [vmem:[#allocation5 + $0x614] ss:$24 sps:$4 sm:$0xff]   ;;  %v14276_v9 = vld [vmem:[#allocation5 + $0x608] ss:$24 sps:$4 sm:$0xff]  }
 0x200   :  { %4193 = vmatpush1.bf16.msra.mxu0 %v14192_v10  ;;  %v14279_v10 = vld [vmem:[#allocation5 + $0x610] ss:$24 sps:$4 sm:$0xff]  }
 0x201   :  { %4322 = vmatpush1.bf16.msra.mxu1 %v14195_v11  ;;  %4194 = vmatprep.subr.bf16.mxu0 %v14200_v13  ;;  %v14284_v11 = vld [vmem:[#allocation5 + $0x63c] ss:$24 sps:$4 sm:$0xff]  }
 0x202   :  { %4323 = vmatprep.subr.bf16.mxu1 %v14203_v34  ;;  %v14287_v13 = vld [vmem:[#allocation5 + $0x644] ss:$24 sps:$4 sm:$0xff]   ;;  %v14282_v34 = vld [vmem:[#allocation5 + $0x638] ss:$24 sps:$4 sm:$0xff]  }
 0x204   :  { %4195 = vmatpush1.bf16.msra.mxu0 %v14198_v19  ;;  %v14285_v19 = vld [vmem:[#allocation5 + $0x640] ss:$24 sps:$4 sm:$0xff]  }
 0x205   :  { %4324 = vmatpush1.bf16.msra.mxu1 %v14201_v20  ;;  %4196 = vmatprep.subr.bf16.mxu0 %v14206_v22  ;;  %v14290_v20 = vld [vmem:[#allocation5 + $0x66c] ss:$24 sps:$4 sm:$0xff]  }
 0x206   :  { %4325 = vmatprep.subr.bf16.mxu1 %v14209_v23  ;;  %v14293_v22 = vld [vmem:[#allocation5 + $0x674] ss:$24 sps:$4 sm:$0xff]   ;;  %v14288_v23 = vld [vmem:[#allocation5 + $0x668] ss:$24 sps:$4 sm:$0xff]  }
 0x208   :  { %4197 = vmatpush1.bf16.msra.mxu0 %v14204_v24  ;;  %v14291_v24 = vld [vmem:[#allocation5 + $0x670] ss:$24 sps:$4 sm:$0xff]  }
 0x209   :  { %4326 = vmatpush1.bf16.msra.mxu1 %v14207_v39  ;;  %4198 = vmatprep.subr.bf16.mxu0 %v14212_v25  ;;  %v14296_v39 = vld [vmem:[#allocation5 + $0x69c] ss:$24 sps:$4 sm:$0xff]   ;;  %v14294_v25 = vld [vmem:[#allocation5 + $0x698] ss:$24 sps:$4 sm:$0xff]  }
 0x20a   :  { %4327 = vmatprep.subr.bf16.mxu1 %v14215_v26  ;;  %v14297_v26 = vld [vmem:[#allocation5 + $0x6a0] ss:$24 sps:$4 sm:$0xff]  }
 0x20c   :  { %4199 = vmatpush1.bf16.msra.mxu0 %v14210_v28  ;;  %v14302_v28 = vld [vmem:[#allocation5 + $0x6cc] ss:$24 sps:$4 sm:$0xff]  }
 0x20d   :  { %4328 = vmatpush1.bf16.msra.mxu1 %v14213_v29  ;;  %4200 = vmatprep.subr.bf16.mxu0 %v14218_v30  ;;  %v14305_v29 = vld [vmem:[#allocation5 + $0x6d4] ss:$24 sps:$4 sm:$0xff]   ;;  %v14300_v30 = vld [vmem:[#allocation5 + $0x6c8] ss:$24 sps:$4 sm:$0xff]  }
 0x20e   :  { %4329 = vmatprep.subr.bf16.mxu1 %v14221_v31  ;;  %v14308_v31 = vld [vmem:[#allocation5 + $0x6fc] ss:$24 sps:$4 sm:$0xff]  }
 0x210   :  { %4201 = vmatpush1.bf16.msra.mxu0 %v14216_v33  ;;  %v14311_v33 = vld [vmem:[#allocation5 + $0x704] ss:$24 sps:$4 sm:$0xff]  }
 0x211   :  { %4330 = vmatpush1.bf16.msra.mxu1 %v14219_v35  ;;  %4202 = vmatprep.subr.bf16.mxu0 %v14224_v36  ;;  %v14306_v35 = vld [vmem:[#allocation5 + $0x6f8] ss:$24 sps:$4 sm:$0xff]  }
 0x212   :  { %4331 = vmatprep.subr.bf16.mxu1 %v14227_v48  ;;  %v14309_v36 = vld [vmem:[#allocation5 + $0x700] ss:$24 sps:$4 sm:$0xff]   ;;  %v14314_v48 = vld [vmem:[#allocation5 + $0x72c] ss:$24 sps:$4 sm:$0xff]  }
 0x214   :  { %4203 = vmatpush1.bf16.msra.mxu0 %v14222_v37  ;;  %v14317_v37 = vld [vmem:[#allocation5 + $0x734] ss:$24 sps:$4 sm:$0xff]  }
 0x215   :  { %4332 = vmatpush1.bf16.msra.mxu1 %v14225_v38  ;;  %4204 = vmatprep.subr.bf16.mxu0 %v14230_v40  ;;  %v14312_v38 = vld [vmem:[#allocation5 + $0x728] ss:$24 sps:$4 sm:$0xff]  }
 0x216   :  { %4333 = vmatprep.subr.bf16.mxu1 %v14233_v41  ;;  %v14315_v40 = vld [vmem:[#allocation5 + $0x730] ss:$24 sps:$4 sm:$0xff]   ;;  %v14320_v41 = vld [vmem:[#allocation5 + $0x75c] ss:$24 sps:$4 sm:$0xff]  }
 0x218   :  { %4205 = vmatpush1.bf16.msra.mxu0 %v14228_v42  ;;  %v14323_v42 = vld [vmem:[#allocation5 + $0x764] ss:$24 sps:$4 sm:$0xff]  }
 0x219   :  { %4334 = vmatpush1.bf16.msra.mxu1 %v14231_v43  ;;  %4206 = vmatprep.subr.bf16.mxu0 %v14236_v5  ;;  %v14318_v43 = vld [vmem:[#allocation5 + $0x758] ss:$24 sps:$4 sm:$0xff]  }
 0x21a   :  { %4335 = vmatprep.subr.bf16.mxu1 %v14239_v44  ;;  %v14321_v5 = vld [vmem:[#allocation5 + $0x760] ss:$24 sps:$4 sm:$0xff]   ;;  %v14326_v44 = vld [vmem:[#allocation5 + $0x78c] ss:$24 sps:$4 sm:$0xff]  }
 0x21c   :  { %4207 = vmatpush1.bf16.msra.mxu0 %v14234_v46  ;;  %v14329_v46 = vld [vmem:[#allocation5 + $0x794] ss:$24 sps:$4 sm:$0xff]  }
 0x21d   :  { %4336 = vmatpush1.bf16.msra.mxu1 %v14237_v32  ;;  %4208 = vmatprep.subr.bf16.mxu0 %v14242_v47  ;;  %v14324_v32 = vld [vmem:[#allocation5 + $0x788] ss:$24 sps:$4 sm:$0xff]  }
 0x21e   :  { %4337 = vmatprep.subr.bf16.mxu1 %v14245_v49  ;;  %v14327_v47 = vld [vmem:[#allocation5 + $0x790] ss:$24 sps:$4 sm:$0xff]   ;;  %v14332_v49 = vld [vmem:[#allocation5 + $0x7bc] ss:$24 sps:$4 sm:$0xff]  }
 0x220   :  { %4209 = vmatpush1.bf16.msra.mxu0 %v14240_v51  ;;  %v14335_v51 = vld [vmem:[#allocation5 + $0x7c4] ss:$24 sps:$4 sm:$0xff]  }
 0x221   :  { %4338 = vmatpush1.bf16.msra.mxu1 %v14243_v52  ;;  %4210 = vmatprep.subr.bf16.mxu0 %v14248_v53  ;;  %v14330_v52 = vld [vmem:[#allocation5 + $0x7b8] ss:$24 sps:$4 sm:$0xff]  }
 0x222   :  { %4339 = vmatprep.subr.bf16.mxu1 %v14251_v54  ;;  %v14333_v53 = vld [vmem:[#allocation5 + $0x7c0] ss:$24 sps:$4 sm:$0xff]   ;;  %v14338_v54 = vld [vmem:[#allocation5 + $0x7ec] ss:$24 sps:$4 sm:$0xff]  }
 0x224   :  { %4211 = vmatpush1.bf16.msra.mxu0 %v14246_v55  ;;  %v14341_v55 = vld [vmem:[#allocation5 + $0x7f4] ss:$24 sps:$4 sm:$0xff]  }
 0x225   :  { %4340 = vmatpush1.bf16.msra.mxu1 %v14249_v56  ;;  %4212 = vmatprep.subr.bf16.mxu0 %v14254_v57  ;;  %v14336_v56 = vld [vmem:[#allocation5 + $0x7e8] ss:$24 sps:$4 sm:$0xff]  }
 0x226   :  { %4341 = vmatprep.subr.bf16.mxu1 %v14257_v17  ;;  %v14339_v57 = vld [vmem:[#allocation5 + $0x7f0] ss:$24 sps:$4 sm:$0xff]   ;;  %v14344_v17 = vld [vmem:[#allocation5 + $0x81c] ss:$24 sps:$4 sm:$0xff]  }
 0x228   :  { %4213 = vmatpush1.bf16.msra.mxu0 %v14252_v58  ;;  %v14347_v58 = vld [vmem:[#allocation5 + $0x824] ss:$24 sps:$4 sm:$0xff]  }
 0x229   :  { %4342 = vmatpush1.bf16.msra.mxu1 %v14255_v59  ;;  %4214 = vmatprep.subr.bf16.mxu0 %v14260_v60  ;;  %v14342_v59 = vld [vmem:[#allocation5 + $0x818] ss:$24 sps:$4 sm:$0xff]  }
 0x22a   :  { %4343 = vmatprep.subr.bf16.mxu1 %v14263_v61  ;;  %v14345_v60 = vld [vmem:[#allocation5 + $0x820] ss:$24 sps:$4 sm:$0xff]   ;;  %v14350_v61 = vld [vmem:[#allocation5 + $0x84c] ss:$24 sps:$4 sm:$0xff]  }
 0x22c   :  { %4215 = vmatpush1.bf16.msra.mxu0 %v14258_v62  ;;  %v14353_v62 = vld [vmem:[#allocation5 + $0x854] ss:$24 sps:$4 sm:$0xff]  }
 0x22d   :  { %4344 = vmatpush1.bf16.msra.mxu1 %v14261_v63  ;;  %4216 = vmatprep.subr.bf16.mxu0 %v14266_v21  ;;  %v14348_v63 = vld [vmem:[#allocation5 + $0x848] ss:$24 sps:$4 sm:$0xff]  }
 0x22e   :  { %4345 = vmatprep.subr.bf16.mxu1 %v14269_v0  ;;  %v14351_v21 = vld [vmem:[#allocation5 + $0x850] ss:$24 sps:$4 sm:$0xff]   ;;  %v14356_v0 = vld [vmem:[#allocation5 + $0x87c] ss:$24 sps:$4 sm:$0xff]  }
 0x230   :  { %4217 = vmatpush1.bf16.msra.mxu0 %v14264_v1  ;;  %v14359_v1 = vld [vmem:[#allocation5 + $0x884] ss:$24 sps:$4 sm:$0xff]  }
 0x231   :  { %4346 = vmatpush1.bf16.msra.mxu1 %v14267_v2  ;;  %4218 = vmatprep.subr.bf16.mxu0 %v14272_v3  ;;  %v14354_v2 = vld [vmem:[#allocation5 + $0x878] ss:$24 sps:$4 sm:$0xff]  }
 0x232   :  { %4347 = vmatprep.subr.bf16.mxu1 %v14275_v4  ;;  %v14357_v3 = vld [vmem:[#allocation5 + $0x880] ss:$24 sps:$4 sm:$0xff]   ;;  %v14362_v4 = vld [vmem:[#allocation5 + $0x8ac] ss:$24 sps:$4 sm:$0xff]  }
 0x234   :  { %4219 = vmatpush1.bf16.msra.mxu0 %v14270_v6  ;;  %v14365_v6 = vld [vmem:[#allocation5 + $0x8b4] ss:$24 sps:$4 sm:$0xff]  }
 0x235   :  { %4348 = vmatpush1.bf16.msra.mxu1 %v14273_v27  ;;  %4231 = vmatprep.subr.bf16.mxu0 %v14278_v7  ;;  %v14360_v27 = vld [vmem:[#allocation5 + $0x8a8] ss:$24 sps:$4 sm:$0xff]  }
 0x236   :  { %4360 = vmatprep.subr.bf16.mxu1 %v14281_v8  ;;  %v14363_v7 = vld [vmem:[#allocation5 + $0x8b0] ss:$24 sps:$4 sm:$0xff]   ;;  %v14368_v8 = vld [vmem:[#allocation5 + $0x8dc] ss:$24 sps:$4 sm:$0xff]  }
 0x237   :  { %4221 = vmatmul.mubr.bf16.vlgmr.msra.gmra.mrb[8].mxu0 %v15926_v45 }
 0x238   :  { %4350 = vmatmul.mubr.bf16.vlgmr.msra.gmra.mrb[8].mxu1 %v15926_v45  ;;  %4232 = vmatpush1.bf16.msra.mxu0 %v14276_v9  ;;  %v14299_v45 = vld [vmem:[#allocation5 + $0x6a4] ss:$24 sps:$4 sm:$0xff]  }
 0x239   :  { %4361 = vmatpush1.bf16.msra.mxu1 %v14279_v10  ;;  %4233 = vmatprep.subr.bf16.mxu0 %v14284_v11  ;;  %v14371_v9 = vld [vmem:[#allocation5 + $0x8e4] ss:$24 sps:$4 sm:$0xff]   ;;  %v14366_v10 = vld [vmem:[#allocation5 + $0x8d8] ss:$24 sps:$4 sm:$0xff]  }
 0x23a   :  { %4362 = vmatprep.subr.bf16.mxu1 %v14287_v13  ;;  %4263 = vmatprep.mubr.bf16.mxu0 %v15934_v50  ;;  %v14369_v11 = vld [vmem:[#allocation5 + $0x8e0] ss:$24 sps:$4 sm:$0xff]   ;;  %v14374_v13 = vld [vmem:[#allocation7 + $0x4] ss:$24 sps:$4 sm:$0xff]  }
 0x23b   :  { %4392 = vmatprep.mubr.bf16.mxu1 %v15934_v50  ;;  %v14303_v50 = vld [vmem:[#allocation5 + $0x6d0] ss:$24 sps:$4 sm:$0xff]  }
 0x23c   :  { %4234 = vmatpush1.bf16.msra.mxu0 %v14282_v34  ;;  %v14377_v34 = vld [vmem:[#allocation7 + $0xc] ss:$24 sps:$4 sm:$0xff]  }
 0x23d   :  { %4363 = vmatpush1.bf16.msra.mxu1 %v14285_v19  ;;  %4235 = vmatprep.subr.bf16.mxu0 %v14290_v20  ;;  %v11004_v19 = vld [vmem:[%s17445_s1 + $0x68] sm:$0xff]  ;;  %v11010_v20 = vld [vmem:[%s17445_s1 + $0x98] sm:$0xff] }
 0x23e   :  { %4364 = vmatprep.subr.bf16.mxu1 %v14293_v22  ;;  %v14372_v22 = vld [vmem:[#allocation7] ss:$24 sps:$4 sm:$0xff]  }
 0x240   :  { %4236 = vmatpush1.bf16.msra.mxu0 %v14288_v23  ;;  %v14375_v23 = vld [vmem:[#allocation7 + $0x8] ss:$24 sps:$4 sm:$0xff]  }
 0x241   :  { %4365 = vmatpush1.bf16.msra.mxu1 %v14291_v24  ;;  %4237 = vmatprep.subr.bf16.mxu0 %v14296_v39  ;;  %v14380_v24 = vld [vmem:[#allocation7 + $0x34] ss:$24 sps:$4 sm:$0xff]  }
 0x242   :  { %4366 = vmatprep.subr.bf16.mxu1 %v14299_v45  ;;  %v14383_v39 = vld [vmem:[#allocation7 + $0x3c] ss:$24 sps:$4 sm:$0xff]   ;;  %v16061_v45 = vpack.c.bf16 %v11010_v20, %v11004_v19  ;;  %v14423_v20 = vld [vmem:[#allocation7 + $0x188] ss:$24 sps:$4 sm:$0xff]  }
 0x244   :  { %4238 = vmatpush1.bf16.msra.mxu0 %v14294_v25  ;;  %v14378_v25 = vld [vmem:[#allocation7 + $0x30] ss:$24 sps:$4 sm:$0xff]  }
 0x245   :  { %4367 = vmatpush1.bf16.msra.mxu1 %v14297_v26  ;;  %4239 = vmatprep.subr.bf16.mxu0 %v14302_v28  ;;  %v14381_v26 = vld [vmem:[#allocation7 + $0x38] ss:$24 sps:$4 sm:$0xff]   ;;  %v14386_v28 = vld [vmem:[#allocation7 + $0x64] ss:$24 sps:$4 sm:$0xff]  }
 0x246   :  { %4368 = vmatprep.subr.bf16.mxu1 %v14305_v29  ;;  %v14389_v29 = vld [vmem:[#allocation7 + $0x6c] ss:$24 sps:$4 sm:$0xff]  }
 0x248   :  { %4240 = vmatpush1.bf16.msra.mxu0 %v14300_v30  ;;  %v417_v30 = vlaneseq }
 0x249   :  { %4369 = vmatpush1.bf16.msra.mxu1 %v14303_v50  ;;  %4241 = vmatprep.subr.bf16.mxu0 %v14308_v31  ;;  %v14384_v50 = vld [vmem:[#allocation7 + $0x60] ss:$24 sps:$4 sm:$0xff]  }
 0x24a   :  { %4370 = vmatprep.subr.bf16.mxu1 %v14311_v33  ;;  %v14387_v31 = vld [vmem:[#allocation7 + $0x68] ss:$24 sps:$4 sm:$0xff]   ;;  %v14395_v33 = vld [vmem:[#allocation7 + $0x9c] ss:$24 sps:$4 sm:$0xff]  }
 0x24c   :  { %4242 = vmatpush1.bf16.msra.mxu0 %v14306_v35  ;;  %v16067_v35 = vshrl.u32 %v417_v30, 7  ;;  %v14440_v30 = vld [vmem:[#allocation7 + $0x214] ss:$24 sps:$4 sm:$0xff]  }
 0x24d   :  { %4371 = vmatpush1.bf16.msra.mxu1 %v14309_v36  ;;  %4243 = vmatprep.subr.bf16.mxu0 %v14314_v48  ;;  %v14390_v36 = vld [vmem:[#allocation7 + $0x90] ss:$24 sps:$4 sm:$0xff]  }
 0x24e   :  { %4372 = vmatprep.subr.bf16.mxu1 %v14317_v37  ;;  %v14393_v48 = vld [vmem:[#allocation7 + $0x98] ss:$24 sps:$4 sm:$0xff]   ;;  %v14398_v37 = vld [vmem:[#allocation7 + $0xc4] ss:$24 sps:$4 sm:$0xff]  }
 0x250   :  { %4244 = vmatpush1.bf16.msra.mxu0 %v14312_v38  ;;  %v14401_v38 = vld [vmem:[#allocation7 + $0xcc] ss:$24 sps:$4 sm:$0xff]  }
 0x251   :  { %4373 = vmatpush1.bf16.msra.mxu1 %v14315_v40  ;;  %4245 = vmatprep.subr.bf16.mxu0 %v14320_v41  ;;  %v16070_v40 = vsub.s32 0, %v16067_v35  ;;  %v14396_v41 = vld [vmem:[#allocation7 + $0xc0] ss:$24 sps:$4 sm:$0xff]  }
 0x252   :  { %4374 = vmatprep.subr.bf16.mxu1 %v14323_v42  ;;  %v14399_v42 = vld [vmem:[#allocation7 + $0xc8] ss:$24 sps:$4 sm:$0xff]  }
 0x254   :  { %4246 = vmatpush1.bf16.msra.mxu0 %v14318_v43  ;;  %v16075_v43 = vld [vmem:[%s17450_s6] sm:$0x3f] }
 0x255   :  { %4375 = vmatpush1.bf16.msra.mxu1 %v14321_v5  ;;  %4247 = vmatprep.subr.bf16.mxu0 %v14326_v44  ;;  %v14404_v5 = vld [vmem:[#allocation7 + $0xf4] ss:$24 sps:$4 sm:$0xff]  }
 0x256   :  { %4376 = vmatprep.subr.bf16.mxu1 %v14329_v46  ;;  %v14407_v44 = vld [vmem:[#allocation7 + $0xfc] ss:$24 sps:$4 sm:$0xff]   ;;  %v16078_v46 = vsub.s32 1, %v16067_v35 }
 0x258   :  { %4248 = vmatpush1.bf16.msra.mxu0 %v14324_v32  ;;  %v2549_v32 = vrot.slane %v16075_v43, %v16070_v40 }
 0x259   :  { %4377 = vmatpush1.bf16.msra.mxu1 %v14327_v47  ;;  %4249 = vmatprep.subr.bf16.mxu0 %v14332_v49  ;;  %v2553_v47 = vrot.slane %v16075_v43, %v16078_v46  ;;  %v14402_v49 = vld [vmem:[#allocation7 + $0xf0] ss:$24 sps:$4 sm:$0xff]  }
 0x25a   :  { %4378 = vmatprep.subr.bf16.mxu1 %v14335_v51  ;;  %v14405_v51 = vld [vmem:[#allocation7 + $0xf8] ss:$24 sps:$4 sm:$0xff]  }
 0x25c   :  { %4250 = vmatpush1.bf16.msra.mxu0 %v14330_v52  ;;  %v415_v52 = vld [vmem:[%s17449_s5] sm:$0x3f] }
 0x25d   :  { %4379 = vmatpush1.bf16.msra.mxu1 %v14333_v53  ;;  %4251 = vmatprep.subr.bf16.mxu0 %v14338_v54  ;;  %v14410_v53 = vld [vmem:[#allocation7 + $0x124] ss:$24 sps:$4 sm:$0xff]  }
 0x25e   :  { %4380 = vmatprep.subr.bf16.mxu1 %v14341_v55  ;;  %v14413_v54 = vld [vmem:[#allocation7 + $0x12c] ss:$24 sps:$4 sm:$0xff]  }
 0x260   :  { %4252 = vmatpush1.bf16.msra.mxu0 %v14336_v56 }
 0x261   :  { %4381 = vmatpush1.bf16.msra.mxu1 %v14339_v57  ;;  %4253 = vmatprep.subr.bf16.mxu0 %v14344_v17 }
 0x262   :  { %4382 = vmatprep.subr.bf16.mxu1 %v14347_v58 }
 0x264   :  { %4254 = vmatpush1.bf16.msra.mxu0 %v14342_v59  ;;  %v424_v59 = vrot.slane %v415_v52, %v16078_v46  ;;  %v14467_v52 = vld [vmem:[#allocation7 + $0x2dc] ss:$24 sps:$4 sm:$0xff]  }
 0x265   :  { %4383 = vmatpush1.bf16.msra.mxu1 %v14345_v60  ;;  %4255 = vmatprep.subr.bf16.mxu0 %v14350_v61 }
 0x266   :  { %4384 = vmatprep.subr.bf16.mxu1 %v14353_v62 }
 0x268   :  { %4256 = vmatpush1.bf16.msra.mxu0 %v14348_v63  ;;  %v14408_v63 = vld [vmem:[#allocation7 + $0x120] ss:$24 sps:$4 sm:$0xff]  }
 0x269   :  { %4385 = vmatpush1.bf16.msra.mxu1 %v14351_v21  ;;  %4257 = vmatprep.subr.bf16.mxu0 %v14356_v0  ;;  %v14411_v21 = vld [vmem:[#allocation7 + $0x128] ss:$24 sps:$4 sm:$0xff]  }
 0x26a   :  { %4386 = vmatprep.subr.bf16.mxu1 %v14359_v1 }
 0x26c   :  { %4258 = vmatpush1.bf16.msra.mxu0 %v14354_v2 }
 0x26d   :  { %4387 = vmatpush1.bf16.msra.mxu1 %v14357_v3  ;;  %4259 = vmatprep.subr.bf16.mxu0 %v14362_v4  ;;  %v14416_v3 = vld [vmem:[#allocation7 + $0x154] ss:$24 sps:$4 sm:$0xff]  }
 0x26e   :  { %4388 = vmatprep.subr.bf16.mxu1 %v14365_v6  ;;  %v14419_v4 = vld [vmem:[#allocation7 + $0x15c] ss:$24 sps:$4 sm:$0xff]  }
 0x270   :  { %4260 = vmatpush1.bf16.msra.mxu0 %v14360_v27 }
 0x271   :  { %4389 = vmatpush1.bf16.msra.mxu1 %v14363_v7  ;;  %4261 = vmatprep.subr.bf16.mxu0 %v14368_v8  ;;  %v13180_v8 = vadd.f32 %v16043_v16, %v424_v59  ;;  %v14420_v16 = vld [vmem:[#allocation7 + $0x180] ss:$24 sps:$4 sm:$0xff]   ;;  %v14470_v59 = vld [vmem:[#allocation7 + $0x304] ss:$24 sps:$4 sm:$0xff]  }
 0x272   :  { %4390 = vmatprep.subr.bf16.mxu1 %v14371_v9 }
 0x273   :  { %v16111_v19 = vmul.f32 0.14433756, %v13180_v8 }
 0x274   :  { %4262 = vmatpush1.bf16.msra.mxu0 %v14366_v10  ;;  %v14414_v10 = vld [vmem:[#allocation7 + $0x150] ss:$24 sps:$4 sm:$0xff]  }
 0x275   :  { %4391 = vmatpush1.bf16.msra.mxu1 %v14369_v11  ;;  %6163 = vmatprep.subr.bf16.mxu0 %v14374_v13  ;;  %v14417_v11 = vld [vmem:[#allocation7 + $0x158] ss:$24 sps:$4 sm:$0xff]   ;;  %v14422_v13 = vld [vmem:[#allocation7 + $0x184] ss:$24 sps:$4 sm:$0xff]  }
 0x276   :  { %6292 = vmatprep.subr.bf16.mxu1 %v14377_v34  ;;  %v14425_v34 = vld [vmem:[#allocation7 + $0x18c] ss:$24 sps:$4 sm:$0xff]  }
 0x277   :  { %4264 = vmatmul.mubr.bf16.vlgmr.msra.gmra.mrb[8].mxu0 %v16033_v12 }
 0x278   :  { %4393 = vmatmul.mubr.bf16.vlgmr.msra.gmra.mrb[8].mxu1 %v16033_v12  ;;  %6164 = vmatpush1.bf16.msra.mxu0 %v14372_v22  ;;  %v14392_v12 = vld [vmem:[#allocation7 + $0x94] ss:$24 sps:$4 sm:$0xff]  }
 0x279   :  { %6293 = vmatpush1.bf16.msra.mxu1 %v14375_v23  ;;  %6165 = vmatprep.subr.bf16.mxu0 %v14380_v24  ;;  %v14428_v22 = vld [vmem:[#allocation7 + $0x1b4] ss:$24 sps:$4 sm:$0xff]   ;;  %v14426_v24 = vld [vmem:[#allocation7 + $0x1b0] ss:$24 sps:$4 sm:$0xff]  }
 0x27a   :  { %6294 = vmatprep.subr.bf16.mxu1 %v14383_v39  ;;  %6195 = vmatprep.mubr.bf16.mxu0 %v16061_v45  ;;  %v14431_v23 = vld [vmem:[#allocation7 + $0x1bc] ss:$24 sps:$4 sm:$0xff]   ;;  %v14429_v39 = vld [vmem:[#allocation7 + $0x1b8] ss:$24 sps:$4 sm:$0xff]  }
 0x27b   :  { %6324 = vmatprep.mubr.bf16.mxu1 %v16061_v45 }
 0x27c   :  { %6166 = vmatpush1.bf16.msra.mxu0 %v14378_v25  ;;  %v14434_v25 = vld [vmem:[#allocation7 + $0x1e4] ss:$24 sps:$4 sm:$0xff]  }
 0x27d   :  { %6295 = vmatpush1.bf16.msra.mxu1 %v14381_v26  ;;  %6167 = vmatprep.subr.bf16.mxu0 %v14386_v28  ;;  %v14437_v26 = vld [vmem:[#allocation7 + $0x1ec] ss:$24 sps:$4 sm:$0xff]   ;;  %v14432_v28 = vld [vmem:[#allocation7 + $0x1e0] ss:$24 sps:$4 sm:$0xff]  }
 0x27e   :  { %6296 = vmatprep.subr.bf16.mxu1 %v14389_v29  ;;  %v14435_v29 = vld [vmem:[#allocation7 + $0x1e8] ss:$24 sps:$4 sm:$0xff]  }
 0x280   :  { %6168 = vmatpush1.bf16.msra.mxu0 %v14384_v50  ;;  %v14443_v50 = vld [vmem:[#allocation7 + $0x21c] ss:$24 sps:$4 sm:$0xff]  }
 0x281   :  { %6297 = vmatpush1.bf16.msra.mxu1 %v14387_v31  ;;  %6169 = vmatprep.subr.bf16.mxu0 %v14392_v12  ;;  %v14438_v31 = vld [vmem:[#allocation7 + $0x210] ss:$24 sps:$4 sm:$0xff]  }
 0x282   :  { %6298 = vmatprep.subr.bf16.mxu1 %v14395_v33  ;;  %v14441_v12 = vld [vmem:[#allocation7 + $0x218] ss:$24 sps:$4 sm:$0xff]   ;;  %v14446_v33 = vld [vmem:[#allocation7 + $0x244] ss:$24 sps:$4 sm:$0xff]  }
 0x284   :  { %6170 = vmatpush1.bf16.msra.mxu0 %v14390_v36  ;;  %v14449_v36 = vld [vmem:[#allocation7 + $0x24c] ss:$24 sps:$4 sm:$0xff]  }
 0x285   :  { %6299 = vmatpush1.bf16.msra.mxu1 %v14393_v48  ;;  %6171 = vmatprep.subr.bf16.mxu0 %v14398_v37  ;;  %v14444_v48 = vld [vmem:[#allocation7 + $0x240] ss:$24 sps:$4 sm:$0xff]  }
 0x286   :  { %6300 = vmatprep.subr.bf16.mxu1 %v14401_v38  ;;  %v14447_v37 = vld [vmem:[#allocation7 + $0x248] ss:$24 sps:$4 sm:$0xff]   ;;  %v14452_v38 = vld [vmem:[#allocation7 + $0x274] ss:$24 sps:$4 sm:$0xff]  }
 0x288   :  { %6172 = vmatpush1.bf16.msra.mxu0 %v14396_v41  ;;  %v14455_v41 = vld [vmem:[#allocation7 + $0x27c] ss:$24 sps:$4 sm:$0xff]  }
 0x289   :  { %6301 = vmatpush1.bf16.msra.mxu1 %v14399_v42  ;;  %6173 = vmatprep.subr.bf16.mxu0 %v14404_v5  ;;  %v14450_v42 = vld [vmem:[#allocation7 + $0x270] ss:$24 sps:$4 sm:$0xff]  }
 0x28a   :  { %6302 = vmatprep.subr.bf16.mxu1 %v14407_v44  ;;  %v16087_v55 = vpop.f32.mrb[4].mxu0  ;;  %v14453_v5 = vld [vmem:[#allocation7 + $0x278] ss:$24 sps:$4 sm:$0xff]   ;;  %v14458_v44 = vld [vmem:[#allocation7 + $0x2a4] ss:$24 sps:$4 sm:$0xff]  }
 0x28b   :  { %v4136_v56 = vpop.f32.mrb[4].mxu1  ;;  %v16091_v17 = vpop.f32.mrb[5].mxu0 }
 0x28c   :  { %v16089_v57 = vadd.f32 %v4136_v56, %v2549_v32  ;;  %v4138_v58 = vpop.f32.mrb[5].mxu1  ;;  %v2253_v61 = vpop.f32.mrb[6].mxu0  ;;  %6174 = vmatpush1.bf16.msra.mxu0 %v14402_v49  ;;  %v14459_v49 = vld [vmem:[#allocation7 + $0x2a8] ss:$24 sps:$4 sm:$0xff]   ;;  %v11003_v56 = vld [vmem:[%s17445_s1 + $0x60] sm:$0xff] }
 0x28d   :  { %v16094_v60 = vadd.f32 %v4138_v58, %v2553_v47  ;;  %v4140_v62 = vpop.f32.mrb[6].mxu1  ;;  %6303 = vmatpush1.bf16.msra.mxu1 %v14405_v51  ;;  %v2254_v1 = vpop.f32.mrb[7].mxu0  ;;  %6175 = vmatprep.subr.bf16.mxu0 %v14410_v53  ;;  %v14464_v51 = vld [vmem:[#allocation7 + $0x2d4] ss:$24 sps:$4 sm:$0xff]   ;;  %v14462_v53 = vld [vmem:[#allocation7 + $0x2d0] ss:$24 sps:$4 sm:$0xff]  }
 0x28e   :  { %v16096_v0 = vadd.f32 %v4140_v62, %v2549_v32  ;;  %v4142_v2 = vpop.f32.mrb[7].mxu1  ;;  %6304 = vmatprep.subr.bf16.mxu1 %v14413_v54  ;;  %v14461_v32 = vld [vmem:[#allocation7 + $0x2ac] ss:$24 sps:$4 sm:$0xff]   ;;  %v14465_v54 = vld [vmem:[#allocation7 + $0x2d8] ss:$24 sps:$4 sm:$0xff]  }
 0x28f   :  { %v16098_v6 = vadd.f32 %v4142_v2, %v2553_v47  ;;  %v14456_v47 = vld [vmem:[#allocation7 + $0x2a0] ss:$24 sps:$4 sm:$0xff]   ;;  %v14473_v61 = vld [vmem:[#allocation7 + $0x30c] ss:$24 sps:$4 sm:$0xff]  }
 0x290   :  { %v12924_v27 = vpack.c.bf16 %v16096_v0, %v16089_v57  ;;  %6176 = vmatpush1.bf16.msra.mxu0 %v14408_v63  ;;  %v11009_v58 = vld [vmem:[%s17445_s1 + $0x90] sm:$0xff]  ;;  %v11006_v63 = vld [vmem:[%s17445_s1 + $0x78] sm:$0xff] }
 0x291   :  { %6305 = vmatpush1.bf16.msra.mxu1 %v14411_v21  ;;  %v16107_v9 = vpack.i.bf16 %v16098_v6, %v16094_v60  ;;  %6177 = vmatprep.subr.bf16.mxu0 %v14416_v3  ;;  %v16121_v62 = vpack.c.bf16 %v11009_v58, %v11003_v56  ;;  %v11012_v21 = vld [vmem:[%s17445_s1 + $0xa8] sm:$0xff]  ;;  %v14471_v2 = vld [vmem:[#allocation7 + $0x308] ss:$24 sps:$4 sm:$0xff]   ;;  %v14476_v3 = vld [vmem:[#allocation7 + $0x334] ss:$24 sps:$4 sm:$0xff]  }
 0x292   :  { %6306 = vmatprep.subr.bf16.mxu1 %v14419_v4  ;;  %v14468_v1 = vld [vmem:[#allocation7 + $0x300] ss:$24 sps:$4 sm:$0xff]   ;;  %v14479_v4 = vld [vmem:[#allocation7 + $0x33c] ss:$24 sps:$4 sm:$0xff]   ;;  %v16129_v8 = vpack.c.bf16 %v11012_v21, %v11006_v63  ;;  %v14533_v58 = vld [vmem:[#allocation7 + $0x4ec] ss:$24 sps:$4 sm:$0xff]  }
 0x293   :  { %13329 = vrot.lane.b32.xlu0 %v16107_v9, %s14976_s26  ;;  %v14530_v56 = vld [vmem:[#allocation7 + $0x4e4] ss:$24 sps:$4 sm:$0xff]   ;;  %v14536_v63 = vld [vmem:[#allocation7 + $0x514] ss:$24 sps:$4 sm:$0xff]  }
 0x294   :  { %6178 = vmatpush1.bf16.msra.mxu0 %v14414_v10  ;;  %v14474_v10 = vld [vmem:[#allocation7 + $0x330] ss:$24 sps:$4 sm:$0xff]   ;;  %v14539_v21 = vld [vmem:[#allocation7 + $0x51c] ss:$24 sps:$4 sm:$0xff]  }
 0x295   :  { %6307 = vmatpush1.bf16.msra.mxu1 %v14417_v11  ;;  %6179 = vmatprep.subr.bf16.mxu0 %v14422_v13  ;;  %v14477_v11 = vld [vmem:[#allocation7 + $0x338] ss:$24 sps:$4 sm:$0xff]   ;;  %v14482_v13 = vld [vmem:[#allocation7 + $0x364] ss:$24 sps:$4 sm:$0xff]  }
 0x296   :  { %6308 = vmatprep.subr.bf16.mxu1 %v14425_v34  ;;  %v14485_v34 = vld [vmem:[#allocation7 + $0x36c] ss:$24 sps:$4 sm:$0xff]  }
 0x297   :  { %7896 = vrot.lane.b32.xlu0 %v16111_v19, %s14976_s26 }
 0x298   :  { %6180 = vmatpush1.bf16.msra.mxu0 %v14420_v16  ;;  %v14480_v16 = vld [vmem:[#allocation7 + $0x360] ss:$24 sps:$4 sm:$0xff]  }
 0x299   :  { %6309 = vmatpush1.bf16.msra.mxu1 %v14423_v20  ;;  %6181 = vmatprep.subr.bf16.mxu0 %v14428_v22  ;;  %v14483_v20 = vld [vmem:[#allocation7 + $0x368] ss:$24 sps:$4 sm:$0xff]   ;;  %v14488_v22 = vld [vmem:[#allocation7 + $0x394] ss:$24 sps:$4 sm:$0xff]  }
 0x29a   :  { %6310 = vmatprep.subr.bf16.mxu1 %v14431_v23  ;;  %v14491_v23 = vld [vmem:[#allocation7 + $0x39c] ss:$24 sps:$4 sm:$0xff]  }
 0x29c   :  { %6182 = vmatpush1.bf16.msra.mxu0 %v14426_v24  ;;  %v14486_v24 = vld [vmem:[#allocation7 + $0x390] ss:$24 sps:$4 sm:$0xff]  }
 0x29d   :  { %6311 = vmatpush1.bf16.msra.mxu1 %v14429_v39  ;;  %6183 = vmatprep.subr.bf16.mxu0 %v14434_v25  ;;  %v14489_v39 = vld [vmem:[#allocation7 + $0x398] ss:$24 sps:$4 sm:$0xff]   ;;  %v14494_v25 = vld [vmem:[#allocation7 + $0x3c4] ss:$24 sps:$4 sm:$0xff]  }
 0x29e   :  { %6312 = vmatprep.subr.bf16.mxu1 %v14437_v26  ;;  %v14497_v26 = vld [vmem:[#allocation7 + $0x3cc] ss:$24 sps:$4 sm:$0xff]  }
 0x2a0   :  { %6184 = vmatpush1.bf16.msra.mxu0 %v14432_v28  ;;  %v14492_v28 = vld [vmem:[#allocation7 + $0x3c0] ss:$24 sps:$4 sm:$0xff]  }
 0x2a1   :  { %6313 = vmatpush1.bf16.msra.mxu1 %v14435_v29  ;;  %6185 = vmatprep.subr.bf16.mxu0 %v14440_v30  ;;  %v14495_v29 = vld [vmem:[#allocation7 + $0x3c8] ss:$24 sps:$4 sm:$0xff]   ;;  %v14500_v30 = vld [vmem:[#allocation7 + $0x3f4] ss:$24 sps:$4 sm:$0xff]  }
 0x2a2   :  { %6314 = vmatprep.subr.bf16.mxu1 %v14443_v50  ;;  %v14503_v50 = vld [vmem:[#allocation7 + $0x3fc] ss:$24 sps:$4 sm:$0xff]  }
 0x2a4   :  { %6186 = vmatpush1.bf16.msra.mxu0 %v14438_v31  ;;  %v14498_v31 = vld [vmem:[#allocation7 + $0x3f0] ss:$24 sps:$4 sm:$0xff]  }
 0x2a5   :  { %6315 = vmatpush1.bf16.msra.mxu1 %v14441_v12  ;;  %6187 = vmatprep.subr.bf16.mxu0 %v14446_v33  ;;  %v14501_v12 = vld [vmem:[#allocation7 + $0x3f8] ss:$24 sps:$4 sm:$0xff]   ;;  %v14506_v33 = vld [vmem:[#allocation7 + $0x424] ss:$24 sps:$4 sm:$0xff]  }
 0x2a6   :  { %6316 = vmatprep.subr.bf16.mxu1 %v14449_v36  ;;  %v14509_v36 = vld [vmem:[#allocation7 + $0x42c] ss:$24 sps:$4 sm:$0xff]  }
 0x2a8   :  { %6188 = vmatpush1.bf16.msra.mxu0 %v14444_v48  ;;  %v14504_v48 = vld [vmem:[#allocation7 + $0x420] ss:$24 sps:$4 sm:$0xff]  }
 0x2a9   :  { %6317 = vmatpush1.bf16.msra.mxu1 %v14447_v37  ;;  %6189 = vmatprep.subr.bf16.mxu0 %v14452_v38  ;;  %v14507_v37 = vld [vmem:[#allocation7 + $0x428] ss:$24 sps:$4 sm:$0xff]   ;;  %v14512_v38 = vld [vmem:[#allocation7 + $0x454] ss:$24 sps:$4 sm:$0xff]  }
 0x2aa   :  { %6318 = vmatprep.subr.bf16.mxu1 %v14455_v41  ;;  %v14515_v41 = vld [vmem:[#allocation7 + $0x45c] ss:$24 sps:$4 sm:$0xff]  }
 0x2ac   :  { %6190 = vmatpush1.bf16.msra.mxu0 %v14450_v42  ;;  %v14510_v42 = vld [vmem:[#allocation7 + $0x450] ss:$24 sps:$4 sm:$0xff]  }
 0x2ad   :  { %6319 = vmatpush1.bf16.msra.mxu1 %v14453_v5  ;;  %6191 = vmatprep.subr.bf16.mxu0 %v14458_v44  ;;  %v14513_v5 = vld [vmem:[#allocation7 + $0x458] ss:$24 sps:$4 sm:$0xff]   ;;  %v14518_v44 = vld [vmem:[#allocation7 + $0x484] ss:$24 sps:$4 sm:$0xff]  }
 0x2ae   :  { %6320 = vmatprep.subr.bf16.mxu1 %v14461_v32  ;;  %v14521_v32 = vld [vmem:[#allocation7 + $0x48c] ss:$24 sps:$4 sm:$0xff]  }
 0x2b0   :  { %6192 = vmatpush1.bf16.msra.mxu0 %v14456_v47  ;;  %v14516_v47 = vld [vmem:[#allocation7 + $0x480] ss:$24 sps:$4 sm:$0xff]  }
 0x2b1   :  { %6321 = vmatpush1.bf16.msra.mxu1 %v14459_v49  ;;  %6193 = vmatprep.subr.bf16.mxu0 %v14464_v51  ;;  %v14519_v49 = vld [vmem:[#allocation7 + $0x488] ss:$24 sps:$4 sm:$0xff]   ;;  %v14524_v51 = vld [vmem:[#allocation7 + $0x4b4] ss:$24 sps:$4 sm:$0xff]  }
 0x2b2   :  { %6322 = vmatprep.subr.bf16.mxu1 %v14467_v52  ;;  %v14527_v52 = vld [vmem:[#allocation7 + $0x4bc] ss:$24 sps:$4 sm:$0xff]  }
 0x2b4   :  { %6194 = vmatpush1.bf16.msra.mxu0 %v14462_v53  ;;  %v14522_v53 = vld [vmem:[#allocation7 + $0x4b0] ss:$24 sps:$4 sm:$0xff]  }
 0x2b5   :  { %6323 = vmatpush1.bf16.msra.mxu1 %v14465_v54  ;;  %6206 = vmatprep.subr.bf16.mxu0 %v14470_v59  ;;  %v14525_v54 = vld [vmem:[#allocation7 + $0x4b8] ss:$24 sps:$4 sm:$0xff]  }
 0x2b6   :  { %6335 = vmatprep.subr.bf16.mxu1 %v14473_v61  ;;  %v14528_v59 = vld [vmem:[#allocation7 + $0x4e0] ss:$24 sps:$4 sm:$0xff]  }
 0x2b7   :  { %6196 = vmatmul.mubr.bf16.vlgmr.msra.gmra.mrb[12].mxu0 %v16121_v62  ;;  %v14531_v61 = vld [vmem:[#allocation7 + $0x4e8] ss:$24 sps:$4 sm:$0xff]  }
 0x2b8   :  { %6325 = vmatmul.mubr.bf16.vlgmr.msra.gmra.mrb[12].mxu1 %v16121_v62  ;;  %6207 = vmatpush1.bf16.msra.mxu0 %v14468_v1  ;;  %v14534_v1 = vld [vmem:[#allocation7 + $0x510] ss:$24 sps:$4 sm:$0xff]  }
 0x2b9   :  { %6336 = vmatpush1.bf16.msra.mxu1 %v14471_v2  ;;  %6208 = vmatprep.subr.bf16.mxu0 %v14476_v3  ;;  %v14537_v2 = vld [vmem:[#allocation7 + $0x518] ss:$24 sps:$4 sm:$0xff]   ;;  %v14542_v3 = vld [vmem:[#allocation7 + $0x544] ss:$24 sps:$4 sm:$0xff]  }
 0x2ba   :  { %6337 = vmatprep.subr.bf16.mxu1 %v14479_v4  ;;  %6238 = vmatprep.mubr.bf16.mxu0 %v16129_v8  ;;  %v14545_v4 = vld [vmem:[#allocation7 + $0x54c] ss:$24 sps:$4 sm:$0xff]  }
 0x2bb   :  { %6367 = vmatprep.mubr.bf16.mxu1 %v16129_v8 }
 0x2bc   :  { %6209 = vmatpush1.bf16.msra.mxu0 %v14474_v10  ;;  %v14540_v10 = vld [vmem:[#allocation7 + $0x540] ss:$24 sps:$4 sm:$0xff]  }
 0x2bd   :  { %6338 = vmatpush1.bf16.msra.mxu1 %v14477_v11  ;;  %6210 = vmatprep.subr.bf16.mxu0 %v14482_v13  ;;  %v14543_v11 = vld [vmem:[#allocation7 + $0x548] ss:$24 sps:$4 sm:$0xff]   ;;  %v14548_v13 = vld [vmem:[#allocation7 + $0x574] ss:$24 sps:$4 sm:$0xff]  }
 0x2be   :  { %6339 = vmatprep.subr.bf16.mxu1 %v14485_v34  ;;  %v14551_v34 = vld [vmem:[#allocation7 + $0x57c] ss:$24 sps:$4 sm:$0xff]  }
 0x2c0   :  { %6211 = vmatpush1.bf16.msra.mxu0 %v14480_v16  ;;  %v14546_v16 = vld [vmem:[#allocation7 + $0x570] ss:$24 sps:$4 sm:$0xff]  }
 0x2c1   :  { %6340 = vmatpush1.bf16.msra.mxu1 %v14483_v20  ;;  %6212 = vmatprep.subr.bf16.mxu0 %v14488_v22  ;;  %v14549_v20 = vld [vmem:[#allocation7 + $0x578] ss:$24 sps:$4 sm:$0xff]   ;;  %v14554_v22 = vld [vmem:[#allocation7 + $0x5a4] ss:$24 sps:$4 sm:$0xff]  }
 0x2c2   :  { %6341 = vmatprep.subr.bf16.mxu1 %v14491_v23  ;;  %v14557_v23 = vld [vmem:[#allocation7 + $0x5ac] ss:$24 sps:$4 sm:$0xff]  }
 0x2c4   :  { %6213 = vmatpush1.bf16.msra.mxu0 %v14486_v24  ;;  %v14552_v24 = vld [vmem:[#allocation7 + $0x5a0] ss:$24 sps:$4 sm:$0xff]  }
 0x2c5   :  { %6342 = vmatpush1.bf16.msra.mxu1 %v14489_v39  ;;  %6214 = vmatprep.subr.bf16.mxu0 %v14494_v25  ;;  %v14555_v39 = vld [vmem:[#allocation7 + $0x5a8] ss:$24 sps:$4 sm:$0xff]   ;;  %v14560_v25 = vld [vmem:[#allocation7 + $0x5d4] ss:$24 sps:$4 sm:$0xff]  }
 0x2c6   :  { %6343 = vmatprep.subr.bf16.mxu1 %v14497_v26  ;;  %v14563_v26 = vld [vmem:[#allocation7 + $0x5dc] ss:$24 sps:$4 sm:$0xff]  }
 0x2c8   :  { %6215 = vmatpush1.bf16.msra.mxu0 %v14492_v28  ;;  %v14558_v28 = vld [vmem:[#allocation7 + $0x5d0] ss:$24 sps:$4 sm:$0xff]  }
 0x2c9   :  { %6344 = vmatpush1.bf16.msra.mxu1 %v14495_v29  ;;  %6216 = vmatprep.subr.bf16.mxu0 %v14500_v30  ;;  %v14561_v29 = vld [vmem:[#allocation7 + $0x5d8] ss:$24 sps:$4 sm:$0xff]   ;;  %v11005_v30 = vld [vmem:[%s17445_s1 + $0x70] sm:$0xff] }
 0x2ca   :  { %6345 = vmatprep.subr.bf16.mxu1 %v14503_v50  ;;  %v11011_v50 = vld [vmem:[%s17445_s1 + $0xa0] sm:$0xff] }
 0x2cc   :  { %6217 = vmatpush1.bf16.msra.mxu0 %v14498_v31  ;;  %v14566_v31 = vld [vmem:[#allocation7 + $0x604] ss:$24 sps:$4 sm:$0xff]  }
 0x2cd   :  { %6346 = vmatpush1.bf16.msra.mxu1 %v14501_v12  ;;  %6218 = vmatprep.subr.bf16.mxu0 %v14506_v33  ;;  %v14569_v12 = vld [vmem:[#allocation7 + $0x60c] ss:$24 sps:$4 sm:$0xff]   ;;  %v16141_v33 = vpack.c.bf16 %v11011_v50, %v11005_v30  ;;  %v14618_v30 = vld [vmem:[#allocation7 + $0x7b0] ss:$24 sps:$4 sm:$0xff]  }
 0x2ce   :  { %6347 = vmatprep.subr.bf16.mxu1 %v14509_v36  ;;  %v11008_v36 = vld [vmem:[%s17445_s1 + $0x88] sm:$0xff] }
 0x2cf   :  { %v14621_v50 = vld [vmem:[#allocation7 + $0x7b8] ss:$24 sps:$4 sm:$0xff]  }
 0x2d0   :  { %6219 = vmatpush1.bf16.msra.mxu0 %v14504_v48  ;;  %v11014_v48 = vld [vmem:[%s17445_s1 + $0xb8] sm:$0xff] }
 0x2d1   :  { %6348 = vmatpush1.bf16.msra.mxu1 %v14507_v37  ;;  %6220 = vmatprep.subr.bf16.mxu0 %v14512_v38  ;;  %v14564_v37 = vld [vmem:[#allocation7 + $0x600] ss:$24 sps:$4 sm:$0xff]  }
 0x2d2   :  { %6349 = vmatprep.subr.bf16.mxu1 %v14515_v41  ;;  %v14567_v38 = vld [vmem:[#allocation7 + $0x608] ss:$24 sps:$4 sm:$0xff]   ;;  %v14572_v41 = vld [vmem:[#allocation7 + $0x634] ss:$24 sps:$4 sm:$0xff]  }
 0x2d4   :  { %6221 = vmatpush1.bf16.msra.mxu0 %v14510_v42  ;;  %v14575_v42 = vld [vmem:[#allocation7 + $0x63c] ss:$24 sps:$4 sm:$0xff]  }
 0x2d5   :  { %6350 = vmatpush1.bf16.msra.mxu1 %v14513_v5  ;;  %6222 = vmatprep.subr.bf16.mxu0 %v14518_v44  ;;  %v16149_v5 = vpack.c.bf16 %v11014_v48, %v11008_v36  ;;  %v14570_v44 = vld [vmem:[#allocation7 + $0x630] ss:$24 sps:$4 sm:$0xff]   ;;  %v14624_v36 = vld [vmem:[#allocation7 + $0x7e0] ss:$24 sps:$4 sm:$0xff]  }
 0x2d6   :  { %6351 = vmatprep.subr.bf16.mxu1 %v14521_v32  ;;  %v14573_v32 = vld [vmem:[#allocation7 + $0x638] ss:$24 sps:$4 sm:$0xff]   ;;  %v14627_v48 = vld [vmem:[#allocation7 + $0x7e8] ss:$24 sps:$4 sm:$0xff]  }
 0x2d8   :  { %6223 = vmatpush1.bf16.msra.mxu0 %v14516_v47  ;;  %v14578_v47 = vld [vmem:[#allocation7 + $0x664] ss:$24 sps:$4 sm:$0xff]  }
 0x2d9   :  { %6352 = vmatpush1.bf16.msra.mxu1 %v14519_v49  ;;  %6224 = vmatprep.subr.bf16.mxu0 %v14524_v51  ;;  %v14581_v49 = vld [vmem:[#allocation7 + $0x66c] ss:$24 sps:$4 sm:$0xff]   ;;  %v14576_v51 = vld [vmem:[#allocation7 + $0x660] ss:$24 sps:$4 sm:$0xff]  }
 0x2da   :  { %6353 = vmatprep.subr.bf16.mxu1 %v14527_v52  ;;  %v14579_v52 = vld [vmem:[#allocation7 + $0x668] ss:$24 sps:$4 sm:$0xff]  }
 0x2dc   :  { %6225 = vmatpush1.bf16.msra.mxu0 %v14522_v53  ;;  %v14584_v53 = vld [vmem:[#allocation7 + $0x694] ss:$24 sps:$4 sm:$0xff]  }
 0x2dd   :  { %6354 = vmatpush1.bf16.msra.mxu1 %v14525_v54  ;;  %6226 = vmatprep.subr.bf16.mxu0 %v14530_v56  ;;  %v14587_v54 = vld [vmem:[#allocation7 + $0x69c] ss:$24 sps:$4 sm:$0xff]   ;;  %v14582_v56 = vld [vmem:[#allocation7 + $0x690] ss:$24 sps:$4 sm:$0xff]  }
 0x2de   :  { %6355 = vmatprep.subr.bf16.mxu1 %v14533_v58  ;;  %v14585_v58 = vld [vmem:[#allocation7 + $0x698] ss:$24 sps:$4 sm:$0xff]  }
 0x2e0   :  { %6227 = vmatpush1.bf16.msra.mxu0 %v14528_v59  ;;  %v14590_v59 = vld [vmem:[#allocation7 + $0x6c4] ss:$24 sps:$4 sm:$0xff]  }
 0x2e1   :  { %6356 = vmatpush1.bf16.msra.mxu1 %v14531_v61  ;;  %6228 = vmatprep.subr.bf16.mxu0 %v14536_v63  ;;  %v14593_v61 = vld [vmem:[#allocation7 + $0x6cc] ss:$24 sps:$4 sm:$0xff]   ;;  %v14588_v63 = vld [vmem:[#allocation7 + $0x6c0] ss:$24 sps:$4 sm:$0xff]  }
 0x2e2   :  { %6357 = vmatprep.subr.bf16.mxu1 %v14539_v21  ;;  %v14591_v21 = vld [vmem:[#allocation7 + $0x6c8] ss:$24 sps:$4 sm:$0xff]  }
 0x2e4   :  { %6229 = vmatpush1.bf16.msra.mxu0 %v14534_v1  ;;  %v14596_v1 = vld [vmem:[#allocation7 + $0x6f4] ss:$24 sps:$4 sm:$0xff]  }
 0x2e5   :  { %6358 = vmatpush1.bf16.msra.mxu1 %v14537_v2  ;;  %6230 = vmatprep.subr.bf16.mxu0 %v14542_v3  ;;  %v14599_v2 = vld [vmem:[#allocation7 + $0x6fc] ss:$24 sps:$4 sm:$0xff]   ;;  %v14594_v3 = vld [vmem:[#allocation7 + $0x6f0] ss:$24 sps:$4 sm:$0xff]  }
 0x2e6   :  { %6359 = vmatprep.subr.bf16.mxu1 %v14545_v4  ;;  %v14597_v4 = vld [vmem:[#allocation7 + $0x6f8] ss:$24 sps:$4 sm:$0xff]  }
 0x2e8   :  { %6231 = vmatpush1.bf16.msra.mxu0 %v14540_v10  ;;  %v14602_v10 = vld [vmem:[#allocation7 + $0x724] ss:$24 sps:$4 sm:$0xff]  }
 0x2e9   :  { %6360 = vmatpush1.bf16.msra.mxu1 %v14543_v11  ;;  %6232 = vmatprep.subr.bf16.mxu0 %v14548_v13  ;;  %v14605_v11 = vld [vmem:[#allocation7 + $0x72c] ss:$24 sps:$4 sm:$0xff]   ;;  %v14600_v13 = vld [vmem:[#allocation7 + $0x720] ss:$24 sps:$4 sm:$0xff]  }
 0x2ea   :  { %6361 = vmatprep.subr.bf16.mxu1 %v14551_v34  ;;  %v14603_v34 = vld [vmem:[#allocation7 + $0x728] ss:$24 sps:$4 sm:$0xff]  }
 0x2ec   :  { %6233 = vmatpush1.bf16.msra.mxu0 %v14546_v16  ;;  %v14608_v16 = vld [vmem:[#allocation7 + $0x754] ss:$24 sps:$4 sm:$0xff]  }
 0x2ed   :  { %6362 = vmatpush1.bf16.msra.mxu1 %v14549_v20  ;;  %6234 = vmatprep.subr.bf16.mxu0 %v14554_v22  ;;  %v14611_v20 = vld [vmem:[#allocation7 + $0x75c] ss:$24 sps:$4 sm:$0xff]   ;;  %v14606_v22 = vld [vmem:[#allocation7 + $0x750] ss:$24 sps:$4 sm:$0xff]  }
 0x2ee   :  { %6363 = vmatprep.subr.bf16.mxu1 %v14557_v23  ;;  %v14609_v23 = vld [vmem:[#allocation7 + $0x758] ss:$24 sps:$4 sm:$0xff]  }
 0x2f0   :  { %6235 = vmatpush1.bf16.msra.mxu0 %v14552_v24  ;;  %v14614_v24 = vld [vmem:[#allocation7 + $0x784] ss:$24 sps:$4 sm:$0xff]  }
 0x2f1   :  { %6364 = vmatpush1.bf16.msra.mxu1 %v14555_v39  ;;  %6236 = vmatprep.subr.bf16.mxu0 %v14560_v25  ;;  %v14617_v39 = vld [vmem:[#allocation7 + $0x78c] ss:$24 sps:$4 sm:$0xff]   ;;  %v14612_v25 = vld [vmem:[#allocation7 + $0x780] ss:$24 sps:$4 sm:$0xff]  }
 0x2f2   :  { %6365 = vmatprep.subr.bf16.mxu1 %v14563_v26  ;;  %v14615_v26 = vld [vmem:[#allocation7 + $0x788] ss:$24 sps:$4 sm:$0xff]  }
 0x2f4   :  { %6237 = vmatpush1.bf16.msra.mxu0 %v14558_v28  ;;  %v14620_v28 = vld [vmem:[#allocation7 + $0x7b4] ss:$24 sps:$4 sm:$0xff]  }
 0x2f5   :  { %6366 = vmatpush1.bf16.msra.mxu1 %v14561_v29  ;;  %6249 = vmatprep.subr.bf16.mxu0 %v14566_v31  ;;  %v14623_v29 = vld [vmem:[#allocation7 + $0x7bc] ss:$24 sps:$4 sm:$0xff]  }
 0x2f6   :  { %6378 = vmatprep.subr.bf16.mxu1 %v14569_v12  ;;  %v14626_v31 = vld [vmem:[#allocation7 + $0x7e4] ss:$24 sps:$4 sm:$0xff]  }
 0x2f7   :  { %6239 = vmatmul.mubr.bf16.vlgmr.msra.gmra.mrb[12].mxu0 %v16141_v33  ;;  %v14629_v12 = vld [vmem:[#allocation7 + $0x7ec] ss:$24 sps:$4 sm:$0xff]  }
 0x2f8   :  { %6368 = vmatmul.mubr.bf16.vlgmr.msra.gmra.mrb[12].mxu1 %v16141_v33  ;;  %6250 = vmatpush1.bf16.msra.mxu0 %v14564_v37  ;;  %v14632_v37 = vld [vmem:[#allocation7 + $0x814] ss:$24 sps:$4 sm:$0xff]  }
 0x2f9   :  { %6379 = vmatpush1.bf16.msra.mxu1 %v14567_v38  ;;  %6251 = vmatprep.subr.bf16.mxu0 %v14572_v41  ;;  %v14635_v38 = vld [vmem:[#allocation7 + $0x81c] ss:$24 sps:$4 sm:$0xff]   ;;  %v14630_v41 = vld [vmem:[#allocation7 + $0x810] ss:$24 sps:$4 sm:$0xff]  }
 0x2fa   :  { %6380 = vmatprep.subr.bf16.mxu1 %v14575_v42  ;;  %6281 = vmatprep.mubr.bf16.mxu0 %v16149_v5  ;;  %v14633_v42 = vld [vmem:[#allocation7 + $0x818] ss:$24 sps:$4 sm:$0xff]  }
 0x2fb   :  { %6410 = vmatprep.mubr.bf16.mxu1 %v16149_v5 }
 0x2fc   :  { %6252 = vmatpush1.bf16.msra.mxu0 %v14570_v44  ;;  %v14638_v44 = vld [vmem:[#allocation7 + $0x844] ss:$24 sps:$4 sm:$0xff]  }
 0x2fd   :  { %6381 = vmatpush1.bf16.msra.mxu1 %v14573_v32  ;;  %6253 = vmatprep.subr.bf16.mxu0 %v14578_v47  ;;  %v14641_v32 = vld [vmem:[#allocation7 + $0x84c] ss:$24 sps:$4 sm:$0xff]   ;;  %v14636_v47 = vld [vmem:[#allocation7 + $0x840] ss:$24 sps:$4 sm:$0xff]  }
 0x2fe   :  { %6382 = vmatprep.subr.bf16.mxu1 %v14581_v49  ;;  %v14639_v49 = vld [vmem:[#allocation7 + $0x848] ss:$24 sps:$4 sm:$0xff]  }
 0x300   :  { %6254 = vmatpush1.bf16.msra.mxu0 %v14576_v51  ;;  %v14644_v51 = vld [vmem:[#allocation7 + $0x874] ss:$24 sps:$4 sm:$0xff]  }
 0x301   :  { %6383 = vmatpush1.bf16.msra.mxu1 %v14579_v52  ;;  %6255 = vmatprep.subr.bf16.mxu0 %v14584_v53  ;;  %v14647_v52 = vld [vmem:[#allocation7 + $0x87c] ss:$24 sps:$4 sm:$0xff]   ;;  %v14642_v53 = vld [vmem:[#allocation7 + $0x870] ss:$24 sps:$4 sm:$0xff]  }
 0x302   :  { %6384 = vmatprep.subr.bf16.mxu1 %v14587_v54  ;;  %v14645_v54 = vld [vmem:[#allocation7 + $0x878] ss:$24 sps:$4 sm:$0xff]  }
 0x304   :  { %6256 = vmatpush1.bf16.msra.mxu0 %v14582_v56  ;;  %v14650_v56 = vld [vmem:[#allocation7 + $0x8a4] ss:$24 sps:$4 sm:$0xff]  }
 0x305   :  { %6385 = vmatpush1.bf16.msra.mxu1 %v14585_v58  ;;  %6257 = vmatprep.subr.bf16.mxu0 %v14590_v59  ;;  %v14653_v58 = vld [vmem:[#allocation7 + $0x8ac] ss:$24 sps:$4 sm:$0xff]   ;;  %v14648_v59 = vld [vmem:[#allocation7 + $0x8a0] ss:$24 sps:$4 sm:$0xff]  }
 0x306   :  { %6386 = vmatprep.subr.bf16.mxu1 %v14593_v61  ;;  %v14651_v61 = vld [vmem:[#allocation7 + $0x8a8] ss:$24 sps:$4 sm:$0xff]  }
 0x308   :  { %6258 = vmatpush1.bf16.msra.mxu0 %v14588_v63  ;;  %v14656_v63 = vld [vmem:[#allocation7 + $0x8d4] ss:$24 sps:$4 sm:$0xff]  }
 0x309   :  { %6387 = vmatpush1.bf16.msra.mxu1 %v14591_v21  ;;  %6259 = vmatprep.subr.bf16.mxu0 %v14596_v1  ;;  %v14659_v21 = vld [vmem:[#allocation7 + $0x8dc] ss:$24 sps:$4 sm:$0xff]  }
 0x30a   :  { %6388 = vmatprep.subr.bf16.mxu1 %v14599_v2  ;;  %v6572_v1 = vld [vmem:[%s17453_s9 + $0x80] sm:$0xff]  ;;  %v6573_v2 = vld [vmem:[%s17453_s9 + $0x88] sm:$0xff] }
 0x30c   :  { %6260 = vmatpush1.bf16.msra.mxu0 %v14594_v3  ;;  %v14654_v3 = vld [vmem:[#allocation7 + $0x8d0] ss:$24 sps:$4 sm:$0xff]  }
 0x30d   :  { %6389 = vmatpush1.bf16.msra.mxu1 %v14597_v4  ;;  %6261 = vmatprep.subr.bf16.mxu0 %v14602_v10  ;;  %v14657_v4 = vld [vmem:[#allocation7 + $0x8d8] ss:$24 sps:$4 sm:$0xff]  }
 0x30e   :  { %6390 = vmatprep.subr.bf16.mxu1 %v14605_v11  ;;  %v11007_v10 = vld [vmem:[%s17445_s1 + $0x80] sm:$0xff]  ;;  %v11013_v11 = vld [vmem:[%s17445_s1 + $0xb0] sm:$0xff] }
 0x310   :  { %6262 = vmatpush1.bf16.msra.mxu0 %v14600_v13  ;;  %v14662_v13 = vld [vmem:[#allocation7 + $0x14] ss:$24 sps:$4 sm:$0xff]  }
 0x311   :  { %6391 = vmatpush1.bf16.msra.mxu1 %v14603_v34  ;;  %6263 = vmatprep.subr.bf16.mxu0 %v14608_v16  ;;  %v12827_v34 = vpack.c.bf16 %v6573_v2, %v6572_v1  ;;  %v6556_v16 = vld [vmem:[%s17453_s9] sm:$0xff]  ;;  %v6565_v1 = vld [vmem:[%s17453_s9 + $0x48] sm:$0xff]  ;;  %v6582_v2 = vld [vmem:[%s17453_s9 + $0xd0] sm:$0xff] }
 0x312   :  { %6392 = vmatprep.subr.bf16.mxu1 %v14611_v20  ;;  %v6557_v20 = vld [vmem:[%s17453_s9 + $0x8] sm:$0xff] }
 0x314   :  { %6264 = vmatpush1.bf16.msra.mxu0 %v14606_v22  ;;  %v6574_v22 = vld [vmem:[%s17453_s9 + $0x90] sm:$0xff] }
 0x315   :  { %6393 = vmatpush1.bf16.msra.mxu1 %v14609_v23  ;;  %6265 = vmatprep.subr.bf16.mxu0 %v14614_v24  ;;  %v6575_v23 = vld [vmem:[%s17453_s9 + $0x98] sm:$0xff]  ;;  %v16179_v24 = vpack.c.bf16 %v11013_v11, %v11007_v10  ;;  %v16233_v11 = vsub.s32 2, %v16067_v35 }
 0x316   :  { %6394 = vmatprep.subr.bf16.mxu1 %v14617_v39  ;;  %v14660_v39 = vld [vmem:[#allocation7 + $0x10] ss:$24 sps:$4 sm:$0xff]  }
 0x318   :  { %6266 = vmatpush1.bf16.msra.mxu0 %v14612_v25  ;;  %v12829_v25 = vpack.c.bf16 %v6557_v20, %v6556_v16  ;;  %v6566_v16 = vld [vmem:[%s17453_s9 + $0x50] sm:$0xff]  ;;  %v6567_v20 = vld [vmem:[%s17453_s9 + $0x58] sm:$0xff] }
 0x319   :  { %6395 = vmatpush1.bf16.msra.mxu1 %v14615_v26  ;;  %6267 = vmatprep.subr.bf16.mxu0 %v14620_v28  ;;  %v14665_v26 = vld [vmem:[#allocation7 + $0x44] ss:$24 sps:$4 sm:$0xff]   ;;  %v12831_v28 = vpack.c.bf16 %v6575_v23, %v6574_v22  ;;  %v6584_v22 = vld [vmem:[%s17453_s9 + $0xe0] sm:$0xff] }
 0x31a   :  { %6396 = vmatprep.subr.bf16.mxu1 %v14623_v29  ;;  %v6558_v29 = vld [vmem:[%s17453_s9 + $0x10] sm:$0xff]  ;;  %v6585_v23 = vld [vmem:[%s17453_s9 + $0xe8] sm:$0xff] }
 0x31c   :  { %6268 = vmatpush1.bf16.msra.mxu0 %v14618_v30  ;;  %v6559_v30 = vld [vmem:[%s17453_s9 + $0x18] sm:$0xff] }
 0x31d   :  { %6397 = vmatpush1.bf16.msra.mxu1 %v14621_v50  ;;  %6269 = vmatprep.subr.bf16.mxu0 %v14626_v31  ;;  %v6576_v50 = vld [vmem:[%s17453_s9 + $0xa0] sm:$0xff]  ;;  %v6577_v31 = vld [vmem:[%s17453_s9 + $0xa8] sm:$0xff] }
 0x31e   :  { %6398 = vmatprep.subr.bf16.mxu1 %v14629_v12  ;;  %v14663_v12 = vld [vmem:[#allocation7 + $0x40] ss:$24 sps:$4 sm:$0xff]  }
 0x320   :  { %6270 = vmatpush1.bf16.msra.mxu0 %v14624_v36  ;;  %v12833_v36 = vpack.c.bf16 %v6559_v30, %v6558_v29  ;;  %v16253_v29 = vsub.s32 4, %v16067_v35  ;;  %v14680_v30 = vld [vmem:[#allocation7 + $0x134] ss:$24 sps:$4 sm:$0xff]  }
 0x321   :  { %6399 = vmatpush1.bf16.msra.mxu1 %v14627_v48  ;;  %6271 = vmatprep.subr.bf16.mxu0 %v14632_v37  ;;  %v14668_v48 = vld [vmem:[#allocation7 + $0x74] ss:$24 sps:$4 sm:$0xff]   ;;  %v12835_v37 = vpack.c.bf16 %v6577_v31, %v6576_v50  ;;  %v12851_v50 = vpack.c.bf16 %v6585_v23, %v6584_v22  ;;  %v6589_v23 = vld [vmem:[%s17453_s9 + $0x108] sm:$0xff] }
 0x322   :  { %6400 = vmatprep.subr.bf16.mxu1 %v14635_v38  ;;  %v6560_v38 = vld [vmem:[%s17453_s9 + $0x20] sm:$0xff] }
 0x323   :  { %v6568_v31 = vld [vmem:[%s17453_s9 + $0x60] sm:$0xff] }
 0x324   :  { %6272 = vmatpush1.bf16.msra.mxu0 %v14630_v41  ;;  %v6561_v41 = vld [vmem:[%s17453_s9 + $0x28] sm:$0xff]  ;;  %v6588_v22 = vld [vmem:[%s17453_s9 + $0x100] sm:$0xff] }
 0x325   :  { %6401 = vmatpush1.bf16.msra.mxu1 %v14633_v42  ;;  %6273 = vmatprep.subr.bf16.mxu0 %v14638_v44  ;;  %v6578_v42 = vld [vmem:[%s17453_s9 + $0xb0] sm:$0xff]  ;;  %v6579_v44 = vld [vmem:[%s17453_s9 + $0xb8] sm:$0xff] }
 0x326   :  { %6402 = vmatprep.subr.bf16.mxu1 %v14641_v32  ;;  %v14868_v32 = vld [vmem:[#allocation2 + $0x8] sm:$0xff] }
 0x328   :  { %6274 = vmatpush1.bf16.msra.mxu0 %v14636_v47  ;;  %v14666_v47 = vld [vmem:[#allocation7 + $0x70] ss:$24 sps:$4 sm:$0xff]  }
 0x329   :  { %6403 = vmatpush1.bf16.msra.mxu1 %v14639_v49  ;;  %6275 = vmatprep.subr.bf16.mxu0 %v14644_v51  ;;  %v12837_v49 = vpack.c.bf16 %v6561_v41, %v6560_v38  ;;  %v14671_v51 = vld [vmem:[#allocation7 + $0xa4] ss:$24 sps:$4 sm:$0xff]   ;;  %v6587_v41 = vld [vmem:[%s17453_s9 + $0xf8] sm:$0xff] }
 0x32a   :  { %6404 = vmatprep.subr.bf16.mxu1 %v14647_v52  ;;  %v12839_v52 = vpack.c.bf16 %v6579_v44, %v6578_v42  ;;  %v6586_v38 = vld [vmem:[%s17453_s9 + $0xf0] sm:$0xff] }
 0x32c   :  { %6276 = vmatpush1.bf16.msra.mxu0 %v14642_v53  ;;  %v6562_v53 = vld [vmem:[%s17453_s9 + $0x30] sm:$0xff] }
 0x32d   :  { %6405 = vmatpush1.bf16.msra.mxu1 %v14645_v54  ;;  %6277 = vmatprep.subr.bf16.mxu0 %v14650_v56  ;;  %v6563_v54 = vld [vmem:[%s17453_s9 + $0x38] sm:$0xff]  ;;  %v6581_v56 = vld [vmem:[%s17453_s9 + $0xc8] sm:$0xff] }
 0x32e   :  { %6406 = vmatprep.subr.bf16.mxu1 %v14653_v58  ;;  %v14669_v58 = vld [vmem:[#allocation7 + $0xa0] ss:$24 sps:$4 sm:$0xff]  }
 0x330   :  { %6278 = vmatpush1.bf16.msra.mxu0 %v14648_v59  ;;  %v12841_v59 = vpack.c.bf16 %v6563_v54, %v6562_v53 }
 0x331   :  { %6407 = vmatpush1.bf16.msra.mxu1 %v14651_v61  ;;  %6279 = vmatprep.subr.bf16.mxu0 %v14656_v63  ;;  %v14674_v61 = vld [vmem:[#allocation7 + $0xd4] ss:$24 sps:$4 sm:$0xff]  }
 0x332   :  { %6408 = vmatprep.subr.bf16.mxu1 %v14659_v21  ;;  %v6564_v21 = vld [vmem:[%s17453_s9 + $0x40] sm:$0xff] }
 0x333   :  { %v12845_v10 = vpack.c.bf16 %v6565_v1, %v6564_v21  ;;  %v6604_v1 = vld [vmem:[%s17453_s9 + $0x180] sm:$0xff] }
 0x334   :  { %6280 = vmatpush1.bf16.msra.mxu0 %v14654_v3  ;;  %v6583_v3 = vld [vmem:[%s17453_s9 + $0xd8] sm:$0xff] }
 0x335   :  { %6409 = vmatpush1.bf16.msra.mxu1 %v14657_v4  ;;  %6421 = vmatprep.subr.bf16.mxu0 %v14662_v13  ;;  %v14672_v4 = vld [vmem:[#allocation7 + $0xd0] ss:$24 sps:$4 sm:$0xff]   ;;  %v14677_v13 = vld [vmem:[#allocation7 + $0x104] ss:$24 sps:$4 sm:$0xff]  }
 0x336   :  { %12828 = vmatprep.subr.bf16.mxu1 %v12827_v34  ;;  %v12847_v34 = vpack.c.bf16 %v6583_v3, %v6582_v2  ;;  %v6605_v2 = vld [vmem:[%s17453_s9 + $0x188] sm:$0xff] }
 0x337   :  { %6282 = vmatmul.mubr.bf16.vlgmr.msra.gmra.mrb[12].mxu0 %v16179_v24 }
 0x338   :  { %6411 = vmatmul.mubr.bf16.vlgmr.msra.gmra.mrb[12].mxu1 %v16179_v24  ;;  %6422 = vmatpush1.bf16.msra.mxu0 %v14660_v39  ;;  %v2557_v39 = vrot.slane %v16075_v43, %v16233_v11 }
 0x339   :  { %12830 = vmatpush3.bf16.msra.mxu1 %v12829_v25  ;;  %6423 = vmatprep.subr.bf16.mxu0 %v14665_v26  ;;  %v16250_v25 = vsub.s32 3, %v16067_v35  ;;  %v14675_v26 = vld [vmem:[#allocation7 + $0x100] ss:$24 sps:$4 sm:$0xff]  }
 0x33a   :  { %12832 = vmatprep.subr.bf16.mxu1 %v12831_v28  ;;  %6723 = vmatprep.mubr.f32.mxu1 %v14868_v32  ;;  %v12849_v28 = vpack.c.bf16 %v6567_v20, %v6566_v16  ;;  %v16275_v32 = vrot.slane %v16075_v43, %v16253_v29  ;;  %v14686_v16 = vld [vmem:[#allocation7 + $0x194] ss:$24 sps:$4 sm:$0xff]   ;;  %v12859_v20 = vpack.c.bf16 %v6605_v2, %v6604_v1  ;;  %v14695_v2 = vld [vmem:[#allocation7 + $0x224] ss:$24 sps:$4 sm:$0xff]  }
 0x33b   :  { %6453 = vmatprep.mubr.bf16.mxu0 %v16061_v45  ;;  %v6580_v45 = vld [vmem:[%s17453_s9 + $0xc0] sm:$0xff] }
 0x33c   :  { %6424 = vmatpush1.bf16.msra.mxu0 %v14663_v12  ;;  %v12843_v63 = vpack.c.bf16 %v6581_v56, %v6580_v45  ;;  %v6569_v12 = vld [vmem:[%s17453_s9 + $0x68] sm:$0xff] }
 0x33d   :  { %12834 = vmatpush3.bf16.msra.mxu1 %v12833_v36  ;;  %6425 = vmatprep.subr.bf16.mxu0 %v14668_v48  ;;  %v2561_v48 = vrot.slane %v16075_v43, %v16250_v25  ;;  %v12853_v53 = vpack.c.bf16 %v6569_v12, %v6568_v31  ;;  %v6570_v43 = vld [vmem:[%s17453_s9 + $0x70] sm:$0xff] }
 0x33e   :  { %12836 = vmatprep.subr.bf16.mxu1 %v12835_v37  ;;  %v6590_v12 = vld [vmem:[%s17453_s9 + $0x110] sm:$0xff] }
 0x340   :  { %6426 = vmatpush1.bf16.msra.mxu0 %v14666_v47 }
 0x341   :  { %12838 = vmatpush3.bf16.msra.mxu1 %v12837_v49  ;;  %6427 = vmatprep.subr.bf16.mxu0 %v14671_v51 }
 0x342   :  { %12840 = vmatprep.subr.bf16.mxu1 %v12839_v52  ;;  %v14678_v52 = vld [vmem:[#allocation7 + $0x130] ss:$24 sps:$4 sm:$0xff]  }
 0x344   :  { %6428 = vmatpush1.bf16.msra.mxu0 %v14669_v58  ;;  %v14683_v58 = vld [vmem:[#allocation7 + $0x164] ss:$24 sps:$4 sm:$0xff]  }
 0x345   :  { %12842 = vmatpush3.bf16.msra.mxu1 %v12841_v59  ;;  %6429 = vmatprep.subr.bf16.mxu0 %v14674_v61  ;;  %v12855_v59 = vpack.c.bf16 %v6587_v41, %v6586_v38  ;;  %v6571_v61 = vld [vmem:[%s17453_s9 + $0x78] sm:$0xff]  ;;  %v6609_v38 = vld [vmem:[%s17453_s9 + $0x1a8] sm:$0xff]  ;;  %v14869_v41 = vld [vmem:[#allocation2] sm:$0xff] }
 0x346   :  { %12844 = vmatprep.subr.bf16.mxu1 %v12843_v63 }
 0x348   :  { %6430 = vmatpush1.bf16.msra.mxu0 %v14672_v4 }
 0x349   :  { %12846 = vmatpush3.bf16.msra.mxu1 %v12845_v10  ;;  %6431 = vmatprep.subr.bf16.mxu0 %v14677_v13  ;;  %v14681_v10 = vld [vmem:[#allocation7 + $0x160] ss:$24 sps:$4 sm:$0xff]   ;;  %v12857_v13 = vpack.c.bf16 %v6571_v61, %v6570_v43  ;;  %v14870_v43 = vld [vmem:[#allocation2 + $0x18] sm:$0xff] }
 0x34a   :  { %12848 = vmatprep.subr.bf16.mxu1 %v12847_v34  ;;  %v4265_v36 = vpop.f32.mrb[8].mxu0  ;;  %v14690_v61 = vld [vmem:[#allocation7 + $0x1f0] ss:$24 sps:$4 sm:$0xff]  }
 0x34b   :  { %v16263_v37 = vpop.f32.mrb[8].mxu1  ;;  %v16271_v42 = vadd.f32 %v4265_v36, %v2557_v39  ;;  %v4267_v44 = vpop.f32.mrb[9].mxu0  ;;  %v6591_v36 = vld [vmem:[%s17453_s9 + $0x118] sm:$0xff] }
 0x34c   :  { %v16277_v47 = vpop.f32.mrb[9].mxu1  ;;  %v4269_v49 = vpop.f32.mrb[10].mxu0  ;;  %6432 = vmatpush1.bf16.msra.mxu0 %v14675_v26  ;;  %v16290_v63 = vadd.f32 %v4267_v44, %v2561_v48  ;;  %v6607_v26 = vld [vmem:[%s17453_s9 + $0x198] sm:$0xff]  ;;  %v14687_v44 = vld [vmem:[#allocation7 + $0x1c0] ss:$24 sps:$4 sm:$0xff]  }
 0x34d   :  { %12850 = vmatpush3.bf16.msra.mxu1 %v12849_v28  ;;  %v4398_v51 = vpop.f32.mrb[10].mxu1  ;;  %v16279_v54 = vadd.f32 %v4269_v49, %v2557_v39  ;;  %v4271_v45 = vpop.f32.mrb[11].mxu0  ;;  %6433 = vmatprep.subr.bf16.mxu0 %v14680_v30  ;;  %v6606_v39 = vld [vmem:[%s17453_s9 + $0x190] sm:$0xff]  ;;  %v14684_v28 = vld [vmem:[#allocation7 + $0x190] ss:$24 sps:$4 sm:$0xff]   ;;  %v12861_v30 = vpack.c.bf16 %v6589_v23, %v6588_v22  ;;  %v12865_v49 = vpack.c.bf16 %v6591_v36, %v6590_v12  ;;  %v6613_v22 = vld [vmem:[%s17453_s9 + $0x1c8] sm:$0xff] }
 0x34e   :  { %v16282_v56 = vadd.f32 %v4398_v51, %v16275_v32  ;;  %12852 = vmatprep.subr.bf16.mxu1 %v12851_v50  ;;  %v16292_v21 = vadd.f32 %v4271_v45, %v2561_v48  ;;  %v14689_v50 = vld [vmem:[#allocation7 + $0x1c4] ss:$24 sps:$4 sm:$0xff]   ;;  %v12863_v31 = vpack.c.bf16 %v6607_v26, %v6606_v39  ;;  %v6608_v48 = vld [vmem:[%s17453_s9 + $0x1a0] sm:$0xff]  ;;  %v14693_v23 = vld [vmem:[#allocation7 + $0x220] ss:$24 sps:$4 sm:$0xff]  }
 0x34f   :  { %v16302_v3 = vpack.i.bf16 %v16279_v54, %v16271_v42  ;;  %v14692_v51 = vld [vmem:[#allocation7 + $0x1f4] ss:$24 sps:$4 sm:$0xff]   ;;  %v6593_v45 = vld [vmem:[%s17453_s9 + $0x128] sm:$0xff]  ;;  %v14696_v36 = vld [vmem:[#allocation7 + $0x250] ss:$24 sps:$4 sm:$0xff]  }
 0x350   :  { %v13052_v4 = vpack.c.bf16 %v16292_v21, %v16290_v63  ;;  %6434 = vmatpush1.bf16.msra.mxu0 %v14678_v52  ;;  %v13378_v34 = vpack.i.bf16 %v16292_v21, %v16290_v63  ;;  %v12867_v52 = vpack.c.bf16 %v6609_v38, %v6608_v48  ;;  %v14698_v26 = vld [vmem:[#allocation7 + $0x254] ss:$24 sps:$4 sm:$0xff]   ;;  %v14701_v38 = vld [vmem:[#allocation7 + $0x284] ss:$24 sps:$4 sm:$0xff]  }
 0x351   :  { %12854 = vmatpush3.bf16.msra.mxu1 %v12853_v53  ;;  %6435 = vmatprep.subr.bf16.mxu0 %v14683_v58  ;;  %v6592_v53 = vld [vmem:[%s17453_s9 + $0x120] sm:$0xff]  ;;  %v6610_v58 = vld [vmem:[%s17453_s9 + $0x1b0] sm:$0xff]  ;;  %v6615_v12 = vld [vmem:[%s17453_s9 + $0x1d8] sm:$0xff] }
 0x352   :  { %12856 = vmatprep.subr.bf16.mxu1 %v12855_v59  ;;  %v6611_v59 = vld [vmem:[%s17453_s9 + $0x1b8] sm:$0xff]  ;;  %v12869_v1 = vpack.c.bf16 %v6593_v45, %v6592_v53  ;;  %v14699_v53 = vld [vmem:[#allocation7 + $0x280] ss:$24 sps:$4 sm:$0xff]  }
 0x354   :  { %6436 = vmatpush1.bf16.msra.mxu0 %v14681_v10  ;;  %v12871_v10 = vpack.c.bf16 %v6611_v59, %v6610_v58  ;;  %v14704_v58 = vld [vmem:[#allocation7 + $0x2b4] ss:$24 sps:$4 sm:$0xff]  }
 0x355   :  { %12858 = vmatpush3.bf16.msra.mxu1 %v12857_v13  ;;  %6437 = vmatprep.subr.bf16.mxu0 %v14686_v16  ;;  %v6594_v13 = vld [vmem:[%s17453_s9 + $0x130] sm:$0xff]  ;;  %v6595_v16 = vld [vmem:[%s17453_s9 + $0x138] sm:$0xff] }
 0x356   :  { %12860 = vmatprep.subr.bf16.mxu1 %v12859_v20  ;;  %v6612_v20 = vld [vmem:[%s17453_s9 + $0x1c0] sm:$0xff]  ;;  %v12873_v39 = vpack.c.bf16 %v6595_v16, %v6594_v13  ;;  %v14707_v16 = vld [vmem:[#allocation7 + $0x2e4] ss:$24 sps:$4 sm:$0xff]  }
 0x358   :  { %6724 = vmatmul.mubr.f32.vlgmr.msra.gmra.mrb[16].mxu1 %v14869_v41  ;;  %6438 = vmatpush1.bf16.msra.mxu0 %v14684_v28  ;;  %v12875_v28 = vpack.c.bf16 %v6613_v22, %v6612_v20  ;;  %v6602_v22 = vld [vmem:[%s17453_s9 + $0x170] sm:$0xff] }
 0x359   :  { %12862 = vmatpush3.bf16.msra.mxu1 %v12861_v30  ;;  %6439 = vmatprep.subr.bf16.mxu0 %v14689_v50  ;;  %v6596_v30 = vld [vmem:[%s17453_s9 + $0x140] sm:$0xff]  ;;  %v6597_v50 = vld [vmem:[%s17453_s9 + $0x148] sm:$0xff] }
 0x35a   :  { %12864 = vmatprep.subr.bf16.mxu1 %v12863_v31  ;;  %6793 = vmatprep.mubr.f32.mxu1 %v14870_v43  ;;  %v6614_v31 = vld [vmem:[%s17453_s9 + $0x1d0] sm:$0xff]  ;;  %v12877_v48 = vpack.c.bf16 %v6597_v50, %v6596_v30  ;;  %v6600_v43 = vld [vmem:[%s17453_s9 + $0x160] sm:$0xff] }
 0x35b   :  { %v12879_v41 = vpack.c.bf16 %v6615_v12, %v6614_v31  ;;  %v14710_v50 = vld [vmem:[#allocation7 + $0x314] ss:$24 sps:$4 sm:$0xff]  }
 0x35c   :  { %6440 = vmatpush1.bf16.msra.mxu0 %v14687_v44  ;;  %v6598_v44 = vld [vmem:[%s17453_s9 + $0x150] sm:$0xff]  ;;  %v6620_v12 = vld [vmem:[%s17453_s9 + $0x200] sm:$0xff] }
 0x35d   :  { %12866 = vmatpush3.bf16.msra.mxu1 %v12865_v49  ;;  %6441 = vmatprep.subr.bf16.mxu0 %v14692_v51  ;;  %v6599_v49 = vld [vmem:[%s17453_s9 + $0x158] sm:$0xff]  ;;  %v6616_v51 = vld [vmem:[%s17453_s9 + $0x1e0] sm:$0xff] }
 0x35e   :  { %12868 = vmatprep.subr.bf16.mxu1 %v12867_v52  ;;  %v6617_v52 = vld [vmem:[%s17453_s9 + $0x1e8] sm:$0xff]  ;;  %v12881_v45 = vpack.c.bf16 %v6599_v49, %v6598_v44 }
 0x35f   :  { %v12883_v59 = vpack.c.bf16 %v6617_v52, %v6616_v51  ;;  %v14713_v49 = vld [vmem:[#allocation7 + $0x344] ss:$24 sps:$4 sm:$0xff]  }
 0x360   :  { %6442 = vmatpush1.bf16.msra.mxu0 %v14690_v61  ;;  %v6601_v61 = vld [vmem:[%s17453_s9 + $0x168] sm:$0xff]  ;;  %v6622_v52 = vld [vmem:[%s17453_s9 + $0x210] sm:$0xff] }
 0x361   :  { %12870 = vmatpush3.bf16.msra.mxu1 %v12869_v1  ;;  %6443 = vmatprep.subr.bf16.mxu0 %v14695_v2  ;;  %v6618_v1 = vld [vmem:[%s17453_s9 + $0x1f0] sm:$0xff]  ;;  %v6619_v2 = vld [vmem:[%s17453_s9 + $0x1f8] sm:$0xff]  ;;  %v12885_v13 = vpack.c.bf16 %v6601_v61, %v6600_v43 }
 0x362   :  { %12872 = vmatprep.subr.bf16.mxu1 %v12871_v10  ;;  %v14702_v10 = vld [vmem:[#allocation7 + $0x2b0] ss:$24 sps:$4 sm:$0xff]   ;;  %v12887_v20 = vpack.c.bf16 %v6619_v2, %v6618_v1  ;;  %v14711_v43 = vld [vmem:[#allocation7 + $0x340] ss:$24 sps:$4 sm:$0xff]   ;;  %v14716_v1 = vld [vmem:[#allocation7 + $0x374] ss:$24 sps:$4 sm:$0xff]  }
 0x364   :  { %6444 = vmatpush1.bf16.msra.mxu0 %v14693_v23  ;;  %v6603_v23 = vld [vmem:[%s17453_s9 + $0x178] sm:$0xff] }
 0x365   :  { %12874 = vmatpush3.bf16.msra.mxu1 %v12873_v39  ;;  %6445 = vmatprep.subr.bf16.mxu0 %v14698_v26  ;;  %v6636_v39 = vld [vmem:[%s17453_s9 + $0x280] sm:$0xff]  ;;  %v6637_v26 = vld [vmem:[%s17453_s9 + $0x288] sm:$0xff]  ;;  %v12889_v30 = vpack.c.bf16 %v6603_v23, %v6602_v22 }
 0x366   :  { %12876 = vmatprep.subr.bf16.mxu1 %v12875_v28  ;;  %v14705_v28 = vld [vmem:[#allocation7 + $0x2e0] ss:$24 sps:$4 sm:$0xff]   ;;  %v12891_v31 = vpack.c.bf16 %v6637_v26, %v6636_v39  ;;  %v14714_v22 = vld [vmem:[#allocation7 + $0x370] ss:$24 sps:$4 sm:$0xff]   ;;  %v14719_v39 = vld [vmem:[#allocation7 + $0x3a4] ss:$24 sps:$4 sm:$0xff]  }
 0x368   :  { %6446 = vmatpush1.bf16.msra.mxu0 %v14696_v36  ;;  %v6621_v36 = vld [vmem:[%s17453_s9 + $0x208] sm:$0xff] }
 0x369   :  { %12878 = vmatpush3.bf16.msra.mxu1 %v12877_v48  ;;  %6447 = vmatprep.subr.bf16.mxu0 %v14701_v38  ;;  %v6638_v48 = vld [vmem:[%s17453_s9 + $0x290] sm:$0xff]  ;;  %v6639_v38 = vld [vmem:[%s17453_s9 + $0x298] sm:$0xff]  ;;  %v12893_v44 = vpack.c.bf16 %v6621_v36, %v6620_v12 }
 0x36a   :  { %12880 = vmatprep.subr.bf16.mxu1 %v12879_v41  ;;  %v14708_v41 = vld [vmem:[#allocation7 + $0x310] ss:$24 sps:$4 sm:$0xff]   ;;  %v12895_v51 = vpack.c.bf16 %v6639_v38, %v6638_v48  ;;  %v14722_v36 = vld [vmem:[#allocation7 + $0x3d4] ss:$24 sps:$4 sm:$0xff]  }
 0x36b   :  { %v6628_v38 = vld [vmem:[%s17453_s9 + $0x240] sm:$0xff] }
 0x36c   :  { %6448 = vmatpush1.bf16.msra.mxu0 %v14699_v53  ;;  %v6623_v53 = vld [vmem:[%s17453_s9 + $0x218] sm:$0xff] }
 0x36d   :  { %12882 = vmatpush3.bf16.msra.mxu1 %v12881_v45  ;;  %6449 = vmatprep.subr.bf16.mxu0 %v14704_v58  ;;  %v6640_v45 = vld [vmem:[%s17453_s9 + $0x2a0] sm:$0xff]  ;;  %v6641_v58 = vld [vmem:[%s17453_s9 + $0x2a8] sm:$0xff]  ;;  %v12897_v61 = vpack.c.bf16 %v6623_v53, %v6622_v52  ;;  %v16466_v53 = vpop.f32.mrb[11].mxu1 }
 0x36e   :  { %12884 = vmatprep.subr.bf16.mxu1 %v12883_v59  ;;  %v14871_v59 = vld [vmem:[#allocation2 + $0x10] sm:$0xff]  ;;  %v12899_v2 = vpack.c.bf16 %v6641_v58, %v6640_v45 }
 0x36f   :  { %v14725_v45 = vld [vmem:[#allocation7 + $0x404] ss:$24 sps:$4 sm:$0xff]  }
 0x370   :  { %6450 = vmatpush1.bf16.msra.mxu0 %v14702_v10  ;;  %v6624_v10 = vld [vmem:[%s17453_s9 + $0x220] sm:$0xff] }
 0x371   :  { %12886 = vmatpush3.bf16.msra.mxu1 %v12885_v13  ;;  %6451 = vmatprep.subr.bf16.mxu0 %v14707_v16  ;;  %v6625_v13 = vld [vmem:[%s17453_s9 + $0x228] sm:$0xff]  ;;  %v6643_v16 = vld [vmem:[%s17453_s9 + $0x2b8] sm:$0xff] }
 0x372   :  { %12888 = vmatprep.subr.bf16.mxu1 %v12887_v20  ;;  %v14872_v20 = vld [vmem:[#allocation2 + $0x28] sm:$0xff]  ;;  %v12901_v23 = vpack.c.bf16 %v6625_v13, %v6624_v10  ;;  %v14728_v13 = vld [vmem:[#allocation7 + $0x434] ss:$24 sps:$4 sm:$0xff]  }
 0x374   :  { %6452 = vmatpush1.bf16.msra.mxu0 %v14705_v28  ;;  %v6626_v28 = vld [vmem:[%s17453_s9 + $0x230] sm:$0xff] }
 0x375   :  { %12890 = vmatpush3.bf16.msra.mxu1 %v12889_v30  ;;  %6464 = vmatprep.subr.bf16.mxu0 %v14710_v50  ;;  %v6627_v30 = vld [vmem:[%s17453_s9 + $0x238] sm:$0xff]  ;;  %v6645_v50 = vld [vmem:[%s17453_s9 + $0x2c8] sm:$0xff] }
 0x376   :  { %12892 = vmatprep.subr.bf16.mxu1 %v12891_v31  ;;  %v14717_v31 = vld [vmem:[#allocation7 + $0x3a0] ss:$24 sps:$4 sm:$0xff]   ;;  %v12905_v12 = vpack.c.bf16 %v6627_v30, %v6626_v28  ;;  %v14731_v28 = vld [vmem:[#allocation7 + $0x464] ss:$24 sps:$4 sm:$0xff]  }
 0x377   :  { %6454 = vmatmul.mubr.bf16.vlgmr.msra.gmra.mrb[16].mxu0 %v16121_v62  ;;  %v6642_v62 = vld [vmem:[%s17453_s9 + $0x2b0] sm:$0xff] }
 0x378   :  { %6794 = vmatmul.mubr.f32.vlgmr.msra.gmra.mrb[18].mxu1 %v14871_v59  ;;  %6465 = vmatpush1.bf16.msra.mxu0 %v14708_v41  ;;  %v12903_v26 = vpack.c.bf16 %v6643_v16, %v6642_v62  ;;  %v6629_v41 = vld [vmem:[%s17453_s9 + $0x248] sm:$0xff]  ;;  %v6630_v59 = vld [vmem:[%s17453_s9 + $0x250] sm:$0xff]  ;;  %v6632_v16 = vld [vmem:[%s17453_s9 + $0x260] sm:$0xff] }
 0x379   :  { %12894 = vmatpush3.bf16.msra.mxu1 %v12893_v44  ;;  %6466 = vmatprep.subr.bf16.mxu0 %v14713_v49  ;;  %v6646_v44 = vld [vmem:[%s17453_s9 + $0x2d0] sm:$0xff]  ;;  %v6647_v49 = vld [vmem:[%s17453_s9 + $0x2d8] sm:$0xff]  ;;  %v12909_v52 = vpack.c.bf16 %v6629_v41, %v6628_v38  ;;  %v14977_v41 = vmov 0.0|0.0  }
 0x37a   :  { %12896 = vmatprep.subr.bf16.mxu1 %v12895_v51  ;;  %6863 = vmatprep.mubr.f32.mxu1 %v14872_v20  ;;  %v14720_v51 = vld [vmem:[#allocation7 + $0x3d0] ss:$24 sps:$4 sm:$0xff]   ;;  %v12911_v58 = vpack.c.bf16 %v6647_v49, %v6646_v44  ;;  %v6633_v20 = vld [vmem:[%s17453_s9 + $0x268] sm:$0xff] }
 0x37b   :  { %6496 = vmatprep.mubr.bf16.mxu0 %v16129_v8  ;;  %v6644_v8 = vld [vmem:[%s17453_s9 + $0x2c0] sm:$0xff]  ;;  %v14737_v38 = vld [vmem:[#allocation7 + $0x4c4] ss:$24 sps:$4 sm:$0xff]   ;;  %v14735_v49 = vld [vmem:[#allocation7 + $0x4c0] ss:$24 sps:$4 sm:$0xff]  }
 0x37c   :  { %6467 = vmatpush1.bf16.msra.mxu0 %v14711_v43  ;;  %v12907_v48 = vpack.c.bf16 %v6645_v50, %v6644_v8  ;;  %v6631_v43 = vld [vmem:[%s17453_s9 + $0x258] sm:$0xff]  ;;  %v6634_v8 = vld [vmem:[%s17453_s9 + $0x270] sm:$0xff]  ;;  %v14873_v44 = vld [vmem:[#allocation2 + $0x20] sm:$0xff] }
 0x37d   :  { %12898 = vmatpush3.bf16.msra.mxu1 %v12897_v61  ;;  %6468 = vmatprep.subr.bf16.mxu0 %v14716_v1  ;;  %v6648_v61 = vld [vmem:[%s17453_s9 + $0x2e0] sm:$0xff]  ;;  %v6649_v1 = vld [vmem:[%s17453_s9 + $0x2e8] sm:$0xff]  ;;  %v12913_v10 = vpack.c.bf16 %v6631_v43, %v6630_v59  ;;  %v6635_v50 = vld [vmem:[%s17453_s9 + $0x278] sm:$0xff] }
 0x37e   :  { %12900 = vmatprep.subr.bf16.mxu1 %v12899_v2  ;;  %v14723_v2 = vld [vmem:[#allocation7 + $0x400] ss:$24 sps:$4 sm:$0xff]   ;;  %v12915_v62 = vpack.c.bf16 %v6649_v1, %v6648_v61  ;;  %v14738_v43 = vld [vmem:[#allocation7 + $0x4f0] ss:$24 sps:$4 sm:$0xff]   ;;  %v14743_v61 = vld [vmem:[#allocation7 + $0x524] ss:$24 sps:$4 sm:$0xff]  }
 0x380   :  { %6469 = vmatpush1.bf16.msra.mxu0 %v14714_v22  ;;  %v6650_v22 = vld [vmem:[%s17453_s9 + $0x2f0] sm:$0xff] }
 0x381   :  { %12902 = vmatpush3.bf16.msra.mxu1 %v12901_v23  ;;  %6470 = vmatprep.subr.bf16.mxu0 %v14719_v39  ;;  %v6651_v23 = vld [vmem:[%s17453_s9 + $0x2f8] sm:$0xff] }
 0x382   :  { %12904 = vmatprep.subr.bf16.mxu1 %v12903_v26  ;;  %v14726_v39 = vld [vmem:[#allocation7 + $0x430] ss:$24 sps:$4 sm:$0xff]   ;;  %v12917_v26 = vpack.c.bf16 %v6633_v20, %v6632_v16  ;;  %v12919_v30 = vpack.c.bf16 %v6651_v23, %v6650_v22  ;;  %v14749_v16 = vld [vmem:[#allocation7 + $0x584] ss:$24 sps:$4 sm:$0xff]   ;;  %v14753_v23 = vld [vmem:[#allocation7 + $0x5e0] ss:$24 sps:$4 sm:$0xff]  }
 0x383   :  { %v14750_v20 = vld [vmem:[#allocation7 + $0x5b0] ss:$24 sps:$4 sm:$0xff]   ;;  %v14755_v22 = vld [vmem:[#allocation7 + $0x5e4] ss:$24 sps:$4 sm:$0xff]  }
 0x384   :  { %6471 = vmatpush1.bf16.msra.mxu0 %v14717_v31  ;;  %v14729_v31 = vld [vmem:[#allocation7 + $0x460] ss:$24 sps:$4 sm:$0xff]  }
 0x385   :  { %12906 = vmatpush3.bf16.msra.mxu1 %v12905_v12  ;;  %6472 = vmatprep.subr.bf16.mxu0 %v14722_v36  ;;  %v12921_v12 = vpack.c.bf16 %v6635_v50, %v6634_v8  ;;  %v14734_v36 = vld [vmem:[#allocation7 + $0x494] ss:$24 sps:$4 sm:$0xff]   ;;  %v14762_v50 = vld [vmem:[#allocation7 + $0x670] ss:$24 sps:$4 sm:$0xff]  }
 0x386   :  { %12908 = vmatprep.subr.bf16.mxu1 %v12907_v48  ;;  %v14732_v48 = vld [vmem:[#allocation7 + $0x490] ss:$24 sps:$4 sm:$0xff]   ;;  %v14764_v8 = vld [vmem:[#allocation7 + $0x674] ss:$24 sps:$4 sm:$0xff]  }
 0x388   :  { %6473 = vmatpush1.bf16.msra.mxu0 %v14720_v51  ;;  %v14979_v51 = vmov 0.0  }
 0x389   :  { %12910 = vmatpush3.bf16.msra.mxu1 %v12909_v52  ;;  %6474 = vmatprep.subr.bf16.mxu0 %v14725_v45  ;;  %v14740_v52 = vld [vmem:[#allocation7 + $0x4f4] ss:$24 sps:$4 sm:$0xff]  }
 0x38a   :  { %12912 = vmatprep.subr.bf16.mxu1 %v12911_v58  ;;  %v16504_v45 = vld [vmem:[%s17449_s5] sm:$0x3f] }
 0x38b   :  { %v420_v58 = vrot.slane %v16504_v45, %v16070_v40 }
 0x38c   :  { %6475 = vmatpush1.bf16.msra.mxu0 %v14723_v2  ;;  %v14741_v2 = vld [vmem:[#allocation7 + $0x520] ss:$24 sps:$4 sm:$0xff]  }
 0x38d   :  { %12914 = vmatpush3.bf16.msra.mxu1 %v12913_v10  ;;  %6476 = vmatprep.subr.bf16.mxu0 %v14728_v13  ;;  %v13179_v1 = vadd.f32 %v16039_v14, %v420_v58  ;;  %v14746_v10 = vld [vmem:[#allocation7 + $0x554] ss:$24 sps:$4 sm:$0xff]   ;;  %v14747_v14 = vld [vmem:[#allocation7 + $0x580] ss:$24 sps:$4 sm:$0xff]  }
 0x38e   :  { %12916 = vmatprep.subr.bf16.mxu1 %v12915_v62  ;;  %v14744_v62 = vld [vmem:[#allocation7 + $0x550] ss:$24 sps:$4 sm:$0xff]   ;;  %v14782_v58 = vld [vmem:[#allocation7 + $0x794] ss:$24 sps:$4 sm:$0xff]  }
 0x38f   :  { %v16521_v13 = vmul.f32 0.14433756, %v13179_v1  ;;  %v14783_v1 = vld [vmem:[#allocation7 + $0x7c0] ss:$24 sps:$4 sm:$0xff]  }
 0x390   :  { %6477 = vmatpush1.bf16.msra.mxu0 %v14726_v39  ;;  %v14758_v39 = vld [vmem:[#allocation7 + $0x614] ss:$24 sps:$4 sm:$0xff]  }
 0x391   :  { %12918 = vmatpush3.bf16.msra.mxu1 %v12917_v26  ;;  %6478 = vmatprep.subr.bf16.mxu0 %v14731_v28  ;;  %v14756_v26 = vld [vmem:[#allocation7 + $0x610] ss:$24 sps:$4 sm:$0xff]   ;;  %v14761_v28 = vld [vmem:[#allocation7 + $0x644] ss:$24 sps:$4 sm:$0xff]  }
 0x392   :  { %12920 = vmatprep.subr.bf16.mxu1 %v12919_v30  ;;  %v14759_v30 = vld [vmem:[#allocation7 + $0x640] ss:$24 sps:$4 sm:$0xff]  }
 0x394   :  { %6479 = vmatpush1.bf16.msra.mxu0 %v14729_v31  ;;  %v14767_v31 = vld [vmem:[#allocation7 + $0x6a4] ss:$24 sps:$4 sm:$0xff]  }
 0x395   :  { %12922 = vmatpush3.bf16.msra.mxu1 %v12921_v12  ;;  %6480 = vmatprep.subr.bf16.mxu0 %v14734_v36  ;;  %v14765_v12 = vld [vmem:[#allocation7 + $0x6a0] ss:$24 sps:$4 sm:$0xff]   ;;  %v14770_v36 = vld [vmem:[#allocation7 + $0x6d4] ss:$24 sps:$4 sm:$0xff]  }
 0x396   :  { %12923 = vmatprep.subr.bf16.mxu1 %v14977_v41 }
 0x398   :  { %6864 = vmatmul.mubr.f32.vlgmr.msra.gmra.mrb[20].mxu1 %v14873_v44  ;;  %6481 = vmatpush1.bf16.msra.mxu0 %v14732_v48  ;;  %v14768_v48 = vld [vmem:[#allocation7 + $0x6d0] ss:$24 sps:$4 sm:$0xff]   ;;  %v14776_v44 = vld [vmem:[#allocation7 + $0x734] ss:$24 sps:$4 sm:$0xff]  }
 0x399   :  { %12367 = vmatprep.mubr.msk.f32.mxu1 %vm14978_vm1, %v14979_v51  ;;  %6482 = vmatprep.subr.bf16.mxu0 %v14737_v38  ;;  %v14773_v38 = vld [vmem:[#allocation7 + $0x704] ss:$24 sps:$4 sm:$0xff]  }
 0x39c   :  { %6483 = vmatpush1.bf16.msra.mxu0 %v14735_v49  ;;  %v14779_v49 = vld [vmem:[#allocation7 + $0x764] ss:$24 sps:$4 sm:$0xff]  }
 0x39d   :  { %6484 = vmatprep.subr.bf16.mxu0 %v14740_v52  ;;  %v14777_v52 = vld [vmem:[#allocation7 + $0x760] ss:$24 sps:$4 sm:$0xff]  }
 0x39e   :  { %12926 = vmatpush3.bf16.xpose.msk.msra.mxu1 %vm16510_vm2, %v12924_v27  ;;  %v14752_v27 = vld [vmem:[#allocation7 + $0x5b4] ss:$24 sps:$4 sm:$0xff]  }
 0x39f   :  { %12927 = vmatprep.subr.bf16.mxu1 %v14977_v41 }
 0x3a0   :  { %6485 = vmatpush1.bf16.msra.mxu0 %v14738_v43  ;;  %v14780_v43 = vld [vmem:[#allocation7 + $0x790] ss:$24 sps:$4 sm:$0xff]  }
 0x3a1   :  { %6486 = vmatprep.subr.bf16.mxu0 %v14743_v61  ;;  %v14785_v61 = vld [vmem:[#allocation7 + $0x7c4] ss:$24 sps:$4 sm:$0xff]  }
 0x3a4   :  { %6487 = vmatpush1.bf16.msra.mxu0 %v14741_v2  ;;  %v14788_v2 = vld [vmem:[#allocation7 + $0x7f4] ss:$24 sps:$4 sm:$0xff]  }
 0x3a5   :  { %12368 = vmatmul.mubr.msk.f32.vlgmr.msra.gmra.mrb[22].mxu1 %vm6869_vm0, %v16521_v13  ;;  %6488 = vmatprep.subr.bf16.mxu0 %v14746_v10  ;;  %v14786_v10 = vld [vmem:[#allocation7 + $0x7f0] ss:$24 sps:$4 sm:$0xff]  }
 0x3a6   :  { %12374 = vmatprep.mubr.msk.f32.mxu1 %vm14978_vm1, %v14979_v51 }
 0x3a8   :  { %6489 = vmatpush1.bf16.msra.mxu0 %v14744_v62  ;;  %v14791_v62 = vld [vmem:[#allocation7 + $0x824] ss:$24 sps:$4 sm:$0xff]  }
 0x3a9   :  { %6490 = vmatprep.subr.bf16.mxu0 %v14749_v16  ;;  %v14789_v16 = vld [vmem:[#allocation7 + $0x820] ss:$24 sps:$4 sm:$0xff]  }
 0x3ac   :  { %6491 = vmatpush1.bf16.msra.mxu0 %v14747_v14  ;;  %v14794_v14 = vld [vmem:[#allocation7 + $0x854] ss:$24 sps:$4 sm:$0xff]  }
 0x3ad   :  { %6492 = vmatprep.subr.bf16.mxu0 %v14752_v27  ;;  %v14792_v27 = vld [vmem:[#allocation7 + $0x850] ss:$24 sps:$4 sm:$0xff]  }
 0x3b0   :  { %6493 = vmatpush1.bf16.msra.mxu0 %v14750_v20  ;;  %v14797_v20 = vld [vmem:[#allocation7 + $0x884] ss:$24 sps:$4 sm:$0xff]  }
 0x3b1   :  { %6494 = vmatprep.subr.bf16.mxu0 %v14755_v22  ;;  %v14795_v22 = vld [vmem:[#allocation7 + $0x880] ss:$24 sps:$4 sm:$0xff]  }
 0x3b4   :  { %6495 = vmatpush1.bf16.msra.mxu0 %v14753_v23  ;;  %v14800_v23 = vld [vmem:[#allocation7 + $0x8b4] ss:$24 sps:$4 sm:$0xff]  }
 0x3b5   :  { %6507 = vmatprep.subr.bf16.mxu0 %v14758_v39  ;;  %v14798_v39 = vld [vmem:[#allocation7 + $0x8b0] ss:$24 sps:$4 sm:$0xff]  }
 0x3b7   :  { %6497 = vmatmul.mubr.bf16.vlgmr.msra.gmra.mrb[16].mxu0 %v16141_v33  ;;  %v14771_v33 = vld [vmem:[#allocation7 + $0x700] ss:$24 sps:$4 sm:$0xff]  }
 0x3b8   :  { %6508 = vmatpush1.bf16.msra.mxu0 %v14756_v26  ;;  %6539 = vmatprep.mubr.bf16.mxu0 %v16149_v5  ;;  %v14774_v5 = vld [vmem:[#allocation7 + $0x730] ss:$24 sps:$4 sm:$0xff]   ;;  %v14803_v26 = vld [vmem:[#allocation7 + $0x8e4] ss:$24 sps:$4 sm:$0xff]  }
 0x3b9   :  { %6509 = vmatprep.subr.bf16.mxu0 %v14761_v28  ;;  %v14801_v28 = vld [vmem:[#allocation7 + $0x8e0] ss:$24 sps:$4 sm:$0xff]  }
 0x3bc   :  { %6510 = vmatpush1.bf16.msra.mxu0 %v14759_v30  ;;  %v13330_v30 = vpop.permute.xlu0 %13329 }
 0x3bd   :  { %6511 = vmatprep.subr.bf16.mxu0 %v14764_v8  ;;  %v13332_v8 = vunpack.i.h.bf16 %v13330_v30 }
 0x3c0   :  { %6512 = vmatpush1.bf16.msra.mxu0 %v14762_v50  ;;  %v13331_v50 = vunpack.i.l.bf16 %v13330_v30 }
 0x3c1   :  { %6513 = vmatprep.subr.bf16.mxu0 %v14767_v31 }
 0x3c2   :  { %v12988_v31 = vpack.c.bf16 %v13332_v8, %v13331_v50 }
 0x3c4   :  { %6514 = vmatpush1.bf16.msra.mxu0 %v14765_v12  ;;  %v7897_v12 = vpop.permute.xlu0 %7896 }
 0x3c5   :  { %6515 = vmatprep.subr.bf16.mxu0 %v14770_v36  ;;  %v16540_v36 = vld [vmem:[%s17451_s7] sm:$0x3f]  ;;  %s14980_s7 = smov 16  }
 0x3c8   :  { %6516 = vmatpush1.bf16.msra.mxu0 %v14768_v48  ;;  %v16548_v48 = vrot.slane %v16540_v36, %v16233_v11 }
 0x3c9   :  { %6517 = vmatprep.subr.bf16.mxu0 %v14773_v38  ;;  %v4700_v38 = vrot.slane %v16540_v36, %v16078_v46 }
 0x3cc   :  { %6518 = vmatpush1.bf16.msra.mxu0 %v14771_v33 }
 0x3cd   :  { %6519 = vmatprep.subr.bf16.mxu0 %v14776_v44 }
 0x3d0   :  { %6520 = vmatpush1.bf16.msra.mxu0 %v14774_v5 }
 0x3d1   :  { %6521 = vmatprep.subr.bf16.mxu0 %v14779_v49 }
 0x3d4   :  { %6522 = vmatpush1.bf16.msra.mxu0 %v14777_v52 }
 0x3d5   :  { %6523 = vmatprep.subr.bf16.mxu0 %v14782_v58 }
 0x3d8   :  { %6524 = vmatpush1.bf16.msra.mxu0 %v14780_v43 }
 0x3d9   :  { %6525 = vmatprep.subr.bf16.mxu0 %v14785_v61 }
 0x3dc   :  { %6526 = vmatpush1.bf16.msra.mxu0 %v14783_v1 }
 0x3dd   :  { %6527 = vmatprep.subr.bf16.mxu0 %v14788_v2 }
 0x3e0   :  { %6528 = vmatpush1.bf16.msra.mxu0 %v14786_v10 }
 0x3e1   :  { %6529 = vmatprep.subr.bf16.mxu0 %v14791_v62 }
 0x3e4   :  { %6530 = vmatpush1.bf16.msra.mxu0 %v14789_v16 }
 0x3e5   :  { %6531 = vmatprep.subr.bf16.mxu0 %v14794_v14 }
 0x3e8   :  { %6532 = vmatpush1.bf16.msra.mxu0 %v14792_v27 }
 0x3e9   :  { %6533 = vmatprep.subr.bf16.mxu0 %v14797_v20  ;;  %v13338_v20 = vpack.i.bf16 %v16271_v42, %v16094_v60 }
 0x3ec   :  { %6534 = vmatpush1.bf16.msra.mxu0 %v14795_v22  ;;  %v428_v22 = vrot.slane %v16504_v45, %v16233_v11  ;;  %v11879_v11 = vld [vmem:[%s17454_s10] ss:$0 sm:$0xff] }
 0x3ed   :  { %6535 = vmatprep.subr.bf16.mxu0 %v14800_v23  ;;  %v13343_v23 = vpack.i.bf16 %v16279_v54, %v16098_v6 }
 0x3f0   :  { %6536 = vmatpush1.bf16.msra.mxu0 %v14798_v39  ;;  %v13181_v39 = vadd.f32 %v16041_v15, %v428_v22 }
 0x3f1   :  { %6537 = vmatprep.subr.bf16.mxu0 %v14803_v26 }
 0x3f2   :  { %v16592_v26 = vmul.f32 0.14433756, %v13181_v39  ;;  %v4712_v39 = vrot.slane %v16540_v36, %v16253_v29 }
 0x3f4   :  { %6538 = vmatpush1.bf16.msra.mxu0 %v14801_v28 }
 0x3f5   :  { %12987 = vmatprep.subr.bf16.mxu0 %v14977_v41 }
 0x3f7   :  { %6540 = vmatmul.mubr.bf16.vlgmr.msra.gmra.mrb[16].mxu0 %v16179_v24  ;;  %v4696_v24 = vrot.slane %v16540_v36, %v16070_v40 }
 0x3f8   :  { %12483 = vmatprep.mubr.msk.f32.mxu0 %vm14978_vm1, %v14979_v51 }
 0x3fd   :  { %12990 = vmatpush3.bf16.xpose.msk.msra.mxu0 %vm16510_vm2, %v12988_v31 }
 0x3fe   :  { %12991 = vmatprep.subr.bf16.mxu0 %v14977_v41 }
 0x404   :  { %12484 = vmatmul.mubr.msk.f32.vlgmr.msra.gmra.mrb[20].mxu0 %vm6869_vm0, %v7897_v12 }
 0x405   :  { %12490 = vmatprep.mubr.msk.f32.mxu0 %vm14978_vm1, %v14979_v51 }
 0x40a   :  { %v6283_v33 = vpop.f32.mrb[12].mxu0 }
 0x40b   :  { %v6412_v44 = vpop.f32.mrb[12].mxu1  ;;  %v16552_v5 = vadd.f32 %v6283_v33, %v4696_v24  ;;  %v6285_v49 = vpop.f32.mrb[13].mxu0 }
 0x40c   :  { %v16555_v52 = vadd.f32 %v6412_v44, %v16548_v48  ;;  %v16557_v58 = vpop.f32.mrb[13].mxu1  ;;  %v16559_v43 = vadd.f32 %v6285_v49, %v4700_v38  ;;  %v6287_v40 = vpop.f32.mrb[14].mxu0 }
 0x40d   :  { %v16561_v61 = vpop.f32.mrb[14].mxu1  ;;  %v16563_v1 = vadd.f32 %v6287_v40, %v4696_v24  ;;  %v6289_v2 = vpop.f32.mrb[15].mxu0 }
 0x40e   :  { %v16565_v10 = vpop.f32.mrb[15].mxu1  ;;  %v16567_v46 = vadd.f32 %v6289_v2, %v4700_v38 }
 0x40f   :  { %v12928_v16 = vpack.c.bf16 %v16563_v1, %v16552_v5 }
 0x410   :  { %v16577_v27 = vpack.i.bf16 %v16567_v46, %v16559_v43 }
 0x411   :  { %12929 = vmatpush3.bf16.msra.mxu1 %v12928_v16 }
 0x412   :  { %13334 = vrot.lane.b32.xlu0 %v16577_v27, %s14976_s26  ;;  %12930 = vmatprep.subr.bf16.mxu1 %v14977_v41 }
 0x416   :  { %13344 = vrot.lane.b32.xlu0 %v13343_v23, %s14980_s7  ;;  %v16607_v23 = vsub.s32 5, %v16067_v35 }
 0x41a   :  { %8150 = vrot.lane.b32.xlu0 %v16111_v19, %s14980_s7 }
 0x41e   :  { %8152 = vrot.lane.b32.xlu0 %v16592_v26, %s14980_s7 }
 0x42b   :  { %v12082_v28 = vpop.f32.mrb[16].mxu1 }
 0x42c   :  { %v12083_v30 = vpop.f32.mrb[17].mxu1 }
 0x42d   :  { %v12084_v8 = vadd.f32 %v12083_v30, %v12082_v28  ;;  %v4716_v28 = vrot.slane %v16540_v36, %v16607_v23 }
 0x42f   :  { %v6726_v54 = vadd.f32 %v12084_v8, %v11879_v11 }
 0x44b   :  { %v12117_v50 = vpop.f32.mrb[18].mxu1 }
 0x44c   :  { %v12118_v31 = vpop.f32.mrb[19].mxu1 }
 0x44d   :  { %v12119_v12 = vadd.f32 %v12118_v31, %v12117_v50 }
 0x44f   :  { %v16599_v15 = vadd.f32 %v12119_v12, %v6726_v54 }
 0x46b   :  { %v12152_v24 = vpop.f32.mrb[20].mxu1 }
 0x46c   :  { %v12153_v38 = vpop.f32.mrb[21].mxu1 }
 0x46d   :  { %v16601_v33 = vadd.f32 %v12153_v38, %v12152_v24 }
 0x478   :  { %v16603_v44 = vpop.f32.mrb[22].mxu1 }
 0x479   :  { %v12369_v49 = vpop.f32.mrb[23].mxu1 }
 0x484   :  { %v13335_v40 = vpop.permute.xlu0 %13334 }
 0x485   :  { %v13337_v2 = vunpack.i.h.bf16 %v13335_v40  ;;  %v13336_v16 = vunpack.i.l.bf16 %v13335_v40 }
 0x487   :  { %v12992_v22 = vpack.c.bf16 %v13337_v2, %v13336_v16 }
 0x489   :  { %12993 = vmatpush3.bf16.msra.mxu0 %v12992_v22 }
 0x48a   :  { %13003 = vmatprep.subr.bf16.mxu0 %v14977_v41 }
 0x4ca   :  { %v6541_v30 = vpop.f32.mrb[16].mxu0 }
 0x4cb   :  { %v16613_v8 = vadd.f32 %v6541_v30, %v4712_v39  ;;  %v6543_v11 = vpop.f32.mrb[17].mxu0 }
 0x4cc   :  { %v16615_v54 = vadd.f32 %v6543_v11, %v4716_v28  ;;  %v6545_v50 = vpop.f32.mrb[18].mxu0 }
 0x4cd   :  { %v16617_v31 = vadd.f32 %v6545_v50, %v4712_v39  ;;  %v6547_v12 = vpop.f32.mrb[19].mxu0 }
 0x4ce   :  { %v16619_v24 = vadd.f32 %v6547_v12, %v4716_v28  ;;  %v16637_v12 = vadd.f32 %v16561_v61, %v16548_v48 }
 0x4cf   :  { %v16625_v38 = vpack.i.bf16 %v16617_v31, %v16613_v8 }
 0x4d0   :  { %v16631_v40 = vpack.i.bf16 %v16619_v24, %v16615_v54 }
 0x4d7   :  { %v7974_v2 = vpop.f32.mrb[20].mxu0 }
 0x4d8   :  { %v12485_v16 = vpop.f32.mrb[21].mxu0  ;;  %v7978_v22 = vsel %vm6949_vm3, %v7974_v2, -inf }
 0x4d9   :  { %7979 = vmax.xlane.f32.xlu1 %v7978_v22  ;;  %v13353_v16 = vpack.i.bf16 %v16637_v12, %v16567_v46 }
 0x566   :  { %v7980_v39 = vpop.xlane.xlu1 %7979 }
 0x567   :  { %v7981_v28 = vsub.f32 %v7974_v2, %v7980_v39  ;;  %v14875_v2 = vld [vmem:[%s17450_s6] sm:$0x3f]  ;;  %s14981_s6 = smov 96  }
 0x568   :  { %v2569_v22 = vrot.slane %v14875_v2, %v16607_v23 }
 0x569   :  { %v7982_v30 = vmul.f32 1.442695, %v7981_v28  ;;  %v13345_v28 = vpop.permute.xlu0 %13344 }
 0x56a   :  { %v16650_v39 = vadd.f32 %v16277_v47, %v2569_v22  ;;  %v16653_v48 = vadd.f32 %v16466_v53, %v2569_v22  ;;  %v13346_v62 = vunpack.i.l.bf16 %v13345_v28 }
 0x56b   :  { %14804 = vpow2.f32 %v7982_v30 }
 0x56c   :  { %v16657_v42 = vpack.i.bf16 %v16653_v48, %v16650_v39 }
 0x56d   :  { %v8151_v49 = vpop.permute.xlu0 %8150 }
 0x575   :  { %v14805_v11 = vpop.eup %14804 }
 0x576   :  { %v7984_v50 = vsel %vm6949_vm3, %v14805_v11, 0.0 }
 0x577   :  { %7985 = vadd.xlane.f32.xlu1 %v7984_v50 }
 0x588   :  { %13339 = vrot.lane.b32.xlu1 %v13338_v20, %s14980_s7 }
 0x58c   :  { %13354 = vrot.lane.b32.xlu1 %v13353_v16, %s14980_s7  ;;  %v13347_v16 = vunpack.i.h.bf16 %v13345_v28 }
 0x58e   :  { %v8166_v47 = vsel %vm6949_vm3, %v13346_v62, %v13347_v16 }
 0x604   :  { %v7986_v61 = vpop.xlane.xlu1 %7985 }
 0x605   :  { %14806 = vrcp.f32 %v7986_v61  ;;  %v8153_v61 = vpop.permute.xlu0 %8152 }
 0x608   :  { %v13340_v20 = vpop.permute.xlu1 %13339 }
 0x609   :  { %v13342_v30 = vunpack.i.h.bf16 %v13340_v20  ;;  %v13341_v50 = vunpack.i.l.bf16 %v13340_v20  ;;  %v8154_v20 = vsel %vm6949_vm3, %v8151_v49, %v8153_v61 }
 0x60b   :  { %v8165_v2 = vsel %vm6949_vm3, %v13341_v50, %v13342_v30  ;;  %v13348_v50 = vpack.i.bf16 %v16555_v52, %v16559_v43 }
 0x60c   :  { %v13004_v22 = vpack.c.bf16 %v8166_v47, %v8165_v2  ;;  %v13355_v49 = vpop.permute.xlu1 %13354 }
 0x60d   :  { %v13357_v47 = vunpack.i.h.bf16 %v13355_v49 }
 0x60f   :  { %v14807_v35 = vpop.eup %14806 }
 0x610   :  { %v7988_v53 = vmul.f32 %v14807_v35, %v14805_v11 }
 0x612   :  { %12491 = vmatmul.mubr.msk.f32.vlgmr.msra.gmra.mrb[22].mxu0 %vm6949_vm3, %v7988_v53  ;;  %v13356_v53 = vunpack.i.l.bf16 %v13355_v49 }
 0x613   :  { %13006 = vmatpush3.bf16.xpose.msk.msra.mxu0 %vm16510_vm2, %v13004_v22  ;;  %12512 = vmatprep.mubr.msk.f32.mxu0 %vm14978_vm1, %v14979_v51 }
 0x614   :  { %13007 = vmatprep.subr.bf16.mxu0 %v14977_v41 }
 0x61a   :  { %12513 = vmatmul.mubr.msk.f32.vlgmr.msra.gmra.mrb[24].mxu0 %vm6869_vm0, %v8154_v20 }
 0x61b   :  { %12519 = vmatprep.mubr.msk.f32.mxu0 %vm14978_vm1, %v14979_v51 }
 0x6e5   :  { %v16671_v62 = vpop.f32.mrb[22].mxu0 }
 0x6e6   :  { %v12492_v35 = vpop.f32.mrb[23].mxu0 }
 0x6ed   :  { %v8239_v11 = vpop.f32.mrb[24].mxu0 }
 0x6ee   :  { %v12514_v28 = vpop.f32.mrb[25].mxu0  ;;  %v8243_v30 = vsel %vm6949_vm3, %v8239_v11, -inf }
 0x6ef   :  { %8244 = vmax.xlane.f32.xlu0 %v8243_v30  ;;  %v8265_v28 = vsel %vm6949_vm3, %v13356_v53, %v13357_v47 }
 0x705   :  { %13349 = vrot.lane.b32.xlu0 %v13348_v50, %s14980_s7 }
 0x709   :  { %13359 = vrot.lane.b32.xlu0 %v16302_v3, %s14981_s6 }
 0x77c   :  { %v8245_v16 = vpop.xlane.xlu0 %8244 }
 0x77d   :  { %v8246_v2 = vsub.f32 %v8239_v11, %v8245_v16 }
 0x77f   :  { %v8247_v22 = vmul.f32 1.442695, %v8246_v2 }
 0x780   :  { %v13350_v61 = vpop.permute.xlu0 %13349 }
 0x781   :  { %14808 = vpow2.f32 %v8247_v22  ;;  %v13352_v20 = vunpack.i.h.bf16 %v13350_v61  ;;  %v13351_v35 = vunpack.i.l.bf16 %v13350_v61 }
 0x783   :  { %v8264_v30 = vsel %vm6949_vm3, %v13351_v35, %v13352_v20 }
 0x784   :  { %v13008_v14 = vpack.c.bf16 %v8265_v28, %v8264_v30  ;;  %v13360_v49 = vpop.permute.xlu0 %13359  ;;  %v13363_v30 = vpack.i.bf16 %v16637_v12, %v16555_v52 }
 0x785   :  { %v13362_v16 = vunpack.i.h.bf16 %v13360_v49  ;;  %v13361_v2 = vunpack.i.l.bf16 %v13360_v49 }
 0x786   :  { %13009 = vmatpush3.bf16.msra.mxu0 %v13008_v14 }
 0x787   :  { %13019 = vmatprep.subr.bf16.mxu0 %v14977_v41  ;;  %v13020_v53 = vpack.c.bf16 %v13362_v16, %v13361_v2 }
 0x78b   :  { %v14809_v50 = vpop.eup %14808 }
 0x78c   :  { %v8249_v7 = vsel %vm6949_vm3, %v14809_v50, 0.0 }
 0x78d   :  { %8250 = vadd.xlane.f32.xlu1 %v8249_v7 }
 0x79e   :  { %8422 = vrot.lane.b32.xlu1 %v16592_v26, %s14981_s6 }
 0x81a   :  { %v8251_v11 = vpop.xlane.xlu1 %8250 }
 0x81b   :  { %14810 = vrcp.f32 %v8251_v11 }
 0x81e   :  { %v8423_v7 = vpop.permute.xlu1 %8422 }
 0x825   :  { %v14811_v22 = vpop.eup %14810 }
 0x826   :  { %v8253_v47 = vmul.f32 %v14811_v22, %v14809_v50 }
 0x828   :  { %12520 = vmatmul.mubr.msk.f32.vlgmr.msra.gmra.mrb[26].mxu0 %vm6949_vm3, %v8253_v47 }
 0x829   :  { %13022 = vmatpush3.bf16.xpose.msk.msra.mxu0 %vm16510_vm2, %v13020_v53  ;;  %12541 = vmatprep.mubr.msk.f32.mxu0 %vm14978_vm1, %v14979_v51 }
 0x82a   :  { %13023 = vmatprep.subr.bf16.mxu0 %v14977_v41 }
 0x830   :  { %12542 = vmatmul.mubr.msk.f32.vlgmr.msra.gmra.mrb[28].mxu0 %vm6869_vm0, %v8423_v7 }
 0x831   :  { %12548 = vmatprep.mubr.msk.f32.mxu0 %vm14978_vm1, %v14979_v51 }
 0x8fb   :  { %v16694_v14 = vpop.f32.mrb[26].mxu0 }
 0x8fc   :  { %v12521_v61 = vpop.f32.mrb[27].mxu0 }
 0x903   :  { %v8500_v20 = vpop.f32.mrb[28].mxu0 }
 0x904   :  { %v12543_v35 = vpop.f32.mrb[29].mxu0  ;;  %v8504_v28 = vsel %vm6949_vm3, %v8500_v20, -inf }
 0x905   :  { %8505 = vmax.xlane.f32.xlu0 %v8504_v28 }
 0x91b   :  { %13364 = vrot.lane.b32.xlu0 %v13363_v30, %s14981_s6 }
 0x91f   :  { %8675 = vrot.lane.b32.xlu0 %v16592_v26, %s14982_s22 }
 0x992   :  { %v8506_v50 = vpop.xlane.xlu0 %8505 }
 0x993   :  { %v8507_v11 = vsub.f32 %v8500_v20, %v8506_v50 }
 0x995   :  { %v8508_v49 = vmul.f32 1.442695, %v8507_v11 }
 0x996   :  { %v13365_v16 = vpop.permute.xlu0 %13364 }
 0x997   :  { %14812 = vpow2.f32 %v8508_v49  ;;  %v13367_v2 = vunpack.i.h.bf16 %v13365_v16  ;;  %v13366_v22 = vunpack.i.l.bf16 %v13365_v16 }
 0x999   :  { %v13024_v47 = vpack.c.bf16 %v13367_v2, %v13366_v22 }
 0x99a   :  { %v8676_v50 = vpop.permute.xlu0 %8675 }
 0x99b   :  { %13025 = vmatpush3.bf16.msra.mxu0 %v13024_v47 }
 0x99c   :  { %13035 = vmatprep.subr.bf16.mxu0 %v14977_v41 }
 0x9a1   :  { %v14813_v53 = vpop.eup %14812 }
 0x9a2   :  { %v8510_v52 = vsel %vm6949_vm3, %v14813_v53, 0.0 }
 0x9a3   :  { %8511 = vadd.xlane.f32.xlu1 %v8510_v52 }
 0x9b4   :  { %13369 = vrot.lane.b32.xlu1 %v16302_v3, %s14982_s22 }
 0xa30   :  { %v8512_v12 = vpop.xlane.xlu1 %8511 }
 0xa31   :  { %14814 = vrcp.f32 %v8512_v12 }
 0xa34   :  { %v13370_v26 = vpop.permute.xlu1 %13369 }
 0xa35   :  { %v13372_v7 = vunpack.i.h.bf16 %v13370_v26  ;;  %v13371_v61 = vunpack.i.l.bf16 %v13370_v26  ;;  %v432_v26 = vrot.slane %v16504_v45, %v16250_v25 }
 0xa37   :  { %v13036_v28 = vpack.c.bf16 %v13372_v7, %v13371_v61  ;;  %v13182_v7 = vadd.f32 %v16045_v18, %v432_v26  ;;  %v4708_v18 = vrot.slane %v16540_v36, %v16250_v25 }
 0xa39   :  { %v16723_v61 = vmul.f32 0.14433756, %v13182_v7  ;;  %v16758_v7 = vadd.f32 %v16263_v37, %v16275_v32 }
 0xa3b   :  { %v14815_v20 = vpop.eup %14814 }
 0xa3c   :  { %v8514_v35 = vmul.f32 %v14815_v20, %v14813_v53 }
 0xa3e   :  { %12549 = vmatmul.mubr.msk.f32.vlgmr.msra.gmra.mrb[30].mxu0 %vm6949_vm3, %v8514_v35 }
 0xa3f   :  { %13038 = vmatpush3.bf16.xpose.msk.msra.mxu0 %vm16510_vm2, %v13036_v28  ;;  %12570 = vmatprep.mubr.msk.f32.mxu0 %vm14978_vm1, %v14979_v51 }
 0xa40   :  { %13039 = vmatprep.subr.bf16.mxu0 %v14977_v41 }
 0xa46   :  { %12571 = vmatmul.mubr.msk.f32.vlgmr.msra.gmra.mrb[32].mxu0 %vm6869_vm0, %v8676_v50 }
 0xa47   :  { %12577 = vmatprep.mubr.msk.f32.mxu0 %vm14978_vm1, %v14979_v51 }
 0xb11   :  { %v16715_v3 = vpop.f32.mrb[30].mxu0 }
 0xb12   :  { %v12550_v11 = vpop.f32.mrb[31].mxu0 }
 0xb19   :  { %v8753_v49 = vpop.f32.mrb[32].mxu0 }
 0xb1a   :  { %v12572_v16 = vpop.f32.mrb[33].mxu0  ;;  %v8757_v2 = vsel %vm6949_vm3, %v8753_v49, -inf }
 0xb1b   :  { %8758 = vmax.xlane.f32.xlu1 %v8757_v2  ;;  %v16743_v2 = vadd.f32 %v16565_v10, %v4708_v18 }
 0xba8   :  { %v8759_v22 = vpop.xlane.xlu1 %8758 }
 0xba9   :  { %v8760_v47 = vsub.f32 %v8753_v49, %v8759_v22 }
 0xbab   :  { %v8761_v53 = vmul.f32 1.442695, %v8760_v47 }
 0xbad   :  { %14816 = vpow2.f32 %v8761_v53 }
 0xbb7   :  { %v14817_v52 = vpop.eup %14816 }
 0xbb8   :  { %v8763_v12 = vsel %vm6949_vm3, %v14817_v52, 0.0 }
 0xbb9   :  { %8764 = vadd.xlane.f32.xlu0 %v8763_v12 }
 0xbcf   :  { %13374 = vrot.lane.b32.xlu0 %v13363_v30, %s14982_s22  ;;  %v16740_v30 = vadd.f32 %v16557_v58, %v4708_v18 }
 0xbd1   :  { %v13056_v22 = vpack.c.bf16 %v16743_v2, %v16740_v30 }
 0xbd3   :  { %9172 = vrot.lane.b32.xlu0 %v16723_v61, %s14983_s23 }
 0xc46   :  { %v8765_v20 = vpop.xlane.xlu0 %8764 }
 0xc47   :  { %14818 = vrcp.f32 %v8765_v20  ;;  %v13388_v20 = vpack.i.bf16 %v16758_v7, %v16290_v63 }
 0xc4a   :  { %v13375_v35 = vpop.permute.xlu0 %13374 }
 0xc4b   :  { %v13377_v28 = vunpack.i.h.bf16 %v13375_v35  ;;  %v13376_v50 = vunpack.i.l.bf16 %v13375_v35 }
 0xc4d   :  { %v13040_v11 = vpack.c.bf16 %v13377_v28, %v13376_v50 }
 0xc4e   :  { %v9173_v32 = vpop.permute.xlu0 %9172 }
 0xc4f   :  { %13041 = vmatpush3.bf16.msra.mxu0 %v13040_v11 }
 0xc50   :  { %13051 = vmatprep.subr.bf16.mxu0 %v14977_v41 }
 0xc51   :  { %v14819_v49 = vpop.eup %14818 }
 0xc52   :  { %v8767_v16 = vmul.f32 %v14819_v49, %v14817_v52 }
 0xc54   :  { %12578 = vmatmul.mubr.msk.f32.vlgmr.msra.gmra.mrb[34].mxu0 %vm6949_vm3, %v8767_v16 }
 0xc55   :  { %12599 = vmatprep.mubr.msk.f32.mxu0 %vm14978_vm1, %v14979_v51 }
 0xc58   :  { %13054 = vmatpush3.bf16.xpose.msk.msra.mxu0 %vm16510_vm2, %v13052_v4 }
 0xc59   :  { %13055 = vmatprep.subr.bf16.mxu0 %v14977_v41 }
 0xc5f   :  { %12600 = vmatmul.mubr.msk.f32.vlgmr.msra.gmra.mrb[36].mxu0 %vm6869_vm0, %v16723_v61 }
 0xc60   :  { %13057 = vmatpush3.bf16.msra.mxu0 %v13056_v22  ;;  %12606 = vmatprep.mubr.msk.f32.mxu0 %vm14978_vm1, %v14979_v51 }
 0xc61   :  { %13067 = vmatprep.subr.bf16.mxu0 %v14977_v41 }
 0xd27   :  { %v16752_v25 = vpop.f32.mrb[34].mxu0 }
 0xd28   :  { %v12579_v4 = vpop.f32.mrb[35].mxu0 }
 0xd32   :  { %v9003_v36 = vpop.f32.mrb[36].mxu0 }
 0xd33   :  { %v12601_v58 = vpop.f32.mrb[37].mxu0  ;;  %v9007_v10 = vsel %vm6949_vm3, %v9003_v36, -inf }
 0xd34   :  { %9008 = vmax.xlane.f32.xlu1 %v9007_v10  ;;  %v13383_v58 = vpack.i.bf16 %v16743_v2, %v16740_v30 }
 0xdc1   :  { %v9009_v47 = vpop.xlane.xlu1 %9008 }
 0xdc2   :  { %v9010_v53 = vsub.f32 %v9003_v36, %v9009_v47  ;;  %v436_v36 = vrot.slane %v16504_v45, %v16253_v29  ;;  %v13393_v47 = vpack.i.bf16 %v16282_v56, %v16292_v21  ;;  %v6950_v29 = vsel %vm6949_vm3, %v16603_v44, -inf }
 0xdc4   :  { %v9011_v52 = vmul.f32 1.442695, %v9010_v53  ;;  %v13183_v10 = vadd.f32 %v16087_v55, %v436_v36 }
 0xdc6   :  { %14820 = vpow2.f32 %v9011_v52  ;;  %v16788_v53 = vmul.f32 0.14433756, %v13183_v10 }
 0xdd0   :  { %v14821_v12 = vpop.eup %14820 }
 0xdd1   :  { %v9013_v26 = vsel %vm6949_vm3, %v14821_v12, 0.0 }
 0xdd2   :  { %9014 = vadd.xlane.f32.xlu1 %v9013_v26 }
 0xde3   :  { %13379 = vrot.lane.b32.xlu1 %v13378_v34, %s14983_s23 }
 0xde7   :  { %13389 = vrot.lane.b32.xlu1 %v13388_v20, %s14984_s3 }
 0xe5f   :  { %v9015_v35 = vpop.xlane.xlu1 %9014 }
 0xe60   :  { %14822 = vrcp.f32 %v9015_v35 }
 0xe63   :  { %v13380_v28 = vpop.permute.xlu1 %13379 }
 0xe64   :  { %v13382_v50 = vunpack.i.h.bf16 %v13380_v28  ;;  %v13381_v11 = vunpack.i.l.bf16 %v13380_v28 }
 0xe66   :  { %v13068_v37 = vpack.c.bf16 %v13382_v50, %v13381_v11 }
 0xe67   :  { %v13390_v50 = vpop.permute.xlu1 %13389 }
 0xe6a   :  { %v14823_v49 = vpop.eup %14822 }
 0xe6b   :  { %v9017_v16 = vmul.f32 %v14823_v49, %v14821_v12 }
 0xe6d   :  { %12607 = vmatmul.mubr.msk.f32.vlgmr.msra.gmra.mrb[38].mxu0 %vm6949_vm3, %v9017_v16 }
 0xe6e   :  { %13070 = vmatpush3.bf16.xpose.msk.msra.mxu0 %vm16510_vm2, %v13068_v37  ;;  %12628 = vmatprep.mubr.msk.f32.mxu0 %vm14978_vm1, %v14979_v51 }
 0xe6f   :  { %13071 = vmatprep.subr.bf16.mxu0 %v14977_v41 }
 0xe75   :  { %12629 = vmatmul.mubr.msk.f32.vlgmr.msra.gmra.mrb[40].mxu0 %vm6869_vm0, %v9173_v32  ;;  %v13392_v32 = vunpack.i.h.bf16 %v13390_v50 }
 0xe76   :  { %12635 = vmatprep.mubr.msk.f32.mxu0 %vm14978_vm1, %v14979_v51 }
 0xf40   :  { %v16776_v63 = vpop.f32.mrb[38].mxu0 }
 0xf41   :  { %v12608_v34 = vpop.f32.mrb[39].mxu0 }
 0xf42   :  { %v13391_v34 = vunpack.i.l.bf16 %v13390_v50 }
 0xf48   :  { %v9250_v18 = vpop.f32.mrb[40].mxu0 }
 0xf49   :  { %v12630_v22 = vpop.f32.mrb[41].mxu0  ;;  %v9254_v4 = vsel %vm6949_vm3, %v9250_v18, -inf }
 0xf4a   :  { %9255 = vmax.xlane.f32.xlu0 %v9254_v4  ;;  %v9443_v4 = vsel %vm7374_vm4, %v13391_v34, %v13392_v32 }
 0xf60   :  { %13384 = vrot.lane.b32.xlu0 %v13383_v58, %s14983_s23 }
 0xf64   :  { %13394 = vrot.lane.b32.xlu0 %v13393_v47, %s14984_s3 }
 0xf68   :  { %9430 = vrot.lane.b32.xlu0 %v16788_v53, %s14984_s3 }
 0xf87   :  { %6951 = vmax.xlane.f32.xlu0 %v6950_v29  ;;  %v16812_v29 = vadd.f32 %v16601_v33, %v16599_v15  ;;  %v13403_v15 = vpack.i.bf16 %v16617_v31, %v16743_v2  ;;  %v16824_v33 = vpack.i.bf16 %v16282_v56, %v16758_v7 }
 0xfd7   :  { %v9256_v45 = vpop.xlane.xlu0 %9255 }
 0xfd8   :  { %v9257_v52 = vsub.f32 %v9250_v18, %v9256_v45 }
 0xfda   :  { %v9258_v12 = vmul.f32 1.442695, %v9257_v52 }
 0xfdb   :  { %v13385_v26 = vpop.permute.xlu0 %13384 }
 0xfdc   :  { %14824 = vpow2.f32 %v9258_v12  ;;  %v13387_v55 = vunpack.i.h.bf16 %v13385_v26  ;;  %v13386_v20 = vunpack.i.l.bf16 %v13385_v26 }
 0xfde   :  { %v13072_v35 = vpack.c.bf16 %v13387_v55, %v13386_v20 }
 0xfdf   :  { %v13395_v49 = vpop.permute.xlu0 %13394 }
 0xfe0   :  { %13073 = vmatpush3.bf16.msra.mxu0 %v13072_v35  ;;  %v13397_v16 = vunpack.i.h.bf16 %v13395_v49  ;;  %v13396_v37 = vunpack.i.l.bf16 %v13395_v49 }
 0xfe1   :  { %13083 = vmatprep.subr.bf16.mxu0 %v14977_v41 }
 0xfe2   :  { %v9444_v18 = vsel %vm7374_vm4, %v13396_v37, %v13397_v16 }
 0xfe3   :  { %v13084_v58 = vpack.c.bf16 %v9444_v18, %v9443_v4  ;;  %v9431_v10 = vpop.permute.xlu0 %9430  ;;  %v7034_v4 = vld [vmem:[%s17452_s8] sm:$0xff] }
 0xfe6   :  { %v14825_v21 = vpop.eup %14824 }
 0xfe7   :  { %v9260_v28 = vsel %vm6949_vm3, %v14825_v21, 0.0 }
 0xfe8   :  { %9261 = vadd.xlane.f32.xlu1 %v9260_v28 }
 0xff9   :  { %9428 = vrot.lane.b32.xlu1 %v16723_v61, %s14984_s3 }
0x1014   :  { %v6952_v45 = vpop.xlane.xlu0 %6951 }
0x1015   :  { %v6953_v52 = vsub.f32 %v16603_v44, %v6952_v45  ;;  %v17458_v44 = vpack.i.bf16 %v16096_v0, %v16089_v57  ;;  %v7039_v45 = vld [vmem:[%s17452_s8 + $0x28] sm:$0xff] }
0x1017   :  { %v6954_v12 = vmul.f32 1.442695, %v6953_v52 }
0x1075   :  { %v9262_v11 = vpop.xlane.xlu1 %9261 }
0x1076   :  { %14826 = vrcp.f32 %v9262_v11 }
0x1077   :  { %14828 = vpow2.f32 %v6954_v12 }
0x1079   :  { %v9429_v61 = vpop.permute.xlu1 %9428 }
0x107a   :  { %v9432_v47 = vsel %vm7374_vm4, %v9429_v61, %v9431_v10  ;;  %v7037_v61 = vld [vmem:[%s17452_s8 + $0x18] sm:$0xff] }
0x1080   :  { %v14827_v22 = vpop.eup %14826 }
0x1081   :  { %v9264_v36 = vmul.f32 %v14827_v22, %v14825_v21  ;;  %v14829_v28 = vpop.eup %14828  ;;  %v13398_v22 = vpack.i.bf16 %v16613_v8, %v16740_v30  ;;  %v7036_v30 = vld [vmem:[%s17452_s8 + $0x10] sm:$0xff] }
0x1082   :  { %v6956_v50 = vsel %vm6949_vm3, %v14829_v28, 0.0  ;;  %v12934_v10 = vpack.c.bf16 %v7037_v61, %v7036_v30 }
0x1083   :  { %12636 = vmatmul.mubr.msk.f32.vlgmr.msra.gmra.mrb[42].mxu0 %vm6949_vm3, %v9264_v36  ;;  %v7035_v36 = vld [vmem:[%s17452_s8 + $0x8] sm:$0xff] }
0x1084   :  { %13086 = vmatpush3.bf16.xpose.msk.msra.mxu0 %vm16510_vm2, %v13084_v58  ;;  %12657 = vmatprep.mubr.msk.f32.mxu0 %vm14978_vm1, %v14979_v51  ;;  %v12931_v58 = vpack.c.bf16 %v7035_v36, %v7034_v4 }
0x1085   :  { %13087 = vmatprep.subr.bf16.mxu0 %v14977_v41 }
0x108b   :  { %12658 = vmatmul.mubr.msk.f32.vlgmr.msra.gmra.mrb[44].mxu0 %vm6869_vm0, %v9432_v47  ;;  %v7038_v47 = vld [vmem:[%s17452_s8 + $0x20] sm:$0xff] }
0x108c   :  { %12664 = vmatprep.mubr.msk.f32.mxu0 %vm14978_vm1, %v14979_v51  ;;  %v12937_v52 = vpack.c.bf16 %v7039_v45, %v7038_v47 }
0x1156   :  { %v16815_v26 = vpop.f32.mrb[42].mxu0 }
0x1157   :  { %v12637_v55 = vpop.f32.mrb[43].mxu0 }
0x115e   :  { %v9517_v20 = vpop.f32.mrb[44].mxu0 }
0x115f   :  { %v12659_v35 = vpop.f32.mrb[45].mxu0  ;;  %v9521_v21 = vsel %vm6949_vm3, %v9517_v20, -inf }
0x1160   :  { %9522 = vmax.xlane.f32.xlu1 %v9521_v21 }
0x1164   :  { %6957 = vadd.xlane.f32.xlu1 %v6956_v50 }
0x1175   :  { %13404 = vrot.lane.b32.xlu1 %v13403_v15, %s14984_s3 }
0x1179   :  { %13409 = vrot.lane.b32.xlu1 %v16824_v33, %s14985_s2 }
0x117d   :  { %13414 = vrot.lane.b32.xlu1 %v17458_v44, %s14983_s23 }
0x11ed   :  { %v9523_v11 = vpop.xlane.xlu1 %9522 }
0x11ee   :  { %v9524_v49 = vsub.f32 %v9517_v20, %v9523_v11 }
0x11f0   :  { %v9525_v16 = vmul.f32 1.442695, %v9524_v49 }
0x11f1   :  { %v6958_v37 = vpop.xlane.xlu1 %6957 }
0x11f2   :  { %14830 = vpow2.f32 %v9525_v16 }
0x11f3   :  { %14832 = vrcp.f32 %v6958_v37 }
0x11f5   :  { %v13405_v12 = vpop.permute.xlu1 %13404 }
0x11f6   :  { %v13407_v20 = vunpack.i.h.bf16 %v13405_v12  ;;  %v13406_v35 = vunpack.i.l.bf16 %v13405_v12 }
0x11f8   :  { %v9543_v15 = vsel %vm7374_vm4, %v13406_v35, %v13407_v20 }
0x11f9   :  { %v13410_v49 = vpop.permute.xlu1 %13409 }
0x11fc   :  { %v14831_v2 = vpop.eup %14830 }
0x11fd   :  { %v14833_v32 = vpop.eup %14832  ;;  %v9527_v34 = vsel %vm6949_vm3, %v14831_v2, 0.0 }
0x11fe   :  { %v6960_v18 = vmul.f32 %v14833_v32, %v14829_v28  ;;  %9528 = vadd.xlane.f32.xlu0 %v9527_v34  ;;  %v13412_v32 = vunpack.i.h.bf16 %v13410_v49  ;;  %v13411_v34 = vunpack.i.l.bf16 %v13410_v49  ;;  %v13438_v49 = vpack.i.bf16 %v16650_v39, %v16758_v7 }
0x1200   :  { %12375 = vmatmul.mubr.msk.f32.vlgmr.msra.gmra.mrb[24].mxu1 %vm6949_vm3, %v6960_v18  ;;  %v13100_v18 = vpack.c.bf16 %v13412_v32, %v13411_v34 }
0x1201   :  { %12389 = vmatprep.mubr.msk.f32.mxu1 %vm14978_vm1, %v14979_v51  ;;  %12932 = vmatpush3.bf16.msra.mxu1 %v12931_v58 }
0x1202   :  { %12933 = vmatprep.subr.bf16.mxu1 %v14977_v41 }
0x1205   :  { %12935 = vmatpush3.bf16.msra.mxu1 %v12934_v10 }
0x1206   :  { %12936 = vmatprep.subr.bf16.mxu1 %v14977_v41 }
0x1209   :  { %12938 = vmatpush3.bf16.msra.mxu1 %v12937_v52 }
0x120a   :  { %12939 = vmatprep.subr.bf16.mxu1 %v14977_v41 }
0x1214   :  { %13399 = vrot.lane.b32.xlu0 %v13398_v22, %s14984_s3 }
0x1218   :  { %9700 = vrot.lane.b32.xlu0 %v16788_v53, %s14985_s2 }
0x121c   :  { %7114 = vrot.lane.b32.xlu0 %v16521_v13, %s14983_s23 }
0x128b   :  { %v9529_v55 = vpop.xlane.xlu0 %9528 }
0x128c   :  { %14834 = vrcp.f32 %v9529_v55 }
0x128f   :  { %v13400_v21 = vpop.permute.xlu0 %13399 }
0x1290   :  { %v13402_v28 = vunpack.i.h.bf16 %v13400_v21  ;;  %v13401_v50 = vunpack.i.l.bf16 %v13400_v21 }
0x1292   :  { %v9542_v44 = vsel %vm7374_vm4, %v13401_v50, %v13402_v28 }
0x1293   :  { %v13088_v11 = vpack.c.bf16 %v9543_v15, %v9542_v44  ;;  %v9701_v22 = vpop.permute.xlu0 %9700 }
0x1295   :  { %13089 = vmatpush3.bf16.msra.mxu0 %v13088_v11 }
0x1296   :  { %v14835_v16 = vpop.eup %14834  ;;  %13099 = vmatprep.subr.bf16.mxu0 %v14977_v41 }
0x1297   :  { %v9531_v37 = vmul.f32 %v14835_v16, %v14831_v2  ;;  %v13415_v2 = vpop.permute.xlu1 %13414  ;;  %v7115_v10 = vpop.permute.xlu0 %7114  ;;  %v13443_v16 = vpack.i.bf16 %v16653_v48, %v16282_v56 }
0x1298   :  { %v13417_v4 = vunpack.i.h.bf16 %v13415_v2  ;;  %v13416_v36 = vunpack.i.l.bf16 %v13415_v2 }
0x1299   :  { %12665 = vmatmul.mubr.msk.f32.vlgmr.msra.gmra.mrb[46].mxu0 %vm6949_vm3, %v9531_v37  ;;  %v13448_v37 = vpack.i.bf16 %v16094_v60, %v16089_v57 }
0x129a   :  { %12686 = vmatprep.mubr.msk.f32.mxu0 %vm14978_vm1, %v14979_v51  ;;  %v12940_v30 = vpack.c.bf16 %v13417_v4, %v13416_v36 }
0x129e   :  { %13102 = vmatpush3.bf16.xpose.msk.msra.mxu0 %vm16510_vm2, %v13100_v18 }
0x129f   :  { %13103 = vmatprep.subr.bf16.mxu0 %v14977_v41 }
0x12a5   :  { %12687 = vmatmul.mubr.msk.f32.vlgmr.msra.gmra.mrb[48].mxu0 %vm6869_vm0, %v9701_v22 }
0x12a6   :  { %12693 = vmatprep.mubr.msk.f32.mxu0 %vm14978_vm1, %v14979_v51 }
0x12d3   :  { %v7030_v58 = vpop.f32.mrb[24].mxu1 }
0x12d4   :  { %v12376_v61 = vpop.f32.mrb[25].mxu1  ;;  %12390 = vmatmul.mubr.msk.f32.vlgmr.msra.gmra.mrb[26].mxu1 %vm6869_vm0, %v7030_v58 }
0x12d5   :  { %12942 = vmatpush3.bf16.xpose.msk.msra.mxu1 %vm16510_vm2, %v12940_v30  ;;  %12396 = vmatprep.mubr.msk.f32.mxu1 %vm14978_vm1, %v14979_v51 }
0x12d6   :  { %12943 = vmatprep.subr.bf16.mxu1 %v14977_v41 }
0x12dc   :  { %12397 = vmatmul.mubr.msk.f32.vlgmr.msra.gmra.mrb[28].mxu1 %vm6869_vm0, %v7115_v10 }
0x12dd   :  { %12403 = vmatprep.mubr.msk.f32.mxu1 %vm14978_vm1, %v14979_v51 }
0x136c   :  { %v16885_v47 = vpop.f32.mrb[46].mxu0 }
0x136d   :  { %v12666_v45 = vpop.f32.mrb[47].mxu0 }
0x1378   :  { %v9778_v52 = vpop.f32.mrb[48].mxu0 }
0x1379   :  { %v12688_v12 = vpop.f32.mrb[49].mxu0  ;;  %v9782_v55 = vsel %vm6949_vm3, %v9778_v52, -inf }
0x137a   :  { %9783 = vmax.xlane.f32.xlu1 %v9782_v55 }
0x138b   :  { %13424 = vrot.lane.b32.xlu1 %v16824_v33, %s14976_s26  ;;  %v17459_v33 = vpack.i.bf16 %v16563_v1, %v16552_v5 }
0x138f   :  { %9953 = vrot.lane.b32.xlu1 %v16788_v53, %s14976_s26 }
0x13af   :  { %v7192_v20 = vpop.f32.mrb[28].mxu1 }
0x13b0   :  { %v12398_v35 = vpop.f32.mrb[29].mxu1  ;;  %v7196_v11 = vsel %vm6949_vm3, %v7192_v20, -inf }
0x1407   :  { %v9784_v21 = vpop.xlane.xlu1 %9783 }
0x1408   :  { %v9785_v28 = vsub.f32 %v9778_v52, %v9784_v21 }
0x140a   :  { %v9786_v50 = vmul.f32 1.442695, %v9785_v28 }
0x140b   :  { %v13425_v56 = vpop.permute.xlu1 %13424 }
0x140c   :  { %14836 = vpow2.f32 %v9786_v50  ;;  %v13426_v22 = vunpack.i.l.bf16 %v13425_v56 }
0x140f   :  { %v9954_v60 = vpop.permute.xlu1 %9953 }
0x1416   :  { %v14837_v15 = vpop.eup %14836 }
0x1417   :  { %v9788_v44 = vsel %vm6949_vm3, %v14837_v15, 0.0 }
0x1418   :  { %9789 = vadd.xlane.f32.xlu0 %v9788_v44  ;;  %v11889_v44 = vld [vmem:[%s17452_s8 + $0x30] sm:$0xff] }
0x142e   :  { %13419 = vrot.lane.b32.xlu0 %v16625_v38, %s14985_s2 }
0x144d   :  { %7197 = vmax.xlane.f32.xlu0 %v7196_v11  ;;  %v11890_v11 = vld [vmem:[%s17452_s8 + $0x38] sm:$0xff] }
0x1463   :  { %13429 = vrot.lane.b32.xlu0 %v17459_v33, %s14983_s23  ;;  %v11891_v33 = vld [vmem:[%s17452_s8 + $0x40] sm:$0xff]  ;;  %s10993_s23 = sshll.u32 %s14986_s21, 4  ;;  %s10994_s23 = int_to_ptr.vmem [resolvable:$true] %s10993_s23 }
0x1464   :  { %s14943_s18 = scalar_lea.vmem %s10994_s23, 128  ;;  %p14948_p11 = scmp.lt.s32.totalorder %s10994_s23, %s10994_s23 }
0x1465   :  { %p14944_p10 = scmp.ne.s32.totalorder %s10994_s23, %s14943_s18  ;;  %p14949_p12 = scmp.lt.s32.totalorder %s14943_s18, %s14943_s18 }
0x1467   :  { %13439 = vrot.lane.b32.xlu0 %v13438_v49, %s14980_s7  ;;  %v12947_v49 = vpack.c.bf16 %v11890_v11, %v11889_v44  ;;  %p14950_p13 = por %p14949_p12, %p14948_p11 }
0x1469   :  { %p14951_p0 = pnand %p14950_p13, %p14944_p10 }
0x146b   :  { %13444 = vrot.lane.b32.xlu0 %v13443_v16, %s14980_s7  ;;  %v11892_v16 = vld [vmem:[%s17452_s8 + $0x48] sm:$0xff] }
0x146f   :  { %10207 = vrot.lane.b32.xlu0 %v16788_v53, %s14980_s7  ;;  %v13427_v53 = vunpack.i.h.bf16 %v13425_v56 }
0x1471   :  { %v13116_v57 = vpack.c.bf16 %v13427_v53, %v13426_v22 }
0x1473   :  { %13449 = vrot.lane.b32.xlu0 %v13448_v37, %s14984_s3  ;;  %v12950_v37 = vpack.c.bf16 %v11892_v16, %v11891_v33 }
0x1477   :  { %7370 = vrot.lane.b32.xlu0 %v16521_v13, %s14984_s3 }
0x14a5   :  { %v9790_v32 = vpop.xlane.xlu0 %9789 }
0x14a6   :  { %14838 = vrcp.f32 %v9790_v32  ;;  %v11894_v32 = vld [vmem:[%s17452_s8 + $0x58] sm:$0xff] }
0x14a9   :  { %v13420_v39 = vpop.permute.xlu0 %13419 }
0x14aa   :  { %v13422_v7 = vunpack.i.h.bf16 %v13420_v39  ;;  %v13421_v34 = vunpack.i.l.bf16 %v13420_v39 }
0x14ac   :  { %v13104_v18 = vpack.c.bf16 %v13422_v7, %v13421_v34 }
0x14ae   :  { %13105 = vmatpush3.bf16.msra.mxu0 %v13104_v18 }
0x14af   :  { %13115 = vmatprep.subr.bf16.mxu0 %v14977_v41 }
0x14b0   :  { %v14839_v48 = vpop.eup %14838 }
0x14b1   :  { %v9792_v2 = vmul.f32 %v14839_v48, %v14837_v15 }
0x14b3   :  { %12694 = vmatmul.mubr.msk.f32.vlgmr.msra.gmra.mrb[50].mxu0 %vm6949_vm3, %v9792_v2 }
0x14b4   :  { %12715 = vmatprep.mubr.msk.f32.mxu0 %vm14978_vm1, %v14979_v51 }
0x14b7   :  { %13118 = vmatpush3.bf16.xpose.msk.msra.mxu0 %vm16510_vm2, %v13116_v57 }
0x14b8   :  { %13119 = vmatprep.subr.bf16.mxu0 %v14977_v41 }
0x14be   :  { %12716 = vmatmul.mubr.msk.f32.vlgmr.msra.gmra.mrb[52].mxu0 %vm6869_vm0, %v9954_v60  ;;  %v14876_v60 = vld [vmem:[%s17449_s5] sm:$0x3f] }
0x14bf   :  { %12722 = vmatprep.mubr.msk.f32.mxu0 %vm14978_vm1, %v14979_v51 }
0x14da   :  { %v7198_v13 = vpop.xlane.xlu0 %7197 }
0x14db   :  { %v7199_v4 = vsub.f32 %v7192_v20, %v7198_v13  ;;  %v440_v13 = vrot.slane %v14876_v60, %v16607_v23 }
0x14dd   :  { %v7200_v36 = vmul.f32 1.442695, %v7199_v4  ;;  %v13184_v4 = vadd.f32 %v16091_v17, %v440_v13 }
0x14de   :  { %v13430_v30 = vpop.permute.xlu0 %13429 }
0x14df   :  { %14840 = vpow2.f32 %v7200_v36  ;;  %v13432_v58 = vunpack.i.h.bf16 %v13430_v30  ;;  %v13431_v61 = vunpack.i.l.bf16 %v13430_v30  ;;  %v16961_v36 = vmul.f32 0.14433756, %v13184_v4 }
0x14e0   :  { %v13453_v30 = vpack.i.bf16 %v16098_v6, %v16096_v0 }
0x14e1   :  { %v12944_v10 = vpack.c.bf16 %v13432_v58, %v13431_v61 }
0x14e2   :  { %v13440_v17 = vpop.permute.xlu0 %13439 }
0x14e3   :  { %12945 = vmatpush3.bf16.msra.mxu1 %v12944_v10 }
0x14e4   :  { %12946 = vmatprep.subr.bf16.mxu1 %v14977_v41 }
0x14e6   :  { %v13445_v23 = vpop.permute.xlu0 %13444 }
0x14e7   :  { %v13447_v0 = vunpack.i.h.bf16 %v13445_v23  ;;  %v13446_v6 = vunpack.i.l.bf16 %v13445_v23 }
0x14e9   :  { %v14841_v45 = vpop.eup %14840  ;;  %v10223_v11 = vsel %vm6949_vm3, %v13446_v6, %v13447_v0 }
0x14ea   :  { %v7202_v52 = vsel %vm6949_vm3, %v14841_v45, 0.0  ;;  %v10208_v10 = vpop.permute.xlu0 %10207 }
0x14eb   :  { %7203 = vadd.xlane.f32.xlu1 %v7202_v52 }
0x14ee   :  { %v13450_v52 = vpop.permute.xlu0 %13449 }
0x1578   :  { %v7204_v12 = vpop.xlane.xlu1 %7203 }
0x1579   :  { %14842 = vrcp.f32 %v7204_v12 }
0x1583   :  { %v14843_v55 = vpop.eup %14842 }
0x1584   :  { %v7206_v35 = vmul.f32 %v14843_v55, %v14841_v45  ;;  %v13452_v55 = vunpack.i.h.bf16 %v13450_v52 }
0x1586   :  { %12404 = vmatmul.mubr.msk.f32.vlgmr.msra.gmra.mrb[30].mxu1 %vm6949_vm3, %v7206_v35  ;;  %v16926_v20 = vpop.f32.mrb[50].mxu0  ;;  %v13451_v35 = vunpack.i.l.bf16 %v13450_v52 }
0x1587   :  { %v12695_v21 = vpop.f32.mrb[51].mxu0  ;;  %12418 = vmatprep.mubr.msk.f32.mxu1 %vm14978_vm1, %v14979_v51  ;;  %12948 = vmatpush3.bf16.msra.mxu1 %v12947_v49 }
0x1588   :  { %12949 = vmatprep.subr.bf16.mxu1 %v14977_v41  ;;  %v13442_v21 = vunpack.i.h.bf16 %v13440_v17  ;;  %v7386_v49 = vsel %vm7374_vm4, %v13451_v35, %v13452_v55  ;;  %v17463_v55 = vpack.i.bf16 %v16567_v46, %v16563_v1 }
0x158b   :  { %12951 = vmatpush3.bf16.msra.mxu1 %v12950_v37 }
0x158c   :  { %12952 = vmatprep.subr.bf16.mxu1 %v14977_v41 }
0x1591   :  { %v10031_v28 = vpop.f32.mrb[52].mxu0 }
0x1592   :  { %v12717_v50 = vpop.f32.mrb[53].mxu0  ;;  %v10035_v15 = vsel %vm6949_vm3, %v10031_v28, -inf }
0x1593   :  { %10036 = vmax.xlane.f32.xlu1 %v10035_v15 }
0x15a4   :  { %13434 = vrot.lane.b32.xlu1 %v16625_v38, %s14976_s26  ;;  %v11893_v38 = vld [vmem:[%s17452_s8 + $0x50] sm:$0xff] }
0x15a5   :  { %v12953_v39 = vpack.c.bf16 %v11894_v32, %v11893_v38 }
0x15a7   :  { %12954 = vmatpush3.bf16.msra.mxu1 %v12953_v39 }
0x15a8   :  { %12955 = vmatprep.subr.bf16.mxu1 %v14977_v41 }
0x1620   :  { %v10037_v7 = vpop.xlane.xlu1 %10036 }
0x1621   :  { %v10038_v34 = vsub.f32 %v10031_v28, %v10037_v7  ;;  %v13441_v28 = vunpack.i.l.bf16 %v13440_v17 }
0x1623   :  { %v10039_v18 = vmul.f32 1.442695, %v10038_v34  ;;  %v10222_v37 = vsel %vm6949_vm3, %v13441_v28, %v13442_v21  ;;  %v7371_v34 = vpop.permute.xlu0 %7370 }
0x1624   :  { %v13435_v56 = vpop.permute.xlu1 %13434  ;;  %v13132_v39 = vpack.c.bf16 %v10223_v11, %v10222_v37 }
0x1625   :  { %14844 = vpow2.f32 %v10039_v18  ;;  %v13437_v48 = vunpack.i.h.bf16 %v13435_v56  ;;  %v13436_v53 = vunpack.i.l.bf16 %v13435_v56 }
0x1627   :  { %v13120_v22 = vpack.c.bf16 %v13437_v48, %v13436_v53 }
0x1629   :  { %13121 = vmatpush3.bf16.msra.mxu0 %v13120_v22 }
0x162a   :  { %13131 = vmatprep.subr.bf16.mxu0 %v14977_v41 }
0x162f   :  { %v14845_v2 = vpop.eup %14844 }
0x1630   :  { %v10041_v57 = vsel %vm6949_vm3, %v14845_v2, 0.0 }
0x1631   :  { %10042 = vadd.xlane.f32.xlu1 %v10041_v57 }
0x1642   :  { %10209 = vrot.lane.b32.xlu1 %v16961_v36, %s14980_s7 }
0x1646   :  { %13454 = vrot.lane.b32.xlu1 %v13453_v30, %s14984_s3  ;;  %v17460_v30 = vpack.i.bf16 %v16619_v24, %v16617_v31  ;;  %v17461_v31 = vpack.i.bf16 %v16615_v54, %v16613_v8  ;;  %v17462_v24 = vpack.i.bf16 %v16559_v43, %v16552_v5 }
0x164a   :  { %7372 = vrot.lane.b32.xlu1 %v16111_v19, %s14984_s3 }
0x1659   :  { %v7284_v58 = vpop.f32.mrb[30].mxu1 }
0x165a   :  { %v12405_v61 = vpop.f32.mrb[31].mxu1  ;;  %12419 = vmatmul.mubr.msk.f32.vlgmr.msra.gmra.mrb[26].mxu1 %vm6869_vm0, %v7284_v58 }
0x165b   :  { %12425 = vmatprep.mubr.msk.f32.mxu1 %vm14978_vm1, %v14979_v51 }
0x16be   :  { %v10043_v45 = vpop.xlane.xlu1 %10042 }
0x16bf   :  { %14846 = vrcp.f32 %v10043_v45 }
0x16c2   :  { %v10210_v12 = vpop.permute.xlu1 %10209 }
0x16c3   :  { %v10211_v56 = vsel %vm6949_vm3, %v10208_v10, %v10210_v12 }
0x16c6   :  { %v13455_v50 = vpop.permute.xlu1 %13454 }
0x16c7   :  { %v13457_v15 = vunpack.i.h.bf16 %v13455_v50  ;;  %v13456_v44 = vunpack.i.l.bf16 %v13455_v50 }
0x16c9   :  { %v14847_v33 = vpop.eup %14846  ;;  %v7387_v16 = vsel %vm7374_vm4, %v13456_v44, %v13457_v15 }
0x16ca   :  { %v10045_v38 = vmul.f32 %v14847_v33, %v14845_v2  ;;  %v12956_v32 = vpack.c.bf16 %v7387_v16, %v7386_v49  ;;  %v7373_v7 = vpop.permute.xlu1 %7372 }
0x16cb   :  { %v7375_v18 = vsel %vm7374_vm4, %v7371_v34, %v7373_v7 }
0x16cc   :  { %12958 = vmatpush3.bf16.xpose.msk.msra.mxu1 %vm16510_vm2, %v12956_v32  ;;  %12723 = vmatmul.mubr.msk.f32.vlgmr.msra.gmra.mrb[54].mxu0 %vm6949_vm3, %v10045_v38 }
0x16cd   :  { %13134 = vmatpush3.bf16.xpose.msk.msra.mxu0 %vm16510_vm2, %v13132_v39  ;;  %12744 = vmatprep.mubr.msk.f32.mxu0 %vm14978_vm1, %v14979_v51 }
0x16ce   :  { %13135 = vmatprep.subr.bf16.mxu0 %v14977_v41  ;;  %12959 = vmatprep.subr.bf16.mxu1 %v14977_v41 }
0x16d3   :  { %12426 = vmatmul.mubr.msk.f32.vlgmr.msra.gmra.mrb[32].mxu1 %vm6869_vm0, %v7375_v18 }
0x16d4   :  { %12745 = vmatmul.mubr.msk.f32.vlgmr.msra.gmra.mrb[56].mxu0 %vm6869_vm0, %v10211_v56  ;;  %12432 = vmatprep.mubr.msk.f32.mxu1 %vm14978_vm1, %v14979_v51 }
0x16d5   :  { %12751 = vmatprep.mubr.msk.f32.mxu0 %vm14978_vm1, %v14979_v51 }
0x179f   :  { %v16994_v48 = vpop.f32.mrb[54].mxu0 }
0x17a0   :  { %v12724_v53 = vpop.f32.mrb[55].mxu0 }
0x17a6   :  { %v7460_v22 = vpop.f32.mrb[32].mxu1 }
0x17a7   :  { %v10296_v2 = vpop.f32.mrb[56].mxu0  ;;  %v12427_v57 = vpop.f32.mrb[33].mxu1  ;;  %v7464_v60 = vsel %vm6949_vm3, %v7460_v22, -inf }
0x17a8   :  { %v12746_v13 = vpop.f32.mrb[57].mxu0  ;;  %v10300_v4 = vsel %vm6949_vm3, %v10296_v2, -inf  ;;  %7465 = vmax.xlane.f32.xlu1 %v7464_v60 }
0x17a9   :  { %10301 = vmax.xlane.f32.xlu0 %v10300_v4 }
0x17b9   :  { %13464 = vrot.lane.b32.xlu1 %v17460_v30, %s14980_s7 }
0x17bd   :  { %13469 = vrot.lane.b32.xlu1 %v16657_v42, %s14981_s6 }
0x1835   :  { %v7466_v58 = vpop.xlane.xlu1 %7465 }
0x1836   :  { %v10302_v61 = vpop.xlane.xlu0 %10301  ;;  %v7467_v17 = vsub.f32 %v7460_v22, %v7466_v58  ;;  %v11900_v22 = vld [vmem:[%s17452_s8 + $0x60] sm:$0xff] }
0x1837   :  { %v10303_v23 = vsub.f32 %v10296_v2, %v10302_v61  ;;  %v11901_v2 = vld [vmem:[%s17452_s8 + $0x68] sm:$0xff]  ;;  %v11902_v61 = vld [vmem:[%s17452_s8 + $0x70] sm:$0xff] }
0x1838   :  { %v7468_v10 = vmul.f32 1.442695, %v7467_v17  ;;  %v12963_v30 = vpack.c.bf16 %v11901_v2, %v11900_v22  ;;  %v11903_v17 = vld [vmem:[%s17452_s8 + $0x78] sm:$0xff] }
0x1839   :  { %v10304_v45 = vmul.f32 1.442695, %v10303_v23  ;;  %v13465_v8 = vpop.permute.xlu1 %13464 }
0x183a   :  { %14848 = vpow2.f32 %v7468_v10  ;;  %v13467_v35 = vunpack.i.h.bf16 %v13465_v8  ;;  %v13466_v21 = vunpack.i.l.bf16 %v13465_v8  ;;  %v12966_v10 = vpack.c.bf16 %v11903_v17, %v11902_v61  ;;  %v11911_v17 = vld [vmem:[%s17452_s8 + $0x90] sm:$0xff] }
0x183b   :  { %14850 = vpow2.f32 %v10304_v45  ;;  %v11904_v45 = vld [vmem:[%s17452_s8 + $0x80] sm:$0xff] }
0x183c   :  { %v10322_v15 = vsel %vm6949_vm3, %v13466_v21, %v13467_v35 }
0x183d   :  { %v13470_v28 = vpop.permute.xlu1 %13469 }
0x183e   :  { %v13472_v49 = vunpack.i.h.bf16 %v13470_v28  ;;  %v13471_v16 = vunpack.i.l.bf16 %v13470_v28 }
0x1840   :  { %v13148_v39 = vpack.c.bf16 %v13472_v49, %v13471_v16 }
0x1844   :  { %v14849_v52 = vpop.eup %14848 }
0x1845   :  { %v14851_v12 = vpop.eup %14850  ;;  %v7470_v0 = vsel %vm6949_vm3, %v14849_v52, 0.0 }
0x1846   :  { %v10306_v6 = vsel %vm6949_vm3, %v14851_v12, 0.0  ;;  %7471 = vadd.xlane.f32.xlu1 %v7470_v0 }
0x1847   :  { %10307 = vadd.xlane.f32.xlu0 %v10306_v6 }
0x1857   :  { %13489 = vrot.lane.b32.xlu1 %v16631_v40, %s14981_s6 }
0x185d   :  { %13459 = vrot.lane.b32.xlu0 %v17461_v31, %s14980_s7 }
0x1861   :  { %10479 = vrot.lane.b32.xlu0 %v16961_v36, %s14981_s6 }
0x1865   :  { %13474 = vrot.lane.b32.xlu0 %v17462_v24, %s14984_s3 }
0x1869   :  { %13479 = vrot.lane.b32.xlu0 %v17463_v55, %s14984_s3 }
0x186d   :  { %13484 = vrot.lane.b32.xlu0 %v16107_v9, %s14985_s2 }
0x1871   :  { %7643 = vrot.lane.b32.xlu0 %v16111_v19, %s14985_s2 }
0x18d3   :  { %v7472_v44 = vpop.xlane.xlu1 %7471 }
0x18d4   :  { %v10308_v54 = vpop.xlane.xlu0 %10307 }
0x18d5   :  { %14852 = vrcp.f32 %v10308_v54 }
0x18d6   :  { %14854 = vrcp.f32 %v7472_v44 }
0x18d7   :  { %v13490_v18 = vpop.permute.xlu1 %13489 }
0x18d8   :  { %v13460_v50 = vpop.permute.xlu0 %13459  ;;  %v13492_v13 = vunpack.i.h.bf16 %v13490_v18  ;;  %v13491_v4 = vunpack.i.l.bf16 %v13490_v18 }
0x18d9   :  { %v13462_v5 = vunpack.i.h.bf16 %v13460_v50  ;;  %v13461_v43 = vunpack.i.l.bf16 %v13460_v50 }
0x18da   :  { %v13152_v23 = vpack.c.bf16 %v13492_v13, %v13491_v4 }
0x18db   :  { %v10321_v1 = vsel %vm6949_vm3, %v13461_v43, %v13462_v5 }
0x18dc   :  { %v13136_v46 = vpack.c.bf16 %v10322_v15, %v10321_v1  ;;  %v10480_v11 = vpop.permute.xlu0 %10479 }
0x18de   :  { %13137 = vmatpush3.bf16.msra.mxu0 %v13136_v46 }
0x18df   :  { %v14853_v9 = vpop.eup %14852  ;;  %13147 = vmatprep.subr.bf16.mxu0 %v14977_v41 }
0x18e0   :  { %v10310_v19 = vmul.f32 %v14853_v9, %v14851_v12  ;;  %v13475_v33 = vpop.permute.xlu0 %13474  ;;  %v14855_v57 = vpop.eup %14854 }
0x18e1   :  { %v13477_v37 = vunpack.i.h.bf16 %v13475_v33  ;;  %v13476_v38 = vunpack.i.l.bf16 %v13475_v33  ;;  %v7474_v58 = vmul.f32 %v14855_v57, %v14849_v52  ;;  %v11905_v52 = vld [vmem:[%s17452_s8 + $0x88] sm:$0xff] }
0x18e2   :  { %12752 = vmatmul.mubr.msk.f32.vlgmr.msra.gmra.mrb[58].mxu0 %vm6949_vm3, %v10310_v19  ;;  %v12969_v12 = vpack.c.bf16 %v11905_v52, %v11904_v45  ;;  %v11914_v52 = vld [vmem:[%s17452_s8 + $0xa8] sm:$0xff] }
0x18e3   :  { %12773 = vmatprep.mubr.msk.f32.mxu0 %vm14978_vm1, %v14979_v51  ;;  %v7485_v56 = vsel %vm7374_vm4, %v13476_v38, %v13477_v37 }
0x18e4   :  { %v13480_v32 = vpop.permute.xlu0 %13479 }
0x18e5   :  { %v13482_v7 = vunpack.i.h.bf16 %v13480_v32  ;;  %v13481_v34 = vunpack.i.l.bf16 %v13480_v32 }
0x18e7   :  { %v7486_v53 = vsel %vm7374_vm4, %v13481_v34, %v13482_v7  ;;  %13150 = vmatpush3.bf16.xpose.msk.msra.mxu0 %vm16510_vm2, %v13148_v39 }
0x18e8   :  { %v12960_v60 = vpack.c.bf16 %v7486_v53, %v7485_v56  ;;  %13151 = vmatprep.subr.bf16.mxu0 %v14977_v41  ;;  %v13485_v31 = vpop.permute.xlu0 %13484 }
0x18e9   :  { %v13487_v24 = vunpack.i.h.bf16 %v13485_v31  ;;  %v13486_v55 = vunpack.i.l.bf16 %v13485_v31  ;;  %v11916_v31 = vld [vmem:[%s17452_s8 + $0xb8] sm:$0xff] }
0x18ea   :  { %12961 = vmatpush3.bf16.msra.mxu1 %v12960_v60 }
0x18eb   :  { %12962 = vmatprep.subr.bf16.mxu1 %v14977_v41  ;;  %v12972_v8 = vpack.c.bf16 %v13487_v24, %v13486_v55 }
0x18ec   :  { %v7644_v5 = vpop.permute.xlu0 %7643 }
0x18ed   :  { %12433 = vmatmul.mubr.msk.f32.vlgmr.msra.gmra.mrb[34].mxu1 %vm6949_vm3, %v7474_v58 }
0x18ee   :  { %12774 = vmatmul.mubr.msk.f32.vlgmr.msra.gmra.mrb[60].mxu0 %vm6869_vm0, %v10480_v11  ;;  %12964 = vmatpush3.bf16.msra.mxu1 %v12963_v30 }
0x18ef   :  { %13153 = vmatpush3.bf16.msra.mxu0 %v13152_v23  ;;  %12965 = vmatprep.subr.bf16.mxu1 %v14977_v41  ;;  %v11912_v23 = vld [vmem:[%s17452_s8 + $0x98] sm:$0xff] }
0x18f0   :  { %12447 = vmatprep.mubr.msk.f32.mxu1 %vm14978_vm1, %v14979_v51  ;;  %12780 = vmatprep.mubr.msk.f32.mxu0 %vm14978_vm1, %v14979_v51  ;;  %v12979_v45 = vpack.c.bf16 %v11912_v23, %v11911_v17  ;;  %v11967_v17 = vld [vmem:[%s17452_s8 + $0x188] sm:$0xff] }
0x18f1   :  { %13163 = vmatprep.subr.bf16.mxu0 %v14977_v41 }
0x18f2   :  { %12967 = vmatpush3.bf16.msra.mxu1 %v12966_v10  ;;  %v11913_v10 = vld [vmem:[%s17452_s8 + $0xa0] sm:$0xff] }
0x18f3   :  { %12968 = vmatprep.subr.bf16.mxu1 %v14977_v41 }
0x18f6   :  { %12970 = vmatpush3.bf16.msra.mxu1 %v12969_v12  ;;  %v12982_v12 = vpack.c.bf16 %v11914_v52, %v11913_v10  ;;  %v11968_v10 = vld [vmem:[%s17452_s8 + $0x190] sm:$0xff] }
0x18f7   :  { %12971 = vmatprep.subr.bf16.mxu1 %v14977_v41 }
0x19b5   :  { %v17066_v0 = vpop.f32.mrb[58].mxu0 }
0x19b6   :  { %v12753_v6 = vpop.f32.mrb[59].mxu0 }
0x19b7   :  { %v11915_v6 = vld [vmem:[%s17452_s8 + $0xb0] sm:$0xff] }
0x19b8   :  { %v12985_v24 = vpack.c.bf16 %v11916_v31, %v11915_v6  ;;  %v11971_v6 = vld [vmem:[%s17452_s8 + $0x1a8] sm:$0xff] }
0x19c0   :  { %v7558_v54 = vpop.f32.mrb[34].mxu1 }
0x19c1   :  { %v12434_v35 = vpop.f32.mrb[35].mxu1  ;;  %12448 = vmatmul.mubr.msk.f32.vlgmr.msra.gmra.mrb[26].mxu1 %vm6869_vm0, %v7558_v54  ;;  %v10557_v21 = vpop.f32.mrb[60].mxu0 }
0x19c2   :  { %12974 = vmatpush3.bf16.xpose.msk.msra.mxu1 %vm16510_vm2, %v12972_v8  ;;  %v12775_v28 = vpop.f32.mrb[61].mxu0  ;;  %v10561_v50 = vsel %vm6949_vm3, %v10557_v21, -inf  ;;  %12454 = vmatprep.mubr.msk.f32.mxu1 %vm14978_vm1, %v14979_v51 }
0x19c3   :  { %10562 = vmax.xlane.f32.xlu0 %v10561_v50  ;;  %12975 = vmatprep.subr.bf16.mxu1 %v14977_v41  ;;  %v11922_v28 = vld [vmem:[%s17452_s8 + $0xc0] sm:$0xff]  ;;  %v11923_v50 = vld [vmem:[%s17452_s8 + $0xc8] sm:$0xff] }
0x19c9   :  { %12455 = vmatmul.mubr.msk.f32.vlgmr.msra.gmra.mrb[36].mxu1 %vm6869_vm0, %v7644_v5  ;;  %v12995_v5 = vpack.c.bf16 %v11923_v50, %v11922_v28  ;;  %v11981_v28 = vld [vmem:[%s17452_s8 + $0x1d0] sm:$0xff]  ;;  %v11982_v50 = vld [vmem:[%s17452_s8 + $0x1d8] sm:$0xff] }
0x19ca   :  { %12461 = vmatprep.mubr.msk.f32.mxu1 %vm14978_vm1, %v14979_v51 }
0x19d9   :  { %13494 = vrot.lane.b32.xlu0 %v16657_v42, %s14982_s22 }
0x1a50   :  { %v10563_v43 = vpop.xlane.xlu0 %10562 }
0x1a51   :  { %v10564_v15 = vsub.f32 %v10557_v21, %v10563_v43  ;;  %v11924_v43 = vld [vmem:[%s17452_s8 + $0xd0] sm:$0xff] }
0x1a53   :  { %v10565_v44 = vmul.f32 1.442695, %v10564_v15  ;;  %v11925_v15 = vld [vmem:[%s17452_s8 + $0xd8] sm:$0xff] }
0x1a54   :  { %v13495_v33 = vpop.permute.xlu0 %13494 }
0x1a55   :  { %14856 = vpow2.f32 %v10565_v44  ;;  %v13497_v49 = vunpack.i.h.bf16 %v13495_v33  ;;  %v13496_v16 = vunpack.i.l.bf16 %v13495_v33 }
0x1a57   :  { %v13164_v32 = vpack.c.bf16 %v13497_v49, %v13496_v16  ;;  %v11935_v49 = vld [vmem:[%s17452_s8 + $0x100] sm:$0xff]  ;;  %v11936_v16 = vld [vmem:[%s17452_s8 + $0x108] sm:$0xff] }
0x1a5f   :  { %v14857_v1 = vpop.eup %14856 }
0x1a60   :  { %v10567_v46 = vsel %vm6949_vm3, %v14857_v1, 0.0 }
0x1a61   :  { %10568 = vadd.xlane.f32.xlu1 %v10567_v46  ;;  %v11926_v46 = vld [vmem:[%s17452_s8 + $0xe0] sm:$0xff] }
0x1a72   :  { %10732 = vrot.lane.b32.xlu1 %v16961_v36, %s14982_s22 }
0x1a9c   :  { %v7721_v11 = vpop.f32.mrb[36].mxu1 }
0x1a9d   :  { %v12456_v9 = vpop.f32.mrb[37].mxu1  ;;  %v7725_v19 = vsel %vm6949_vm3, %v7721_v11, -inf }
0x1a9e   :  { %7726 = vmax.xlane.f32.xlu1 %v7725_v19  ;;  %v11933_v19 = vld [vmem:[%s17452_s8 + $0xf0] sm:$0xff] }
0x1aaf   :  { %13499 = vrot.lane.b32.xlu1 %v16577_v27, %s14985_s2 }
0x1aee   :  { %v10569_v42 = vpop.xlane.xlu1 %10568 }
0x1aef   :  { %14858 = vrcp.f32 %v10569_v42  ;;  %v11934_v42 = vld [vmem:[%s17452_s8 + $0xf8] sm:$0xff] }
0x1af0   :  { %v13011_v33 = vpack.c.bf16 %v11934_v42, %v11933_v19  ;;  %v12000_v19 = vld [vmem:[%s17452_s8 + $0x218] sm:$0xff] }
0x1af2   :  { %v10733_v36 = vpop.permute.xlu1 %10732 }
0x1af9   :  { %v14859_v37 = vpop.eup %14858 }
0x1afa   :  { %v10571_v38 = vmul.f32 %v14859_v37, %v14857_v1  ;;  %v13014_v37 = vpack.c.bf16 %v11936_v16, %v11935_v49  ;;  %v12002_v49 = vld [vmem:[%s17452_s8 + $0x228] sm:$0xff] }
0x1afc   :  { %12781 = vmatmul.mubr.msk.f32.vlgmr.msra.gmra.mrb[62].mxu0 %vm6949_vm3, %v10571_v38  ;;  %v11937_v38 = vld [vmem:[%s17452_s8 + $0x110] sm:$0xff] }
0x1afd   :  { %13166 = vmatpush3.bf16.xpose.msk.msra.mxu0 %vm16510_vm2, %v13164_v32  ;;  %12802 = vmatprep.mubr.msk.f32.mxu0 %vm14978_vm1, %v14979_v51  ;;  %v11938_v32 = vld [vmem:[%s17452_s8 + $0x118] sm:$0xff] }
0x1afe   :  { %13167 = vmatprep.subr.bf16.mxu0 %v14977_v41 }
0x1b04   :  { %12803 = vmatmul.mubr.msk.f32.vlgmr.msra.gmra.mrb[64].mxu0 %vm6869_vm0, %v10733_v36  ;;  %v13017_v36 = vpack.c.bf16 %v11938_v32, %v11937_v38  ;;  %v12004_v38 = vld [vmem:[%s17452_s8 + $0x238] sm:$0xff] }
0x1b05   :  { %12809 = vmatprep.mubr.msk.f32.mxu0 %vm14978_vm1, %v14979_v51 }
0x1b2b   :  { %v7727_v27 = vpop.xlane.xlu1 %7726 }
0x1b2c   :  { %v7728_v39 = vsub.f32 %v7721_v11, %v7727_v27  ;;  %v11927_v11 = vld [vmem:[%s17452_s8 + $0xe8] sm:$0xff] }
0x1b2d   :  { %v13001_v9 = vpack.c.bf16 %v11927_v11, %v11926_v46  ;;  %v11945_v27 = vld [vmem:[%s17452_s8 + $0x128] sm:$0xff]  ;;  %v11992_v46 = vld [vmem:[%s17452_s8 + $0x200] sm:$0xff] }
0x1b2e   :  { %v7729_v7 = vmul.f32 1.442695, %v7728_v39  ;;  %v11993_v11 = vld [vmem:[%s17452_s8 + $0x208] sm:$0xff] }
0x1b2f   :  { %v13500_v34 = vpop.permute.xlu1 %13499 }
0x1b30   :  { %14860 = vpow2.f32 %v7729_v7  ;;  %v13502_v18 = vunpack.i.h.bf16 %v13500_v34  ;;  %v13501_v56 = vunpack.i.l.bf16 %v13500_v34  ;;  %v11946_v7 = vld [vmem:[%s17452_s8 + $0x130] sm:$0xff]  ;;  %v11947_v34 = vld [vmem:[%s17452_s8 + $0x138] sm:$0xff] }
0x1b32   :  { %v12976_v59 = vpack.c.bf16 %v13502_v18, %v13501_v56  ;;  %v13030_v18 = vpack.c.bf16 %v11947_v34, %v11946_v7  ;;  %v11948_v56 = vld [vmem:[%s17452_s8 + $0x140] sm:$0xff] }
0x1b34   :  { %12977 = vmatpush3.bf16.msra.mxu1 %v12976_v59  ;;  %v11949_v59 = vld [vmem:[%s17452_s8 + $0x148] sm:$0xff] }
0x1b35   :  { %12978 = vmatprep.subr.bf16.mxu1 %v14977_v41 }
0x1b3a   :  { %v14861_v53 = vpop.eup %14860 }
0x1b3b   :  { %v7731_v22 = vsel %vm6949_vm3, %v14861_v53, 0.0 }
0x1b3c   :  { %7732 = vadd.xlane.f32.xlu0 %v7731_v22  ;;  %v11956_v22 = vld [vmem:[%s17452_s8 + $0x158] sm:$0xff] }
0x1bc9   :  { %v7733_v2 = vpop.xlane.xlu0 %7732 }
0x1bca   :  { %14862 = vrcp.f32 %v7733_v2 }
0x1bcf   :  { %v17097_v57 = vpop.f32.mrb[62].mxu0 }
0x1bd0   :  { %v12782_v60 = vpop.f32.mrb[63].mxu0 }
0x1bd1   :  { %v11957_v60 = vld [vmem:[%s17452_s8 + $0x160] sm:$0xff] }
0x1bd4   :  { %v14863_v13 = vpop.eup %14862 }
0x1bd5   :  { %v7735_v4 = vmul.f32 %v14863_v13, %v14861_v53  ;;  %v13033_v53 = vpack.c.bf16 %v11949_v59, %v11948_v56  ;;  %v11958_v13 = vld [vmem:[%s17452_s8 + $0x168] sm:$0xff]  ;;  %v12013_v56 = vld [vmem:[%s17452_s8 + $0x258] sm:$0xff] }
0x1bd7   :  { %12462 = vmatmul.mubr.msk.f32.vlgmr.msra.gmra.mrb[38].mxu1 %vm6949_vm3, %v7735_v4  ;;  %v10810_v30 = vpop.f32.mrb[64].mxu0  ;;  %v13046_v4 = vpack.c.bf16 %v11958_v13, %v11957_v60  ;;  %v12021_v13 = vld [vmem:[%s17452_s8 + $0x270] sm:$0xff] }
0x1bd8   :  { %v12804_v58 = vpop.f32.mrb[65].mxu0  ;;  %v10814_v61 = vsel %vm6949_vm3, %v10810_v30, -inf  ;;  %12476 = vmatprep.mubr.msk.f32.mxu1 %vm14978_vm1, %v14979_v51  ;;  %12980 = vmatpush3.bf16.msra.mxu1 %v12979_v45  ;;  %v11969_v45 = vld [vmem:[%s17452_s8 + $0x198] sm:$0xff] }
0x1bd9   :  { %10815 = vmax.xlane.f32.xlu0 %v10814_v61  ;;  %12981 = vmatprep.subr.bf16.mxu1 %v14977_v41  ;;  %v11960_v58 = vld [vmem:[%s17452_s8 + $0x178] sm:$0xff]  ;;  %v13062_v52 = vpack.c.bf16 %v11969_v45, %v11968_v10  ;;  %v12033_v10 = vld [vmem:[%s17452_s8 + $0x2a8] sm:$0xff] }
0x1bdc   :  { %12983 = vmatpush3.bf16.msra.mxu1 %v12982_v12  ;;  %v11970_v12 = vld [vmem:[%s17452_s8 + $0x1a0] sm:$0xff] }
0x1bdd   :  { %12984 = vmatprep.subr.bf16.mxu1 %v14977_v41  ;;  %v13065_v31 = vpack.c.bf16 %v11971_v6, %v11970_v12  ;;  %v12035_v12 = vld [vmem:[%s17452_s8 + $0x2b8] sm:$0xff] }
0x1be0   :  { %12986 = vmatpush3.bf16.msra.mxu1 %v12985_v24  ;;  %v11978_v24 = vld [vmem:[%s17452_s8 + $0x1b8] sm:$0xff] }
0x1be1   :  { %12994 = vmatprep.subr.bf16.mxu1 %v14977_v41 }
0x1c66   :  { %v10816_v55 = vpop.xlane.xlu0 %10815 }
0x1c67   :  { %v10817_v8 = vsub.f32 %v10810_v30, %v10816_v55  ;;  %v11959_v30 = vld [vmem:[%s17452_s8 + $0x170] sm:$0xff] }
0x1c68   :  { %v13049_v61 = vpack.c.bf16 %v11960_v58, %v11959_v30  ;;  %v12024_v58 = vld [vmem:[%s17452_s8 + $0x288] sm:$0xff] }
0x1c69   :  { %v10818_v54 = vmul.f32 1.442695, %v10817_v8  ;;  %v11979_v8 = vld [vmem:[%s17452_s8 + $0x1c0] sm:$0xff] }
0x1c6b   :  { %14864 = vpow2.f32 %v10818_v54  ;;  %v11980_v54 = vld [vmem:[%s17452_s8 + $0x1c8] sm:$0xff] }
0x1c75   :  { %v17124_v35 = vpop.eup %14864 }
0x1c76   :  { %v10820_v21 = vsel %vm6949_vm3, %v17124_v35, 0.0 }
0x1c77   :  { %10821 = vadd.xlane.f32.xlu0 %v10820_v21  ;;  %v13078_v21 = vpack.c.bf16 %v11980_v54, %v11979_v8  ;;  %v12045_v54 = vld [vmem:[%s17452_s8 + $0x2e0] sm:$0xff] }
0x1c8d   :  { %13504 = vrot.lane.b32.xlu0 %v16631_v40, %s14982_s22  ;;  %v12998_v40 = vpack.c.bf16 %v11925_v15, %v11924_v43  ;;  %v11989_v43 = vld [vmem:[%s17452_s8 + $0x1e8] sm:$0xff] }
0x1caa   :  { %v7811_v44 = vpop.f32.mrb[38].mxu1 }
0x1cab   :  { %v12463_v1 = vpop.f32.mrb[39].mxu1  ;;  %12477 = vmatmul.mubr.msk.f32.vlgmr.msra.gmra.mrb[26].mxu1 %vm6869_vm0, %v7811_v44  ;;  %v11990_v44 = vld [vmem:[%s17452_s8 + $0x1f0] sm:$0xff] }
0x1cac   :  { %12996 = vmatpush3.bf16.msra.mxu1 %v12995_v5  ;;  %12505 = vmatprep.mubr.msk.f32.mxu1 %vm14978_vm1, %v14979_v51  ;;  %v13081_v5 = vpack.c.bf16 %v11982_v50, %v11981_v28  ;;  %v11991_v1 = vld [vmem:[%s17452_s8 + $0x1f8] sm:$0xff]  ;;  %v12047_v50 = vld [vmem:[%s17452_s8 + $0x2f0] sm:$0xff] }
0x1cad   :  { %12997 = vmatprep.subr.bf16.mxu1 %v14977_v41 }
0x1cb0   :  { %12999 = vmatpush3.bf16.msra.mxu1 %v12998_v40  ;;  %v13094_v40 = vpack.c.bf16 %v11991_v1, %v11990_v44 }
0x1cb1   :  { %13000 = vmatprep.subr.bf16.mxu1 %v14977_v41 }
0x1cb4   :  { %13002 = vmatpush3.bf16.msra.mxu1 %v13001_v9  ;;  %v13097_v9 = vpack.c.bf16 %v11993_v11, %v11992_v46 }
0x1cb5   :  { %13010 = vmatprep.subr.bf16.mxu1 %v14977_v41 }
0x1cb7   :  { %12506 = vmatmul.mubr.msk.f32.vlgmr.msra.gmra.mrb[26].mxu1 %vm6869_vm0, %v16671_v62  ;;  %v11944_v62 = vld [vmem:[%s17452_s8 + $0x120] sm:$0xff] }
0x1cb8   :  { %13012 = vmatpush3.bf16.msra.mxu1 %v13011_v33  ;;  %12534 = vmatprep.mubr.msk.f32.mxu1 %vm14978_vm1, %v14979_v51  ;;  %v13027_v39 = vpack.c.bf16 %v11945_v27, %v11944_v62  ;;  %v12001_v33 = vld [vmem:[%s17452_s8 + $0x220] sm:$0xff]  ;;  %v12011_v62 = vld [vmem:[%s17452_s8 + $0x248] sm:$0xff] }
0x1cb9   :  { %13013 = vmatprep.subr.bf16.mxu1 %v14977_v41  ;;  %v13110_v16 = vpack.c.bf16 %v12002_v49, %v12001_v33 }
0x1cbc   :  { %13015 = vmatpush3.bf16.msra.mxu1 %v13014_v37  ;;  %v12003_v37 = vld [vmem:[%s17452_s8 + $0x230] sm:$0xff] }
0x1cbd   :  { %13016 = vmatprep.subr.bf16.mxu1 %v14977_v41 }
0x1cc0   :  { %13018 = vmatpush3.bf16.msra.mxu1 %v13017_v36  ;;  %v13113_v36 = vpack.c.bf16 %v12004_v38, %v12003_v37 }
0x1cc1   :  { %13026 = vmatprep.subr.bf16.mxu1 %v14977_v41 }
0x1cc3   :  { %12535 = vmatmul.mubr.msk.f32.vlgmr.msra.gmra.mrb[26].mxu1 %vm6869_vm0, %v16694_v14  ;;  %v11955_v14 = vld [vmem:[%s17452_s8 + $0x150] sm:$0xff] }
0x1cc4   :  { %13028 = vmatpush3.bf16.msra.mxu1 %v13027_v39  ;;  %12563 = vmatprep.mubr.msk.f32.mxu1 %vm14978_vm1, %v14979_v51  ;;  %v13043_v2 = vpack.c.bf16 %v11956_v22, %v11955_v14  ;;  %v12014_v14 = vld [vmem:[%s17452_s8 + $0x260] sm:$0xff]  ;;  %v12015_v22 = vld [vmem:[%s17452_s8 + $0x268] sm:$0xff] }
0x1cc5   :  { %13029 = vmatprep.subr.bf16.mxu1 %v14977_v41 }
0x1cc8   :  { %13031 = vmatpush3.bf16.msra.mxu1 %v13030_v18  ;;  %v12012_v18 = vld [vmem:[%s17452_s8 + $0x250] sm:$0xff] }
0x1cc9   :  { %13032 = vmatprep.subr.bf16.mxu1 %v14977_v41 }
0x1ccc   :  { %13034 = vmatpush3.bf16.msra.mxu1 %v13033_v53  ;;  %v13126_v53 = vpack.c.bf16 %v12013_v56, %v12012_v18 }
0x1ccd   :  { %13042 = vmatprep.subr.bf16.mxu1 %v14977_v41 }
0x1ccf   :  { %12564 = vmatmul.mubr.msk.f32.vlgmr.msra.gmra.mrb[26].mxu1 %vm6869_vm0, %v16715_v3  ;;  %v11966_v3 = vld [vmem:[%s17452_s8 + $0x180] sm:$0xff] }
0x1cd0   :  { %13044 = vmatpush3.bf16.msra.mxu1 %v13043_v2  ;;  %12592 = vmatprep.mubr.msk.f32.mxu1 %vm14978_vm1, %v14979_v51  ;;  %v13059_v23 = vpack.c.bf16 %v11967_v17, %v11966_v3  ;;  %v12025_v3 = vld [vmem:[%s17452_s8 + $0x290] sm:$0xff]  ;;  %v12026_v17 = vld [vmem:[%s17452_s8 + $0x298] sm:$0xff] }
0x1cd1   :  { %13045 = vmatprep.subr.bf16.mxu1 %v14977_v41 }
0x1cd4   :  { %13047 = vmatpush3.bf16.msra.mxu1 %v13046_v4  ;;  %v12022_v4 = vld [vmem:[%s17452_s8 + $0x278] sm:$0xff] }
0x1cd5   :  { %13048 = vmatprep.subr.bf16.mxu1 %v14977_v41  ;;  %v13139_v30 = vpack.c.bf16 %v12022_v4, %v12021_v13 }
0x1cd8   :  { %13050 = vmatpush3.bf16.msra.mxu1 %v13049_v61 }
0x1cd9   :  { %13058 = vmatprep.subr.bf16.mxu1 %v14977_v41 }
0x1cdb   :  { %12593 = vmatmul.mubr.msk.f32.vlgmr.msra.gmra.mrb[26].mxu1 %vm6869_vm0, %v16752_v25  ;;  %v11977_v25 = vld [vmem:[%s17452_s8 + $0x1b0] sm:$0xff] }
0x1cdc   :  { %13060 = vmatpush3.bf16.msra.mxu1 %v13059_v23  ;;  %12621 = vmatprep.mubr.msk.f32.mxu1 %vm14978_vm1, %v14979_v51  ;;  %v13075_v55 = vpack.c.bf16 %v11978_v24, %v11977_v25  ;;  %v13145_v23 = vpack.c.bf16 %v12026_v17, %v12025_v3  ;;  %v12037_v25 = vld [vmem:[%s17452_s8 + $0x2c8] sm:$0xff] }
0x1cdd   :  { %13061 = vmatprep.subr.bf16.mxu1 %v14977_v41 }
0x1ce0   :  { %13063 = vmatpush3.bf16.msra.mxu1 %v13062_v52  ;;  %v12034_v52 = vld [vmem:[%s17452_s8 + $0x2b0] sm:$0xff] }
0x1ce1   :  { %13064 = vmatprep.subr.bf16.mxu1 %v14977_v41  ;;  %v13158_v6 = vpack.c.bf16 %v12035_v12, %v12034_v52 }
0x1ce4   :  { %13066 = vmatpush3.bf16.msra.mxu1 %v13065_v31  ;;  %v12036_v31 = vld [vmem:[%s17452_s8 + $0x2c0] sm:$0xff] }
0x1ce5   :  { %13074 = vmatprep.subr.bf16.mxu1 %v14977_v41  ;;  %v13161_v24 = vpack.c.bf16 %v12037_v25, %v12036_v31 }
0x1ce7   :  { %12622 = vmatmul.mubr.msk.f32.vlgmr.msra.gmra.mrb[26].mxu1 %vm6869_vm0, %v16776_v63  ;;  %v11988_v63 = vld [vmem:[%s17452_s8 + $0x1e0] sm:$0xff] }
0x1ce8   :  { %13076 = vmatpush3.bf16.msra.mxu1 %v13075_v55  ;;  %12650 = vmatprep.mubr.msk.f32.mxu1 %vm14978_vm1, %v14979_v51  ;;  %v13091_v15 = vpack.c.bf16 %v11989_v43, %v11988_v63  ;;  %v12044_v55 = vld [vmem:[%s17452_s8 + $0x2d8] sm:$0xff] }
0x1ce9   :  { %13077 = vmatprep.subr.bf16.mxu1 %v14977_v41 }
0x1cec   :  { %13079 = vmatpush3.bf16.msra.mxu1 %v13078_v21  ;;  %v12046_v21 = vld [vmem:[%s17452_s8 + $0x2e8] sm:$0xff] }
0x1ced   :  { %13080 = vmatprep.subr.bf16.mxu1 %v14977_v41  ;;  %v13174_v28 = vpack.c.bf16 %v12046_v21, %v12045_v54 }
0x1cf0   :  { %13082 = vmatpush3.bf16.msra.mxu1 %v13081_v5  ;;  %v12048_v5 = vld [vmem:[%s17452_s8 + $0x2f8] sm:$0xff] }
0x1cf1   :  { %13090 = vmatprep.subr.bf16.mxu1 %v14977_v41  ;;  %v13177_v63 = vpack.c.bf16 %v12048_v5, %v12047_v50 }
0x1cf3   :  { %12651 = vmatmul.mubr.msk.f32.vlgmr.msra.gmra.mrb[26].mxu1 %vm6869_vm0, %v16815_v26  ;;  %v11999_v26 = vld [vmem:[%s17452_s8 + $0x210] sm:$0xff] }
0x1cf4   :  { %13092 = vmatpush3.bf16.msra.mxu1 %v13091_v15  ;;  %12679 = vmatprep.mubr.msk.f32.mxu1 %vm14978_vm1, %v14979_v51  ;;  %v13107_v42 = vpack.c.bf16 %v12000_v19, %v11999_v26 }
0x1cf5   :  { %13093 = vmatprep.subr.bf16.mxu1 %v14977_v41 }
0x1cf8   :  { %13095 = vmatpush3.bf16.msra.mxu1 %v13094_v40 }
0x1cf9   :  { %13096 = vmatprep.subr.bf16.mxu1 %v14977_v41 }
0x1cfc   :  { %13098 = vmatpush3.bf16.msra.mxu1 %v13097_v9 }
0x1cfd   :  { %13106 = vmatprep.subr.bf16.mxu1 %v14977_v41 }
0x1cff   :  { %12680 = vmatmul.mubr.msk.f32.vlgmr.msra.gmra.mrb[26].mxu1 %vm6869_vm0, %v16885_v47  ;;  %v12010_v47 = vld [vmem:[%s17452_s8 + $0x240] sm:$0xff] }
0x1d00   :  { %13108 = vmatpush3.bf16.msra.mxu1 %v13107_v42  ;;  %12708 = vmatprep.mubr.msk.f32.mxu1 %vm14978_vm1, %v14979_v51  ;;  %v13123_v39 = vpack.c.bf16 %v12011_v62, %v12010_v47 }
0x1d01   :  { %13109 = vmatprep.subr.bf16.mxu1 %v14977_v41 }
0x1d04   :  { %13111 = vmatpush3.bf16.msra.mxu1 %v13110_v16  ;;  %v10822_v32 = vpop.xlane.xlu0 %10821 }
0x1d05   :  { %14866 = vrcp.f32 %v10822_v32  ;;  %13112 = vmatprep.subr.bf16.mxu1 %v14977_v41 }
0x1d08   :  { %13114 = vmatpush3.bf16.msra.mxu1 %v13113_v36  ;;  %v13505_v27 = vpop.permute.xlu0 %13504 }
0x1d09   :  { %v13507_v7 = vunpack.i.h.bf16 %v13505_v27  ;;  %v13506_v34 = vunpack.i.l.bf16 %v13505_v27  ;;  %13122 = vmatprep.subr.bf16.mxu1 %v14977_v41 }
0x1d0b   :  { %v13168_v59 = vpack.c.bf16 %v13507_v7, %v13506_v34  ;;  %12709 = vmatmul.mubr.msk.f32.vlgmr.msra.gmra.mrb[26].mxu1 %vm6869_vm0, %v16926_v20  ;;  %v13129_v20 = vpack.c.bf16 %v12015_v22, %v12014_v14 }
0x1d0c   :  { %13124 = vmatpush3.bf16.msra.mxu1 %v13123_v39  ;;  %12737 = vmatprep.mubr.msk.f32.mxu1 %vm14978_vm1, %v14979_v51 }
0x1d0d   :  { %13169 = vmatpush3.bf16.msra.mxu0 %v13168_v59  ;;  %13125 = vmatprep.subr.bf16.mxu1 %v14977_v41 }
0x1d0f   :  { %v14867_v2 = vpop.eup %14866 }
0x1d10   :  { %v10824_v60 = vmul.f32 %v14867_v2, %v17124_v35  ;;  %13127 = vmatpush3.bf16.msra.mxu1 %v13126_v53  ;;  %v12023_v35 = vld [vmem:[%s17452_s8 + $0x280] sm:$0xff] }
0x1d11   :  { %13128 = vmatprep.subr.bf16.mxu1 %v14977_v41  ;;  %v13142_v61 = vpack.c.bf16 %v12024_v58, %v12023_v35 }
0x1d12   :  { %12810 = vmatmul.mubr.msk.f32.vlgmr.msra.gmra.mrb[66].mxu0 %vm6949_vm3, %v10824_v60 }
0x1d14   :  { %13130 = vmatpush3.bf16.msra.mxu1 %v13129_v20 }
0x1d15   :  { %13138 = vmatprep.subr.bf16.mxu1 %v14977_v41 }
0x1d17   :  { %12738 = vmatmul.mubr.msk.f32.vlgmr.msra.gmra.mrb[26].mxu1 %vm6869_vm0, %v16994_v48  ;;  %v12032_v48 = vld [vmem:[%s17452_s8 + $0x2a0] sm:$0xff] }
0x1d18   :  { %13140 = vmatpush3.bf16.msra.mxu1 %v13139_v30  ;;  %12766 = vmatprep.mubr.msk.f32.mxu1 %vm14978_vm1, %v14979_v51  ;;  %v13155_v45 = vpack.c.bf16 %v12033_v10, %v12032_v48 }
0x1d19   :  { %13141 = vmatprep.subr.bf16.mxu1 %v14977_v41 }
0x1d1c   :  { %13143 = vmatpush3.bf16.msra.mxu1 %v13142_v61 }
0x1d1d   :  { %13144 = vmatprep.subr.bf16.mxu1 %v14977_v41 }
0x1d20   :  { %13146 = vmatpush3.bf16.msra.mxu1 %v13145_v23 }
0x1d21   :  { %13154 = vmatprep.subr.bf16.mxu1 %v14977_v41 }
0x1d23   :  { %12767 = vmatmul.mubr.msk.f32.vlgmr.msra.gmra.mrb[26].mxu1 %vm6869_vm0, %v17066_v0  ;;  %v12043_v0 = vld [vmem:[%s17452_s8 + $0x2d0] sm:$0xff] }
0x1d24   :  { %13156 = vmatpush3.bf16.msra.mxu1 %v13155_v45  ;;  %12795 = vmatprep.mubr.msk.f32.mxu1 %vm14978_vm1, %v14979_v51  ;;  %v13171_v8 = vpack.c.bf16 %v12044_v55, %v12043_v0 }
0x1d25   :  { %13157 = vmatprep.subr.bf16.mxu1 %v14977_v41 }
0x1d28   :  { %13159 = vmatpush3.bf16.msra.mxu1 %v13158_v6 }
0x1d29   :  { %13160 = vmatprep.subr.bf16.mxu1 %v14977_v41 }
0x1d2c   :  { %13162 = vmatpush3.bf16.msra.mxu1 %v13161_v24 }
0x1d2d   :  { %13170 = vmatprep.subr.bf16.mxu1 %v14977_v41 }
0x1d2f   :  { %12796 = vmatmul.mubr.msk.f32.vlgmr.msra.gmra.mrb[26].mxu1 %vm6869_vm0, %v17097_v57 }
0x1d30   :  { %13172 = vmatpush3.bf16.msra.mxu1 %v13171_v8  ;;  %12824 = vmatprep.mubr.msk.f32.mxu1 %vm14978_vm1, %v14979_v51 }
0x1d31   :  { %13173 = vmatprep.subr.bf16.mxu1 %v14977_v41 }
0x1d34   :  { %13175 = vmatpush3.bf16.msra.mxu1 %v13174_v28 }
0x1d35   :  { %13176 = vmatprep.subr.bf16.mxu1 %v14977_v41 }
0x1d38   :  { %13178 = vmatpush3.bf16.msra.mxu1 %v13177_v63 }
0x1de5   :  { %v10900_v57 = vpop.f32.mrb[66].mxu0 }
0x1de6   :  { %v12811_v43 = vpop.f32.mrb[67].mxu0  ;;  %12825 = vmatmul.mubr.msk.f32.vlgmr.msra.gmra.mrb[26].mxu1 %vm6869_vm0, %v10900_v57 }
0x1eb9   :  { %v10980_v51 = vpop.f32.mrb[26].mxu1 }
0x1eba   :  { %v13209_v15 = vadd.f32 %v10980_v51, %v16812_v29  ;;  %v12826_v44 = vpop.f32.mrb[27].mxu1 }
0x1ebc   :  { %10986 = vst.msk [vmem:[#allocation8] sm:$0xff] %vm10985_vm5, %v13209_v15 }
0x1ebd   :  { %14954 = shalt.err (!%p14951_p0)
}
0x1ebe   :  { %s14955_s4 = scalar_lea.hbm %s17455_s11, 128 }
0x1ebf   :  { %p14956_p1 = scmp.ne.s32.totalorder %s17455_s11, %s14955_s4  ;;  %p14959_p2 = scmp.lt.u32.totalorder %s14955_s4, %s17455_s11 }
0x1ec1   :  { %p14961_p3 = pnand %p14959_p2, %p14956_p1 }
0x1ec3   :  { %14964 = shalt.err (!%p14961_p3)
}
0x1ec4   :  { %10996 = dma.vmem_to_hbm [thread:$0]  %s10994_s23, 128, %s17455_s11, [#allocation4]  }
0x1ec5   :  { %14969 = dma.done.wait [#allocation4], 128  }
0x1ec6   :  { %14970 = vsyncadd [#allocation4], 4294967168 }
0x1ec7   :  { %11000 = vsyncpa [#allocation3], 1 }
0x1ec8   :  { %11001 = vsyncpa [#allocation6], 1 }
0x1ec9   :  { %11002 = vsyncpa [#allocation4], 1 }

</bundles_post_ra>
